<compile_context>
chip_gen: v6e
topology: v6e:2x2x1
jax: 0.10.0
libtpu: 0.0.40
codegen_flags: <defaults>
</compile_context>

<pallas_src>
import functools

import numpy as np
import jax
import jax.numpy as jnp
from jax.experimental import pallas as pl
from jax.experimental.pallas import tpu as pltpu

EPS = 1e-5  # PyTorch default eps for GroupNorm and BatchNorm2d


def _round_up(x, m):
    return (x + m - 1) // m * m


# ----------------------------------------------------------------------------
# Fused dilated Conv2d (bias=False) + GroupNorm for ALL branches.
# grid = (branch, sample, column_tile)
# ----------------------------------------------------------------------------
def fused_conv_gn_kernel(wT_ref, patT_ref, gmat_ref, gamma_ref, beta_ref,
                         out_ref, sum_ref, sq_ref, *, T, TCOL, HW):
    # wT_ref   : (1, Cout, KKC)        bf16  transposed conv weight (this branch)
    # patT_ref : (1, 1, KKC, TCOL)     bf16  im2col tile (branch, sample, tile)
    # gmat_ref : (Cout, Cout)          f32   block-diag group-average matrix, 1/(HW*Cg)
    # gamma/beta_ref : (1, Cout, 1)    f32
    # out_ref  : (1, 1, T, Cout, TCOL) f32   resident across the column-tile axis
    # sum_ref / sq_ref : (Cout, 1)     f32   VMEM scratch
    t = pl.program_id(2)

    @pl.when(t == 0)
    def _init():
        sum_ref[...] = jnp.zeros_like(sum_ref)

    # One lane-dense MXU matmul per tile, f32 accumulation.
    tile = jnp.dot(wT_ref[0], patT_ref[0, 0],
                   preferred_element_type=jnp.float32)          # (Cout, TCOL)
    sum_ref[...] += jnp.sum(tile, axis=1, keepdims=True)        # padded cols are 0
    out_ref[0, 0, t] = tile                                     # raw conv, stays in VMEM

    @pl.when(t == T - 1)
    def _finalize():
        # Group mean broadcast back to channels.  (Cout,Cout)@(Cout,1) is
        # negligible; HIGHEST keeps the statistics in true f32.
        gmean = jnp.dot(gmat_ref[...], sum_ref[...],
                        preferred_element_type=jnp.float32,
                        precision=jax.lax.Precision.HIGHEST)     # (Cout, 1)

        # Centered variance: second pass over the VMEM-resident block (no HBM).
        sq_ref[...] = jnp.zeros_like(sq_ref)

        def _center_sq(j, carry):
            seg = out_ref[0, 0, j] - gmean
            sq_ref[...] += jnp.sum(seg * seg, axis=1, keepdims=True)
            return carry

        jax.lax.fori_loop(0, T, _center_sq, 0, unroll=(T <= 8))

        # Zero-padded columns contributed exactly gmean^2 each -- remove them.
        n_pad = float(T * TCOL - HW)
        sq = sq_ref[...] - n_pad * (gmean * gmean)
        gvar = jnp.dot(gmat_ref[...], sq,
                       preferred_element_type=jnp.float32,
                       precision=jax.lax.Precision.HIGHEST)      # (Cout, 1)

        scale = jax.lax.rsqrt(gvar + EPS) * gamma_ref[0]         # (Cout, 1)
        shift = beta_ref[0] - gmean * scale

        def _normalize(j, carry):
            out_ref[0, 0, j] = out_ref[0, 0, j] * scale + shift
            return carry

        jax.lax.fori_loop(0, T, _normalize, 0, unroll=(T <= 8))


def fused_conv_gn(wT, patT, gmat, gamma, beta, *, T, TCOL, HW, vmem_limit):
    NB, Cout, KKC = wT.shape
    _, N, _, _ = patT.shape
    kernel = functools.partial(fused_conv_gn_kernel, T=T, TCOL=TCOL, HW=HW)
    return pl.pallas_call(
        kernel,
        out_shape=jax.ShapeDtypeStruct((N, NB, T, Cout, TCOL), jnp.float32),
        grid=(NB, N, T),
        in_specs=[
            pl.BlockSpec((1, Cout, KKC), lambda b, n, t: (b, 0, 0)),
            pl.BlockSpec((1, 1, KKC, TCOL), lambda b, n, t: (b, n, 0, t)),
            pl.BlockSpec((Cout, Cout), lambda b, n, t: (0, 0)),
            pl.BlockSpec((1, Cout, 1), lambda b, n, t: (b, 0, 0)),
            pl.BlockSpec((1, Cout, 1), lambda b, n, t: (b, 0, 0)),
        ],
        # Output block index ignores t -> resident accumulator across column tiles.
        out_specs=pl.BlockSpec((1, 1, T, Cout, TCOL),
                               lambda b, n, t: (n, b, 0, 0, 0)),
        scratch_shapes=[pltpu.VMEM((Cout, 1), jnp.float32),
                        pltpu.VMEM((Cout, 1), jnp.float32)],
        compiler_params=pltpu.CompilerParams(
            dimension_semantics=("parallel", "parallel", "arbitrary"),
            vmem_limit_bytes=int(vmem_limit)),
    )(wT, patT, gmat, gamma, beta)


# ----------------------------------------------------------------------------
# Module wrapper (forward), parameter init, and pure-JAX reference
# ----------------------------------------------------------------------------
def assp_multiscale_forward(x_nchw, params, GN_chan=16, tcol=None):
    x = x_nchw.astype(jnp.float32)
    N, Cin, H, W = x.shape
    HW = H * W
    K = 3
    nb = len(params["conv_ws"])
    dilations = [1, 2, 5, 7, 9, 11][:nb]
    Cout = params["conv_ws"][0].shape[-1]
    assert Cout % GN_chan == 0
    Cg = Cout // GN_chan

    # ---- column tile: multiple of 128 lanes; HW is zero-padded up to it ----
    if tcol is None:
        tcol = max(128, min(1024, _round_up(HW, 128)))
    tcol = _round_up(int(tcol), 128)
    HWp = _round_up(HW, tcol)
    T = HWp // tcol
    KKC = K * K * Cin

    # ---- pad ONCE to max dilation and cast to bf16 BEFORE slicing ----
    pmax = max(dilations)
    xpad = jnp.pad(x, ((0, 0), (0, 0), (pmax, pmax), (pmax, pmax))
                   ).astype(jnp.bfloat16)

    # ---- wrapper im2col, built directly in the (nb, N, KKC, HWp) bf16 layout.
    # TODO(synk): for large Cin move im2col into the kernel (per-tap MXU
    # accumulation) to avoid the 9x per-branch HBM patch amplification.
    pats = []
    for d in dilations:
        taps = []
        for ky in range(K):
            for kx in range(K):
                oy = pmax + (ky - 1) * d
                ox = pmax + (kx - 1) * d
                taps.append(jax.lax.slice(xpad, (0, 0, oy, ox),
                                          (N, Cin, oy + H, ox + W)))
        p = jnp.stack(taps, axis=0)                       # (KK, N, Cin, H, W)
        p = jnp.transpose(p, (1, 0, 2, 3, 4)).reshape(N, KKC, HW)
        pats.append(p)
    patT = jnp.stack(pats, axis=0)                        # (nb, N, KKC, HW) bf16
    if HWp != HW:
        patT = jnp.pad(patT, ((0, 0), (0, 0), (0, 0), (0, HWp - HW)))
    # NOTE: the contraction dim (KKC) is deliberately not zero-padded to 128: the
    # kernel is HBM-bound and explicit padding would add patch traffic for no MXU
    # gain (VMEM sublane padding happens implicitly anyway).

    # ---- weights: embed the 1x1 branch as the centre tap of a 3x3; transpose ----
    wts = []
    for w in params["conv_ws"]:
        if w.shape[0] == 1:
            w = jnp.zeros((K, K, Cin, Cout), jnp.float32).at[1, 1].set(w[0, 0])
        wts.append(w.reshape(KKC, Cout).T)                # (Cout, KKC)
    wT = jnp.stack(wts, axis=0).astype(jnp.bfloat16)      # (nb, Cout, KKC)

    gamma_s = jnp.stack(params["gn_gammas"], 0).reshape(nb, Cout, 1).astype(jnp.float32)
    beta_s = jnp.stack(params["gn_betas"], 0).reshape(nb, Cout, 1).astype(jnp.float32)

    # ---- hoisted block-diagonal group-average matrix (constant) ----
    ids = np.arange(Cout)
    gmat = jnp.asarray((ids[:, None] // Cg == ids[None, :] // Cg)
                       .astype(np.float32) / float(HW * Cg))

    # ---- per-chip VMEM budget: actual working set + headroom, >= 32 MiB, capped
    #      at 64 MiB so it is valid on v7x (raise toward ~96 MiB on v5e/v6e when
    #      using larger column tiles). ----
    working = 2 * (T * Cout * tcol * 4          # resident out block (double-buffered)
                   + KKC * tcol * 2             # patch tile, bf16
                   + Cout * KKC * 2             # weight tile, bf16
                   + Cout * Cout * 4)           # gmat
    vmem_limit = min(max(2 * working, 32 * 2**20), 64 * 2**20)

    y = fused_conv_gn(wT, patT, gmat, gamma_s, beta_s,
                      T=T, TCOL=tcol, HW=HW, vmem_limit=vmem_limit)
    # (N, nb, T, Cout, tcol) -> (N, nb, Cout, H, W).  When T == 1 the transpose is
    # a free reshape; otherwise it is a single XLA copy pass.
    y = jnp.transpose(y, (0, 1, 3, 2, 4)).reshape(N, nb, Cout, HWp)[..., :HW]
    y = y.reshape(N, nb, Cout, H, W)
    outs = [y[:, b] for b in range(nb)]

    # ---- global-avg-pool + 1x1 conv + BatchNorm2d (training-mode batch stats):
    #      tiny -> plain XLA (per perf review); bilinear upsample of a 1x1 map
    #      with align_corners=True is a constant broadcast. ----
    m = jnp.mean(x, axis=(2, 3))                                       # (N, Cin)
    yb = jnp.dot(m, params["w_pool"], precision=jax.lax.Precision.HIGHEST)
    mu = jnp.mean(yb, axis=0, keepdims=True)
    var = jnp.mean((yb - mu) ** 2, axis=0, keepdims=True)              # biased
    yb = (yb - mu) * jax.lax.rsqrt(var + EPS) * params["bn_gamma"] + params["bn_beta"]
    outs.append(jnp.broadcast_to(yb[:, :, None, None], (N, Cout, H, W)))
    return outs


def make_params(key, in_channels, out_channels, assp_channels=4):
    dilations = [1, 2, 5, 7, 9, 11][:assp_channels]
    ksizes = [1] + [3] * (assp_channels - 1)
    keys = jax.random.split(key, assp_channels + 1)
    conv_ws, gn_gammas, gn_betas = [], [], []
    for i, (K, d) in enumerate(zip(ksizes, dilations)):
        fan_in = in_channels * K * K
        std = float(np.sqrt(2.0 / fan_in))  # kaiming_normal_, nonlinearity='relu'
        conv_ws.append(jax.random.normal(
            keys[i], (K, K, in_channels, out_channels), jnp.float32) * std)
        gn_gammas.append(jnp.ones((out_channels,), jnp.float32))   # GroupNorm affine
        gn_betas.append(jnp.zeros((out_channels,), jnp.float32))
    w_pool = jax.random.normal(keys[-1], (in_channels, out_channels),
                               jnp.float32) * float(np.sqrt(2.0 / in_channels))
    return {"conv_ws": conv_ws, "gn_gammas": gn_gammas, "gn_betas": gn_betas,
            "w_pool": w_pool,
            "bn_gamma": jnp.ones((out_channels,), jnp.float32),       # fill_(1.0)
            "bn_beta": jnp.full((out_channels,), 1e-4, jnp.float32)}  # fill_(0.0001)


def reference_forward(x_nchw, params, GN_chan=16):
    nb = len(params["conv_ws"])
    dilations = [1, 2, 5, 7, 9, 11][:nb]
    outs = []
    for i in range(nb):
        w = params["conv_ws"][i]
        K, d = w.shape[0], dilations[i]
        p = 0 if K == 1 else d
        y = jax.lax.conv_general_dilated(
            x_nchw, w, window_strides=(1, 1), padding=[(p, p), (p, p)],
            rhs_dilation=(d, d), dimension_numbers=('NCHW', 'HWIO', 'NCHW'),
            precision=jax.lax.Precision.HIGHEST)
        N, C, H, W = y.shape
        yg = y.reshape(N, GN_chan, C // GN_chan, H, W)
        mu = yg.mean(axis=(2, 3, 4), keepdims=True)
        var = ((yg - mu) ** 2).mean(axis=(2, 3, 4), keepdims=True)
        yn = ((yg - mu) * jax.lax.rsqrt(var + EPS)).reshape(N, C, H, W)
        gamma, beta = params["gn_gammas"][i], params["gn_betas"][i]
        outs.append(yn * gamma[None, :, None, None] + beta[None, :, None, None])
    m = x_nchw.mean(axis=(2, 3))
    y = jnp.dot(m, params["w_pool"], precision=jax.lax.Precision.HIGHEST)
    mu = y.mean(axis=0, keepdims=True)
    var = ((y - mu) ** 2).mean(axis=0, keepdims=True)
    yb = (y - mu) * jax.lax.rsqrt(var + EPS) * params["bn_gamma"] + params["bn_beta"]
    N, _, H, W = x_nchw.shape
    outs.append(jnp.broadcast_to(yb[:, :, None, None], (N, yb.shape[1], H, W)))
    return outs


if __name__ == "__main__":
    key = jax.random.PRNGKey(0)
    kx, kp = jax.random.split(key)
    N, Cin, H, W = 2, 8, 16, 16
    Cout, GN_chan = 256, 16          # module defaults: out_channels=256, GN_chan=16
    x = jax.random.normal(kx, (N, Cin, H, W), jnp.float32)
    params = make_params(kp, Cin, Cout, assp_channels=4)

    fwd = jax.jit(assp_multiscale_forward, static_argnames=("GN_chan", "tcol"))

    # tcol=128 -> 2 column tiles per sample: exercises the tiled accumulation
    # and the VMEM-resident GroupNorm finalize path.
    outs = fwd(x, params, GN_chan=GN_chan, tcol=128)
    outs = [jax.block_until_ready(o) for o in outs]
    refs = reference_forward(x, params, GN_chan=GN_chan)
    for o, r in zip(outs, refs):
        np.testing.assert_allclose(np.asarray(o), np.asarray(r),
                                   atol=3e-2, rtol=2e-2)

    # Second shape: HW=144 is not a multiple of 128 -> exercises the padded-column
    # statistics correction and the non-trivial output re-layout.
    x2 = jax.random.normal(kx, (N, Cin, 12, 12), jnp.float32)
    outs2 = fwd(x2, params, GN_chan=GN_chan, tcol=128)
    outs2 = [jax.block_until_ready(o) for o in outs2]
    refs2 = reference_forward(x2, params, GN_chan=GN_chan)
    for o, r in zip(outs2, refs2):
        np.testing.assert_allclose(np.asarray(o), np.asarray(r),
                                   atol=3e-2, rtol=2e-2)

    print("KERNEL_OK")
</pallas_src>

<mosaic_0001>
module attributes {stable_mosaic.version = 11 : i64} {
  func.func @fused_conv_gn_kernel(%arg0: i32, %arg1: i32, %arg2: i32, %arg3: memref<1x256x72xbf16, #tpu.memory_space<vmem>>, %arg4: memref<1x1x72x128xbf16, #tpu.memory_space<vmem>>, %arg5: memref<256x256xf32, #tpu.memory_space<vmem>>, %arg6: memref<1x256x1xf32, #tpu.memory_space<vmem>>, %arg7: memref<1x256x1xf32, #tpu.memory_space<vmem>>, %arg8: memref<1x1x2x256x128xf32, #tpu.memory_space<vmem>>, %arg9: memref<256x1xf32, #tpu.memory_space<vmem>>, %arg10: memref<256x1xf32, #tpu.memory_space<vmem>>) attributes {dimension_semantics = [#tpu.dimension_semantics<parallel>, #tpu.dimension_semantics<parallel>, #tpu.dimension_semantics<arbitrary>], iteration_bounds = array<i64: 4, 2, 2>, scalar_prefetch = 0 : i64, scratch_operands = 2 : i64, tpu.core_type = #tpu.core_type<tc>, window_params = [{transform_indices = @transform_0, window_bounds = array<i64: 1, 256, 72>}, {transform_indices = @transform_1, window_bounds = array<i64: 1, 1, 72, 128>}, {pipeline_mode = #tpu.pipeline_mode<synchronous>, transform_indices = @transform_2, window_bounds = array<i64: 256, 256>}, {transform_indices = @transform_3, window_bounds = array<i64: 1, 256, 1>}, {transform_indices = @transform_4, window_bounds = array<i64: 1, 256, 1>}, {transform_indices = @transform_5, window_bounds = array<i64: 1, 1, 2, 256, 128>}]} {
    %c0_i32 = arith.constant 0 : i32
    %0 = arith.cmpi eq, %arg2, %c0_i32 : i32
    %1 = arith.extui %0 : i1 to i32
    %c0_i32_0 = arith.constant 0 : i32
    %2 = arith.cmpi ne, %1, %c0_i32_0 : i32
    scf.if %2 {
      %cst_17 = arith.constant 0.000000e+00 : f32
      %20 = vector.broadcast %cst_17 : f32 to vector<256x1xf32>
      %c0_18 = arith.constant 0 : index
      %c0_19 = arith.constant 0 : index
      %21 = vector.load %arg9[%c0_18, %c0_19] : memref<256x1xf32, #tpu.memory_space<vmem>>, vector<256x1xf32>
      tpu.vector_store %arg9[%c0_18, %c0_19], %20 {strides = array<i32>} : memref<256x1xf32, #tpu.memory_space<vmem>>, vector<256x1xf32>,
    } else {
    }
    %c0 = arith.constant 0 : index
    %c0_1 = arith.constant 0 : index
    %c0_2 = arith.constant 0 : index
    %3 = vector.load %arg3[%c0, %c0_1, %c0_2] : memref<1x256x72xbf16, #tpu.memory_space<vmem>>, vector<1x256x72xbf16>
    %4 = vector.shape_cast %3 : vector<1x256x72xbf16> to vector<256x72xbf16>
    %c0_3 = arith.constant 0 : index
    %c0_4 = arith.constant 0 : index
    %c0_5 = arith.constant 0 : index
    %c0_6 = arith.constant 0 : index
    %5 = vector.load %arg4[%c0_3, %c0_4, %c0_5, %c0_6] : memref<1x1x72x128xbf16, #tpu.memory_space<vmem>>, vector<1x1x72x128xbf16>
    %6 = vector.shape_cast %5 : vector<1x1x72x128xbf16> to vector<72x128xbf16>
    %cst = arith.constant dense<0.000000e+00> : vector<256x128xf32>
    %7 = tpu.matmul %4, %6, %cst {dimension_numbers = #tpu.dot_dimension_numbers<[1], [0], [0], [1], [0, 0, 1, 1], [], []>} : vector<256x72xbf16>, vector<72x128xbf16>, vector<256x128xf32> -> vector<256x128xf32>
    %c0_7 = arith.constant 0 : index
    %c0_8 = arith.constant 0 : index
    %8 = vector.load %arg9[%c0_7, %c0_8] : memref<256x1xf32, #tpu.memory_space<vmem>>, vector<256x1xf32>
    %cst_9 = arith.constant dense<0.000000e+00> : vector<256xf32>
    %9 = vector.multi_reduction <add>, %7, %cst_9 [1] : vector<256x128xf32> to vector<256xf32>
    %10 = vector.shape_cast %9 : vector<256xf32> to vector<256x1xf32>
    %11 = arith.addf %8, %10 : vector<256x1xf32>
    %c0_10 = arith.constant 0 : index
    %c0_11 = arith.constant 0 : index
    %12 = vector.load %arg9[%c0_10, %c0_11] : memref<256x1xf32, #tpu.memory_space<vmem>>, vector<256x1xf32>
    tpu.vector_store %arg9[%c0_10, %c0_11], %11 {strides = array<i32>} : memref<256x1xf32, #tpu.memory_space<vmem>>, vector<256x1xf32>,
    %c0_12 = arith.constant 0 : index
    %c0_13 = arith.constant 0 : index
    %13 = arith.index_cast %arg2 : i32 to index
    %c0_14 = arith.constant 0 : index
    %c0_15 = arith.constant 0 : index
    %14 = vector.load %arg8[%c0_12, %c0_13, %13, %c0_14, %c0_15] : memref<1x1x2x256x128xf32, #tpu.memory_space<vmem>>, vector<1x1x1x256x128xf32>
    %15 = vector.shape_cast %14 : vector<1x1x1x256x128xf32> to vector<256x128xf32>
    %16 = vector.shape_cast %7 : vector<256x128xf32> to vector<1x1x1x256x128xf32>
    tpu.vector_store %arg8[%c0_12, %c0_13, %13, %c0_14, %c0_15], %16 {strides = array<i32>} : memref<1x1x2x256x128xf32, #tpu.memory_space<vmem>>, vector<1x1x1x256x128xf32>,
    %c1_i32 = arith.constant 1 : i32
    %17 = arith.cmpi eq, %arg2, %c1_i32 : i32
    %18 = arith.extui %17 : i1 to i32
    %c0_i32_16 = arith.constant 0 : i32
    %19 = arith.cmpi ne, %18, %c0_i32_16 : i32
    scf.if %19 {
      %c0_17 = arith.constant 0 : index
      %c0_18 = arith.constant 0 : index
      %20 = vector.load %arg5[%c0_17, %c0_18] : memref<256x256xf32, #tpu.memory_space<vmem>>, vector<256x256xf32>
      %c0_19 = arith.constant 0 : index
      %c0_20 = arith.constant 0 : index
      %21 = vector.load %arg9[%c0_19, %c0_20] : memref<256x1xf32, #tpu.memory_space<vmem>>, vector<256x1xf32>
      %cst_21 = arith.constant dense<0.000000e+00> : vector<256x1xf32>
      %22 = tpu.matmul %20, %21, %cst_21 {dimension_numbers = #tpu.dot_dimension_numbers<[1], [0], [0], [1], [0, 0, 1, 1], [], []>, precision = #tpu.contract_precision<fp32>} : vector<256x256xf32>, vector<256x1xf32>, vector<256x1xf32> -> vector<256x1xf32>
      %cst_22 = arith.constant 0.000000e+00 : f32
      %23 = vector.broadcast %cst_22 : f32 to vector<256x1xf32>
      %c0_23 = arith.constant 0 : index
      %c0_24 = arith.constant 0 : index
      %24 = vector.load %arg10[%c0_23, %c0_24] : memref<256x1xf32, #tpu.memory_space<vmem>>, vector<256x1xf32>
      tpu.vector_store %arg10[%c0_23, %c0_24], %23 {strides = array<i32>} : memref<256x1xf32, #tpu.memory_space<vmem>>, vector<256x1xf32>,
      %c0_i32_25 = arith.constant 0 : i32
      %c0_26 = arith.constant 0 : index
      %c0_27 = arith.constant 0 : index
      %25 = arith.index_cast %c0_i32_25 : i32 to index
      %c0_28 = arith.constant 0 : index
      %c0_29 = arith.constant 0 : index
      %26 = vector.load %arg8[%c0_26, %c0_27, %25, %c0_28, %c0_29] : memref<1x1x2x256x128xf32, #tpu.memory_space<vmem>>, vector<1x1x1x256x128xf32>
      %27 = vector.shape_cast %26 : vector<1x1x1x256x128xf32> to vector<256x128xf32>
      %28 = vector.broadcast %22 : vector<256x1xf32> to vector<256x128xf32>
      %29 = arith.subf %27, %28 : vector<256x128xf32>
      %c0_30 = arith.constant 0 : index
      %c0_31 = arith.constant 0 : index
      %30 = vector.load %arg10[%c0_30, %c0_31] : memref<256x1xf32, #tpu.memory_space<vmem>>, vector<256x1xf32>
      %31 = arith.mulf %29, %29 : vector<256x128xf32>
      %cst_32 = arith.constant dense<0.000000e+00> : vector<256xf32>
      %32 = vector.multi_reduction <add>, %31, %cst_32 [1] : vector<256x128xf32> to vector<256xf32>
      %33 = vector.shape_cast %32 : vector<256xf32> to vector<256x1xf32>
      %34 = arith.addf %30, %33 : vector<256x1xf32>
      %c0_33 = arith.constant 0 : index
      %c0_34 = arith.constant 0 : index
      %35 = vector.load %arg10[%c0_33, %c0_34] : memref<256x1xf32, #tpu.memory_space<vmem>>, vector<256x1xf32>
      tpu.vector_store %arg10[%c0_33, %c0_34], %34 {strides = array<i32>} : memref<256x1xf32, #tpu.memory_space<vmem>>, vector<256x1xf32>,
      %c1_i32_35 = arith.constant 1 : i32
      %c0_36 = arith.constant 0 : index
      %c0_37 = arith.constant 0 : index
      %36 = arith.index_cast %c1_i32_35 : i32 to index
      %c0_38 = arith.constant 0 : index
      %c0_39 = arith.constant 0 : index
      %37 = vector.load %arg8[%c0_36, %c0_37, %36, %c0_38, %c0_39] : memref<1x1x2x256x128xf32, #tpu.memory_space<vmem>>, vector<1x1x1x256x128xf32>
      %38 = vector.shape_cast %37 : vector<1x1x1x256x128xf32> to vector<256x128xf32>
      %39 = vector.broadcast %22 : vector<256x1xf32> to vector<256x128xf32>
      %40 = arith.subf %38, %39 : vector<256x128xf32>
      %c0_40 = arith.constant 0 : index
      %c0_41 = arith.constant 0 : index
      %41 = vector.load %arg10[%c0_40, %c0_41] : memref<256x1xf32, #tpu.memory_space<vmem>>, vector<256x1xf32>
      %42 = arith.mulf %40, %40 : vector<256x128xf32>
      %cst_42 = arith.constant dense<0.000000e+00> : vector<256xf32>
      %43 = vector.multi_reduction <add>, %42, %cst_42 [1] : vector<256x128xf32> to vector<256xf32>
      %44 = vector.shape_cast %43 : vector<256xf32> to vector<256x1xf32>
      %45 = arith.addf %41, %44 : vector<256x1xf32>
      %c0_43 = arith.constant 0 : index
      %c0_44 = arith.constant 0 : index
      %46 = vector.load %arg10[%c0_43, %c0_44] : memref<256x1xf32, #tpu.memory_space<vmem>>, vector<256x1xf32>
      tpu.vector_store %arg10[%c0_43, %c0_44], %45 {strides = array<i32>} : memref<256x1xf32, #tpu.memory_space<vmem>>, vector<256x1xf32>,
      %c2_i32 = arith.constant 2 : i32
      %c0_45 = arith.constant 0 : index
      %c0_46 = arith.constant 0 : index
      %47 = vector.load %arg10[%c0_45, %c0_46] : memref<256x1xf32, #tpu.memory_space<vmem>>, vector<256x1xf32>
      %48 = arith.mulf %22, %22 : vector<256x1xf32>
      %cst_47 = arith.constant 0.000000e+00 : f32
      %49 = vector.broadcast %cst_47 : f32 to vector<256x1xf32>
      %50 = arith.mulf %49, %48 : vector<256x1xf32>
      %51 = arith.subf %47, %50 : vector<256x1xf32>
      %c0_48 = arith.constant 0 : index
      %c0_49 = arith.constant 0 : index
      %52 = vector.load %arg5[%c0_48, %c0_49] : memref<256x256xf32, #tpu.memory_space<vmem>>, vector<256x256xf32>
      %cst_50 = arith.constant dense<0.000000e+00> : vector<256x1xf32>
      %53 = tpu.matmul %52, %51, %cst_50 {dimension_numbers = #tpu.dot_dimension_numbers<[1], [0], [0], [1], [0, 0, 1, 1], [], []>, precision = #tpu.contract_precision<fp32>} : vector<256x256xf32>, vector<256x1xf32>, vector<256x1xf32> -> vector<256x1xf32>
      %cst_51 = arith.constant 9.99999974E-6 : f32
      %54 = vector.broadcast %cst_51 : f32 to vector<256x1xf32>
      %55 = arith.addf %53, %54 : vector<256x1xf32>
      %56 = math.rsqrt %55 : vector<256x1xf32>
      %c0_52 = arith.constant 0 : index
      %c0_53 = arith.constant 0 : index
      %c0_54 = arith.constant 0 : index
      %57 = vector.load %arg6[%c0_52, %c0_53, %c0_54] : memref<1x256x1xf32, #tpu.memory_space<vmem>>, vector<1x256x1xf32>
      %58 = vector.shape_cast %57 : vector<1x256x1xf32> to vector<256x1xf32>
      %59 = arith.mulf %56, %58 : vector<256x1xf32>
      %c0_55 = arith.constant 0 : index
      %c0_56 = arith.constant 0 : index
      %c0_57 = arith.constant 0 : index
      %60 = vector.load %arg7[%c0_55, %c0_56, %c0_57] : memref<1x256x1xf32, #tpu.memory_space<vmem>>, vector<1x256x1xf32>
      %61 = vector.shape_cast %60 : vector<1x256x1xf32> to vector<256x1xf32>
      %62 = arith.mulf %22, %59 : vector<256x1xf32>
      %63 = arith.subf %61, %62 : vector<256x1xf32>
      %c0_i32_58 = arith.constant 0 : i32
      %c0_59 = arith.constant 0 : index
      %c0_60 = arith.constant 0 : index
      %64 = arith.index_cast %c0_i32_58 : i32 to index
      %c0_61 = arith.constant 0 : index
      %c0_62 = arith.constant 0 : index
      %65 = vector.load %arg8[%c0_59, %c0_60, %64, %c0_61, %c0_62] : memref<1x1x2x256x128xf32, #tpu.memory_space<vmem>>, vector<1x1x1x256x128xf32>
      %66 = vector.shape_cast %65 : vector<1x1x1x256x128xf32> to vector<256x128xf32>
      %67 = vector.broadcast %59 : vector<256x1xf32> to vector<256x128xf32>
      %68 = arith.mulf %66, %67 : vector<256x128xf32>
      %69 = vector.broadcast %63 : vector<256x1xf32> to vector<256x128xf32>
      %70 = arith.addf %68, %69 : vector<256x128xf32>
      %c0_63 = arith.constant 0 : index
      %c0_64 = arith.constant 0 : index
      %71 = arith.index_cast %c0_i32_58 : i32 to index
      %c0_65 = arith.constant 0 : index
      %c0_66 = arith.constant 0 : index
      %72 = vector.load %arg8[%c0_63, %c0_64, %71, %c0_65, %c0_66] : memref<1x1x2x256x128xf32, #tpu.memory_space<vmem>>, vector<1x1x1x256x128xf32>
      %73 = vector.shape_cast %72 : vector<1x1x1x256x128xf32> to vector<256x128xf32>
      %74 = vector.shape_cast %70 : vector<256x128xf32> to vector<1x1x1x256x128xf32>
      tpu.vector_store %arg8[%c0_63, %c0_64, %71, %c0_65, %c0_66], %74 {strides = array<i32>} : memref<1x1x2x256x128xf32, #tpu.memory_space<vmem>>, vector<1x1x1x256x128xf32>,
      %c1_i32_67 = arith.constant 1 : i32
      %c0_68 = arith.constant 0 : index
      %c0_69 = arith.constant 0 : index
      %75 = arith.index_cast %c1_i32_67 : i32 to index
      %c0_70 = arith.constant 0 : index
      %c0_71 = arith.constant 0 : index
      %76 = vector.load %arg8[%c0_68, %c0_69, %75, %c0_70, %c0_71] : memref<1x1x2x256x128xf32, #tpu.memory_space<vmem>>, vector<1x1x1x256x128xf32>
      %77 = vector.shape_cast %76 : vector<1x1x1x256x128xf32> to vector<256x128xf32>
      %78 = vector.broadcast %59 : vector<256x1xf32> to vector<256x128xf32>
      %79 = arith.mulf %77, %78 : vector<256x128xf32>
      %80 = vector.broadcast %63 : vector<256x1xf32> to vector<256x128xf32>
      %81 = arith.addf %79, %80 : vector<256x128xf32>
      %c0_72 = arith.constant 0 : index
      %c0_73 = arith.constant 0 : index
      %82 = arith.index_cast %c1_i32_67 : i32 to index
      %c0_74 = arith.constant 0 : index
      %c0_75 = arith.constant 0 : index
      %83 = vector.load %arg8[%c0_72, %c0_73, %82, %c0_74, %c0_75] : memref<1x1x2x256x128xf32, #tpu.memory_space<vmem>>, vector<1x1x1x256x128xf32>
      %84 = vector.shape_cast %83 : vector<1x1x1x256x128xf32> to vector<256x128xf32>
      %85 = vector.shape_cast %81 : vector<256x128xf32> to vector<1x1x1x256x128xf32>
      tpu.vector_store %arg8[%c0_72, %c0_73, %82, %c0_74, %c0_75], %85 {strides = array<i32>} : memref<1x1x2x256x128xf32, #tpu.memory_space<vmem>>, vector<1x1x1x256x128xf32>,
      %c2_i32_76 = arith.constant 2 : i32
    } else {
    }
    return
  }
  func.func @transform_0(%arg0: i32, %arg1: i32, %arg2: i32) -> (i32, i32, i32) {
    %c0_i32 = arith.constant 0 : i32
    %c0_i32_0 = arith.constant 0 : i32
    %c0_i32_1 = arith.constant 0 : i32
    return %arg0, %c0_i32, %c0_i32_0 : i32, i32, i32
  }
  func.func @transform_1(%arg0: i32, %arg1: i32, %arg2: i32) -> (i32, i32, i32, i32) {
    %c0_i32 = arith.constant 0 : i32
    %c0_i32_0 = arith.constant 0 : i32
    return %arg0, %arg1, %c0_i32, %arg2 : i32, i32, i32, i32
  }
  func.func @transform_2(%arg0: i32, %arg1: i32, %arg2: i32) -> (i32, i32) {
    %c0_i32 = arith.constant 0 : i32
    %c0_i32_0 = arith.constant 0 : i32
    %c0_i32_1 = arith.constant 0 : i32
    return %c0_i32, %c0_i32_0 : i32, i32
  }
  func.func @transform_3(%arg0: i32, %arg1: i32, %arg2: i32) -> (i32, i32, i32) {
    %c0_i32 = arith.constant 0 : i32
    %c0_i32_0 = arith.constant 0 : i32
    %c0_i32_1 = arith.constant 0 : i32
    return %arg0, %c0_i32, %c0_i32_0 : i32, i32, i32
  }
  func.func @transform_4(%arg0: i32, %arg1: i32, %arg2: i32) -> (i32, i32, i32) {
    %c0_i32 = arith.constant 0 : i32
    %c0_i32_0 = arith.constant 0 : i32
    %c0_i32_1 = arith.constant 0 : i32
    return %arg0, %c0_i32, %c0_i32_0 : i32, i32, i32
  }
  func.func @transform_5(%arg0: i32, %arg1: i32, %arg2: i32) -> (i32, i32, i32, i32, i32) {
    %c0_i32 = arith.constant 0 : i32
    %c0_i32_0 = arith.constant 0 : i32
    %c0_i32_1 = arith.constant 0 : i32
    %c0_i32_2 = arith.constant 0 : i32
    return %arg1, %arg0, %c0_i32, %c0_i32_0, %c0_i32_1 : i32, i32, i32, i32, i32
  }
}

</mosaic_0001>

<bundles_post_ra>
// kernel: assp_multiscale_forward.1
= control target key start
LH: loop header
LB: loop body
LE: loop exit
PB: predicated region body
PF: predicated region fallthrough
CT: control target
= control target key end

     0   :  { %s13559_s0 = inlined_call_operand.vmem [shape: bf16[4,256,72], index: 0, kind: input, shape index: {}]   ;;  %s13560_s1 = inlined_call_operand.vmem [shape: bf16[4,2,72,256], index: 1, kind: input, shape index: {}]   ;;  %s13561_s2 = inlined_call_operand.vmem [shape: f32[256,256], index: 2, kind: input, shape index: {}]   ;;  %s13562_s3 = inlined_call_operand.vmem [shape: f32[4,256,1], index: 3, kind: input, shape index: {}]   ;;  %s13563_s4 = inlined_call_operand.vmem [shape: f32[4,256,1], index: 4, kind: input, shape index: {}]   ;;  %s13564_s5 = inlined_call_operand.vmem [shape: f32[2,4,2,256,128], index: 5, kind: output, shape index: {}]  }
   0x1   :  { %14231 = sst [smem:[#allocation183_spill]] %s13560_s1 }
   0x2   :  { %s8595_s18 = smov 0   ;;  %s8597_s19 = smov 0  }
   0x3   :  { %s8599_s20 = smov 0   ;;  %s8601_s21 = smov 0  }
   0x4   :  { %s8603_s22 = smov 0   ;;  %s8605_s23 = smov 0  }
   0x5   :  { %s8607_s24 = smov 0   ;;  %s8609_s25 = smov 0  }
   0x6   :  { %s8611_s26 = smov 0  }
   0x7 LB: > { %14232 = sst [smem:[#allocation5_spill]] %s8556_s25  ;;  %s27_s27 = sadd.s32 1, %s8548_s23  ;;  %s8560_s26 = sphi %s8611_s26, %s15_s26   ;;  %s8556_s25 = sphi %s8609_s25, %s15279_s25   ;;  %s8552_s24 = sphi %s8607_s24, %s15285_s24   ;;  %s8548_s23 = sphi %s8605_s23, %s15284_s23   ;;  %s8544_s22 = sphi %s8603_s22, %s15276_s22   ;;  %s8540_s21 = sphi %s8601_s21, %s15283_s21   ;;  %s8536_s20 = sphi %s8599_s20, %s15282_s20   ;;  %s8532_s19 = sphi %s8597_s19, %s15281_s19   ;;  %s8528_s18 = sphi %s8595_s18, %s15280_s18  }
   0x8   : > { %p28_p0 = scmp.ge.s32.totalorder %s27_s27, 2  ;;  %s30_s28 = sadd.s32 1, %s8552_s24 }
   0x9   : > { %p78_p1 = scmp.ne.s32.totalorder %s8532_s19, %s8528_s18  ;;  %p79_p2 = scmp.eq.s32.totalorder %s8560_s26, 0 }
   0xa   : > { %s15287_s28 = smov (!%p28_p0, %s30_s28), %s8552_s24  ;;  %s34_s29 = sadd.s32 1, %s8556_s25 }
   0xb   : > { %p32_p3 = scmp.ge.s32.totalorder %s15287_s28, 2  ;;  %p8647_p4 = por %p79_p2, %p78_p1 }
   0xc   : > { %s15293_s27 = smov (%p28_p0, %s27_s27), 0  ;;  %s71_s11 = sadd.s32 1, %s8532_s19 }
   0xd   : > { %s15289_s28 = smov (%p32_p3, %s15287_s28), 0  ;;  %s15291_s29 = smov (!%p32_p3, %s34_s29), %s8556_s25 }
   0xe   : > { %14234 = sst [smem:[#allocation6_spill]] %s15289_s28  ;;  %p36_p5 = scmp.ge.s32.totalorder %s15291_s29, 4 }
   0xf   : > { %14235 = sst [smem:[#allocation7_spill]] %s15293_s27  ;;  %s65_s6 = ssub.s32 %s8552_s24, %s15289_s28 }
  0x10   : > { %s15295_s29 = smov (%p36_p5, %s15291_s29), 0  ;;  %s67_s7 = ssub.s32 %s8548_s23, %s15293_s27 }
  0x11   : > { %14236 = sst [smem:[#allocation8_spill]] %s15295_s29  ;;  %s64_s8 = ssub.s32 %s8556_s25, %s15295_s29 }
  0x12   : > { %s66_s9 = sor.u32 %s65_s6, %s64_s8  ;;  %p8096_p7 = scmp.ge.s32.totalorder %s8560_s26, 16 }
  0x13   : > { %s68_s10 = sor.u32 %s67_s7, %s66_s9 }
  0x14   : > { %p69_p6 = scmp.eq.s32.totalorder %s68_s10, 0  ;;  %208 = sbr.rel (%p8096_p7) target bundleno = 40 (0x28), region = 20 }
  0x16   : > { %s8666_s12 = scalar_select %p69_p6, %s8532_s19, %s71_s11  }
  0x19   : > { %219 = sbr.rel (!%p8647_p4) target bundleno = 40 (0x28), region = 28  ;;  %s221_s13 = sand.u32 (%p8647_p4), 1, %s8532_s19  }
  0x1a   : > { %s8325_s14 = smul.u32 (%p8647_p4), 18, %s8552_s24  ;;  %s14237_s1 = sld [smem:[#allocation183_spill]] (%p8647_p4) }
  0x1b   : > { %s8324_s15 = smul.u32 (%p8647_p4), 36, %s221_s13 }
  0x1c   : > { %s225_s16 = sadd.s32 (%p8647_p4), %s8548_s23, %s8325_s14  ;;  %s8326_s17 = smul.u32 (%p8647_p4), 36, %s8556_s25 }
  0x1d   : > { %s223_s30 = scalar_lea.vmem (%p8647_p4), [#allocation4], %s8324_s15 }
  0x1e   : > { %s227_s6 = sadd.s32 %s8326_s17, %s225_s16 }
  0x1f   : > { %s8097_s7 = sshll.u32 %s227_s6, 2 }
  0x20   : > { %s229_s10 = scalar_lea.vmem %s14237_s1, %s8097_s7 }
  0x21   : > { %v246_v0 = vld [vmem:[%s229_s10] sm:$0xf]  ;;  %v248_v1 = vld [vmem:[%s229_s10 + $0x8] sm:$0xf]  ;;  %v250_v2 = vld [vmem:[%s229_s10 + $0x10] sm:$0xf] }
  0x22   : > { %247 = vst [vmem:[%s223_s30] sm:$0xf] %v246_v0  ;;  %249 = vst [vmem:[%s223_s30 + $0x4] sm:$0xf] %v248_v1  ;;  %v252_v3 = vld [vmem:[%s229_s10 + $0x18] sm:$0xf] }
  0x23   : > { %251 = vst [vmem:[%s223_s30 + $0x8] sm:$0xf] %v250_v2  ;;  %v254_v4 = vld [vmem:[%s229_s10 + $0x20] sm:$0xf]  ;;  %v256_v5 = vld [vmem:[%s229_s10 + $0x28] sm:$0xf] }
  0x24   : > { %253 = vst [vmem:[%s223_s30 + $0xc] sm:$0xf] %v252_v3  ;;  %255 = vst [vmem:[%s223_s30 + $0x10] sm:$0xf] %v254_v4  ;;  %v258_v6 = vld [vmem:[%s229_s10 + $0x30] sm:$0xf] }
  0x25   : > { %257 = vst [vmem:[%s223_s30 + $0x14] sm:$0xf] %v256_v5  ;;  %v260_v7 = vld [vmem:[%s229_s10 + $0x38] sm:$0xf]  ;;  %v262_v8 = vld [vmem:[%s229_s10 + $0x40] sm:$0xf] }
  0x26   : > { %259 = vst [vmem:[%s223_s30 + $0x18] sm:$0xf] %v258_v6  ;;  %261 = vst [vmem:[%s223_s30 + $0x1c] sm:$0xf] %v260_v7 }
  0x27   : > { %263 = vst [vmem:[%s223_s30 + $0x20] sm:$0xf] %v262_v8 }
  0x28 PF: > { %p8098_p8 = scmp.ge.s32.totalorder %s8560_s26, 1  ;;  %p320_p9 = scmp.lt.s32.totalorder %s8560_s26, 17 }
  0x2a   : > { %p321_p10 = pnand %p8098_p8, %p320_p9 }
  0x2b   : > { %s327_s11 = sand.u32 (!%p321_p10), 1, %s8528_s18   ;;  %p373_p11 = scmp.lt.s32.totalorder (!%p321_p10), %s8544_s22, 3 }
  0x2c   : > { %324 = sbr.rel (%p321_p10) target bundleno = 2256 (0x8d0), region = 77  ;;  %p388_p12 = scmp.lt.s32.totalorder (!%p321_p10), %s8540_s21, 1 }
  0x2d   : > { %s8327_s13 = smul.u32 (!%p321_p10), 36, %s327_s11  ;;  %p8108_p13 = scmp.ne.s32.totalorder (!%p321_p10), %s8536_s20, 0 }
  0x2f   : > { %s8705_s16 = scalar_lea.vmem (!%p321_p10), [#allocation4], %s8327_s13 }
  0x31   : > { %s15297_s22 = smov (!%p373_p11, %s8544_s22), 3  ;;  %s15299_s21 = smov (!%p388_p12, %s8540_s21), 1 }
  0x32   : > { %s8246_s14 = sshll.u32 %s15297_s22, 7  ;;  %s8247_s15 = sshll.u32 %s15297_s22, 8 }
  0x33   : > { %s8687_s6 = scalar_lea.vmem %s13559_s0, %s8246_s14  ;;  %s8692_s9 = scalar_lea.vmem %s13562_s3, %s8247_s15 }
  0x34   : > { %s8697_s18 = scalar_lea.vmem %s13563_s4, %s8247_s15  ;;  %s8105_s11 = sshll.u32 %s15297_s22, 6 }
  0x35   : > { %s8106_s1 = sshll.u32 %s15299_s21, 8  ;;  %401 = sbr.rel (%p8108_p13) target bundleno = 75 (0x4b), region = 85 }
  0x36   : > { %s394_s29 = sadd.s32 %s8106_s1, %s8105_s11 }
  0x37   : > { %s8107_s28 = sshll.u32 %s394_s29, 3 }
  0x38   : > { %s8703_s14 = scalar_lea.vmem %s13564_s5, %s8107_s28 }
  0x3a   : > { %vm402_vm0 = vcmask 7168   ;;  %v8562_v9 = vmov 0.0  }
  0x3b   : > { %403 = vst.msk [vmem:[#allocation2] sm:$0xff] %vm402_vm0, %v8562_v9  ;;  %404 = vst.msk [vmem:[#allocation2 + $0x8] sm:$0xff] %vm402_vm0, %v8562_v9 }
  0x3c   : > { %405 = vst.msk [vmem:[#allocation2 + $0x10] sm:$0xff] %vm402_vm0, %v8562_v9  ;;  %406 = vst.msk [vmem:[#allocation2 + $0x18] sm:$0xff] %vm402_vm0, %v8562_v9 }
  0x3d   : > { %407 = vst.msk [vmem:[#allocation2 + $0x20] sm:$0xff] %vm402_vm0, %v8562_v9  ;;  %408 = vst.msk [vmem:[#allocation2 + $0x28] sm:$0xff] %vm402_vm0, %v8562_v9 }
  0x3e   : > { %409 = vst.msk [vmem:[#allocation2 + $0x30] sm:$0xff] %vm402_vm0, %v8562_v9  ;;  %410 = vst.msk [vmem:[#allocation2 + $0x38] sm:$0xff] %vm402_vm0, %v8562_v9 }
  0x3f   : > { %411 = vst.msk [vmem:[#allocation2 + $0x40] sm:$0xff] %vm402_vm0, %v8562_v9  ;;  %412 = vst.msk [vmem:[#allocation2 + $0x48] sm:$0xff] %vm402_vm0, %v8562_v9 }
  0x40   : > { %413 = vst.msk [vmem:[#allocation2 + $0x50] sm:$0xff] %vm402_vm0, %v8562_v9  ;;  %414 = vst.msk [vmem:[#allocation2 + $0x58] sm:$0xff] %vm402_vm0, %v8562_v9 }
  0x41   : > { %415 = vst.msk [vmem:[#allocation2 + $0x60] sm:$0xff] %vm402_vm0, %v8562_v9  ;;  %416 = vst.msk [vmem:[#allocation2 + $0x68] sm:$0xff] %vm402_vm0, %v8562_v9 }
  0x42   : > { %417 = vst.msk [vmem:[#allocation2 + $0x70] sm:$0xff] %vm402_vm0, %v8562_v9  ;;  %418 = vst.msk [vmem:[#allocation2 + $0x78] sm:$0xff] %vm402_vm0, %v8562_v9 }
  0x43   : > { %419 = vst.msk [vmem:[#allocation2 + $0x80] sm:$0xff] %vm402_vm0, %v8562_v9  ;;  %420 = vst.msk [vmem:[#allocation2 + $0x88] sm:$0xff] %vm402_vm0, %v8562_v9 }
  0x44   : > { %421 = vst.msk [vmem:[#allocation2 + $0x90] sm:$0xff] %vm402_vm0, %v8562_v9  ;;  %422 = vst.msk [vmem:[#allocation2 + $0x98] sm:$0xff] %vm402_vm0, %v8562_v9 }
  0x45   : > { %423 = vst.msk [vmem:[#allocation2 + $0xa0] sm:$0xff] %vm402_vm0, %v8562_v9  ;;  %424 = vst.msk [vmem:[#allocation2 + $0xa8] sm:$0xff] %vm402_vm0, %v8562_v9 }
  0x46   : > { %425 = vst.msk [vmem:[#allocation2 + $0xb0] sm:$0xff] %vm402_vm0, %v8562_v9  ;;  %426 = vst.msk [vmem:[#allocation2 + $0xb8] sm:$0xff] %vm402_vm0, %v8562_v9 }
  0x47   : > { %427 = vst.msk [vmem:[#allocation2 + $0xc0] sm:$0xff] %vm402_vm0, %v8562_v9  ;;  %428 = vst.msk [vmem:[#allocation2 + $0xc8] sm:$0xff] %vm402_vm0, %v8562_v9 }
  0x48   : > { %429 = vst.msk [vmem:[#allocation2 + $0xd0] sm:$0xff] %vm402_vm0, %v8562_v9  ;;  %430 = vst.msk [vmem:[#allocation2 + $0xd8] sm:$0xff] %vm402_vm0, %v8562_v9 }
  0x49   : > { %431 = vst.msk [vmem:[#allocation2 + $0xe0] sm:$0xff] %vm402_vm0, %v8562_v9  ;;  %432 = vst.msk [vmem:[#allocation2 + $0xe8] sm:$0xff] %vm402_vm0, %v8562_v9 }
  0x4a   : > { %433 = vst.msk [vmem:[#allocation2 + $0xf0] sm:$0xff] %vm402_vm0, %v8562_v9  ;;  %434 = vst.msk [vmem:[#allocation2 + $0xf8] sm:$0xff] %vm402_vm0, %v8562_v9 }
  0x4b PF: > { %v8403_v10 = vld [vmem:[%s8705_s16 + $0x20] ss:$0 sps:$4 sm:$0xff]   ;;  %vm632_vm1 = vcmask 1043456   ;;  %v8404_v11 = vld [vmem:[%s8705_s16 + $0x18] sm:$0xff]   ;;  %v8405_v13 = vld [vmem:[%s8705_s16 + $0x10] sm:$0xff]   ;;  %vm583_vm2 = vcmask 588800  }
  0x4c   : > { %8322 = vmatprep.subr.msk.bf16.mxu0 %vm632_vm1, %v8403_v10  ;;  %8323 = vmatprep.subr.msk.bf16.mxu1 %vm632_vm1, %v8403_v10  ;;  %v634_v12 = vsel %vm632_vm1, %v8403_v10, 0  ;;  %v8408_v14 = vld [vmem:[%s8687_s6] sm:$0xff]   ;;  %v8406_v16 = vld [vmem:[%s8705_s16 + $0x8] sm:$0xff]   ;;  %v8413_v22 = vld [vmem:[%s8687_s6 + $0x18] sm:$0xff]   ;;  %s8146_s1 = sshll.u32 %s8536_s20, 8  ;;  %vm925_vm3 = vcmask 7168  }
  0x4d   : > { %8271 = vmatpush3.bf16.msra.mxu0 %v634_v12  ;;  %8317 = vmatpush3.bf16.msra.mxu1 %v634_v12  ;;  %v8409_v15 = vld [vmem:[%s8687_s6 + $0x40] sm:$0xff]   ;;  %v8410_v18 = vld [vmem:[%s8687_s6 + $0x8] sm:$0xff]   ;;  %v8412_v20 = vld [vmem:[%s8687_s6 + $0x10] sm:$0xff]   ;;  %s8779_s21 = scalar_lea.vmem %s8703_s14, %s8146_s1  ;;  %p8147_p0 = scmp.ne.s32.totalorder %s8536_s20, 1 }
  0x4e   : > { %8272 = vmatprep.subr.bf16.mxu0 %v8404_v11  ;;  %8313 = vmatprep.subr.bf16.mxu1 %v8404_v11  ;;  %v8407_v17 = vld [vmem:[%s8705_s16] sm:$0xff]   ;;  %v8414_v21 = vld [vmem:[%s8687_s6 + $0x50] sm:$0xff]   ;;  %v8415_v23 = vld [vmem:[%s8687_s6 + $0x58] sm:$0xff]  }
  0x4f   : > { %8280 = vmatprep.mubr.msk.bf16.mxu0 %vm583_vm2, %v8408_v14  ;;  %8296 = vmatprep.mubr.msk.bf16.mxu1 %vm583_vm2, %v8409_v15  ;;  %v8411_v19 = vld [vmem:[%s8687_s6 + $0x48] sm:$0xff]   ;;  %v8416_v24 = vld [vmem:[%s8687_s6 + $0x20] sm:$0xff]   ;;  %v8420_v28 = vld [vmem:[%s8687_s6 + $0x30] sm:$0xff]  }
  0x50   : > { %v8418_v25 = vld [vmem:[%s8687_s6 + $0x60] sm:$0xff]   ;;  %v8417_v26 = vld [vmem:[%s8687_s6 + $0x28] sm:$0xff]   ;;  %v8422_v29 = vld [vmem:[%s8687_s6 + $0x70] sm:$0xff]  }
  0x51   : > { %8273 = vmatpush3.bf16.msra.mxu0 %v8404_v11  ;;  %8318 = vmatpush3.bf16.msra.mxu1 %v8404_v11  ;;  %v8419_v27 = vld [vmem:[%s8687_s6 + $0x68] sm:$0xff]   ;;  %v8421_v30 = vld [vmem:[%s8687_s6 + $0x38] sm:$0xff]   ;;  %v815_v0 = vld [vmem:[#allocation2 + $0x90] sm:$0xff] }
  0x52   : > { %8274 = vmatprep.subr.bf16.mxu0 %v8405_v13  ;;  %8314 = vmatprep.subr.bf16.mxu1 %v8405_v13  ;;  %v8423_v31 = vld [vmem:[%s8687_s6 + $0x78] sm:$0xff]   ;;  %v799_v1 = vld [vmem:[#allocation2 + $0x10] sm:$0xff]  ;;  %v797_v6 = vld [vmem:[#allocation2] sm:$0xff] }
  0x53   : > { %v800_v7 = vld [vmem:[#allocation2 + $0x18] sm:$0xff]  ;;  %v813_v12 = vld [vmem:[#allocation2 + $0x80] sm:$0xff] }
  0x55   : > { %8275 = vmatpush3.bf16.msra.mxu0 %v8405_v13  ;;  %8319 = vmatpush3.bf16.msra.mxu1 %v8405_v13  ;;  %v816_v13 = vld [vmem:[#allocation2 + $0x98] sm:$0xff] }
  0x56   : > { %8276 = vmatprep.subr.bf16.mxu0 %v8406_v16  ;;  %8315 = vmatprep.subr.bf16.mxu1 %v8406_v16 }
  0x59   : > { %8277 = vmatpush3.bf16.msra.mxu0 %v8406_v16  ;;  %8320 = vmatpush3.bf16.msra.mxu1 %v8406_v16 }
  0x5a   : > { %8278 = vmatprep.subr.bf16.mxu0 %v8407_v17  ;;  %8316 = vmatprep.subr.bf16.mxu1 %v8407_v17 }
  0x5d   : > { %8279 = vmatpush3.bf16.msra.mxu0 %v8407_v17  ;;  %8321 = vmatpush3.bf16.msra.mxu1 %v8407_v17 }
  0x60   : > { %8281 = vmatmul.mubr.msk.bf16.vlgmr.msra.gmra.mxu0 %vm583_vm2, %v8410_v18  ;;  %8297 = vmatmul.mubr.msk.bf16.vlgmr.msra.gmra.mxu1 %vm583_vm2, %v8411_v19  ;;  %v814_v18 = vld [vmem:[#allocation2 + $0x88] sm:$0xff] }
  0x61   : > { %8284 = vmatprep.mubr.msk.bf16.mxu0 %vm583_vm2, %v8412_v20  ;;  %8300 = vmatprep.mubr.msk.bf16.mxu1 %vm583_vm2, %v8414_v21  ;;  %v798_v19 = vld [vmem:[#allocation2 + $0x8] sm:$0xff] }
  0x68   : > { %8285 = vmatmul.mubr.msk.bf16.gmra.mxu0 %vm583_vm2, %v8413_v22  ;;  %8301 = vmatmul.mubr.msk.bf16.gmra.mxu1 %vm583_vm2, %v8415_v23 }
  0x69   : > { %8288 = vmatprep.mubr.msk.bf16.mxu0 %vm583_vm2, %v8416_v24  ;;  %8304 = vmatprep.mubr.msk.bf16.mxu1 %vm583_vm2, %v8418_v25  ;;  %v803_v24 = vld [vmem:[#allocation2 + $0x30] sm:$0xff]  ;;  %v804_v25 = vld [vmem:[#allocation2 + $0x38] sm:$0xff] }
  0x70   : > { %8289 = vmatmul.mubr.msk.bf16.gmra.mxu0 %vm583_vm2, %v8417_v26  ;;  %8305 = vmatmul.mubr.msk.bf16.gmra.mxu1 %vm583_vm2, %v8419_v27 }
  0x71   : > { %8292 = vmatprep.mubr.msk.bf16.mxu0 %vm583_vm2, %v8420_v28  ;;  %8308 = vmatprep.mubr.msk.bf16.mxu1 %vm583_vm2, %v8422_v29 }
  0x78   : > { %8293 = vmatmul.mubr.msk.bf16.gmra.mxu0 %vm583_vm2, %v8421_v30  ;;  %8309 = vmatmul.mubr.msk.bf16.gmra.mxu1 %vm583_vm2, %v8423_v31  ;;  %v819_v30 = vld [vmem:[#allocation2 + $0xb0] sm:$0xff]  ;;  %v820_v31 = vld [vmem:[#allocation2 + $0xb8] sm:$0xff] }
 0x120   : > { %v8282_v32 = vpop.f32.mrf.mxu0  ;;  %v8298_v33 = vpop.f32.mrf.mxu1 }
 0x121   : > { %962 = vst [vmem:[%s8779_s21 + $0x10] sm:$0xff] %v8282_v32  ;;  %978 = vst [vmem:[%s8779_s21 + $0x90] sm:$0xff] %v8298_v33  ;;  %865 = vadd.xlane.f32.xlu0 %v8298_v33  ;;  %833 = vadd.xlane.f32.xlu1 %v8282_v32 }
 0x122   : > { %v670_v34 = vpop.f32.mrf.mxu0  ;;  %v734_v35 = vpop.f32.mrf.mxu1 }
 0x123   : > { %960 = vst [vmem:[%s8779_s21] sm:$0xff] %v670_v34  ;;  %976 = vst [vmem:[%s8779_s21 + $0x80] sm:$0xff] %v734_v35 }
 0x124   : > { %v8283_v36 = vpop.f32.mrf.mxu0  ;;  %v8299_v37 = vpop.f32.mrf.mxu1 }
 0x125   : > { %963 = vst [vmem:[%s8779_s21 + $0x18] sm:$0xff] %v8283_v36  ;;  %979 = vst [vmem:[%s8779_s21 + $0x98] sm:$0xff] %v8299_v37  ;;  %829 = vadd.xlane.f32.xlu0 %v670_v34  ;;  %835 = vadd.xlane.f32.xlu1 %v8283_v36  ;;  %v801_v36 = vld [vmem:[#allocation2 + $0x20] sm:$0xff] }
 0x126   : > { %v673_v38 = vpop.f32.mrf.mxu0  ;;  %v737_v39 = vpop.f32.mrf.mxu1 }
 0x127   : > { %961 = vst [vmem:[%s8779_s21 + $0x8] sm:$0xff] %v673_v38  ;;  %977 = vst [vmem:[%s8779_s21 + $0x88] sm:$0xff] %v737_v39 }
 0x128   : > { %v8286_v40 = vpop.f32.mrf.mxu0  ;;  %v8302_v41 = vpop.f32.mrf.mxu1 }
 0x129   : > { %966 = vst [vmem:[%s8779_s21 + $0x30] sm:$0xff] %v8286_v40  ;;  %861 = vadd.xlane.f32.xlu0 %v734_v35  ;;  %867 = vadd.xlane.f32.xlu1 %v8299_v37  ;;  %982 = vst [vmem:[%s8779_s21 + $0xb0] sm:$0xff] %v8302_v41  ;;  %v802_v37 = vld [vmem:[#allocation2 + $0x28] sm:$0xff] }
 0x12a   : > { %v686_v42 = vpop.f32.mrf.mxu0  ;;  %v750_v43 = vpop.f32.mrf.mxu1 }
 0x12b   : > { %964 = vst [vmem:[%s8779_s21 + $0x20] sm:$0xff] %v686_v42  ;;  %980 = vst [vmem:[%s8779_s21 + $0xa0] sm:$0xff] %v750_v43 }
 0x12c   : > { %v8287_v44 = vpop.f32.mrf.mxu0  ;;  %v8303_v45 = vpop.f32.mrf.mxu1 }
 0x12d   : > { %967 = vst [vmem:[%s8779_s21 + $0x38] sm:$0xff] %v8287_v44  ;;  %863 = vadd.xlane.f32.xlu1 %v737_v39  ;;  %831 = vadd.xlane.f32.xlu0 %v673_v38  ;;  %983 = vst [vmem:[%s8779_s21 + $0xb8] sm:$0xff] %v8303_v45 }
 0x12e   : > { %v689_v46 = vpop.f32.mrf.mxu0  ;;  %v753_v47 = vpop.f32.mrf.mxu1 }
 0x12f   : > { %965 = vst [vmem:[%s8779_s21 + $0x28] sm:$0xff] %v689_v46  ;;  %981 = vst [vmem:[%s8779_s21 + $0xa8] sm:$0xff] %v753_v47 }
 0x130   : > { %v8290_v48 = vpop.f32.mrf.mxu0  ;;  %v8306_v49 = vpop.f32.mrf.mxu1 }
 0x131   : > { %841 = vadd.xlane.f32.xlu0 %v8286_v40  ;;  %843 = vadd.xlane.f32.xlu1 %v8287_v44  ;;  %970 = vst [vmem:[%s8779_s21 + $0x50] sm:$0xff] %v8290_v48  ;;  %986 = vst [vmem:[%s8779_s21 + $0xd0] sm:$0xff] %v8306_v49 }
 0x132   : > { %v702_v50 = vpop.f32.mrf.mxu0  ;;  %v766_v51 = vpop.f32.mrf.mxu1 }
 0x133   : > { %968 = vst [vmem:[%s8779_s21 + $0x40] sm:$0xff] %v702_v50  ;;  %984 = vst [vmem:[%s8779_s21 + $0xc0] sm:$0xff] %v766_v51 }
 0x134   : > { %v8291_v52 = vpop.f32.mrf.mxu0  ;;  %v8307_v53 = vpop.f32.mrf.mxu1 }
 0x135   : > { %873 = vadd.xlane.f32.xlu0 %v8302_v41  ;;  %875 = vadd.xlane.f32.xlu1 %v8303_v45  ;;  %971 = vst [vmem:[%s8779_s21 + $0x58] sm:$0xff] %v8291_v52  ;;  %987 = vst [vmem:[%s8779_s21 + $0xd8] sm:$0xff] %v8307_v53 }
 0x136   : > { %v705_v54 = vpop.f32.mrf.mxu0  ;;  %v769_v55 = vpop.f32.mrf.mxu1 }
 0x137   : > { %969 = vst [vmem:[%s8779_s21 + $0x48] sm:$0xff] %v705_v54  ;;  %985 = vst [vmem:[%s8779_s21 + $0xc8] sm:$0xff] %v769_v55 }
 0x138   : > { %v8294_v56 = vpop.f32.mrf.mxu0  ;;  %v8310_v57 = vpop.f32.mrf.mxu1 }
 0x139   : > { %837 = vadd.xlane.f32.xlu0 %v686_v42  ;;  %839 = vadd.xlane.f32.xlu1 %v689_v46  ;;  %974 = vst [vmem:[%s8779_s21 + $0x70] sm:$0xff] %v8294_v56  ;;  %990 = vst [vmem:[%s8779_s21 + $0xf0] sm:$0xff] %v8310_v57  ;;  %v817_v42 = vld [vmem:[#allocation2 + $0xa0] sm:$0xff] }
 0x13a   : > { %v718_v58 = vpop.f32.mrf.mxu0  ;;  %v782_v59 = vpop.f32.mrf.mxu1 }
 0x13b   : > { %972 = vst [vmem:[%s8779_s21 + $0x60] sm:$0xff] %v718_v58  ;;  %988 = vst [vmem:[%s8779_s21 + $0xe0] sm:$0xff] %v782_v59 }
 0x13c   : > { %v8295_v60 = vpop.f32.mrf.mxu0  ;;  %v8311_v61 = vpop.f32.mrf.mxu1 }
 0x13d   : > { %869 = vadd.xlane.f32.xlu0 %v750_v43  ;;  %871 = vadd.xlane.f32.xlu1 %v753_v47  ;;  %975 = vst [vmem:[%s8779_s21 + $0x78] sm:$0xff] %v8295_v60  ;;  %991 = vst [vmem:[%s8779_s21 + $0xf8] sm:$0xff] %v8311_v61  ;;  %v818_v43 = vld [vmem:[#allocation2 + $0xa8] sm:$0xff] }
 0x13e   : > { %v721_v62 = vpop.f32.mrf.mxu0  ;;  %v785_v63 = vpop.f32.mrf.mxu1 }
 0x13f   : > { %973 = vst [vmem:[%s8779_s21 + $0x68] sm:$0xff] %v721_v62  ;;  %989 = vst [vmem:[%s8779_s21 + $0xe8] sm:$0xff] %v785_v63 }
 0x141   : > { %849 = vadd.xlane.f32.xlu0 %v8290_v48  ;;  %851 = vadd.xlane.f32.xlu1 %v8291_v52  ;;  %v807_v48 = vld [vmem:[#allocation2 + $0x50] sm:$0xff] }
 0x145   : > { %881 = vadd.xlane.f32.xlu0 %v8306_v49  ;;  %883 = vadd.xlane.f32.xlu1 %v8307_v53  ;;  %v808_v49 = vld [vmem:[#allocation2 + $0x58] sm:$0xff] }
 0x149   : > { %845 = vadd.xlane.f32.xlu0 %v702_v50  ;;  %847 = vadd.xlane.f32.xlu1 %v705_v54  ;;  %v823_v54 = vld [vmem:[#allocation2 + $0xd0] sm:$0xff] }
 0x14d   : > { %877 = vadd.xlane.f32.xlu0 %v766_v51  ;;  %879 = vadd.xlane.f32.xlu1 %v769_v55  ;;  %v824_v55 = vld [vmem:[#allocation2 + $0xd8] sm:$0xff] }
 0x151   : > { %857 = vadd.xlane.f32.xlu0 %v8294_v56  ;;  %859 = vadd.xlane.f32.xlu1 %v8295_v60  ;;  %v805_v60 = vld [vmem:[#allocation2 + $0x40] sm:$0xff] }
 0x155   : > { %853 = vadd.xlane.f32.xlu0 %v718_v58  ;;  %855 = vadd.xlane.f32.xlu1 %v721_v62 }
 0x159   : > { %885 = vadd.xlane.f32.xlu0 %v782_v59  ;;  %887 = vadd.xlane.f32.xlu1 %v785_v63 }
 0x15d   : > { %889 = vadd.xlane.f32.xlu0 %v8310_v57  ;;  %891 = vadd.xlane.f32.xlu1 %v8311_v61  ;;  %v806_v61 = vld [vmem:[#allocation2 + $0x48] sm:$0xff] }
 0x1aa   : > { %v866_v2 = vpop.xlane.xlu0 %865  ;;  %v834_v3 = vpop.xlane.xlu1 %833 }
 0x1ab   : > { %v911_v4 = vadd.f32 %v866_v2, %v815_v0  ;;  %v895_v5 = vadd.f32 %v834_v3, %v799_v1  ;;  %v821_v2 = vld [vmem:[#allocation2 + $0xc0] sm:$0xff]  ;;  %v822_v3 = vld [vmem:[#allocation2 + $0xc8] sm:$0xff] }
 0x1ad   : > { %944 = vst.msk [vmem:[#allocation2 + $0x90] sm:$0xff] %vm925_vm3, %v911_v4  ;;  %928 = vst.msk [vmem:[#allocation2 + $0x10] sm:$0xff] %vm925_vm3, %v895_v5 }
 0x1ae   : > { %v830_v8 = vpop.xlane.xlu0 %829  ;;  %v836_v9 = vpop.xlane.xlu1 %835 }
 0x1af   : > { %v893_v10 = vadd.f32 %v830_v8, %v797_v6  ;;  %v896_v11 = vadd.f32 %v836_v9, %v800_v7  ;;  %v811_v8 = vld [vmem:[#allocation2 + $0x70] sm:$0xff]  ;;  %v812_v9 = vld [vmem:[#allocation2 + $0x78] sm:$0xff] }
 0x1b1   : > { %926 = vst.msk [vmem:[#allocation2] sm:$0xff] %vm925_vm3, %v893_v10  ;;  %929 = vst.msk [vmem:[#allocation2 + $0x18] sm:$0xff] %vm925_vm3, %v896_v11 }
 0x1b2   : > { %v862_v14 = vpop.xlane.xlu0 %861  ;;  %v868_v15 = vpop.xlane.xlu1 %867 }
 0x1b3   : > { %v909_v16 = vadd.f32 %v862_v14, %v813_v12  ;;  %v912_v17 = vadd.f32 %v868_v15, %v816_v13  ;;  %v809_v14 = vld [vmem:[#allocation2 + $0x60] sm:$0xff]  ;;  %v810_v15 = vld [vmem:[#allocation2 + $0x68] sm:$0xff] }
 0x1b5   : > { %942 = vst.msk [vmem:[#allocation2 + $0x80] sm:$0xff] %vm925_vm3, %v909_v16  ;;  %945 = vst.msk [vmem:[#allocation2 + $0x98] sm:$0xff] %vm925_vm3, %v912_v17 }
 0x1b6   : > { %v864_v20 = vpop.xlane.xlu1 %863  ;;  %v832_v21 = vpop.xlane.xlu0 %831 }
 0x1b7   : > { %v910_v22 = vadd.f32 %v864_v20, %v814_v18  ;;  %v894_v23 = vadd.f32 %v832_v21, %v798_v19  ;;  %v825_v20 = vld [vmem:[#allocation2 + $0xe0] sm:$0xff]  ;;  %v826_v21 = vld [vmem:[#allocation2 + $0xe8] sm:$0xff] }
 0x1b9   : > { %943 = vst.msk [vmem:[#allocation2 + $0x88] sm:$0xff] %vm925_vm3, %v910_v22  ;;  %927 = vst.msk [vmem:[#allocation2 + $0x8] sm:$0xff] %vm925_vm3, %v894_v23 }
 0x1ba   : > { %v842_v26 = vpop.xlane.xlu0 %841  ;;  %v844_v27 = vpop.xlane.xlu1 %843 }
 0x1bb   : > { %v899_v28 = vadd.f32 %v842_v26, %v803_v24  ;;  %v900_v29 = vadd.f32 %v844_v27, %v804_v25  ;;  %v827_v26 = vld [vmem:[#allocation2 + $0xf0] sm:$0xff]  ;;  %v828_v27 = vld [vmem:[#allocation2 + $0xf8] sm:$0xff] }
 0x1bd   : > { %932 = vst.msk [vmem:[#allocation2 + $0x30] sm:$0xff] %vm925_vm3, %v899_v28  ;;  %933 = vst.msk [vmem:[#allocation2 + $0x38] sm:$0xff] %vm925_vm3, %v900_v29 }
 0x1be   : > { %v874_v32 = vpop.xlane.xlu0 %873  ;;  %v876_v33 = vpop.xlane.xlu1 %875 }
 0x1bf   : > { %v915_v34 = vadd.f32 %v874_v32, %v819_v30  ;;  %v916_v35 = vadd.f32 %v876_v33, %v820_v31 }
 0x1c1   : > { %948 = vst.msk [vmem:[#allocation2 + $0xb0] sm:$0xff] %vm925_vm3, %v915_v34  ;;  %949 = vst.msk [vmem:[#allocation2 + $0xb8] sm:$0xff] %vm925_vm3, %v916_v35 }
 0x1c2   : > { %v838_v38 = vpop.xlane.xlu0 %837  ;;  %v840_v39 = vpop.xlane.xlu1 %839 }
 0x1c3   : > { %v897_v40 = vadd.f32 %v838_v38, %v801_v36  ;;  %v898_v41 = vadd.f32 %v840_v39, %v802_v37 }
 0x1c5   : > { %930 = vst.msk [vmem:[#allocation2 + $0x20] sm:$0xff] %vm925_vm3, %v897_v40  ;;  %931 = vst.msk [vmem:[#allocation2 + $0x28] sm:$0xff] %vm925_vm3, %v898_v41 }
 0x1c6   : > { %v870_v44 = vpop.xlane.xlu0 %869  ;;  %v872_v45 = vpop.xlane.xlu1 %871 }
 0x1c7   : > { %v913_v46 = vadd.f32 %v870_v44, %v817_v42  ;;  %v914_v47 = vadd.f32 %v872_v45, %v818_v43 }
 0x1c9   : > { %946 = vst.msk [vmem:[#allocation2 + $0xa0] sm:$0xff] %vm925_vm3, %v913_v46  ;;  %947 = vst.msk [vmem:[#allocation2 + $0xa8] sm:$0xff] %vm925_vm3, %v914_v47 }
 0x1ca   : > { %v850_v50 = vpop.xlane.xlu0 %849  ;;  %v852_v51 = vpop.xlane.xlu1 %851 }
 0x1cb   : > { %v903_v52 = vadd.f32 %v850_v50, %v807_v48  ;;  %v904_v53 = vadd.f32 %v852_v51, %v808_v49 }
 0x1cd   : > { %936 = vst.msk [vmem:[#allocation2 + $0x50] sm:$0xff] %vm925_vm3, %v903_v52  ;;  %937 = vst.msk [vmem:[#allocation2 + $0x58] sm:$0xff] %vm925_vm3, %v904_v53 }
 0x1ce   : > { %v882_v56 = vpop.xlane.xlu0 %881  ;;  %v884_v57 = vpop.xlane.xlu1 %883 }
 0x1cf   : > { %v919_v58 = vadd.f32 %v882_v56, %v823_v54  ;;  %v920_v59 = vadd.f32 %v884_v57, %v824_v55 }
 0x1d1   : > { %952 = vst.msk [vmem:[#allocation2 + $0xd0] sm:$0xff] %vm925_vm3, %v919_v58  ;;  %953 = vst.msk [vmem:[#allocation2 + $0xd8] sm:$0xff] %vm925_vm3, %v920_v59 }
 0x1d2   : > { %v846_v62 = vpop.xlane.xlu0 %845  ;;  %v848_v63 = vpop.xlane.xlu1 %847 }
 0x1d3   : > { %v901_v0 = vadd.f32 %v846_v62, %v805_v60  ;;  %v902_v1 = vadd.f32 %v848_v63, %v806_v61 }
 0x1d5   : > { %934 = vst.msk [vmem:[#allocation2 + $0x40] sm:$0xff] %vm925_vm3, %v901_v0  ;;  %935 = vst.msk [vmem:[#allocation2 + $0x48] sm:$0xff] %vm925_vm3, %v902_v1 }
 0x1d6   : > { %v878_v4 = vpop.xlane.xlu0 %877  ;;  %v880_v5 = vpop.xlane.xlu1 %879 }
 0x1d7   : > { %v917_v6 = vadd.f32 %v878_v4, %v821_v2  ;;  %v918_v7 = vadd.f32 %v880_v5, %v822_v3 }
 0x1d9   : > { %950 = vst.msk [vmem:[#allocation2 + $0xc0] sm:$0xff] %vm925_vm3, %v917_v6  ;;  %951 = vst.msk [vmem:[#allocation2 + $0xc8] sm:$0xff] %vm925_vm3, %v918_v7 }
 0x1da   : > { %v858_v10 = vpop.xlane.xlu0 %857  ;;  %v860_v11 = vpop.xlane.xlu1 %859 }
 0x1db   : > { %v907_v12 = vadd.f32 %v858_v10, %v811_v8  ;;  %v908_v13 = vadd.f32 %v860_v11, %v812_v9 }
 0x1dd   : > { %940 = vst.msk [vmem:[#allocation2 + $0x70] sm:$0xff] %vm925_vm3, %v907_v12  ;;  %941 = vst.msk [vmem:[#allocation2 + $0x78] sm:$0xff] %vm925_vm3, %v908_v13 }
 0x1de   : > { %v854_v16 = vpop.xlane.xlu0 %853  ;;  %v856_v17 = vpop.xlane.xlu1 %855 }
 0x1df   : > { %v905_v18 = vadd.f32 %v854_v16, %v809_v14  ;;  %v906_v19 = vadd.f32 %v856_v17, %v810_v15 }
 0x1e1   : > { %938 = vst.msk [vmem:[#allocation2 + $0x60] sm:$0xff] %vm925_vm3, %v905_v18  ;;  %939 = vst.msk [vmem:[#allocation2 + $0x68] sm:$0xff] %vm925_vm3, %v906_v19 }
 0x1e2   : > { %v886_v22 = vpop.xlane.xlu0 %885  ;;  %v888_v23 = vpop.xlane.xlu1 %887 }
 0x1e3   : > { %v921_v24 = vadd.f32 %v886_v22, %v825_v20  ;;  %v922_v25 = vadd.f32 %v888_v23, %v826_v21 }
 0x1e5   : > { %954 = vst.msk [vmem:[#allocation2 + $0xe0] sm:$0xff] %vm925_vm3, %v921_v24  ;;  %955 = vst.msk [vmem:[#allocation2 + $0xe8] sm:$0xff] %vm925_vm3, %v922_v25  ;;  %995 = sbr.rel (%p8147_p0) target bundleno = 2256 (0x8d0), region = 89 }
 0x1e6   : > { %v890_v28 = vpop.xlane.xlu0 %889  ;;  %v892_v29 = vpop.xlane.xlu1 %891 }
 0x1e7   : > { %v923_v30 = vadd.f32 %v890_v28, %v827_v26  ;;  %v924_v31 = vadd.f32 %v892_v29, %v828_v27 }
 0x1e9   : > { %956 = vst.msk [vmem:[#allocation2 + $0xf0] sm:$0xff] %vm925_vm3, %v923_v30  ;;  %957 = vst.msk [vmem:[#allocation2 + $0xf8] sm:$0xff] %vm925_vm3, %v924_v31 }
 0x1ea   : > { %v1075_v32 = vld [vmem:[#allocation2 + $0x78] sm:$0xff]  ;;  %v1074_v33 = vld [vmem:[#allocation2 + $0x70] sm:$0xff]  ;;  %v1073_v34 = vld [vmem:[#allocation2 + $0x68] sm:$0xff]  ;;  %v13594_v35 = vmov 0.0  }
 0x1eb   : > { %1092 = vmatprep.subr.mxu0 %v13594_v35  ;;  %3690 = vst.msk [vmem:[#allocation3] sm:$0xff] %vm925_vm3, %v13594_v35  ;;  %3691 = vst.msk [vmem:[#allocation3 + $0x8] sm:$0xff] %vm925_vm3, %v13594_v35  ;;  %v8911_v36 = vand.u32 4294901760, %v1075_v32  ;;  %v8913_v37 = vand.u32 4294901760, %v1074_v33  ;;  %v8915_v38 = vand.u32 4294901760, %v1073_v34  ;;  %v1072_v39 = vld [vmem:[#allocation2 + $0x60] sm:$0xff]  ;;  %1669 = vmatprep.subr.mxu1 %v13594_v35 }
 0x1ec   : > { %3692 = vst.msk [vmem:[#allocation3 + $0x10] sm:$0xff] %vm925_vm3, %v13594_v35  ;;  %3693 = vst.msk [vmem:[#allocation3 + $0x18] sm:$0xff] %vm925_vm3, %v13594_v35  ;;  %v1071_v40 = vld [vmem:[#allocation2 + $0x58] sm:$0xff]  ;;  %v1070_v41 = vld [vmem:[#allocation2 + $0x50] sm:$0xff]  ;;  %v8918_v42 = vand.u32 4294901760, %v1072_v39 }
 0x1ed   : > { %3694 = vst.msk [vmem:[#allocation3 + $0x20] sm:$0xff] %vm925_vm3, %v13594_v35  ;;  %3695 = vst.msk [vmem:[#allocation3 + $0x28] sm:$0xff] %vm925_vm3, %v13594_v35  ;;  %v8920_v43 = vand.u32 4294901760, %v1071_v40  ;;  %v8922_v44 = vand.u32 4294901760, %v1070_v41  ;;  %v1069_v45 = vld [vmem:[#allocation2 + $0x48] sm:$0xff]  ;;  %v1068_v46 = vld [vmem:[#allocation2 + $0x40] sm:$0xff]  ;;  %1094 = vmatpush1.msra.mxu0 %v8911_v36  ;;  %v8926_v47 = vsub.f32 %v1075_v32, %v8911_v36  ;;  %v8929_v48 = vsub.f32 %v1074_v33, %v8913_v37 }
 0x1ee   : > { %3696 = vst.msk [vmem:[#allocation3 + $0x30] sm:$0xff] %vm925_vm3, %v13594_v35  ;;  %3697 = vst.msk [vmem:[#allocation3 + $0x38] sm:$0xff] %vm925_vm3, %v13594_v35  ;;  %v8931_v49 = vand.u32 4294901760, %v1069_v45  ;;  %v8934_v50 = vsub.f32 %v1073_v34, %v8915_v38  ;;  %v1067_v51 = vld [vmem:[#allocation2 + $0x38] sm:$0xff]  ;;  %1095 = vmatprep.subr.mxu0 %v13594_v35  ;;  %v8938_v52 = vsub.f32 %v1072_v39, %v8918_v42  ;;  %v8947_v57 = vand.u32 4294901760, %v1068_v46  ;;  %v1066_v58 = vld [vmem:[#allocation2 + $0x30] sm:$0xff] }
 0x1ef   : > { %3698 = vst.msk [vmem:[#allocation3 + $0x40] sm:$0xff] %vm925_vm3, %v13594_v35  ;;  %3699 = vst.msk [vmem:[#allocation3 + $0x48] sm:$0xff] %vm925_vm3, %v13594_v35  ;;  %v8941_v53 = vsub.f32 %v1071_v40, %v8920_v43  ;;  %1097 = vmatpush1.msra.mxu0 %v8913_v37  ;;  %v13586_v54 = vand.u32 4294901760, %v8926_v47  ;;  %v13584_v55 = vand.u32 4294901760, %v8929_v48  ;;  %v8951_v60 = vand.u32 4294901760, %v1067_v51  ;;  %v1065_v4 = vld [vmem:[#allocation2 + $0x28] sm:$0xff] }
 0x1f0   : > { %3700 = vst.msk [vmem:[#allocation3 + $0x50] sm:$0xff] %vm925_vm3, %v13594_v35  ;;  %3701 = vst.msk [vmem:[#allocation3 + $0x58] sm:$0xff] %vm925_vm3, %v13594_v35  ;;  %v13583_v56 = vand.u32 4294901760, %v8934_v50  ;;  %1098 = vmatprep.subr.mxu0 %v13594_v35  ;;  %v13581_v59 = vand.u32 4294901760, %v8938_v52  ;;  %v8955_v62 = vsub.f32 %v1070_v41, %v8922_v44  ;;  %v8968_v2 = vsub.f32 %v1069_v45, %v8931_v49  ;;  %v1064_v9 = vld [vmem:[#allocation2 + $0x20] sm:$0xff]  ;;  %v1063_v17 = vld [vmem:[#allocation2 + $0x18] sm:$0xff] }
 0x1f1   : > { %3702 = vst.msk [vmem:[#allocation3 + $0x60] sm:$0xff] %vm925_vm3, %v13594_v35  ;;  %3703 = vst.msk [vmem:[#allocation3 + $0x68] sm:$0xff] %vm925_vm3, %v13594_v35  ;;  %v13580_v61 = vand.u32 4294901760, %v8941_v53  ;;  %1100 = vmatpush1.msra.mxu0 %v8915_v38  ;;  %v1673_v63 = vsub.f32 %v8926_v47, %v13586_v54  ;;  %v1680_v0 = vsub.f32 %v8929_v48, %v13584_v55  ;;  %v8971_v3 = vand.u32 4294901760, %v1066_v58  ;;  %v1062_v21 = vld [vmem:[#allocation2 + $0x10] sm:$0xff]  ;;  %v1061_v27 = vld [vmem:[#allocation2 + $0x8] sm:$0xff] }
 0x1f2   : > { %3704 = vst.msk [vmem:[#allocation3 + $0x70] sm:$0xff] %vm925_vm3, %v13594_v35  ;;  %3705 = vst.msk [vmem:[#allocation3 + $0x78] sm:$0xff] %vm925_vm3, %v13594_v35  ;;  %v1687_v1 = vsub.f32 %v8934_v50, %v13583_v56  ;;  %1101 = vmatprep.subr.mxu0 %v13594_v35  ;;  %v1694_v7 = vsub.f32 %v8938_v52, %v13581_v59  ;;  %v13579_v8 = vand.u32 4294901760, %v8955_v62  ;;  %v8986_v13 = vand.u32 4294901760, %v1065_v4  ;;  %v1060_v33 = vld [vmem:[#allocation2] sm:$0xff] }
 0x1f3   : > { %3706 = vst.msk [vmem:[#allocation3 + $0x80] sm:$0xff] %vm925_vm3, %v13594_v35  ;;  %3707 = vst.msk [vmem:[#allocation3 + $0x88] sm:$0xff] %vm925_vm3, %v13594_v35  ;;  %1103 = vmatpush1.msra.mxu0 %v8918_v42  ;;  %v1674_v5 = vand.u32 4294901760, %v1673_v63  ;;  %v1681_v6 = vand.u32 4294901760, %v1680_v0  ;;  %v1701_v10 = vsub.f32 %v8941_v53, %v13580_v61  ;;  %v8983_v11 = vsub.f32 %v1068_v46, %v8947_v57  ;;  %v1091_v46 = vld [vmem:[#allocation2 + $0xf8] sm:$0xff]  ;;  %v1082_v61 = vld [vmem:[#allocation2 + $0xb0] sm:$0xff] }
 0x1f4   : > { %3708 = vst.msk [vmem:[#allocation3 + $0x90] sm:$0xff] %vm925_vm3, %v13594_v35  ;;  %3709 = vst.msk [vmem:[#allocation3 + $0x98] sm:$0xff] %vm925_vm3, %v13594_v35  ;;  %1104 = vmatprep.subr.mxu0 %v13594_v35  ;;  %v1688_v12 = vand.u32 4294901760, %v1687_v1  ;;  %v13577_v14 = vand.u32 4294901760, %v8968_v2  ;;  %v8990_v15 = vsub.f32 %v1067_v51, %v8951_v60  ;;  %v8994_v16 = vand.u32 4294901760, %v1064_v9 }
 0x1f5   : > { %3710 = vst.msk [vmem:[#allocation3 + $0xa0] sm:$0xff] %vm925_vm3, %v13594_v35  ;;  %3711 = vst.msk [vmem:[#allocation3 + $0xa8] sm:$0xff] %vm925_vm3, %v13594_v35  ;;  %1106 = vmatpush1.msra.mxu0 %v8920_v43  ;;  %1675 = vmatpush1.msra.mxu1 %v1674_v5  ;;  %v1695_v18 = vand.u32 4294901760, %v1694_v7  ;;  %v1708_v19 = vsub.f32 %v8955_v62, %v13579_v8  ;;  %v13576_v20 = vand.u32 4294901760, %v8983_v11  ;;  %v1702_v23 = vand.u32 4294901760, %v1701_v10  ;;  %v1083_v8 = vld [vmem:[#allocation2 + $0xb8] sm:$0xff] }
 0x1f6   : > { %3712 = vst.msk [vmem:[#allocation3 + $0xb0] sm:$0xff] %vm925_vm3, %v13594_v35  ;;  %3713 = vst.msk [vmem:[#allocation3 + $0xb8] sm:$0xff] %vm925_vm3, %v13594_v35  ;;  %1107 = vmatprep.subr.mxu0 %v13594_v35  ;;  %1676 = vmatprep.subr.mxu1 %v13594_v35  ;;  %v9002_v22 = vsub.f32 %v1066_v58, %v8971_v3  ;;  %v1715_v24 = vsub.f32 %v8968_v2, %v13577_v14  ;;  %v9010_v25 = vand.u32 4294901760, %v1063_v17 }
 0x1f7   : > { %3714 = vst.msk [vmem:[#allocation3 + $0xc0] sm:$0xff] %vm925_vm3, %v13594_v35  ;;  %3715 = vst.msk [vmem:[#allocation3 + $0xc8] sm:$0xff] %vm925_vm3, %v13594_v35  ;;  %1109 = vmatpush1.msra.mxu0 %v8922_v44  ;;  %1682 = vmatpush1.msra.mxu1 %v1681_v6  ;;  %v13574_v26 = vand.u32 4294901760, %v8990_v15  ;;  %v9014_v28 = vsub.f32 %v1065_v4, %v8986_v13  ;;  %v9018_v29 = vand.u32 4294901760, %v1062_v21  ;;  %v1709_v30 = vand.u32 4294901760, %v1708_v19  ;;  %v1090_v4 = vld [vmem:[#allocation2 + $0xf0] sm:$0xff] }
 0x1f8   : > { %3716 = vst.msk [vmem:[#allocation3 + $0xd0] sm:$0xff] %vm925_vm3, %v13594_v35  ;;  %3717 = vst.msk [vmem:[#allocation3 + $0xd8] sm:$0xff] %vm925_vm3, %v13594_v35  ;;  %1110 = vmatprep.subr.mxu0 %v13594_v35  ;;  %1683 = vmatprep.subr.mxu1 %v13594_v35  ;;  %v1722_v31 = vsub.f32 %v8983_v11, %v13576_v20  ;;  %v13573_v32 = vand.u32 4294901760, %v9002_v22  ;;  %v9026_v34 = vsub.f32 %v1064_v9, %v8994_v16  ;;  %v1084_v20 = vld [vmem:[#allocation2 + $0xc0] sm:$0xff] }
 0x1f9   : > { %3718 = vst.msk [vmem:[#allocation3 + $0xe0] sm:$0xff] %vm925_vm3, %v13594_v35  ;;  %3719 = vst.msk [vmem:[#allocation3 + $0xe8] sm:$0xff] %vm925_vm3, %v13594_v35  ;;  %1112 = vmatpush1.msra.mxu0 %v8931_v49  ;;  %1689 = vmatpush1.msra.mxu1 %v1688_v12  ;;  %v9030_v39 = vand.u32 4294901760, %v1061_v27  ;;  %v1716_v40 = vand.u32 4294901760, %v1715_v24  ;;  %v1729_v41 = vsub.f32 %v8990_v15, %v13574_v26  ;;  %v13571_v45 = vand.u32 4294901760, %v9014_v28  ;;  %v1089_v12 = vld [vmem:[#allocation2 + $0xe8] sm:$0xff] }
 0x1fa   : > { %3720 = vst.msk [vmem:[#allocation3 + $0xf0] sm:$0xff] %vm925_vm3, %v13594_v35  ;;  %3721 = vst.msk [vmem:[#allocation3 + $0xf8] sm:$0xff] %vm925_vm3, %v13594_v35  ;;  %1113 = vmatprep.subr.mxu0 %v13594_v35  ;;  %1690 = vmatprep.subr.mxu1 %v13594_v35  ;;  %v9038_v51 = vsub.f32 %v1063_v17, %v9010_v25  ;;  %v9042_v58 = vand.u32 4294901760, %v1060_v33  ;;  %v1723_v63 = vand.u32 4294901760, %v1722_v31  ;;  %v13570_v1 = vand.u32 4294901760, %v9026_v34  ;;  %v1088_v24 = vld [vmem:[#allocation2 + $0xe0] sm:$0xff] }
 0x1fb   : > { %14238 = vst [vmem:[#allocation9_spill] sm:$0xff] %v8941_v53  ;;  %14239 = vst [vmem:[#allocation10_spill] sm:$0xff] %v8994_v16  ;;  %1115 = vmatpush1.msra.mxu0 %v8947_v57  ;;  %1696 = vmatpush1.msra.mxu1 %v1695_v18  ;;  %v1736_v0 = vsub.f32 %v9002_v22, %v13573_v32  ;;  %v9050_v5 = vsub.f32 %v1062_v21, %v9018_v29  ;;  %v9054_v6 = vand.u32 4294901760, %v1091_v46  ;;  %v1085_v32 = vld [vmem:[#allocation2 + $0xc8] sm:$0xff] }
 0x1fc   : > { %14240 = vst [vmem:[#allocation11_spill] sm:$0xff] %v9002_v22  ;;  %14241 = vst [vmem:[#allocation12_spill] sm:$0xff] %v9010_v25  ;;  %1116 = vmatprep.subr.mxu0 %v13594_v35  ;;  %1697 = vmatprep.subr.mxu1 %v13594_v35  ;;  %v1730_v7 = vand.u32 4294901760, %v1729_v41  ;;  %v1743_v9 = vsub.f32 %v9014_v28, %v13571_v45  ;;  %v13569_v10 = vand.u32 4294901760, %v9038_v51  ;;  %v9066_v18 = vand.u32 4294901760, %v1090_v4 }
 0x1fd   : > { %14242 = vst [vmem:[#allocation13_spill] sm:$0xff] %v9018_v29  ;;  %14243 = vst [vmem:[#allocation14_spill] sm:$0xff] %v9026_v34  ;;  %1118 = vmatpush1.msra.mxu0 %v8951_v60  ;;  %1703 = vmatpush1.msra.mxu1 %v1702_v23  ;;  %v9062_v17 = vsub.f32 %v1061_v27, %v9030_v39  ;;  %v1737_v19 = vand.u32 4294901760, %v1736_v0  ;;  %v1750_v21 = vsub.f32 %v9026_v34, %v13570_v1  ;;  %v1086_v1 = vld [vmem:[#allocation2 + $0xd0] sm:$0xff] }
 0x1fe   : > { %14244 = vst [vmem:[#allocation15_spill] sm:$0xff] %v9030_v39  ;;  %14245 = vst [vmem:[#allocation16_spill] sm:$0xff] %v9038_v51  ;;  %1119 = vmatprep.subr.mxu0 %v13594_v35  ;;  %1704 = vmatprep.subr.mxu1 %v13594_v35  ;;  %v13572_v23 = vand.u32 4294901760, %v9050_v5  ;;  %v9074_v27 = vsub.f32 %v1060_v33, %v9042_v58  ;;  %v1744_v31 = vand.u32 4294901760, %v1743_v9  ;;  %v9090_v0 = vand.u32 4294901760, %v1088_v24 }
 0x1ff   : > { %14246 = vst [vmem:[#allocation17_spill] sm:$0xff] %v9042_v58  ;;  %1121 = vmatpush1.msra.mxu0 %v8971_v3  ;;  %1710 = vmatpush1.msra.mxu1 %v1709_v30  ;;  %14247 = vst [vmem:[#allocation18_spill] sm:$0xff] %v9050_v5  ;;  %v9078_v30 = vand.u32 4294901760, %v1089_v12  ;;  %v13575_v41 = vand.u32 4294901760, %v9062_v17  ;;  %v9086_v33 = vsub.f32 %v1091_v46, %v9054_v6  ;;  %v9114_v26 = vand.u32 4294901760, %v1086_v1 }
 0x200   : > { %1122 = vmatprep.subr.mxu0 %v13594_v35  ;;  %1711 = vmatprep.subr.mxu1 %v13594_v35  ;;  %14248 = vst [vmem:[#allocation19_spill] sm:$0xff] %v9054_v6  ;;  %14249 = vst [vmem:[#allocation20_spill] sm:$0xff] %v9062_v17  ;;  %v1764_v9 = vsub.f32 %v9050_v5, %v13572_v23  ;;  %v9098_v46 = vsub.f32 %v1090_v4, %v9066_v18  ;;  %v9126_v14 = vand.u32 4294901760, %v1085_v32 }
 0x201   : > { %1124 = vmatpush1.msra.mxu0 %v8986_v13  ;;  %1717 = vmatpush1.msra.mxu1 %v1716_v40  ;;  %14250 = vst [vmem:[#allocation21_spill] sm:$0xff] %v9066_v18  ;;  %14251 = vst [vmem:[#allocation22_spill] sm:$0xff] %v9074_v27  ;;  %v1757_v40 = vsub.f32 %v9038_v51, %v13569_v10  ;;  %v13578_v10 = vand.u32 4294901760, %v9074_v27  ;;  %v13582_v23 = vand.u32 4294901760, %v9086_v33  ;;  %v9138_v59 = vand.u32 4294901760, %v1084_v20 }
 0x202   : > { %1125 = vmatprep.subr.mxu0 %v13594_v35  ;;  %1718 = vmatprep.subr.mxu1 %v13594_v35  ;;  %14252 = vst [vmem:[#allocation23_spill] sm:$0xff] %v9078_v30  ;;  %14253 = vst [vmem:[#allocation24_spill] sm:$0xff] %v9086_v33  ;;  %v9110_v4 = vsub.f32 %v1089_v12, %v9078_v30  ;;  %v9122_v12 = vsub.f32 %v1088_v24, %v9090_v0  ;;  %v9150_v56 = vand.u32 4294901760, %v1083_v8 }
 0x203   : > { %1127 = vmatpush1.msra.mxu0 %v8994_v16  ;;  %1724 = vmatpush1.msra.mxu1 %v1723_v63  ;;  %v1087_v63 = vld [vmem:[#allocation2 + $0xd8] sm:$0xff]  ;;  %14254 = vst [vmem:[#allocation25_spill] sm:$0xff] %v9090_v0  ;;  %14255 = vst [vmem:[#allocation26_spill] sm:$0xff] %v9098_v46  ;;  %v9152_v55 = vand.u32 4294901760, %v1082_v61  ;;  %v9160_v54 = vsub.f32 %v1085_v32, %v9126_v14  ;;  %v997_v32 = vld [vmem:[%s13561_s2 + $0x8] sm:$0xff] }
 0x204   : > { %1128 = vmatprep.subr.mxu0 %v13594_v35  ;;  %1725 = vmatprep.subr.mxu1 %v13594_v35  ;;  %v9102_v45 = vand.u32 4294901760, %v1087_v63  ;;  %14257 = vst [vmem:[#allocation28_spill] sm:$0xff] %v9110_v4  ;;  %14258 = vst [vmem:[#allocation29_spill] sm:$0xff] %v9114_v26 }
 0x205   : > { %1130 = vmatpush1.msra.mxu0 %v9010_v25  ;;  %1731 = vmatpush1.msra.mxu1 %v1730_v7  ;;  %v1751_v7 = vand.u32 4294901760, %v1750_v21  ;;  %v1771_v21 = vsub.f32 %v9062_v17, %v13575_v41  ;;  %v13585_v41 = vand.u32 4294901760, %v9098_v46  ;;  %14259 = vst [vmem:[#allocation30_spill] sm:$0xff] %v9122_v12  ;;  %14260 = vst [vmem:[#allocation31_spill] sm:$0xff] %v9126_v14 }
 0x206   : > { %1131 = vmatprep.subr.mxu0 %v13594_v35  ;;  %1732 = vmatprep.subr.mxu1 %v13594_v35  ;;  %14256 = vst [vmem:[#allocation27_spill] sm:$0xff] %v9102_v45  ;;  %v9134_v24 = vsub.f32 %v1087_v63, %v9102_v45  ;;  %14262 = vst [vmem:[#allocation33_spill] sm:$0xff] %v9138_v59  ;;  %v9146_v63 = vsub.f32 %v1086_v1, %v9114_v26  ;;  %v1081_v1 = vld [vmem:[#allocation2 + $0xa8] sm:$0xff] }
 0x207   : > { %1133 = vmatpush1.msra.mxu0 %v9018_v29  ;;  %1738 = vmatpush1.msra.mxu1 %v1737_v19  ;;  %v1758_v19 = vand.u32 4294901760, %v1757_v40  ;;  %v1778_v40 = vsub.f32 %v9074_v27, %v13578_v10  ;;  %v13587_v10 = vand.u32 4294901760, %v9110_v4  ;;  %14264 = vst [vmem:[#allocation35_spill] sm:$0xff] %v9150_v56  ;;  %14265 = vst [vmem:[#allocation36_spill] sm:$0xff] %v9152_v55 }
 0x208   : > { %1134 = vmatprep.subr.mxu0 %v13594_v35  ;;  %1739 = vmatprep.subr.mxu1 %v13594_v35  ;;  %14261 = vst [vmem:[#allocation32_spill] sm:$0xff] %v9134_v24  ;;  %14263 = vst [vmem:[#allocation34_spill] sm:$0xff] %v9146_v63 }
 0x209   : > { %1136 = vmatpush1.msra.mxu0 %v9030_v39  ;;  %1745 = vmatpush1.msra.mxu1 %v1744_v31  ;;  %v1765_v31 = vand.u32 4294901760, %v1764_v9  ;;  %v1785_v9 = vsub.f32 %v9086_v33, %v13582_v23  ;;  %14266 = vst [vmem:[#allocation37_spill] sm:$0xff] %v9160_v54  ;;  %v1078_v33 = vld [vmem:[#allocation2 + $0x90] sm:$0xff] }
 0x20a   : > { %1137 = vmatprep.subr.mxu0 %v13594_v35  ;;  %1746 = vmatprep.subr.mxu1 %v13594_v35  ;;  %v9242_v27 = vand.u32 4294901760, %v1078_v33 }
 0x20b   : > { %1139 = vmatpush1.msra.mxu0 %v9042_v58  ;;  %1752 = vmatpush1.msra.mxu1 %v1751_v7  ;;  %v1772_v7 = vand.u32 4294901760, %v1771_v21  ;;  %v1792_v21 = vsub.f32 %v9098_v46, %v13585_v41  ;;  %v9170_v41 = vsub.f32 %v1084_v20, %v9138_v59  ;;  %v1076_v58 = vld [vmem:[#allocation2 + $0x80] sm:$0xff] }
 0x20c   : > { %1140 = vmatprep.subr.mxu0 %v13594_v35  ;;  %1753 = vmatprep.subr.mxu1 %v13594_v35  ;;  %14285 = vst [vmem:[#allocation50_spill] sm:$0xff] %v9242_v27 }
 0x20d   : > { %1142 = vmatpush2.msra.mxu0 %v9054_v6  ;;  %1759 = vmatpush1.msra.mxu1 %v1758_v19  ;;  %v1779_v19 = vand.u32 4294901760, %v1778_v40  ;;  %v1799_v40 = vsub.f32 %v9110_v4, %v13587_v10  ;;  %v1793_v23 = vand.u32 4294901760, %v1792_v21  ;;  %v1080_v4 = vld [vmem:[#allocation2 + $0xa0] sm:$0xff]  ;;  %14268 = vst [vmem:[#allocation38_spill] sm:$0xff] %v9170_v41  ;;  %v9180_v21 = vsub.f32 %v1083_v8, %v9150_v56  ;;  %v999_v8 = vld [vmem:[%s13561_s2 + $0x18] sm:$0xff] }
 0x20e   : > { %1143 = vmatprep.subr.mxu0 %v13594_v35  ;;  %1760 = vmatprep.subr.mxu1 %v13594_v35  ;;  %v14271_v10 = vand.u32 4294901760, %v9134_v24  ;;  %v9212_v6 = vand.u32 4294901760, %v999_v8 }
 0x20f   : > { %1145 = vmatpush2.msra.mxu0 %v9066_v18  ;;  %1766 = vmatpush1.msra.mxu1 %v1765_v31  ;;  %v1786_v31 = vand.u32 4294901760, %v1785_v9  ;;  %14270 = vst [vmem:[#allocation40_spill] sm:$0xff] %v9180_v21  ;;  %v1800_v20 = vand.u32 4294901760, %v1799_v40  ;;  %v14276_v40 = vand.u32 4294901760, %v9146_v63  ;;  %v998_v18 = vld [vmem:[%s13561_s2 + $0x10] sm:$0xff] }
 0x210   : > { %1146 = vmatprep.subr.mxu0 %v13594_v35  ;;  %1767 = vmatprep.subr.mxu1 %v13594_v35  ;;  %14278 = vst [vmem:[#allocation45_spill] sm:$0xff] %v9212_v6 }
 0x211   : > { %1148 = vmatpush2.msra.mxu0 %v9078_v30  ;;  %1773 = vmatpush1.msra.mxu1 %v1772_v7  ;;  %v14267_v7 = vand.u32 4294901760, %v9122_v12  ;;  %v14273_v30 = vmov 0.0  }
 0x212   : > { %1149 = vmatprep.subr.mxu0 %v13594_v35  ;;  %1774 = vmatprep.subr.mxu1 %v13594_v35 }
 0x213   : > { %1151 = vmatpush2.msra.mxu0 %v9090_v0  ;;  %1780 = vmatpush1.msra.mxu1 %v1779_v19  ;;  %v1806_v9 = vsub.f32 %v9122_v12, %v14267_v7  ;;  %v9177_v19 = vand.u32 4294901760, %v1081_v1  ;;  %v996_v7 = vld [vmem:[%s13561_s2] sm:$0xff]  ;;  %v1813_v12 = vsub.f32 %v9134_v24, %v14271_v10  ;;  %v1079_v24 = vld [vmem:[#allocation2 + $0x98] sm:$0xff] }
 0x214   : > { %1152 = vmatprep.subr.mxu0 %v13594_v35  ;;  %1781 = vmatprep.subr.mxu1 %v13594_v35  ;;  %v9191_v35 = vsub.f32 %v1082_v61, %v9152_v55  ;;  %v1820_v61 = vsub.f32 %v9146_v63, %v14276_v40  ;;  %v9207_v46 = vand.u32 4294901760, %v996_v7  ;;  %v1077_v63 = vld [vmem:[#allocation2 + $0x88] sm:$0xff] }
 0x215   : > { %14269 = vst [vmem:[#allocation39_spill] sm:$0xff] %v9177_v19  ;;  %1154 = vmatpush2.msra.mxu0 %v9102_v45  ;;  %1787 = vmatpush2.msra.mxu1 %v1786_v31  ;;  %v9198_v45 = vand.u32 4294901760, %v1080_v4  ;;  %v9200_v31 = vand.u32 4294901760, %v997_v32  ;;  %v1807_v10 = vand.u32 4294901760, %v1806_v9  ;;  %v14279_v9 = vand.u32 4294901760, %v9160_v54 }
 0x216   : > { %14272 = vst [vmem:[#allocation41_spill] sm:$0xff] %v9191_v35  ;;  %1155 = vmatprep.subr.mxu0 %v14273_v30  ;;  %1788 = vmatprep.subr.mxu1 %v14273_v30  ;;  %14277 = vst [vmem:[#allocation44_spill] sm:$0xff] %v9207_v46  ;;  %v1821_v0 = vand.u32 4294901760, %v1820_v61  ;;  %v9255_v61 = vsub.f32 %v999_v8, %v9212_v6  ;;  %v14291_v17 = vand.u32 4294901760, %v9191_v35  ;;  %v9271_v8 = vand.u32 4294901760, %v1076_v58 }
 0x217   : > { %14274 = vst [vmem:[#allocation42_spill] sm:$0xff] %v9198_v45  ;;  %14275 = vst [vmem:[#allocation43_spill] sm:$0xff] %v9200_v31  ;;  %1157 = vmatpush2.msra.mxu0 %v9114_v26  ;;  %1794 = vmatpush2.msra.mxu1 %v1793_v23  ;;  %v1814_v23 = vand.u32 4294901760, %v1813_v12  ;;  %v1827_v40 = vsub.f32 %v9160_v54, %v14279_v9  ;;  %v9220_v26 = vsub.f32 %v1081_v1, %v9177_v19  ;;  %v1001_v1 = vld [vmem:[%s13561_s2 + $0x28] sm:$0xff] }
 0x218   : > { %1158 = vmatprep.subr.mxu0 %v14273_v30  ;;  %1795 = vmatprep.subr.mxu1 %v14273_v30  ;;  %v9230_v12 = vsub.f32 %v997_v32, %v9200_v31  ;;  %v9233_v9 = vsub.f32 %v1080_v4, %v9198_v45  ;;  %v14284_v54 = vand.u32 4294901760, %v9170_v41  ;;  %v9245_v32 = vsub.f32 %v996_v7, %v9207_v46  ;;  %v1000_v7 = vld [vmem:[%s13561_s2 + $0x20] sm:$0xff] }
 0x219   : > { %1160 = vmatpush2.msra.mxu0 %v9126_v14  ;;  %1801 = vmatpush2.msra.mxu1 %v1800_v20  ;;  %14280 = vst [vmem:[#allocation46_spill] sm:$0xff] %v9220_v26  ;;  %v9227_v20 = vand.u32 4294901760, %v1079_v24  ;;  %v14287_v4 = vand.u32 4294901760, %v9180_v21  ;;  %14289 = vst [vmem:[#allocation53_spill] sm:$0xff] %v9255_v61  ;;  %v1848_v39 = vsub.f32 %v9191_v35, %v14291_v17  ;;  %v1003_v17 = vld [vmem:[%s13561_s2 + $0x38] sm:$0xff]  ;;  %v9286_v29 = vand.u32 4294901760, %v1000_v7 }
 0x21a   : > { %1161 = vmatprep.subr.mxu0 %v14273_v30  ;;  %1802 = vmatprep.subr.mxu1 %v14273_v30  ;;  %14282 = vst [vmem:[#allocation48_spill] sm:$0xff] %v9230_v12  ;;  %14283 = vst [vmem:[#allocation49_spill] sm:$0xff] %v9233_v9  ;;  %v1834_v14 = vsub.f32 %v9170_v41, %v14284_v54  ;;  %v9257_v54 = vand.u32 4294901760, %v998_v18  ;;  %v1828_v41 = vand.u32 4294901760, %v1827_v40 }
 0x21b   : > { %14281 = vst [vmem:[#allocation47_spill] sm:$0xff] %v9227_v20  ;;  %1163 = vmatpush2.msra.mxu0 %v9138_v59  ;;  %1808 = vmatpush2.msra.mxu1 %v1807_v10  ;;  %14286 = vst [vmem:[#allocation51_spill] sm:$0xff] %v9245_v32  ;;  %v1841_v59 = vsub.f32 %v9180_v21, %v14287_v4  ;;  %v9252_v10 = vand.u32 4294901760, %v1077_v63  ;;  %v9267_v21 = vand.u32 4294901760, %v1001_v1 }
 0x21c   : > { %1164 = vmatprep.subr.mxu0 %v14273_v30  ;;  %1809 = vmatprep.subr.mxu1 %v14273_v30  ;;  %14290 = vst [vmem:[#allocation54_spill] sm:$0xff] %v9257_v54  ;;  %v1835_v40 = vand.u32 4294901760, %v1834_v14  ;;  %v9284_v35 = vsub.f32 %v1078_v33, %v9242_v27  ;;  %14295 = vst [vmem:[#allocation58_spill] sm:$0xff] %v9286_v29  ;;  %v9292_v5 = vsub.f32 %v998_v18, %v9257_v54 }
 0x21d   : > { %14288 = vst [vmem:[#allocation52_spill] sm:$0xff] %v9252_v10  ;;  %1166 = vmatpush2.msra.mxu0 %v9150_v56  ;;  %1815 = vmatpush2.msra.mxu1 %v1814_v23  ;;  %14292 = vst [vmem:[#allocation55_spill] sm:$0xff] %v9267_v21  ;;  %v9276_v23 = vsub.f32 %v1079_v24, %v9227_v20  ;;  %v1842_v24 = vand.u32 4294901760, %v1841_v59  ;;  %v1849_v14 = vand.u32 4294901760, %v1848_v39  ;;  %v1002_v59 = vld [vmem:[%s13561_s2 + $0x30] sm:$0xff]  ;;  %v14300_v18 = vand.u32 4294901760, %v9230_v12 }
 0x21e   : > { %1167 = vmatprep.subr.mxu0 %v14273_v30  ;;  %1816 = vmatprep.subr.mxu1 %v14273_v30  ;;  %14294 = vst [vmem:[#allocation57_spill] sm:$0xff] %v9284_v35  ;;  %14296 = vst [vmem:[#allocation59_spill] sm:$0xff] %v9292_v5  ;;  %v9299_v4 = vsub.f32 %v1001_v1, %v9267_v21  ;;  %v9316_v56 = vsub.f32 %v1077_v63, %v9252_v10  ;;  %v14304_v63 = vand.u32 4294901760, %v9255_v61 }
 0x21f   : > { %14293 = vst [vmem:[#allocation56_spill] sm:$0xff] %v9276_v23  ;;  %1169 = vmatpush2.msra.mxu0 %v9152_v55  ;;  %1822 = vmatpush2.msra.mxu1 %v1821_v0  ;;  %v14297_v0 = vand.u32 4294901760, %v9220_v26  ;;  %v9301_v55 = vand.u32 4294901760, %v1003_v17  ;;  %v1191_v39 = vsub.f32 %v9230_v12, %v14300_v18  ;;  %v9330_v1 = vsub.f32 %v1000_v7, %v9286_v29 }
 0x220   : > { %1170 = vmatprep.subr.mxu0 %v14273_v30  ;;  %1823 = vmatprep.subr.mxu1 %v14273_v30  ;;  %14298 = vst [vmem:[#allocation60_spill] sm:$0xff] %v9299_v4 }
 0x221   : > { %1172 = vmatpush2.msra.mxu0 %v9177_v19  ;;  %1829 = vmatpush2.msra.mxu1 %v1828_v41  ;;  %v1855_v33 = vsub.f32 %v9220_v26, %v14297_v0  ;;  %14299 = vst [vmem:[#allocation61_spill] sm:$0xff] %v9301_v55  ;;  %v14301_v41 = vand.u32 4294901760, %v9233_v9  ;;  %v1005_v26 = vld [vmem:[%s13561_s2 + $0x48] sm:$0xff]  ;;  %v14302_v19 = vand.u32 4294901760, %v9245_v32  ;;  %14303 = vst [vmem:[#allocation62_spill] sm:$0xff] %v9330_v1 }
 0x222   : > { %1173 = vmatprep.subr.mxu0 %v14273_v30  ;;  %1830 = vmatprep.subr.mxu1 %v14273_v30  ;;  %v9343_v7 = vsub.f32 %v1003_v17, %v9301_v55  ;;  %v9345_v12 = vand.u32 4294901760, %v1005_v26  ;;  %v1007_v17 = vld [vmem:[%s13561_s2 + $0x58] sm:$0xff] }
 0x223   : > { %v1862_v0 = vsub.f32 %v9233_v9, %v14301_v41  ;;  %1175 = vmatpush2.msra.mxu0 %v9198_v45  ;;  %1836 = vmatpush2.msra.mxu1 %v1835_v40  ;;  %v1197_v18 = vsub.f32 %v9245_v32, %v14302_v19  ;;  %v9327_v41 = vsub.f32 %v1076_v58, %v9271_v8  ;;  %v9338_v45 = vand.u32 4294901760, %v1002_v59  ;;  %v1004_v32 = vld [vmem:[%s13561_s2 + $0x40] sm:$0xff] }
 0x224   : > { %1176 = vmatprep.subr.mxu0 %v14273_v30  ;;  %1837 = vmatprep.subr.mxu1 %v14273_v30  ;;  %v1206_v40 = vsub.f32 %v9255_v61, %v14304_v63  ;;  %v1856_v58 = vand.u32 4294901760, %v1855_v33  ;;  %14306 = vst [vmem:[#allocation64_spill] sm:$0xff] %v9345_v12  ;;  %v1192_v63 = vand.u32 4294901760, %v1191_v39  ;;  %v14309_v19 = vand.u32 4294901760, %v9292_v5 }
 0x225   : > { %14305 = vst [vmem:[#allocation63_spill] sm:$0xff] %v9338_v45  ;;  %1178 = vmatpush2.msra.mxu0 %v9227_v20  ;;  %1843 = vmatpush2.msra.mxu1 %v1842_v24  ;;  %v1863_v9 = vand.u32 4294901760, %v1862_v0  ;;  %v14307_v24 = vand.u32 4294901760, %v9276_v23  ;;  %v1198_v61 = vand.u32 4294901760, %v1197_v18  ;;  %v14308_v20 = vand.u32 4294901760, %v9284_v35 }
 0x226   : > { %1179 = vmatprep.subr.mxu0 %v14273_v30  ;;  %1844 = vmatprep.subr.mxu1 %v14273_v30  ;;  %v9373_v18 = vand.u32 4294901760, %v1004_v32  ;;  %v14312_v0 = vand.u32 4294901760, %v9299_v4  ;;  %v14316_v39 = vand.u32 4294901760, %v9327_v41 }
 0x227   : > { %v1869_v33 = vsub.f32 %v9276_v23, %v14307_v24  ;;  %1181 = vmatpush2.msra.mxu0 %v9242_v27  ;;  %1850 = vmatpush2.msra.mxu1 %v1849_v14  ;;  %v1876_v51 = vsub.f32 %v9284_v35, %v14308_v20  ;;  %v1207_v24 = vand.u32 4294901760, %v1206_v40  ;;  %v1212_v23 = vsub.f32 %v9292_v5, %v14309_v19  ;;  %v1006_v20 = vld [vmem:[%s13561_s2 + $0x50] sm:$0xff]  ;;  %v1009_v5 = vld [vmem:[%s13561_s2 + $0x68] sm:$0xff] }
 0x228   : > { %1182 = vmatprep.subr.mxu0 %v14273_v30  ;;  %1851 = vmatprep.subr.mxu1 %v14273_v30  ;;  %v9371_v14 = vsub.f32 %v1002_v59, %v9338_v45  ;;  %14311 = vst [vmem:[#allocation66_spill] sm:$0xff] %v9373_v18  ;;  %v1221_v40 = vsub.f32 %v9299_v4, %v14312_v0  ;;  %v9386_v59 = vand.u32 4294901760, %v1007_v17  ;;  %v14317_v27 = vand.u32 4294901760, %v9330_v1 }
 0x229   : > { %1184 = vmatpush2.msra.mxu0 %v9252_v10  ;;  %1857 = vmatpush2.msra.mxu1 %v1856_v58  ;;  %v9384_v19 = vsub.f32 %v1005_v26, %v9345_v12  ;;  %v1870_v58 = vand.u32 4294901760, %v1869_v33  ;;  %v14315_v10 = vand.u32 4294901760, %v9316_v56  ;;  %v1877_v26 = vand.u32 4294901760, %v1876_v51 }
 0x22a   : > { %14310 = vst [vmem:[#allocation65_spill] sm:$0xff] %v9371_v14  ;;  %14314 = vst [vmem:[#allocation68_spill] sm:$0xff] %v9386_v59  ;;  %1185 = vmatprep.subr.mxu0 %v14273_v30  ;;  %1858 = vmatprep.subr.mxu1 %v14273_v30  ;;  %v1890_v4 = vsub.f32 %v9327_v41, %v14316_v39  ;;  %v1227_v35 = vsub.f32 %v9330_v1, %v14317_v27  ;;  %v9403_v25 = vand.u32 4294901760, %v1006_v20 }
 0x22b   : > { %14313 = vst [vmem:[#allocation67_spill] sm:$0xff] %v9384_v19  ;;  %v1883_v0 = vsub.f32 %v9316_v56, %v14315_v10  ;;  %1187 = vmatpush2.msra.mxu0 %v9271_v8  ;;  %1193 = vmatprep.mubr.f32.mxu0 %v1192_v63  ;;  %v1213_v33 = vand.u32 4294901760, %v1212_v23  ;;  %v13678_v34 = vand.u32 4294901760, %v9371_v14  ;;  %v9407_v10 = vsub.f32 %v1004_v32, %v9373_v18  ;;  %v1008_v32 = vld [vmem:[%s13561_s2 + $0x60] sm:$0xff]  ;;  %v1011_v23 = vld [vmem:[%s13561_s2 + $0x78] sm:$0xff] }
 0x22c   : > { %14318 = vst [vmem:[#allocation69_spill] sm:$0xff] %v9403_v25  ;;  %1864 = vmatpush2.msra.mxu1 %v1863_v9  ;;  %1199 = vmatmul.mubr.f32.vlgmr.msra.gmra.mxu0 %v1198_v61  ;;  %v9409_v63 = vand.u32 4294901760, %v1009_v5  ;;  %v1222_v51 = vand.u32 4294901760, %v1221_v40  ;;  %v14320_v39 = vand.u32 4294901760, %v9343_v7  ;;  %v9417_v9 = vsub.f32 %v1007_v17, %v9386_v59 }
 0x22d   : > { %1865 = vmatprep.subr.mxu1 %v14273_v30  ;;  %1208 = vmatprep.mubr.f32.mxu0 %v1207_v24  ;;  %v1884_v61 = vand.u32 4294901760, %v1883_v0  ;;  %v1891_v24 = vand.u32 4294901760, %v1890_v4  ;;  %v1228_v40 = vand.u32 4294901760, %v1227_v35  ;;  %v1242_v17 = vsub.f32 %v9371_v14, %v13678_v34  ;;  %v1010_v35 = vld [vmem:[%s13561_s2 + $0x70] sm:$0xff] }
 0x22e   : > { %14319 = vst [vmem:[#allocation70_spill] sm:$0xff] %v9409_v63  ;;  %v1236_v27 = vsub.f32 %v9343_v7, %v14320_v39  ;;  %1871 = vmatpush2.msra.mxu1 %v1870_v58  ;;  %1894 = vmatprep.mubr.f32.mxu1 %v9200_v31  ;;  %v9428_v39 = vsub.f32 %v1006_v20, %v9403_v25  ;;  %v13685_v58 = vand.u32 4294901760, %v9407_v10  ;;  %v9438_v1 = vand.u32 4294901760, %v1008_v32 }
 0x22f   : > { %1872 = vmatprep.subr.mxu1 %v14273_v30  ;;  %2118 = vmatprep.subr.mxu0 %v14273_v30  ;;  %v9436_v0 = vsub.f32 %v1009_v5, %v9409_v63  ;;  %v14324_v20 = vand.u32 4294901760, %v9384_v19  ;;  %v9448_v34 = vand.u32 4294901760, %v1011_v23  ;;  %v1013_v5 = vld [vmem:[%s13561_s2 + $0x88] sm:$0xff] }
 0x230   : > { %14321 = vst [vmem:[#allocation71_spill] sm:$0xff] %v9428_v39  ;;  %1878 = vmatpush2.msra.mxu1 %v1877_v26  ;;  %1214 = vmatmul.mubr.f32.gmra.mxu0 %v1213_v33  ;;  %14323 = vst [vmem:[#allocation73_spill] sm:$0xff] %v9438_v1  ;;  %v1237_v4 = vand.u32 4294901760, %v1236_v27  ;;  %v9456_v27 = vand.u32 4294901760, %v1010_v35  ;;  %v9464_v31 = vsub.f32 %v1008_v32, %v9438_v1  ;;  %v1015_v32 = vld [vmem:[%s13561_s2 + $0x98] sm:$0xff] }
 0x231   : > { %14322 = vst [vmem:[#allocation72_spill] sm:$0xff] %v9436_v0  ;;  %1879 = vmatprep.subr.mxu1 %v14273_v30  ;;  %1223 = vmatprep.mubr.f32.mxu0 %v1222_v51  ;;  %v1251_v26 = vsub.f32 %v9384_v19, %v14324_v20  ;;  %14325 = vst [vmem:[#allocation74_spill] sm:$0xff] %v9448_v34  ;;  %v1243_v20 = vand.u32 4294901760, %v1242_v17  ;;  %v13692_v33 = vand.u32 4294901760, %v9436_v0  ;;  %v14328_v19 = vand.u32 4294901760, %v9417_v9  ;;  %v1012_v17 = vld [vmem:[%s13561_s2 + $0x80] sm:$0xff] }
 0x232   : > { %1885 = vmatpush2.msra.mxu1 %v1884_v61  ;;  %2121 = vmatpush1.msra.mxu0 %v8926_v47  ;;  %14326 = vst [vmem:[#allocation75_spill] sm:$0xff] %v9456_v27  ;;  %v1257_v61 = vsub.f32 %v9407_v10, %v13685_v58  ;;  %14327 = vst [vmem:[#allocation76_spill] sm:$0xff] %v9464_v31 }
 0x233   : > { %1886 = vmatprep.subr.mxu1 %v14273_v30  ;;  %2122 = vmatprep.subr.mxu0 %v14273_v30  ;;  %v1252_v51 = vand.u32 4294901760, %v1251_v26  ;;  %v1266_v14 = vsub.f32 %v9417_v9, %v14328_v19  ;;  %v1281_v58 = vsub.f32 %v9436_v0, %v13692_v33  ;;  %v1017_v33 = vld [vmem:[%s13561_s2 + $0xa8] sm:$0xff] }
 0x234   : > { %1892 = vmatpush2.msra.mxu1 %v1891_v24  ;;  %1229 = vmatmul.mubr.f32.gmra.mxu0 %v1228_v40  ;;  %v9471_v24 = vsub.f32 %v1011_v23, %v9448_v34  ;;  %v9473_v40 = vand.u32 4294901760, %v1013_v5  ;;  %v9487_v23 = vsub.f32 %v1010_v35, %v9456_v27  ;;  %v1258_v26 = vand.u32 4294901760, %v1257_v61  ;;  %v1014_v61 = vld [vmem:[%s13561_s2 + $0x90] sm:$0xff] }
 0x235   : > { %1896 = vmatmul.mubr.f32.vlgmr.msra.gmra.mxu1 %v9207_v46  ;;  %1238 = vmatprep.mubr.f32.mxu0 %v1237_v4  ;;  %v14331_v4 = vand.u32 4294901760, %v9428_v39  ;;  %v9495_v46 = vand.u32 4294901760, %v1012_v17  ;;  %v1267_v35 = vand.u32 4294901760, %v1266_v14 }
 0x236   : > { %14329 = vst [vmem:[#allocation77_spill] sm:$0xff] %v9471_v24  ;;  %14330 = vst [vmem:[#allocation78_spill] sm:$0xff] %v9473_v40  ;;  %1901 = vmatprep.mubr.f32.mxu1 %v9212_v6  ;;  %2535 = vmatprep.subr.mxu1 %v14273_v30  ;;  %v13697_v6 = vand.u32 4294901760, %v9464_v31 }
 0x237   : > { %v1272_v19 = vsub.f32 %v9428_v39, %v14331_v4  ;;  %14332 = vst [vmem:[#allocation79_spill] sm:$0xff] %v9487_v23  ;;  %2537 = vmatpush1.msra.mxu1 %v8911_v36  ;;  %2125 = vmatpush1.msra.mxu0 %v8929_v48  ;;  %14333 = vst [vmem:[#allocation80_spill] sm:$0xff] %v9495_v46  ;;  %v9501_v39 = vsub.f32 %v1013_v5, %v9473_v40  ;;  %v1282_v5 = vand.u32 4294901760, %v1281_v58 }
 0x238   : > { %1244 = vmatmul.mubr.f32.gmra.mxu0 %v1243_v20  ;;  %2538 = vmatprep.subr.mxu1 %v14273_v30  ;;  %v9503_v20 = vand.u32 4294901760, %v1015_v32  ;;  %v1287_v4 = vsub.f32 %v9464_v31, %v13697_v6  ;;  %v14338_v58 = vand.u32 4294901760, %v9471_v24  ;;  %v1019_v31 = vld [vmem:[%s13561_s2 + $0xb8] sm:$0xff] }
 0x239   : > { %1903 = vmatmul.mubr.f32.gmra.mxu1 %v9257_v54  ;;  %1253 = vmatprep.mubr.f32.mxu0 %v1252_v51  ;;  %14334 = vst [vmem:[#allocation81_spill] sm:$0xff] %v9501_v39  ;;  %v1273_v14 = vand.u32 4294901760, %v1272_v19  ;;  %v9522_v54 = vand.u32 4294901760, %v1014_v61  ;;  %v1016_v19 = vld [vmem:[%s13561_s2 + $0xa0] sm:$0xff]  ;;  %v9536_v51 = vand.u32 4294901760, %v1017_v33 }
 0x23a   : > { %14335 = vst [vmem:[#allocation82_spill] sm:$0xff] %v9503_v20  ;;  %1908 = vmatprep.mubr.f32.mxu1 %v9267_v21  ;;  %2540 = vmatpush1.msra.mxu1 %v8913_v37  ;;  %v9520_v21 = vsub.f32 %v1012_v17, %v9495_v46  ;;  %v9534_v17 = vsub.f32 %v1015_v32, %v9503_v20  ;;  %v1288_v32 = vand.u32 4294901760, %v1287_v4 }
 0x23b   : > { %2126 = vmatprep.subr.mxu0 %v14273_v30  ;;  %2541 = vmatprep.subr.mxu1 %v14273_v30  ;;  %14337 = vst [vmem:[#allocation84_spill] sm:$0xff] %v9522_v54  ;;  %14340 = vst [vmem:[#allocation86_spill] sm:$0xff] %v9536_v51  ;;  %v9563_v4 = vsub.f32 %v1017_v33, %v9536_v51 }
 0x23c   : > { %1259 = vmatmul.mubr.f32.gmra.mxu0 %v1258_v26  ;;  %14336 = vst [vmem:[#allocation83_spill] sm:$0xff] %v9520_v21  ;;  %2543 = vmatpush1.msra.mxu1 %v8915_v38  ;;  %v1296_v26 = vsub.f32 %v9471_v24, %v14338_v58  ;;  %14339 = vst [vmem:[#allocation85_spill] sm:$0xff] %v9534_v17  ;;  %v9546_v58 = vand.u32 4294901760, %v1016_v19  ;;  %v13714_v6 = vand.u32 4294901760, %v9520_v21 }
 0x23d   : > { %1910 = vmatmul.mubr.f32.gmra.mxu1 %v9286_v29  ;;  %1268 = vmatprep.mubr.f32.mxu0 %v1267_v35  ;;  %v14341_v35 = vand.u32 4294901760, %v9487_v23  ;;  %v9552_v24 = vsub.f32 %v1014_v61, %v9522_v54  ;;  %14345 = vst [vmem:[#allocation89_spill] sm:$0xff] %v9563_v4  ;;  %v1018_v61 = vld [vmem:[%s13561_s2 + $0xb0] sm:$0xff] }
 0x23e   : > { %1915 = vmatprep.mubr.f32.mxu1 %v9301_v55  ;;  %2129 = vmatpush1.msra.mxu0 %v8934_v50  ;;  %14342 = vst [vmem:[#allocation87_spill] sm:$0xff] %v9546_v58  ;;  %v9554_v55 = vand.u32 4294901760, %v1019_v31  ;;  %v1317_v33 = vsub.f32 %v9520_v21, %v13714_v6  ;;  %v1023_v21 = vld [vmem:[%s13561_s2 + $0xd8] sm:$0xff] }
 0x23f   : > { %v1302_v29 = vsub.f32 %v9487_v23, %v14341_v35  ;;  %2130 = vmatprep.subr.mxu0 %v14273_v30  ;;  %2544 = vmatprep.subr.mxu1 %v14273_v30  ;;  %v1297_v35 = vand.u32 4294901760, %v1296_v26  ;;  %v14344_v23 = vand.u32 4294901760, %v9501_v39 }
 0x240   : > { %1274 = vmatmul.mubr.f32.gmra.mxu0 %v1273_v14  ;;  %14343 = vst [vmem:[#allocation88_spill] sm:$0xff] %v9554_v55  ;;  %2546 = vmatpush1.msra.mxu1 %v8918_v42 }
 0x241   : > { %1917 = vmatmul.mubr.f32.gmra.mxu1 %v9338_v45  ;;  %1283 = vmatprep.mubr.f32.mxu0 %v1282_v5  ;;  %v1311_v0 = vsub.f32 %v9501_v39, %v14344_v23  ;;  %v1021_v5 = vld [vmem:[%s13561_s2 + $0xc8] sm:$0xff]  ;;  %v1303_v26 = vand.u32 4294901760, %v1302_v29  ;;  %v9574_v23 = vsub.f32 %v1016_v19, %v9546_v58  ;;  %v9585_v45 = vand.u32 4294901760, %v1018_v61  ;;  %v1020_v29 = vld [vmem:[%s13561_s2 + $0xc0] sm:$0xff] }
 0x242   : > { %1922 = vmatprep.mubr.f32.mxu1 %v9345_v12  ;;  %2133 = vmatpush1.msra.mxu0 %v8938_v52  ;;  %v9583_v12 = vsub.f32 %v1019_v31, %v9554_v55  ;;  %v9596_v31 = vand.u32 4294901760, %v1021_v5  ;;  %v14354_v39 = vand.u32 4294901760, %v9563_v4 }
 0x243   : > { %14346 = vst [vmem:[#allocation90_spill] sm:$0xff] %v9574_v23  ;;  %2134 = vmatprep.subr.mxu0 %v14273_v30  ;;  %2547 = vmatprep.subr.mxu1 %v14273_v30  ;;  %14348 = vst [vmem:[#allocation92_spill] sm:$0xff] %v9585_v45  ;;  %v1312_v19 = vand.u32 4294901760, %v1311_v0  ;;  %v1318_v0 = vand.u32 4294901760, %v1317_v33 }
 0x244   : > { %1289 = vmatmul.mubr.f32.gmra.mxu0 %v1288_v32  ;;  %14347 = vst [vmem:[#allocation91_spill] sm:$0xff] %v9583_v12  ;;  %2549 = vmatpush1.msra.mxu1 %v8920_v43  ;;  %v14349_v32 = vand.u32 4294901760, %v9534_v17  ;;  %14350 = vst [vmem:[#allocation93_spill] sm:$0xff] %v9596_v31  ;;  %v9621_v33 = vsub.f32 %v1021_v5, %v9596_v31 }
 0x245   : > { %1924 = vmatmul.mubr.f32.gmra.mxu1 %v9373_v18  ;;  %1298 = vmatprep.mubr.f32.mxu0 %v1297_v35  ;;  %v9604_v35 = vand.u32 4294901760, %v1020_v29 }
 0x246   : > { %v1326_v6 = vsub.f32 %v9534_v17, %v14349_v32  ;;  %1929 = vmatprep.mubr.f32.mxu1 %v9386_v59  ;;  %2137 = vmatpush1.msra.mxu0 %v8941_v53  ;;  %v14352_v32 = vand.u32 4294901760, %v9552_v24  ;;  %v13734_v59 = vand.u32 4294901760, %v9583_v12  ;;  %v9613_v17 = vsub.f32 %v1018_v61, %v9585_v45  ;;  %14355 = vst [vmem:[#allocation96_spill] sm:$0xff] %v9621_v33  ;;  %v1022_v61 = vld [vmem:[%s13561_s2 + $0xd0] sm:$0xff] }
 0x247   : > { %14351 = vst [vmem:[#allocation94_spill] sm:$0xff] %v9604_v35  ;;  %2138 = vmatprep.subr.mxu0 %v14273_v30  ;;  %2550 = vmatprep.subr.mxu1 %v14273_v30  ;;  %v9623_v53 = vand.u32 4294901760, %v1023_v21  ;;  %v9637_v5 = vsub.f32 %v1020_v29, %v9604_v35 }
 0x248   : > { %1304 = vmatmul.mubr.f32.gmra.mxu0 %v1303_v26  ;;  %v1332_v14 = vsub.f32 %v9552_v24, %v14352_v32  ;;  %14353 = vst [vmem:[#allocation95_spill] sm:$0xff] %v9613_v17  ;;  %2552 = vmatpush1.msra.mxu1 %v8922_v44  ;;  %v1327_v18 = vand.u32 4294901760, %v1326_v6  ;;  %v1341_v26 = vsub.f32 %v9563_v4, %v14354_v39  ;;  %v14357_v6 = vand.u32 4294901760, %v9574_v23 }
 0x249   : > { %1931 = vmatmul.mubr.f32.gmra.mxu1 %v9403_v25  ;;  %1313 = vmatprep.mubr.f32.mxu0 %v1312_v19  ;;  %14356 = vst [vmem:[#allocation97_spill] sm:$0xff] %v9623_v53  ;;  %v1025_v19 = vld [vmem:[%s13561_s2 + $0xe8] sm:$0xff]  ;;  %14358 = vst [vmem:[#allocation98_spill] sm:$0xff] %v9637_v5  ;;  %v13739_v25 = vand.u32 4294901760, %v9613_v17  ;;  %v9645_v4 = vand.u32 4294901760, %v1022_v61 }
 0x24a   : > { %1936 = vmatprep.mubr.f32.mxu1 %v9409_v63  ;;  %2141 = vmatpush1.msra.mxu0 %v8955_v62  ;;  %v1347_v39 = vsub.f32 %v9574_v23, %v14357_v6  ;;  %v1333_v32 = vand.u32 4294901760, %v1332_v14  ;;  %v1356_v63 = vsub.f32 %v9583_v12, %v13734_v59  ;;  %v1342_v29 = vand.u32 4294901760, %v1341_v26  ;;  %v1027_v59 = vld [vmem:[%s13561_s2 + $0xf8] sm:$0xff] }
 0x24b   : > { %2142 = vmatprep.subr.mxu0 %v14273_v30  ;;  %2553 = vmatprep.subr.mxu1 %v14273_v30  ;;  %14359 = vst [vmem:[#allocation99_spill] sm:$0xff] %v9645_v4  ;;  %v9651_v23 = vsub.f32 %v1023_v21, %v9623_v53  ;;  %v9653_v14 = vand.u32 4294901760, %v1025_v19  ;;  %v1362_v6 = vsub.f32 %v9613_v17, %v13739_v25  ;;  %v9686_v26 = vand.u32 4294901760, %v1027_v59  ;;  %v1029_v17 = vld [vmem:[%s13561_s2 + $0x108] sm:$0xff] }
 0x24c   : > { %1319 = vmatmul.mubr.f32.gmra.mxu0 %v1318_v0  ;;  %2555 = vmatpush1.msra.mxu1 %v8931_v49  ;;  %v1024_v0 = vld [vmem:[%s13561_s2 + $0xe0] sm:$0xff]  ;;  %v1357_v21 = vand.u32 4294901760, %v1356_v63  ;;  %v14364_v63 = vand.u32 4294901760, %v9621_v33 }
 0x24d   : > { %1938 = vmatmul.mubr.f32.gmra.mxu1 %v9438_v1  ;;  %1328 = vmatprep.mubr.f32.mxu0 %v1327_v18  ;;  %14360 = vst [vmem:[#allocation100_spill] sm:$0xff] %v9651_v23  ;;  %14361 = vst [vmem:[#allocation101_spill] sm:$0xff] %v9653_v14  ;;  %v1348_v18 = vand.u32 4294901760, %v1347_v39  ;;  %v9672_v1 = vand.u32 4294901760, %v1024_v0  ;;  %v1026_v39 = vld [vmem:[%s13561_s2 + $0xf0] sm:$0xff] }
 0x24e   : > { %1943 = vmatprep.mubr.f32.mxu1 %v9448_v34  ;;  %2145 = vmatpush1.msra.mxu0 %v8968_v2  ;;  %v9670_v34 = vsub.f32 %v1022_v61, %v9645_v4  ;;  %v9684_v61 = vsub.f32 %v1025_v19, %v9653_v14  ;;  %14366 = vst [vmem:[#allocation105_spill] sm:$0xff] %v9686_v26  ;;  %v1363_v19 = vand.u32 4294901760, %v1362_v6 }
 0x24f   : > { %2146 = vmatprep.subr.mxu0 %v14273_v30  ;;  %2556 = vmatprep.subr.mxu1 %v14273_v30  ;;  %14363 = vst [vmem:[#allocation103_spill] sm:$0xff] %v9672_v1  ;;  %v9713_v6 = vsub.f32 %v1027_v59, %v9686_v26 }
 0x250   : > { %1334 = vmatmul.mubr.f32.gmra.mxu0 %v1333_v32  ;;  %14362 = vst [vmem:[#allocation102_spill] sm:$0xff] %v9670_v34  ;;  %2558 = vmatpush1.msra.mxu1 %v8947_v57  ;;  %v1371_v32 = vsub.f32 %v9621_v33, %v14364_v63  ;;  %14365 = vst [vmem:[#allocation104_spill] sm:$0xff] %v9684_v61  ;;  %v9696_v63 = vand.u32 4294901760, %v1026_v39  ;;  %v13756_v25 = vand.u32 4294901760, %v9670_v34 }
 0x251   : > { %1945 = vmatmul.mubr.f32.gmra.mxu1 %v9456_v27  ;;  %1343 = vmatprep.mubr.f32.mxu0 %v1342_v29  ;;  %v14367_v29 = vand.u32 4294901760, %v9637_v5  ;;  %v9702_v33 = vsub.f32 %v1024_v0, %v9672_v1  ;;  %14372 = vst [vmem:[#allocation109_spill] sm:$0xff] %v9713_v6  ;;  %v1028_v0 = vld [vmem:[%s13561_s2 + $0x100] sm:$0xff] }
 0x252   : > { %1950 = vmatprep.mubr.f32.mxu1 %v9473_v40  ;;  %2149 = vmatpush1.msra.mxu0 %v8983_v11  ;;  %14368 = vst [vmem:[#allocation106_spill] sm:$0xff] %v9696_v63  ;;  %v9704_v40 = vand.u32 4294901760, %v1029_v17  ;;  %v1392_v59 = vsub.f32 %v9670_v34, %v13756_v25  ;;  %v1033_v34 = vld [vmem:[%s13561_s2 + $0x128] sm:$0xff] }
 0x253   : > { %v1377_v27 = vsub.f32 %v9637_v5, %v14367_v29  ;;  %2150 = vmatprep.subr.mxu0 %v14273_v30  ;;  %2559 = vmatprep.subr.mxu1 %v14273_v30  ;;  %14369 = vst [vmem:[#allocation107_spill] sm:$0xff] %v9702_v33  ;;  %v1372_v29 = vand.u32 4294901760, %v1371_v32  ;;  %v14371_v5 = vand.u32 4294901760, %v9651_v23 }
 0x254   : > { %1349 = vmatmul.mubr.f32.gmra.mxu0 %v1348_v18  ;;  %14370 = vst [vmem:[#allocation108_spill] sm:$0xff] %v9704_v40  ;;  %2561 = vmatpush1.msra.mxu1 %v8951_v60 }
 0x255   : > { %1952 = vmatmul.mubr.f32.gmra.mxu1 %v9495_v46  ;;  %1358 = vmatprep.mubr.f32.mxu0 %v1357_v21  ;;  %v1386_v12 = vsub.f32 %v9651_v23, %v14371_v5  ;;  %v1031_v21 = vld [vmem:[%s13561_s2 + $0x118] sm:$0xff]  ;;  %v1378_v32 = vand.u32 4294901760, %v1377_v27  ;;  %v9724_v5 = vsub.f32 %v1026_v39, %v9696_v63  ;;  %v9735_v46 = vand.u32 4294901760, %v1028_v0  ;;  %v1030_v27 = vld [vmem:[%s13561_s2 + $0x110] sm:$0xff] }
 0x256   : > { %1957 = vmatprep.mubr.f32.mxu1 %v9503_v20  ;;  %2153 = vmatpush1.msra.mxu0 %v8990_v15  ;;  %v9733_v20 = vsub.f32 %v1029_v17, %v9704_v40  ;;  %v9746_v17 = vand.u32 4294901760, %v1031_v21  ;;  %v14381_v23 = vand.u32 4294901760, %v9713_v6 }
 0x257   : > { %14373 = vst [vmem:[#allocation110_spill] sm:$0xff] %v9724_v5  ;;  %2154 = vmatprep.subr.mxu0 %v14273_v30  ;;  %2562 = vmatprep.subr.mxu1 %v14273_v30  ;;  %14375 = vst [vmem:[#allocation112_spill] sm:$0xff] %v9735_v46  ;;  %v1387_v39 = vand.u32 4294901760, %v1386_v12  ;;  %v1393_v12 = vand.u32 4294901760, %v1392_v59 }
 0x258   : > { %1364 = vmatmul.mubr.f32.gmra.mxu0 %v1363_v19  ;;  %14374 = vst [vmem:[#allocation111_spill] sm:$0xff] %v9733_v20  ;;  %2564 = vmatpush1.msra.mxu1 %v8971_v3  ;;  %v14376_v19 = vand.u32 4294901760, %v9684_v61  ;;  %14377 = vst [vmem:[#allocation113_spill] sm:$0xff] %v9746_v17  ;;  %v9771_v59 = vsub.f32 %v1031_v21, %v9746_v17 }
 0x259   : > { %1959 = vmatmul.mubr.f32.gmra.mxu1 %v9522_v54  ;;  %1373 = vmatprep.mubr.f32.mxu0 %v1372_v29  ;;  %v9754_v29 = vand.u32 4294901760, %v1030_v27 }
 0x25a   : > { %v1401_v25 = vsub.f32 %v9684_v61, %v14376_v19  ;;  %1964 = vmatprep.mubr.f32.mxu1 %v9536_v51  ;;  %2157 = vmatpush1.msra.mxu0 %v9002_v22  ;;  %v14379_v19 = vand.u32 4294901760, %v9702_v33  ;;  %v13776_v51 = vand.u32 4294901760, %v9733_v20  ;;  %v9763_v61 = vsub.f32 %v1028_v0, %v9735_v46  ;;  %14382 = vst [vmem:[#allocation116_spill] sm:$0xff] %v9771_v59  ;;  %v1032_v0 = vld [vmem:[%s13561_s2 + $0x120] sm:$0xff] }
 0x25b   : > { %14378 = vst [vmem:[#allocation114_spill] sm:$0xff] %v9754_v29  ;;  %2158 = vmatprep.subr.mxu0 %v14273_v30  ;;  %2565 = vmatprep.subr.mxu1 %v14273_v30  ;;  %v9773_v22 = vand.u32 4294901760, %v1033_v34  ;;  %v9787_v21 = vsub.f32 %v1030_v27, %v9754_v29 }
 0x25c   : > { %1379 = vmatmul.mubr.f32.gmra.mxu0 %v1378_v32  ;;  %v1407_v18 = vsub.f32 %v9702_v33, %v14379_v19  ;;  %14380 = vst [vmem:[#allocation115_spill] sm:$0xff] %v9763_v61  ;;  %2567 = vmatpush1.msra.mxu1 %v8986_v13  ;;  %v1402_v54 = vand.u32 4294901760, %v1401_v25  ;;  %v1416_v32 = vsub.f32 %v9713_v6, %v14381_v23  ;;  %v14384_v25 = vand.u32 4294901760, %v9724_v5  ;;  %v1039_v33 = vld [vmem:[%s13561_s2 + $0x158] sm:$0xff] }
 0x25d   : > { %1966 = vmatmul.mubr.f32.gmra.mxu1 %v9546_v58  ;;  %1388 = vmatprep.mubr.f32.mxu0 %v1387_v39  ;;  %14383 = vst [vmem:[#allocation117_spill] sm:$0xff] %v9773_v22  ;;  %v1035_v39 = vld [vmem:[%s13561_s2 + $0x138] sm:$0xff]  ;;  %14385 = vst [vmem:[#allocation118_spill] sm:$0xff] %v9787_v21  ;;  %v9795_v6 = vand.u32 4294901760, %v1032_v0  ;;  %v14389_v58 = vld [vmem:[#allocation14_spill] sm:$0xff] }
 0x25e   : > { %1971 = vmatprep.mubr.f32.mxu1 %v9554_v55  ;;  %2161 = vmatpush1.msra.mxu0 %v9014_v28  ;;  %v1422_v23 = vsub.f32 %v9724_v5, %v14384_v25  ;;  %v1408_v19 = vand.u32 4294901760, %v1407_v18  ;;  %v1431_v55 = vsub.f32 %v9733_v20, %v13776_v51  ;;  %v1417_v27 = vand.u32 4294901760, %v1416_v32  ;;  %v1037_v51 = vld [vmem:[%s13561_s2 + $0x148] sm:$0xff]  ;;  %v14393_v32 = vld [vmem:[#allocation12_spill] sm:$0xff] }
 0x25f   : > { %2162 = vmatprep.subr.mxu0 %v14273_v30  ;;  %2568 = vmatprep.subr.mxu1 %v14273_v30  ;;  %14386 = vst [vmem:[#allocation119_spill] sm:$0xff] %v9795_v6  ;;  %v9801_v5 = vsub.f32 %v1033_v34, %v9773_v22  ;;  %v9803_v18 = vand.u32 4294901760, %v1035_v39  ;;  %v14390_v25 = vand.u32 4294901760, %v9763_v61 }
 0x260   : > { %1394 = vmatmul.mubr.f32.gmra.mxu0 %v1393_v12  ;;  %2570 = vmatpush1.msra.mxu1 %v8994_v16  ;;  %v1034_v12 = vld [vmem:[%s13561_s2 + $0x130] sm:$0xff]  ;;  %v1432_v34 = vand.u32 4294901760, %v1431_v55  ;;  %v14394_v55 = vand.u32 4294901760, %v9771_v59 }
 0x261   : > { %1973 = vmatmul.mubr.f32.gmra.mxu1 %v9585_v45  ;;  %1403 = vmatprep.mubr.f32.mxu0 %v1402_v54  ;;  %14387 = vst [vmem:[#allocation120_spill] sm:$0xff] %v9801_v5  ;;  %14388 = vst [vmem:[#allocation121_spill] sm:$0xff] %v9803_v18  ;;  %v1423_v54 = vand.u32 4294901760, %v1422_v23  ;;  %v1437_v45 = vsub.f32 %v9763_v61, %v14390_v25  ;;  %v9822_v20 = vand.u32 4294901760, %v1034_v12  ;;  %v1036_v23 = vld [vmem:[%s13561_s2 + $0x140] sm:$0xff]  ;;  %v9836_v61 = vand.u32 4294901760, %v1037_v51 }
 0x262   : > { %1978 = vmatprep.mubr.f32.mxu1 %v9596_v31  ;;  %2165 = vmatpush1.msra.mxu0 %v14389_v58  ;;  %v9820_v31 = vsub.f32 %v1032_v0, %v9795_v6  ;;  %v9834_v0 = vsub.f32 %v1035_v39, %v9803_v18 }
 0x263   : > { %2166 = vmatprep.subr.mxu0 %v14273_v30  ;;  %2571 = vmatprep.subr.mxu1 %v14273_v30  ;;  %14392 = vst [vmem:[#allocation123_spill] sm:$0xff] %v9822_v20  ;;  %14396 = vst [vmem:[#allocation125_spill] sm:$0xff] %v9836_v61  ;;  %v1438_v39 = vand.u32 4294901760, %v1437_v45  ;;  %v9863_v45 = vsub.f32 %v1037_v51, %v9836_v61 }
 0x264   : > { %1409 = vmatmul.mubr.f32.gmra.mxu0 %v1408_v19  ;;  %14391 = vst [vmem:[#allocation122_spill] sm:$0xff] %v9820_v31  ;;  %2573 = vmatpush1.msra.mxu1 %v14393_v32  ;;  %v1446_v19 = vsub.f32 %v9771_v59, %v14394_v55  ;;  %14395 = vst [vmem:[#allocation124_spill] sm:$0xff] %v9834_v0  ;;  %v14397_v32 = vld [vmem:[#allocation16_spill] sm:$0xff]  ;;  %v9846_v55 = vand.u32 4294901760, %v1036_v23  ;;  %v9852_v59 = vsub.f32 %v1034_v12, %v9822_v20  ;;  %v1038_v12 = vld [vmem:[%s13561_s2 + $0x150] sm:$0xff] }
 0x265   : > { %1980 = vmatmul.mubr.f32.gmra.mxu1 %v9604_v35  ;;  %1418 = vmatprep.mubr.f32.mxu0 %v1417_v27  ;;  %v14398_v27 = vand.u32 4294901760, %v9787_v21  ;;  %14404 = vst [vmem:[#allocation129_spill] sm:$0xff] %v9863_v45  ;;  %v14407_v51 = vand.u32 4294901760, %v9820_v31 }
 0x266   : > { %1985 = vmatprep.mubr.f32.mxu1 %v9623_v53  ;;  %2169 = vmatpush1.msra.mxu0 %v14397_v32  ;;  %14399 = vst [vmem:[#allocation126_spill] sm:$0xff] %v9846_v55  ;;  %14400 = vst [vmem:[#allocation127_spill] sm:$0xff] %v9852_v59  ;;  %v9854_v53 = vand.u32 4294901760, %v1039_v33  ;;  %v14402_v32 = vld [vmem:[#allocation13_spill] sm:$0xff] }
 0x267   : > { %v1452_v35 = vsub.f32 %v9787_v21, %v14398_v27  ;;  %2170 = vmatprep.subr.mxu0 %v14273_v30  ;;  %2574 = vmatprep.subr.mxu1 %v14273_v30  ;;  %v1447_v27 = vand.u32 4294901760, %v1446_v19  ;;  %v14403_v21 = vand.u32 4294901760, %v9801_v5  ;;  %v14405_v19 = vld [vmem:[#allocation18_spill] sm:$0xff] }
 0x268   : > { %1424 = vmatmul.mubr.f32.gmra.mxu0 %v1423_v54  ;;  %14401 = vst [vmem:[#allocation128_spill] sm:$0xff] %v9854_v53  ;;  %2576 = vmatpush1.msra.mxu1 %v14402_v32  ;;  %v1467_v54 = vsub.f32 %v9820_v31, %v14407_v51  ;;  %v1043_v31 = vld [vmem:[%s13561_s2 + $0x178] sm:$0xff]  ;;  %v14413_v32 = vld [vmem:[#allocation20_spill] sm:$0xff] }
 0x269   : > { %1987 = vmatmul.mubr.f32.gmra.mxu1 %v9645_v4  ;;  %1433 = vmatprep.mubr.f32.mxu0 %v1432_v34  ;;  %v1461_v58 = vsub.f32 %v9801_v5, %v14403_v21  ;;  %v1041_v34 = vld [vmem:[%s13561_s2 + $0x168] sm:$0xff]  ;;  %v1453_v25 = vand.u32 4294901760, %v1452_v35  ;;  %v9874_v21 = vsub.f32 %v1036_v23, %v9846_v55  ;;  %v9883_v4 = vsub.f32 %v1039_v33, %v9854_v53  ;;  %v1040_v35 = vld [vmem:[%s13561_s2 + $0x160] sm:$0xff]  ;;  %v14410_v23 = vld [vmem:[#allocation15_spill] sm:$0xff] }
 0x26a   : > { %1992 = vmatprep.mubr.f32.mxu1 %v9653_v14  ;;  %2173 = vmatpush1.msra.mxu0 %v14405_v19  ;;  %v9885_v5 = vand.u32 4294901760, %v1038_v12  ;;  %v14411_v19 = vand.u32 4294901760, %v9834_v0  ;;  %v9896_v33 = vand.u32 4294901760, %v1041_v34  ;;  %v9923_v16 = vand.u32 4294901760, %v1043_v31 }
 0x26b   : > { %14406 = vst [vmem:[#allocation130_spill] sm:$0xff] %v9874_v21  ;;  %2174 = vmatprep.subr.mxu0 %v14273_v30  ;;  %2577 = vmatprep.subr.mxu1 %v14273_v30  ;;  %14408 = vst [vmem:[#allocation131_spill] sm:$0xff] %v9883_v4 }
 0x26c   : > { %1439 = vmatmul.mubr.f32.gmra.mxu0 %v1438_v39  ;;  %14409 = vst [vmem:[#allocation132_spill] sm:$0xff] %v9885_v5  ;;  %2579 = vmatpush1.msra.mxu1 %v14410_v23  ;;  %v1462_v39 = vand.u32 4294901760, %v1461_v58  ;;  %v1476_v51 = vsub.f32 %v9834_v0, %v14411_v19  ;;  %14412 = vst [vmem:[#allocation133_spill] sm:$0xff] %v9896_v33  ;;  %v1468_v58 = vand.u32 4294901760, %v1467_v54  ;;  %v14415_v19 = vand.u32 4294901760, %v9852_v59 }
 0x26d   : > { %1994 = vmatmul.mubr.f32.gmra.mxu1 %v9672_v1  ;;  %1448 = vmatprep.mubr.f32.mxu0 %v1447_v27  ;;  %v9904_v27 = vand.u32 4294901760, %v1040_v35  ;;  %v9913_v0 = vsub.f32 %v1038_v12, %v9885_v5  ;;  %v14418_v23 = vand.u32 4294901760, %v9863_v45  ;;  %v9921_v54 = vsub.f32 %v1041_v34, %v9896_v33  ;;  %14420 = vst [vmem:[#allocation137_spill] sm:$0xff] %v9923_v16  ;;  %v1042_v12 = vld [vmem:[%s13561_s2 + $0x170] sm:$0xff] }
 0x26e   : > { %1999 = vmatprep.mubr.f32.mxu1 %v9686_v26  ;;  %2177 = vmatpush1.msra.mxu0 %v14413_v32  ;;  %v1482_v14 = vsub.f32 %v9852_v59, %v14415_v19  ;;  %v14417_v32 = vld [vmem:[#allocation17_spill] sm:$0xff]  ;;  %v1477_v1 = vand.u32 4294901760, %v1476_v51  ;;  %v14421_v51 = vld [vmem:[#allocation22_spill] sm:$0xff]  ;;  %v14422_v19 = vand.u32 4294901760, %v9874_v21  ;;  %v9945_v59 = vand.u32 4294901760, %v1042_v12 }
 0x26f   : > { %14414 = vst [vmem:[#allocation134_spill] sm:$0xff] %v9904_v27  ;;  %2178 = vmatprep.subr.mxu0 %v14273_v30  ;;  %2580 = vmatprep.subr.mxu1 %v14273_v30  ;;  %14416 = vst [vmem:[#allocation135_spill] sm:$0xff] %v9913_v0  ;;  %v9937_v34 = vsub.f32 %v1040_v35, %v9904_v27 }
 0x270   : > { %1454 = vmatmul.mubr.f32.gmra.mxu0 %v1453_v25  ;;  %2582 = vmatpush1.msra.mxu1 %v14417_v32  ;;  %v1491_v25 = vsub.f32 %v9863_v45, %v14418_v23  ;;  %14419 = vst [vmem:[#allocation136_spill] sm:$0xff] %v9921_v54  ;;  %v1497_v23 = vsub.f32 %v9874_v21, %v14422_v19  ;;  %v1483_v26 = vand.u32 4294901760, %v1482_v14  ;;  %v13826_v45 = vand.u32 4294901760, %v9913_v0  ;;  %v14432_v19 = vld [vmem:[#allocation21_spill] sm:$0xff] }
 0x271   : > { %2001 = vmatmul.mubr.f32.gmra.mxu1 %v9696_v63  ;;  %1463 = vmatprep.mubr.f32.mxu0 %v1462_v39  ;;  %v1045_v39 = vld [vmem:[%s13561_s2 + $0x188] sm:$0xff]  ;;  %14423 = vst [vmem:[#allocation138_spill] sm:$0xff] %v9937_v34  ;;  %14425 = vst [vmem:[#allocation139_spill] sm:$0xff] %v9945_v59  ;;  %v9951_v21 = vsub.f32 %v1043_v31, %v9923_v16 }
 0x272   : > { %2006 = vmatprep.mubr.f32.mxu1 %v9704_v40  ;;  %2181 = vmatpush1.msra.mxu0 %v14421_v51  ;;  %v14424_v40 = vand.u32 4294901760, %v9883_v4  ;;  %v14426_v51 = vld [vmem:[#allocation19_spill] sm:$0xff]  ;;  %v1492_v35 = vand.u32 4294901760, %v1491_v25  ;;  %v9953_v14 = vand.u32 4294901760, %v1045_v39  ;;  %v1498_v25 = vand.u32 4294901760, %v1497_v23  ;;  %v1046_v23 = vld [vmem:[%s13561_s2 + $0x190] sm:$0xff] }
 0x273   : > { %2182 = vmatprep.subr.mxu0 %v14273_v30  ;;  %2583 = vmatprep.subr.mxu1 %v14273_v30  ;;  %14427 = vst [vmem:[#allocation140_spill] sm:$0xff] %v9951_v21 }
 0x274   : > { %1469 = vmatmul.mubr.f32.gmra.mxu0 %v1468_v58  ;;  %v1506_v63 = vsub.f32 %v9883_v4, %v14424_v40  ;;  %2585 = vmatpush2.msra.mxu1 %v14426_v51  ;;  %14428 = vst [vmem:[#allocation141_spill] sm:$0xff] %v9953_v14  ;;  %v1044_v40 = vld [vmem:[%s13561_s2 + $0x180] sm:$0xff] }
 0x275   : > { %2008 = vmatmul.mubr.f32.gmra.mxu1 %v9735_v46  ;;  %1478 = vmatprep.mubr.f32.mxu0 %v1477_v1  ;;  %v14429_v58 = vld [vmem:[#allocation24_spill] sm:$0xff]  ;;  %v1047_v1 = vld [vmem:[%s13561_s2 + $0x198] sm:$0xff]  ;;  %v1512_v46 = vsub.f32 %v9913_v0, %v13826_v45  ;;  %v9972_v4 = vand.u32 4294901760, %v1044_v40 }
 0x276   : > { %2013 = vmatprep.mubr.f32.mxu1 %v9746_v17  ;;  %2185 = vmatpush2.msra.mxu0 %v14429_v58  ;;  %v1507_v31 = vand.u32 4294901760, %v1506_v63  ;;  %v9970_v17 = vsub.f32 %v1042_v12, %v9945_v59  ;;  %v9984_v12 = vsub.f32 %v1045_v39, %v9953_v14  ;;  %v9986_v0 = vand.u32 4294901760, %v1047_v1  ;;  %v1049_v58 = vld [vmem:[%s13561_s2 + $0x1a8] sm:$0xff]  ;;  %v14444_v45 = vld [vmem:[#allocation28_spill] sm:$0xff] }
 0x277   : > { %2186 = vmatprep.subr.mxu0 %v14273_v30  ;;  %2586 = vmatprep.subr.mxu1 %v14273_v30  ;;  %14431 = vst [vmem:[#allocation143_spill] sm:$0xff] %v9972_v4  ;;  %v1513_v39 = vand.u32 4294901760, %v1512_v46 }
 0x278   : > { %1484 = vmatmul.mubr.f32.gmra.mxu0 %v1483_v26  ;;  %14430 = vst [vmem:[#allocation142_spill] sm:$0xff] %v9970_v17  ;;  %2588 = vmatpush2.msra.mxu1 %v14432_v19  ;;  %v14433_v26 = vand.u32 4294901760, %v9921_v54  ;;  %14434 = vst [vmem:[#allocation144_spill] sm:$0xff] %v9984_v12  ;;  %v14436_v19 = vld [vmem:[#allocation26_spill] sm:$0xff]  ;;  %v10013_v46 = vsub.f32 %v1047_v1, %v9986_v0  ;;  %v14446_v1 = vand.u32 4294901760, %v9970_v17 }
 0x279   : > { %2015 = vmatmul.mubr.f32.gmra.mxu1 %v9754_v29  ;;  %1493 = vmatprep.mubr.f32.mxu0 %v1492_v35  ;;  %14435 = vst [vmem:[#allocation145_spill] sm:$0xff] %v9986_v0  ;;  %v14437_v35 = vand.u32 4294901760, %v9937_v34 }
 0x27a   : > { %v1521_v63 = vsub.f32 %v9921_v54, %v14433_v26  ;;  %2020 = vmatprep.mubr.f32.mxu1 %v9773_v22  ;;  %2189 = vmatpush2.msra.mxu0 %v14436_v19  ;;  %v9996_v26 = vand.u32 4294901760, %v1046_v23  ;;  %v10002_v54 = vsub.f32 %v1044_v40, %v9972_v4  ;;  %v10004_v22 = vand.u32 4294901760, %v1049_v58  ;;  %v14441_v19 = vld [vmem:[#allocation23_spill] sm:$0xff]  ;;  %14443 = vst [vmem:[#allocation149_spill] sm:$0xff] %v10013_v46  ;;  %v1048_v40 = vld [vmem:[%s13561_s2 + $0x1a0] sm:$0xff] }
 0x27b   : > { %v1527_v29 = vsub.f32 %v9937_v34, %v14437_v35  ;;  %2190 = vmatprep.subr.mxu0 %v14273_v30  ;;  %2589 = vmatprep.subr.mxu1 %v14273_v30  ;;  %v14442_v34 = vand.u32 4294901760, %v9951_v21 }
 0x27c   : > { %14438 = vst [vmem:[#allocation146_spill] sm:$0xff] %v9996_v26  ;;  %1499 = vmatmul.mubr.f32.gmra.mxu0 %v1498_v25  ;;  %14439 = vst [vmem:[#allocation147_spill] sm:$0xff] %v10002_v54  ;;  %2591 = vmatpush2.msra.mxu1 %v14441_v19  ;;  %v1522_v35 = vand.u32 4294901760, %v1521_v63  ;;  %v1542_v25 = vsub.f32 %v9970_v17, %v14446_v1  ;;  %v14450_v17 = vld [vmem:[#allocation30_spill] sm:$0xff]  ;;  %v14454_v19 = vand.u32 4294901760, %v10013_v46 }
 0x27d   : > { %14440 = vst [vmem:[#allocation148_spill] sm:$0xff] %v10004_v22  ;;  %2022 = vmatmul.mubr.f32.gmra.mxu1 %v9795_v6  ;;  %1508 = vmatprep.mubr.f32.mxu0 %v1507_v31  ;;  %v1536_v51 = vsub.f32 %v9951_v21, %v14442_v34  ;;  %v1051_v31 = vld [vmem:[%s13561_s2 + $0x1b8] sm:$0xff]  ;;  %v1528_v63 = vand.u32 4294901760, %v1527_v29  ;;  %v10024_v34 = vsub.f32 %v1046_v23, %v9996_v26  ;;  %v10035_v21 = vand.u32 4294901760, %v1048_v40  ;;  %v1050_v29 = vld [vmem:[%s13561_s2 + $0x1b0] sm:$0xff]  ;;  %v14448_v23 = vld [vmem:[#allocation25_spill] sm:$0xff] }
 0x27e   : > { %2027 = vmatprep.mubr.f32.mxu1 %v9803_v18  ;;  %2193 = vmatpush2.msra.mxu0 %v14444_v45  ;;  %v10033_v6 = vsub.f32 %v1049_v58, %v10004_v22  ;;  %v14449_v45 = vand.u32 4294901760, %v9984_v12  ;;  %v10046_v58 = vand.u32 4294901760, %v1051_v31 }
 0x27f   : > { %14445 = vst [vmem:[#allocation150_spill] sm:$0xff] %v10024_v34  ;;  %2194 = vmatprep.subr.mxu0 %v14273_v30  ;;  %2592 = vmatprep.subr.mxu1 %v14273_v30 }
 0x280   : > { %1514 = vmatmul.mubr.f32.gmra.mxu0 %v1513_v39  ;;  %14447 = vst [vmem:[#allocation151_spill] sm:$0xff] %v10033_v6  ;;  %2594 = vmatpush2.msra.mxu1 %v14448_v23  ;;  %v1537_v39 = vand.u32 4294901760, %v1536_v51  ;;  %v1551_v1 = vsub.f32 %v9984_v12, %v14449_v45  ;;  %v1053_v23 = vld [vmem:[%s13561_s2 + $0x1c8] sm:$0xff]  ;;  %v10055_v51 = vand.u32 4294901760, %v1050_v29  ;;  %v1543_v45 = vand.u32 4294901760, %v1542_v25 }
 0x281   : > { %2029 = vmatmul.mubr.f32.gmra.mxu1 %v9822_v20  ;;  %1523 = vmatprep.mubr.f32.mxu0 %v1522_v35  ;;  %v14451_v35 = vand.u32 4294901760, %v10002_v54  ;;  %v10063_v12 = vsub.f32 %v1048_v40, %v10035_v21  ;;  %v10071_v25 = vsub.f32 %v1051_v31, %v10046_v58  ;;  %v10073_v32 = vand.u32 4294901760, %v1053_v23  ;;  %v1052_v40 = vld [vmem:[%s13561_s2 + $0x1c0] sm:$0xff] }
 0x282   : > { %2034 = vmatprep.mubr.f32.mxu1 %v9836_v61  ;;  %2197 = vmatpush2.msra.mxu0 %v14450_v17  ;;  %v14453_v17 = vld [vmem:[#allocation27_spill] sm:$0xff]  ;;  %v1552_v20 = vand.u32 4294901760, %v1551_v1  ;;  %v14457_v1 = vand.u32 4294901760, %v10024_v34  ;;  %v10088_v31 = vsub.f32 %v1050_v29, %v10055_v51 }
 0x283   : > { %2198 = vmatprep.subr.mxu0 %v14273_v30  ;;  %2595 = vmatprep.subr.mxu1 %v14273_v30  ;;  %v1557_v18 = vsub.f32 %v10002_v54, %v14451_v35  ;;  %14452 = vst [vmem:[#allocation152_spill] sm:$0xff] %v10063_v12  ;;  %14455 = vst [vmem:[#allocation27_spill] sm:$0xff] %v10071_v25  ;;  %v14456_v35 = vld [vmem:[#allocation32_spill] sm:$0xff]  ;;  %v10095_v54 = vand.u32 4294901760, %v1052_v40 }
 0x284   : > { %1529 = vmatmul.mubr.f32.gmra.mxu0 %v1528_v63  ;;  %2597 = vmatpush2.msra.mxu1 %v14453_v17  ;;  %v1566_v63 = vsub.f32 %v10013_v46, %v14454_v19  ;;  %v1572_v19 = vsub.f32 %v10024_v34, %v14457_v1  ;;  %14458 = vst [vmem:[#allocation153_spill] sm:$0xff] %v10088_v31  ;;  %v13867_v46 = vand.u32 4294901760, %v10063_v12 }
 0x285   : > { %2036 = vmatmul.mubr.f32.gmra.mxu1 %v9846_v55  ;;  %1538 = vmatprep.mubr.f32.mxu0 %v1537_v39  ;;  %v1055_v39 = vld [vmem:[%s13561_s2 + $0x1d8] sm:$0xff]  ;;  %v1558_v61 = vand.u32 4294901760, %v1557_v18  ;;  %14460 = vst [vmem:[#allocation154_spill] sm:$0xff] %v10095_v54  ;;  %v10101_v34 = vsub.f32 %v1053_v23, %v10073_v32 }
 0x286   : > { %2041 = vmatprep.mubr.f32.mxu1 %v9854_v53  ;;  %2201 = vmatpush2.msra.mxu0 %v14456_v35  ;;  %v14459_v53 = vand.u32 4294901760, %v10033_v6  ;;  %v14461_v35 = vld [vmem:[#allocation29_spill] sm:$0xff]  ;;  %v1567_v1 = vand.u32 4294901760, %v1566_v63  ;;  %v10103_v18 = vand.u32 4294901760, %v1055_v39  ;;  %v1573_v63 = vand.u32 4294901760, %v1572_v19 }
 0x287   : > { %2202 = vmatprep.subr.mxu0 %v14273_v30  ;;  %2598 = vmatprep.subr.mxu1 %v14273_v30  ;;  %14462 = vst [vmem:[#allocation29_spill] sm:$0xff] %v10101_v34  ;;  %v14467_v19 = vand.u32 4294901760, %v10071_v25 }
 0x288   : > { %1544 = vmatmul.mubr.f32.gmra.mxu0 %v1543_v45  ;;  %v1581_v55 = vsub.f32 %v10033_v6, %v14459_v53  ;;  %2600 = vmatpush2.msra.mxu1 %v14461_v35  ;;  %14463 = vst [vmem:[#allocation155_spill] sm:$0xff] %v10103_v18  ;;  %v1054_v53 = vld [vmem:[%s13561_s2 + $0x1d0] sm:$0xff] }
 0x289   : > { %2043 = vmatmul.mubr.f32.gmra.mxu1 %v9885_v5  ;;  %1553 = vmatprep.mubr.f32.mxu0 %v1552_v20  ;;  %v14464_v45 = vld [vmem:[#allocation34_spill] sm:$0xff]  ;;  %v1057_v20 = vld [vmem:[%s13561_s2 + $0x1e8] sm:$0xff]  ;;  %v1587_v5 = vsub.f32 %v10063_v12, %v13867_v46  ;;  %v10122_v6 = vand.u32 4294901760, %v1054_v53  ;;  %v1596_v29 = vsub.f32 %v10071_v25, %v14467_v19 }
 0x28a   : > { %2048 = vmatprep.mubr.f32.mxu1 %v9896_v33  ;;  %2205 = vmatpush2.msra.mxu0 %v14464_v45  ;;  %v1582_v23 = vand.u32 4294901760, %v1581_v55  ;;  %v10120_v33 = vsub.f32 %v1052_v40, %v10095_v54  ;;  %v14466_v45 = vld [vmem:[#allocation31_spill] sm:$0xff]  ;;  %v10131_v55 = vsub.f32 %v1055_v39, %v10103_v18  ;;  %v10133_v46 = vand.u32 4294901760, %v1057_v20  ;;  %v1056_v40 = vld [vmem:[%s13561_s2 + $0x1e0] sm:$0xff]  ;;  %v14469_v12 = vld [vmem:[#allocation37_spill] sm:$0xff] }
 0x28b   : > { %2206 = vmatprep.subr.mxu0 %v14273_v30  ;;  %2601 = vmatprep.subr.mxu1 %v14273_v30  ;;  %14465 = vst [vmem:[#allocation156_spill] sm:$0xff] %v10122_v6  ;;  %v1059_v39 = vld [vmem:[%s13561_s2 + $0x1f8] sm:$0xff]  ;;  %v1588_v19 = vand.u32 4294901760, %v1587_v5  ;;  %v14471_v25 = vld [vmem:[#allocation33_spill] sm:$0xff] }
 0x28c   : > { %1559 = vmatmul.mubr.f32.gmra.mxu0 %v1558_v61  ;;  %2603 = vmatpush2.msra.mxu1 %v14466_v45  ;;  %14468 = vst [vmem:[#allocation157_spill] sm:$0xff] %v10133_v46  ;;  %v10161_v5 = vsub.f32 %v1057_v20, %v10133_v46  ;;  %v14474_v61 = vld [vmem:[#allocation38_spill] sm:$0xff] }
 0x28d   : > { %2050 = vmatmul.mubr.f32.gmra.mxu1 %v9904_v27  ;;  %1568 = vmatprep.mubr.f32.mxu0 %v1567_v1  ;;  %v14470_v1 = vand.u32 4294901760, %v10088_v31 }
 0x28e   : > { %2055 = vmatprep.mubr.f32.mxu1 %v9923_v16  ;;  %2209 = vmatpush2.msra.mxu0 %v14469_v12  ;;  %v10150_v16 = vsub.f32 %v1054_v53, %v10122_v6  ;;  %v10153_v12 = vand.u32 4294901760, %v1056_v40  ;;  %v1058_v53 = vld [vmem:[%s13561_s2 + $0x1f0] sm:$0xff] }
 0x28f   : > { %v1602_v27 = vsub.f32 %v10088_v31, %v14470_v1  ;;  %2210 = vmatprep.subr.mxu0 %v14273_v30  ;;  %2604 = vmatprep.subr.mxu1 %v14273_v30  ;;  %v1597_v1 = vand.u32 4294901760, %v1596_v29  ;;  %v14473_v31 = vand.u32 4294901760, %v10101_v34 }
 0x290   : > { %1574 = vmatmul.mubr.f32.gmra.mxu0 %v1573_v63  ;;  %2606 = vmatpush2.msra.mxu1 %v14471_v25  ;;  %14472 = vst [vmem:[#allocation158_spill] sm:$0xff] %v10153_v12  ;;  %v10177_v63 = vsub.f32 %v1056_v40, %v10153_v12  ;;  %v14481_v25 = vld [vmem:[#allocation36_spill] sm:$0xff] }
 0x291   : > { %2057 = vmatmul.mubr.f32.gmra.mxu1 %v9945_v59  ;;  %1583 = vmatprep.mubr.f32.mxu0 %v1582_v23  ;;  %v1611_v45 = vsub.f32 %v10101_v34, %v14473_v31  ;;  %v10168_v59 = vand.u32 4294901760, %v1059_v39  ;;  %v1603_v29 = vand.u32 4294901760, %v1602_v27  ;;  %v14476_v31 = vand.u32 4294901760, %v10120_v33 }
 0x292   : > { %2062 = vmatprep.mubr.f32.mxu1 %v9953_v14  ;;  %2213 = vmatpush2.msra.mxu0 %v14474_v61  ;;  %v13888_v23 = vand.u32 4294901760, %v10150_v16  ;;  %v14477_v14 = vld [vmem:[#allocation35_spill] sm:$0xff]  ;;  %v10180_v34 = vand.u32 4294901760, %v1058_v53  ;;  %v14479_v61 = vand.u32 4294901760, %v10131_v55 }
 0x293   : > { %14475 = vst [vmem:[#allocation159_spill] sm:$0xff] %v10168_v59  ;;  %2214 = vmatprep.subr.mxu0 %v14273_v30  ;;  %2607 = vmatprep.subr.mxu1 %v14273_v30  ;;  %v1617_v20 = vsub.f32 %v10120_v33, %v14476_v31  ;;  %v1612_v27 = vand.u32 4294901760, %v1611_v45  ;;  %v14480_v31 = vld [vmem:[#allocation40_spill] sm:$0xff]  ;;  %v10190_v40 = vsub.f32 %v1059_v39, %v10168_v59 }
 0x294   : > { %1589 = vmatmul.mubr.f32.gmra.mxu0 %v1588_v19  ;;  %2609 = vmatpush2.msra.mxu1 %v14477_v14  ;;  %14478 = vst [vmem:[#allocation35_spill] sm:$0xff] %v10180_v34  ;;  %v1626_v19 = vsub.f32 %v10131_v55, %v14479_v61  ;;  %v1632_v45 = vsub.f32 %v10150_v16, %v13888_v23  ;;  %v13893_v61 = vand.u32 4294901760, %v10177_v63  ;;  %v14485_v23 = vld [vmem:[#allocation46_spill] sm:$0xff] }
 0x295   : > { %2064 = vmatmul.mubr.f32.gmra.mxu1 %v9972_v4  ;;  %1598 = vmatprep.mubr.f32.mxu0 %v1597_v1  ;;  %v1618_v1 = vand.u32 4294901760, %v1617_v20  ;;  %v14482_v4 = vand.u32 4294901760, %v10161_v5  ;;  %v14483_v20 = vld [vmem:[#allocation41_spill] sm:$0xff] }
 0x296   : > { %2069 = vmatprep.mubr.f32.mxu1 %v9986_v0  ;;  %2217 = vmatpush2.msra.mxu0 %v14480_v31  ;;  %v10200_v0 = vsub.f32 %v1058_v53, %v10180_v34  ;;  %v1627_v39 = vand.u32 4294901760, %v1626_v19  ;;  %v1633_v53 = vand.u32 4294901760, %v1632_v45 }
 0x297   : > { %2218 = vmatprep.subr.mxu0 %v14273_v30  ;;  %2610 = vmatprep.subr.mxu1 %v14273_v30 }
 0x298   : > { %1604 = vmatmul.mubr.f32.gmra.mxu0 %v1603_v29  ;;  %2612 = vmatpush2.msra.mxu1 %v14481_v25  ;;  %v1641_v29 = vsub.f32 %v10161_v5, %v14482_v4  ;;  %v13894_v19 = vand.u32 4294901760, %v10200_v0 }
 0x299   : > { %2071 = vmatmul.mubr.f32.gmra.mxu1 %v9996_v26  ;;  %1613 = vmatprep.mubr.f32.mxu0 %v1612_v27  ;;  %v1647_v27 = vsub.f32 %v10177_v63, %v13893_v61  ;;  %v14484_v26 = vld [vmem:[#allocation39_spill] sm:$0xff] }
 0x29a   : > { %2076 = vmatprep.mubr.f32.mxu1 %v10004_v22  ;;  %2221 = vmatpush2.msra.mxu0 %v14483_v20  ;;  %v1642_v4 = vand.u32 4294901760, %v1641_v29  ;;  %v14486_v22 = vand.u32 4294901760, %v10190_v40  ;;  %v1662_v61 = vsub.f32 %v10200_v0, %v13894_v19  ;;  %v14488_v29 = vld [vmem:[#allocation49_spill] sm:$0xff]  ;;  %v14490_v19 = vld [vmem:[#allocation56_spill] sm:$0xff] }
 0x29b   : > { %2222 = vmatprep.subr.mxu0 %v14273_v30  ;;  %2613 = vmatprep.subr.mxu1 %v14273_v30  ;;  %v1648_v45 = vand.u32 4294901760, %v1647_v27  ;;  %v14489_v27 = vld [vmem:[#allocation47_spill] sm:$0xff] }
 0x29c   : > { %1619 = vmatmul.mubr.f32.gmra.mxu0 %v1618_v1  ;;  %2615 = vmatpush2.msra.mxu1 %v14484_v26  ;;  %v1656_v1 = vsub.f32 %v10190_v40, %v14486_v22 }
 0x29d   : > { %2078 = vmatmul.mubr.f32.gmra.mxu1 %v10035_v21  ;;  %1628 = vmatprep.mubr.f32.mxu0 %v1627_v39  ;;  %v14487_v39 = vld [vmem:[#allocation42_spill] sm:$0xff] }
 0x29e   : > { %2083 = vmatprep.mubr.f32.mxu1 %v10046_v58  ;;  %2225 = vmatpush2.msra.mxu0 %v14485_v23  ;;  %v1657_v22 = vand.u32 4294901760, %v1656_v1  ;;  %v14493_v1 = vld [vmem:[#allocation51_spill] sm:$0xff] }
 0x29f   : > { %2226 = vmatprep.subr.mxu0 %v14273_v30  ;;  %2616 = vmatprep.subr.mxu1 %v14273_v30 }
 0x2a0   : > { %1634 = vmatmul.mubr.f32.gmra.mxu0 %v1633_v53  ;;  %2618 = vmatpush2.msra.mxu1 %v14487_v39  ;;  %v1663_v53 = vand.u32 4294901760, %v1662_v61  ;;  %v14492_v61 = vld [vmem:[#allocation48_spill] sm:$0xff] }
 0x2a1   : > { %2085 = vmatmul.mubr.f32.gmra.mxu1 %v10055_v51  ;;  %1643 = vmatprep.mubr.f32.mxu0 %v1642_v4  ;;  %v14491_v4 = vld [vmem:[#allocation57_spill] sm:$0xff] }
 0x2a2   : > { %2090 = vmatprep.mubr.f32.mxu1 %v10073_v32  ;;  %2229 = vmatpush2.msra.mxu0 %v14488_v29 }
 0x2a3   : > { %2230 = vmatprep.subr.mxu0 %v14273_v30  ;;  %2619 = vmatprep.subr.mxu1 %v14273_v30 }
 0x2a4   : > { %1649 = vmatmul.mubr.f32.gmra.mxu0 %v1648_v45  ;;  %2621 = vmatpush2.msra.mxu1 %v14489_v27  ;;  %v14494_v45 = vld [vmem:[#allocation53_spill] sm:$0xff] }
 0x2a5   : > { %2092 = vmatmul.mubr.f32.gmra.mxu1 %v10095_v54  ;;  %2233 = vmatpush2.msra.mxu0 %v14490_v19  ;;  %v14502_v54 = vand.u32 4294901760, %v14493_v1 }
 0x2a6   : > { %2234 = vmatprep.subr.mxu0 %v14273_v30  ;;  %1658 = vmatprep.mubr.f32.mxu0 %v1657_v22  ;;  %v14495_v22 = vld [vmem:[#allocation50_spill] sm:$0xff] }
 0x2a7   : > { %2097 = vmatprep.mubr.f32.mxu1 %v10103_v18  ;;  %2237 = vmatpush2.msra.mxu0 %v14491_v4  ;;  %v14501_v18 = vld [vmem:[#allocation62_spill] sm:$0xff] }
 0x2a8   : > { %1664 = vmatmul.mubr.f32.gmra.mxu0 %v1663_v53  ;;  %2238 = vmatprep.subr.mxu0 %v14273_v30  ;;  %v14496_v53 = vld [vmem:[#allocation59_spill] sm:$0xff] }
 0x2a9   : > { %2099 = vmatmul.mubr.f32.gmra.mxu1 %v10122_v6  ;;  %2241 = vmatpush2.msra.mxu0 %v9316_v56  ;;  %v14498_v6 = vld [vmem:[#allocation60_spill] sm:$0xff] }
 0x2aa   : > { %2242 = vmatprep.subr.mxu0 %v14273_v30  ;;  %2104 = vmatprep.mubr.f32.mxu1 %v10133_v46  ;;  %v14497_v46 = vld [vmem:[#allocation52_spill] sm:$0xff] }
 0x2ab   : > { %2245 = vmatpush2.msra.mxu0 %v9327_v41  ;;  %2248 = vmatprep.mubr.f32.mxu0 %v14492_v61 }
 0x2ac   : > { %2251 = vmatmul.mubr.f32.vlgmr.msra.gmra.mxu0 %v14493_v1  ;;  %2622 = vmatprep.subr.mxu1 %v14273_v30  ;;  %v14519_v1 = vld [vmem:[#allocation77_spill] sm:$0xff] }
 0x2ad   : > { %2106 = vmatmul.mubr.f32.gmra.mxu1 %v10153_v12  ;;  %2257 = vmatprep.mubr.f32.mxu0 %v14494_v45  ;;  %v14500_v12 = vand.u32 4294901760, %v8926_v47  ;;  %v14504_v47 = vld [vmem:[#allocation65_spill] sm:$0xff] }
 0x2ae   : > { %2111 = vmatprep.mubr.f32.mxu1 %v10168_v59  ;;  %2624 = vmatpush2.msra.mxu1 %v14495_v22  ;;  %v14499_v59 = vand.u32 4294901760, %v14492_v61 }
 0x2af   : > { %2625 = vmatprep.subr.mxu1 %v14273_v30  ;;  %2984 = vmatprep.subr.mxu0 %v14273_v30 }
 0x2b0   : > { %2260 = vmatmul.mubr.f32.gmra.mxu0 %v14496_v53  ;;  %2627 = vmatpush2.msra.mxu1 %v14497_v46 }
 0x2b1   : > { %2113 = vmatmul.mubr.f32.gmra.mxu1 %v10180_v34  ;;  %2628 = vmatprep.subr.mxu1 %v14273_v30  ;;  %v14503_v34 = vand.u32 4294901760, %v14494_v45  ;;  %v14520_v45 = vand.u32 4294901760, %v9417_v9 }
 0x2b2   : > { %2266 = vmatprep.mubr.f32.mxu0 %v14498_v6  ;;  %2630 = vmatpush2.msra.mxu1 %v9271_v8 }
 0x2b3   : > { %2634 = vmatprep.mubr.f32.mxu1 %v14499_v59  ;;  %2988 = vmatpush1.msra.mxu0 %v14500_v12  ;;  %v14505_v59 = vand.u32 4294901760, %v14496_v53  ;;  %v14506_v12 = vld [vmem:[#allocation67_spill] sm:$0xff]  ;;  %v14521_v53 = vld [vmem:[#allocation9_spill] sm:$0xff] }
 0x2b4   : > { %2269 = vmatmul.mubr.f32.gmra.mxu0 %v14501_v18  ;;  %3369 = vmatprep.subr.mxu1 %v14273_v30  ;;  %v14515_v61 = vand.u32 4294901760, %v14506_v12 }
 0x2b5   : > { %2638 = vmatmul.mubr.f32.vlgmr.msra.gmra.mxu1 %v14502_v54  ;;  %2275 = vmatprep.mubr.f32.mxu0 %v9343_v7  ;;  %v14507_v54 = vand.u32 4294901760, %v14498_v6  ;;  %v14511_v6 = vand.u32 4294901760, %v8934_v50  ;;  %v14517_v50 = vld [vmem:[#allocation76_spill] sm:$0xff] }
 0x2b6   : > { %2645 = vmatprep.mubr.f32.mxu1 %v14503_v34  ;;  %3371 = vmatpush1.msra.mxu1 %v8911_v36  ;;  %v14508_v34 = vand.u32 4294901760, %v8929_v48  ;;  %v14509_v36 = vand.u32 4294901760, %v14501_v18  ;;  %v14512_v48 = vld [vmem:[#allocation71_spill] sm:$0xff]  ;;  %v14514_v18 = vld [vmem:[#allocation72_spill] sm:$0xff] }
 0x2b7   : > { %2989 = vmatprep.subr.mxu0 %v14273_v30  ;;  %3372 = vmatprep.subr.mxu1 %v14273_v30 }
 0x2b8   : > { %2278 = vmatmul.mubr.f32.gmra.mxu0 %v14504_v47  ;;  %3374 = vmatpush1.msra.mxu1 %v8913_v37  ;;  %v14510_v37 = vand.u32 4294901760, %v9343_v7  ;;  %v14516_v7 = vand.u32 4294901760, %v8938_v52  ;;  %v14523_v52 = vld [vmem:[#allocation79_spill] sm:$0xff] }
 0x2b9   : > { %2649 = vmatmul.mubr.f32.gmra.mxu1 %v14505_v59  ;;  %2284 = vmatprep.mubr.f32.mxu0 %v14506_v12  ;;  %v14526_v59 = vand.u32 4294901760, %v14514_v18  ;;  %v14528_v12 = vld [vmem:[#allocation83_spill] sm:$0xff] }
 0x2ba   : > { %2656 = vmatprep.mubr.f32.mxu1 %v14507_v54  ;;  %2993 = vmatpush1.msra.mxu0 %v14508_v34  ;;  %v14530_v54 = vld [vmem:[#allocation85_spill] sm:$0xff]  ;;  %v14531_v34 = vand.u32 4294901760, %v14519_v1 }
 0x2bb   : > { %2994 = vmatprep.subr.mxu0 %v14273_v30  ;;  %3375 = vmatprep.subr.mxu1 %v14273_v30 }
 0x2bc   : > { %2287 = vmatmul.mubr.f32.gmra.mxu0 %v9407_v10  ;;  %3377 = vmatpush1.msra.mxu1 %v8915_v38  ;;  %v14513_v38 = vand.u32 4294901760, %v14504_v47  ;;  %v14522_v47 = vand.u32 4294901760, %v14521_v53  ;;  %v14553_v53 = vld [vmem:[#allocation102_spill] sm:$0xff] }
 0x2bd   : > { %2660 = vmatmul.mubr.f32.gmra.mxu1 %v14509_v36  ;;  %2293 = vmatprep.mubr.f32.mxu0 %v9417_v9  ;;  %v14527_v9 = vand.u32 4294901760, %v8955_v62  ;;  %v14532_v36 = vand.u32 4294901760, %v8968_v2  ;;  %v14534_v62 = vld [vmem:[#allocation89_spill] sm:$0xff]  ;;  %v14537_v2 = vld [vmem:[#allocation90_spill] sm:$0xff] }
 0x2be   : > { %2667 = vmatprep.mubr.f32.mxu1 %v14510_v37  ;;  %2998 = vmatpush1.msra.mxu0 %v14511_v6  ;;  %v14536_v6 = vand.u32 4294901760, %v8983_v11  ;;  %v14542_v11 = vld [vmem:[#allocation95_spill] sm:$0xff] }
 0x2bf   : > { %2999 = vmatprep.subr.mxu0 %v14273_v30  ;;  %3378 = vmatprep.subr.mxu1 %v14273_v30 }
 0x2c0   : > { %2296 = vmatmul.mubr.f32.gmra.mxu0 %v14512_v48  ;;  %3380 = vmatpush1.msra.mxu1 %v8918_v42  ;;  %v14518_v42 = vand.u32 4294901760, %v9407_v10  ;;  %v14525_v10 = vld [vmem:[#allocation81_spill] sm:$0xff] }
 0x2c1   : > { %2671 = vmatmul.mubr.f32.gmra.mxu1 %v14513_v38  ;;  %2302 = vmatprep.mubr.f32.mxu0 %v14514_v18  ;;  %v14535_v37 = vand.u32 4294901760, %v14525_v10  ;;  %v14540_v38 = vand.u32 4294901760, %v14530_v54  ;;  %v14541_v18 = vand.u32 4294901760, %v8990_v15  ;;  %v14548_v15 = vld [vmem:[#allocation98_spill] sm:$0xff] }
 0x2c2   : > { %2678 = vmatprep.mubr.f32.mxu1 %v14515_v61  ;;  %3003 = vmatpush1.msra.mxu0 %v14516_v7  ;;  %v14544_v61 = vld [vmem:[#allocation96_spill] sm:$0xff]  ;;  %v14545_v7 = vand.u32 4294901760, %v14534_v62 }
 0x2c3   : > { %3004 = vmatprep.subr.mxu0 %v14273_v30  ;;  %3381 = vmatprep.subr.mxu1 %v14273_v30 }
 0x2c4   : > { %2305 = vmatmul.mubr.f32.gmra.mxu0 %v14517_v50  ;;  %3383 = vmatpush1.msra.mxu1 %v8920_v43  ;;  %v14524_v43 = vand.u32 4294901760, %v14512_v48  ;;  %v14539_v48 = vld [vmem:[#allocation91_spill] sm:$0xff] }
 0x2c5   : > { %2682 = vmatmul.mubr.f32.gmra.mxu1 %v14518_v42  ;;  %2311 = vmatprep.mubr.f32.mxu0 %v14519_v1  ;;  %v14551_v1 = vand.u32 4294901760, %v14539_v48 }
 0x2c6   : > { %2689 = vmatprep.mubr.f32.mxu1 %v14520_v45  ;;  %3008 = vmatpush1.msra.mxu0 %v14522_v47  ;;  %v14552_v45 = vand.u32 4294901760, %v9014_v28  ;;  %v14554_v47 = vld [vmem:[#allocation10_spill] sm:$0xff]  ;;  %v14560_v28 = vld [vmem:[#allocation107_spill] sm:$0xff] }
 0x2c7   : > { %3009 = vmatprep.subr.mxu0 %v14273_v30  ;;  %3384 = vmatprep.subr.mxu1 %v14273_v30 }
 0x2c8   : > { %2314 = vmatmul.mubr.f32.gmra.mxu0 %v14523_v52  ;;  %3386 = vmatpush1.msra.mxu1 %v8922_v44  ;;  %v14529_v44 = vand.u32 4294901760, %v14517_v50  ;;  %v14546_v50 = vld [vmem:[#allocation11_spill] sm:$0xff] }
 0x2c9   : > { %2693 = vmatmul.mubr.f32.gmra.mxu1 %v14524_v43  ;;  %2320 = vmatprep.mubr.f32.mxu0 %v14525_v10  ;;  %v14547_v42 = vand.u32 4294901760, %v14546_v50  ;;  %v14557_v43 = vand.u32 4294901760, %v14544_v61  ;;  %v14558_v10 = vld [vmem:[#allocation14_spill] sm:$0xff] }
 0x2ca   : > { %2700 = vmatprep.mubr.f32.mxu1 %v14526_v59  ;;  %3013 = vmatpush1.msra.mxu0 %v14527_v9  ;;  %v14559_v59 = vand.u32 4294901760, %v14558_v10  ;;  %v14561_v9 = vld [vmem:[#allocation12_spill] sm:$0xff] }
 0x2cb   : > { %3014 = vmatprep.subr.mxu0 %v14273_v30  ;;  %3387 = vmatprep.subr.mxu1 %v14273_v30 }
 0x2cc   : > { %2323 = vmatmul.mubr.f32.gmra.mxu0 %v14528_v12  ;;  %3389 = vmatpush1.msra.mxu1 %v8931_v49  ;;  %v14533_v49 = vand.u32 4294901760, %v14523_v52  ;;  %v14556_v52 = vld [vmem:[#allocation104_spill] sm:$0xff] }
 0x2cd   : > { %2704 = vmatmul.mubr.f32.gmra.mxu1 %v14529_v44  ;;  %2329 = vmatprep.mubr.f32.mxu0 %v14530_v54  ;;  %v14563_v44 = vld [vmem:[#allocation109_spill] sm:$0xff] }
 0x2ce   : > { %2711 = vmatprep.mubr.f32.mxu1 %v14531_v34  ;;  %3018 = vmatpush1.msra.mxu0 %v14532_v36  ;;  %v14565_v34 = vld [vmem:[#allocation16_spill] sm:$0xff]  ;;  %v14578_v50 = vand.u32 4294901760, %v14563_v44 }
 0x2cf   : > { %3019 = vmatprep.subr.mxu0 %v14273_v30  ;;  %3390 = vmatprep.subr.mxu1 %v14273_v30  ;;  %v14566_v36 = vand.u32 4294901760, %v14565_v34 }
 0x2d0   : > { %2332 = vmatmul.mubr.f32.gmra.mxu0 %v9552_v24  ;;  %3392 = vmatpush1.msra.mxu1 %v8947_v57  ;;  %v14538_v57 = vand.u32 4294901760, %v14528_v12  ;;  %v14562_v12 = vand.u32 4294901760, %v14548_v15 }
 0x2d1   : > { %2715 = vmatmul.mubr.f32.gmra.mxu1 %v14533_v49  ;;  %2338 = vmatprep.mubr.f32.mxu0 %v14534_v62  ;;  %v14567_v49 = vld [vmem:[#allocation110_spill] sm:$0xff]  ;;  %v14568_v62 = vld [vmem:[#allocation13_spill] sm:$0xff] }
 0x2d2   : > { %2722 = vmatprep.mubr.f32.mxu1 %v14535_v37  ;;  %3023 = vmatpush1.msra.mxu0 %v14536_v6  ;;  %v14569_v37 = vand.u32 4294901760, %v14553_v53  ;;  %v14570_v6 = vld [vmem:[#allocation111_spill] sm:$0xff] }
 0x2d3   : > { %3024 = vmatprep.subr.mxu0 %v14273_v30  ;;  %3393 = vmatprep.subr.mxu1 %v14273_v30 }
 0x2d4   : > { %2341 = vmatmul.mubr.f32.gmra.mxu0 %v14537_v2  ;;  %3395 = vmatpush1.msra.mxu1 %v8951_v60  ;;  %v14543_v60 = vand.u32 4294901760, %v9552_v24  ;;  %v14550_v24 = vld [vmem:[#allocation100_spill] sm:$0xff] }
 0x2d5   : > { %2726 = vmatmul.mubr.f32.gmra.mxu1 %v14538_v57  ;;  %2347 = vmatprep.mubr.f32.mxu0 %v14539_v48  ;;  %v14564_v54 = vand.u32 4294901760, %v14550_v24  ;;  %v14572_v57 = vld [vmem:[#allocation18_spill] sm:$0xff] }
 0x2d6   : > { %2733 = vmatprep.mubr.f32.mxu1 %v14540_v38  ;;  %3028 = vmatpush1.msra.mxu0 %v14541_v18  ;;  %v14573_v48 = vand.u32 4294901760, %v14572_v57  ;;  %v14574_v18 = vld [vmem:[#allocation115_spill] sm:$0xff]  ;;  %v14596_v57 = vld [vmem:[#allocation21_spill] sm:$0xff] }
 0x2d7   : > { %3029 = vmatprep.subr.mxu0 %v14273_v30  ;;  %3396 = vmatprep.subr.mxu1 %v14273_v30 }
 0x2d8   : > { %2350 = vmatmul.mubr.f32.gmra.mxu0 %v14542_v11  ;;  %3398 = vmatpush1.msra.mxu1 %v8971_v3  ;;  %v14549_v3 = vand.u32 4294901760, %v14537_v2  ;;  %v14571_v2 = vand.u32 4294901760, %v14556_v52 }
 0x2d9   : > { %2737 = vmatmul.mubr.f32.gmra.mxu1 %v14543_v60  ;;  %2356 = vmatprep.mubr.f32.mxu0 %v14544_v61  ;;  %v14576_v60 = vand.u32 4294901760, %v14560_v28  ;;  %v14577_v61 = vld [vmem:[#allocation116_spill] sm:$0xff] }
 0x2da   : > { %2744 = vmatprep.mubr.f32.mxu1 %v14545_v7  ;;  %3033 = vmatpush1.msra.mxu0 %v14547_v42  ;;  %v14579_v42 = vld [vmem:[#allocation20_spill] sm:$0xff] }
 0x2db   : > { %3034 = vmatprep.subr.mxu0 %v14273_v30  ;;  %3399 = vmatprep.subr.mxu1 %v14273_v30 }
 0x2dc   : > { %2359 = vmatmul.mubr.f32.gmra.mxu0 %v14548_v15  ;;  %3401 = vmatpush1.msra.mxu1 %v8986_v13  ;;  %v14555_v13 = vand.u32 4294901760, %v14542_v11  ;;  %v14575_v11 = vld [vmem:[#allocation15_spill] sm:$0xff]  ;;  %v14580_v15 = vand.u32 4294901760, %v14579_v42 }
 0x2dd   : > { %2748 = vmatmul.mubr.f32.gmra.mxu1 %v14549_v3  ;;  %2365 = vmatprep.mubr.f32.mxu0 %v14550_v24  ;;  %v14581_v24 = vld [vmem:[#allocation118_spill] sm:$0xff] }
 0x2de   : > { %2755 = vmatprep.mubr.f32.mxu1 %v14551_v1  ;;  %3038 = vmatpush1.msra.mxu0 %v14552_v45  ;;  %v14582_v1 = vld [vmem:[#allocation17_spill] sm:$0xff]  ;;  %v14583_v45 = vand.u32 4294901760, %v14567_v49 }
 0x2df   : > { %3039 = vmatprep.subr.mxu0 %v14273_v30  ;;  %3402 = vmatprep.subr.mxu1 %v14273_v30 }
 0x2e0   : > { %2368 = vmatmul.mubr.f32.gmra.mxu0 %v14553_v53  ;;  %3404 = vmatpush1.msra.mxu1 %v14554_v47  ;;  %v14584_v53 = vld [vmem:[#allocation120_spill] sm:$0xff] }
 0x2e1   : > { %2759 = vmatmul.mubr.f32.gmra.mxu1 %v14555_v13  ;;  %2374 = vmatprep.mubr.f32.mxu0 %v14556_v52  ;;  %v14585_v13 = vand.u32 4294901760, %v14570_v6  ;;  %v14586_v52 = vld [vmem:[#allocation22_spill] sm:$0xff] }
 0x2e2   : > { %2766 = vmatprep.mubr.f32.mxu1 %v14557_v43  ;;  %3043 = vmatpush1.msra.mxu0 %v14559_v59  ;;  %v14587_v43 = vand.u32 4294901760, %v14586_v52  ;;  %v14588_v59 = vld [vmem:[#allocation122_spill] sm:$0xff] }
 0x2e3   : > { %3044 = vmatprep.subr.mxu0 %v14273_v30  ;;  %3405 = vmatprep.subr.mxu1 %v14273_v30 }
 0x2e4   : > { %2377 = vmatmul.mubr.f32.gmra.mxu0 %v14560_v28  ;;  %3407 = vmatpush1.msra.mxu1 %v14561_v9  ;;  %v14589_v28 = vld [vmem:[#allocation19_spill] sm:$0xff] }
 0x2e5   : > { %2770 = vmatmul.mubr.f32.gmra.mxu1 %v14562_v12  ;;  %2383 = vmatprep.mubr.f32.mxu0 %v14563_v44  ;;  %v14590_v12 = vand.u32 4294901760, %v14574_v18  ;;  %v14591_v44 = vld [vmem:[#allocation124_spill] sm:$0xff] }
 0x2e6   : > { %2777 = vmatprep.mubr.f32.mxu1 %v14564_v54  ;;  %3048 = vmatpush1.msra.mxu0 %v14566_v36  ;;  %v14592_v36 = vand.u32 4294901760, %v14577_v61  ;;  %v14606_v52 = vand.u32 4294901760, %v14591_v44 }
 0x2e7   : > { %3049 = vmatprep.subr.mxu0 %v14273_v30  ;;  %3408 = vmatprep.subr.mxu1 %v14273_v30 }
 0x2e8   : > { %2386 = vmatmul.mubr.f32.gmra.mxu0 %v14567_v49  ;;  %3410 = vmatpush1.msra.mxu1 %v14568_v62  ;;  %v14593_v49 = vld [vmem:[#allocation24_spill] sm:$0xff] }
 0x2e9   : > { %2781 = vmatmul.mubr.f32.gmra.mxu1 %v14569_v37  ;;  %2392 = vmatprep.mubr.f32.mxu0 %v14570_v6  ;;  %v14594_v62 = vand.u32 4294901760, %v14593_v49  ;;  %v14612_v49 = vld [vmem:[#allocation136_spill] sm:$0xff] }
 0x2ea   : > { %2788 = vmatprep.mubr.f32.mxu1 %v14571_v2  ;;  %3053 = vmatpush1.msra.mxu0 %v14573_v48  ;;  %v14595_v2 = vld [vmem:[#allocation127_spill] sm:$0xff] }
 0x2eb   : > { %3054 = vmatprep.subr.mxu0 %v14273_v30  ;;  %3411 = vmatprep.subr.mxu1 %v14273_v30 }
 0x2ec   : > { %v1200_v38 = vpop.f32.mrf.mxu0  ;;  %2395 = vmatmul.mubr.f32.gmra.mxu0 %v14574_v18  ;;  %3413 = vmatpush1.msra.mxu1 %v14575_v11  ;;  %v14598_v18 = vld [vmem:[#allocation129_spill] sm:$0xff] }
 0x2ed   : > { %2792 = vmatmul.mubr.f32.gmra.mxu1 %v14576_v60  ;;  %2401 = vmatprep.mubr.f32.mxu0 %v14577_v61  ;;  %v14599_v61 = vand.u32 4294901760, %v14584_v53 }
 0x2ee   : > { %v1202_v7 = vpop.f32.mrf.mxu0  ;;  %2799 = vmatprep.mubr.f32.mxu1 %v14578_v50  ;;  %3058 = vmatpush1.msra.mxu0 %v14580_v15 }
 0x2ef   : > { %3059 = vmatprep.subr.mxu0 %v14273_v30  ;;  %3414 = vmatprep.subr.mxu1 %v14273_v30  ;;  %v14600_v7 = vld [vmem:[#allocation26_spill] sm:$0xff] }
 0x2f0   : > { %v1215_v3 = vpop.f32.mrf.mxu0  ;;  %2404 = vmatmul.mubr.f32.gmra.mxu0 %v14581_v24  ;;  %3416 = vmatpush1.msra.mxu1 %v14582_v1  ;;  %v14601_v50 = vand.u32 4294901760, %v14600_v7  ;;  %v14602_v1 = vld [vmem:[#allocation130_spill] sm:$0xff]  ;;  %v14618_v7 = vld [vmem:[#allocation140_spill] sm:$0xff] }
 0x2f1   : > { %2803 = vmatmul.mubr.f32.gmra.mxu1 %v14583_v45  ;;  %2410 = vmatprep.mubr.f32.mxu0 %v14584_v53 }
 0x2f2   : > { %v1217_v47 = vpop.f32.mrf.mxu0  ;;  %2810 = vmatprep.mubr.f32.mxu1 %v14585_v13  ;;  %3063 = vmatpush1.msra.mxu0 %v14587_v43  ;;  %v14607_v43 = vld [vmem:[#allocation28_spill] sm:$0xff] }
 0x2f3   : > { %3064 = vmatprep.subr.mxu0 %v14273_v30  ;;  %3417 = vmatprep.subr.mxu1 %v14273_v30  ;;  %v14605_v47 = vld [vmem:[#allocation131_spill] sm:$0xff] }
 0x2f4   : > { %v1230_v10 = vpop.f32.mrf.mxu0  ;;  %2413 = vmatmul.mubr.f32.gmra.mxu0 %v14588_v59  ;;  %3419 = vmatpush2.msra.mxu1 %v14589_v28  ;;  %v14608_v28 = vand.u32 4294901760, %v14607_v43 }
 0x2f5   : > { %v1897_v9 = vpop.f32.mrf.mxu1  ;;  %2814 = vmatmul.mubr.f32.gmra.mxu1 %v14590_v12  ;;  %2419 = vmatprep.mubr.f32.mxu0 %v14591_v44 }
 0x2f6   : > { %v10444_v54 = vadd.f32 %v1897_v9, %v1200_v38  ;;  %v1232_v34 = vpop.f32.mrf.mxu0  ;;  %2821 = vmatprep.mubr.f32.mxu1 %v14592_v36  ;;  %3068 = vmatpush2.msra.mxu0 %v14594_v62  ;;  %v14597_v38 = vand.u32 4294901760, %v14581_v24  ;;  %v14603_v24 = vld [vmem:[#allocation23_spill] sm:$0xff] }
 0x2f7   : > { %v1899_v37 = vpop.f32.mrf.mxu1  ;;  %3069 = vmatprep.subr.mxu0 %v14273_v30  ;;  %3420 = vmatprep.subr.mxu1 %v14273_v30  ;;  %v14609_v34 = vld [vmem:[#allocation135_spill] sm:$0xff] }
 0x2f8   : > { %v1245_v6 = vpop.f32.mrf.mxu0  ;;  %2422 = vmatmul.mubr.f32.gmra.mxu0 %v14595_v2  ;;  %3422 = vmatpush2.msra.mxu1 %v14596_v57  ;;  %v14613_v37 = vand.u32 4294901760, %v14598_v18  ;;  %v14614_v57 = vld [vmem:[#allocation30_spill] sm:$0xff] }
 0x2f9   : > { %v1904_v48 = vpop.f32.mrf.mxu1  ;;  %2825 = vmatmul.mubr.f32.gmra.mxu1 %v14597_v38  ;;  %2428 = vmatprep.mubr.f32.mxu0 %v14598_v18 }
 0x2fa   : > { %v10457_v11 = vadd.f32 %v1904_v48, %v1215_v3  ;;  %v1247_v60 = vpop.f32.mrf.mxu0  ;;  %2832 = vmatprep.mubr.f32.mxu1 %v14599_v61  ;;  %3073 = vmatpush2.msra.mxu0 %v14601_v50  ;;  %v14604_v3 = vand.u32 4294901760, %v14588_v59  ;;  %v14610_v59 = vld [vmem:[#allocation25_spill] sm:$0xff]  ;;  %v14615_v48 = vand.u32 4294901760, %v14614_v57  ;;  %v14616_v61 = vld [vmem:[#allocation138_spill] sm:$0xff] }
 0x2fb   : > { %v1906_v42 = vpop.f32.mrf.mxu1  ;;  %3074 = vmatprep.subr.mxu0 %v14273_v30  ;;  %3423 = vmatprep.subr.mxu1 %v14273_v30 }
 0x2fc   : > { %v1260_v15 = vpop.f32.mrf.mxu0  ;;  %2431 = vmatmul.mubr.f32.gmra.mxu0 %v14602_v1  ;;  %3425 = vmatpush2.msra.mxu1 %v14603_v24  ;;  %v14619_v42 = vand.u32 4294901760, %v14605_v47  ;;  %v14620_v24 = vld [vmem:[#allocation32_spill] sm:$0xff] }
 0x2fd   : > { %v1911_v45 = vpop.f32.mrf.mxu1  ;;  %2836 = vmatmul.mubr.f32.gmra.mxu1 %v14604_v3  ;;  %2437 = vmatprep.mubr.f32.mxu0 %v14605_v47 }
 0x2fe   : > { %v10470_v53 = vadd.f32 %v1911_v45, %v1230_v10  ;;  %v1262_v13 = vpop.f32.mrf.mxu0  ;;  %2843 = vmatprep.mubr.f32.mxu1 %v14606_v52  ;;  %3078 = vmatpush2.msra.mxu0 %v14608_v28  ;;  %v14611_v10 = vand.u32 4294901760, %v14595_v2  ;;  %v14621_v45 = vand.u32 4294901760, %v14620_v24  ;;  %v14624_v52 = vld [vmem:[#allocation144_spill] sm:$0xff]  ;;  %v14625_v28 = vand.u32 4294901760, %v14612_v49 }
 0x2ff   : > { %v1913_v9 = vpop.f32.mrf.mxu1  ;;  %3079 = vmatprep.subr.mxu0 %v14273_v30  ;;  %3426 = vmatprep.subr.mxu1 %v14273_v30  ;;  %v14622_v13 = vld [vmem:[#allocation142_spill] sm:$0xff] }
 0x300   : > { %v1275_v12 = vpop.f32.mrf.mxu0  ;;  %2440 = vmatmul.mubr.f32.gmra.mxu0 %v14609_v34  ;;  %3428 = vmatpush2.msra.mxu1 %v14610_v59  ;;  %v14626_v9 = vld [vmem:[#allocation34_spill] sm:$0xff] }
 0x301   : > { %v1918_v36 = vpop.f32.mrf.mxu1  ;;  %2847 = vmatmul.mubr.f32.gmra.mxu1 %v14611_v10  ;;  %2446 = vmatprep.mubr.f32.mxu0 %v14612_v49  ;;  %v14627_v59 = vand.u32 4294901760, %v14626_v9  ;;  %v14628_v10 = vld [vmem:[#allocation147_spill] sm:$0xff] }
 0x302   : > { %v10483_v44 = vadd.f32 %v1918_v36, %v1245_v6  ;;  %v1277_v62 = vpop.f32.mrf.mxu0  ;;  %2854 = vmatprep.mubr.f32.mxu1 %v14613_v37  ;;  %3083 = vmatpush2.msra.mxu0 %v14615_v48  ;;  %v14617_v6 = vand.u32 4294901760, %v14602_v1  ;;  %v14631_v37 = vld [vmem:[#allocation149_spill] sm:$0xff]  ;;  %v14632_v48 = vand.u32 4294901760, %v14618_v7 }
 0x303   : > { %v1920_v38 = vpop.f32.mrf.mxu1  ;;  %3084 = vmatprep.subr.mxu0 %v14273_v30  ;;  %3429 = vmatprep.subr.mxu1 %v14273_v30 }
 0x304   : > { %v1290_v60 = vpop.f32.mrf.mxu0  ;;  %2449 = vmatmul.mubr.f32.gmra.mxu0 %v14616_v61  ;;  %3431 = vmatpush2.msra.mxu1 %v14453_v17  ;;  %v14633_v38 = vld [vmem:[#allocation37_spill] sm:$0xff] }
 0x305   : > { %v1925_v2 = vpop.f32.mrf.mxu1  ;;  %2858 = vmatmul.mubr.f32.gmra.mxu1 %v14617_v6  ;;  %2455 = vmatprep.mubr.f32.mxu0 %v14618_v7 }
 0x306   : > { %v10496_v18 = vadd.f32 %v1925_v2, %v1260_v15  ;;  %v1292_v50 = vpop.f32.mrf.mxu0  ;;  %2865 = vmatprep.mubr.f32.mxu1 %v14619_v42  ;;  %3088 = vmatpush2.msra.mxu0 %v14621_v45  ;;  %v14623_v15 = vand.u32 4294901760, %v14609_v34  ;;  %v14629_v34 = vld [vmem:[#allocation31_spill] sm:$0xff]  ;;  %v14634_v2 = vand.u32 4294901760, %v14633_v38  ;;  %v14635_v42 = vld [vmem:[#allocation150_spill] sm:$0xff]  ;;  %v14649_v38 = vld [vmem:[#allocation29_spill] sm:$0xff] }
 0x307   : > { %v1927_v3 = vpop.f32.mrf.mxu1  ;;  %3089 = vmatprep.subr.mxu0 %v14273_v30  ;;  %3432 = vmatprep.subr.mxu1 %v14273_v30  ;;  %v14638_v45 = vld [vmem:[#allocation151_spill] sm:$0xff] }
 0x308   : > { %v1305_v17 = vpop.f32.mrf.mxu0  ;;  %2458 = vmatmul.mubr.f32.gmra.mxu0 %v14622_v13  ;;  %3434 = vmatpush2.msra.mxu1 %v14461_v35 }
 0x309   : > { %v1932_v1 = vpop.f32.mrf.mxu1  ;;  %2869 = vmatmul.mubr.f32.gmra.mxu1 %v14623_v15  ;;  %2464 = vmatprep.mubr.f32.mxu0 %v14624_v52  ;;  %v14640_v15 = vld [vmem:[#allocation38_spill] sm:$0xff] }
 0x30a   : > { %v10509_v47 = vadd.f32 %v1932_v1, %v1275_v12  ;;  %v1307_v43 = vpop.f32.mrf.mxu0  ;;  %2876 = vmatprep.mubr.f32.mxu1 %v14625_v28  ;;  %3093 = vmatpush2.msra.mxu0 %v14627_v59  ;;  %v14630_v12 = vand.u32 4294901760, %v14616_v61  ;;  %v14636_v61 = vld [vmem:[#allocation33_spill] sm:$0xff]  ;;  %v14639_v1 = vand.u32 4294901760, %v14624_v52  ;;  %v14642_v59 = vld [vmem:[#allocation152_spill] sm:$0xff] }
 0x30b   : > { %v1934_v36 = vpop.f32.mrf.mxu1  ;;  %3094 = vmatprep.subr.mxu0 %v14273_v30  ;;  %3435 = vmatprep.subr.mxu1 %v14273_v30  ;;  %v14641_v43 = vand.u32 4294901760, %v14640_v15 }
 0x30c   : > { %v1320_v35 = vpop.f32.mrf.mxu0  ;;  %2467 = vmatmul.mubr.f32.gmra.mxu0 %v14628_v10  ;;  %3437 = vmatpush2.msra.mxu1 %v14629_v34  ;;  %v14644_v36 = vld [vmem:[#allocation27_spill] sm:$0xff] }
 0x30d   : > { %v1939_v62 = vpop.f32.mrf.mxu1  ;;  %2880 = vmatmul.mubr.f32.gmra.mxu1 %v14630_v12  ;;  %2473 = vmatprep.mubr.f32.mxu0 %v14631_v37  ;;  %v14646_v12 = vand.u32 4294901760, %v14480_v31 }
 0x30e   : > { %v10522_v49 = vadd.f32 %v1939_v62, %v1290_v60  ;;  %v1322_v57 = vpop.f32.mrf.mxu0  ;;  %2887 = vmatprep.mubr.f32.mxu1 %v14632_v48  ;;  %3098 = vmatpush2.msra.mxu0 %v14634_v2  ;;  %v14637_v60 = vand.u32 4294901760, %v14622_v13  ;;  %v14645_v62 = vand.u32 4294901760, %v14631_v37  ;;  %v14647_v48 = vld [vmem:[#allocation153_spill] sm:$0xff]  ;;  %v14650_v2 = vand.u32 4294901760, %v14638_v45 }
 0x30f   : > { %v1941_v6 = vpop.f32.mrf.mxu1  ;;  %3099 = vmatprep.subr.mxu0 %v14273_v30  ;;  %3438 = vmatprep.subr.mxu1 %v14273_v30  ;;  %v14655_v15 = vand.u32 4294901760, %v14647_v48 }
 0x310   : > { %v1335_v50 = vpop.f32.mrf.mxu0  ;;  %2476 = vmatmul.mubr.f32.gmra.mxu0 %v14635_v42  ;;  %3440 = vmatpush2.msra.mxu1 %v14636_v61  ;;  %v14651_v6 = vand.u32 4294901760, %v14483_v20 }
 0x311   : > { %v1946_v24 = vpop.f32.mrf.mxu1  ;;  %2891 = vmatmul.mubr.f32.gmra.mxu1 %v14637_v60  ;;  %2482 = vmatprep.mubr.f32.mxu0 %v14638_v45  ;;  %v14653_v60 = vand.u32 4294901760, %v14644_v36  ;;  %v14654_v45 = vand.u32 4294901760, %v14485_v23 }
 0x312   : > { %v10535_v7 = vadd.f32 %v1946_v24, %v1305_v17  ;;  %v1337_v3 = vpop.f32.mrf.mxu0  ;;  %2898 = vmatprep.mubr.f32.mxu1 %v14639_v1  ;;  %3103 = vmatpush2.msra.mxu0 %v14641_v43  ;;  %v14643_v17 = vand.u32 4294901760, %v14628_v10 }
 0x313   : > { %v1948_v28 = vpop.f32.mrf.mxu1  ;;  %3104 = vmatprep.subr.mxu0 %v14273_v30  ;;  %3441 = vmatprep.subr.mxu1 %v14273_v30 }
 0x314   : > { %v1350_v9 = vpop.f32.mrf.mxu0  ;;  %2485 = vmatmul.mubr.f32.gmra.mxu0 %v14642_v59  ;;  %3443 = vmatpush2.msra.mxu1 %v14477_v14  ;;  %v14656_v28 = vand.u32 4294901760, %v14649_v38 }
 0x315   : > { %v1953_v13 = vpop.f32.mrf.mxu1  ;;  %2902 = vmatmul.mubr.f32.gmra.mxu1 %v14643_v17  ;;  %2491 = vmatprep.mubr.f32.mxu0 %v14644_v36  ;;  %v14658_v17 = vand.u32 4294901760, %v10120_v33  ;;  %v14659_v36 = vand.u32 4294901760, %v14490_v19  ;;  %v14662_v19 = vand.u32 4294901760, %v10150_v16 }
 0x316   : > { %v10548_v52 = vadd.f32 %v1953_v13, %v1320_v35  ;;  %v1352_v34 = vpop.f32.mrf.mxu0  ;;  %2909 = vmatprep.mubr.f32.mxu1 %v14645_v62  ;;  %3108 = vmatpush2.msra.mxu0 %v14646_v12  ;;  %v14648_v35 = vand.u32 4294901760, %v14635_v42  ;;  %v14660_v12 = vand.u32 4294901760, %v10131_v55 }
 0x317   : > { %v1955_v57 = vpop.f32.mrf.mxu1  ;;  %3109 = vmatprep.subr.mxu0 %v14273_v30  ;;  %3444 = vmatprep.subr.mxu1 %v14273_v30 }
 0x318   : > { %v1365_v14 = vpop.f32.mrf.mxu0  ;;  %2494 = vmatmul.mubr.f32.gmra.mxu0 %v14647_v48  ;;  %3446 = vmatpush2.msra.mxu1 %v14481_v25 }
 0x319   : > { %v1960_v10 = vpop.f32.mrf.mxu1  ;;  %2913 = vmatmul.mubr.f32.gmra.mxu1 %v14648_v35  ;;  %2500 = vmatprep.mubr.f32.mxu0 %v14649_v38  ;;  %v14665_v35 = vand.u32 4294901760, %v9327_v41  ;;  %v14666_v38 = vld [vmem:[#allocation43_spill] sm:$0xff] }
 0x31a   : > { %v10561_v37 = vadd.f32 %v1960_v10, %v1335_v50  ;;  %v1367_v31 = vpop.f32.mrf.mxu0  ;;  %2920 = vmatprep.mubr.f32.mxu1 %v14650_v2  ;;  %3113 = vmatpush2.msra.mxu0 %v14651_v6  ;;  %v14652_v50 = vand.u32 4294901760, %v14642_v59  ;;  %v14668_v2 = vand.u32 4294901760, %v10177_v63  ;;  %v14669_v6 = vld [vmem:[#allocation45_spill] sm:$0xff] }
 0x31b   : > { %v1962_v61 = vpop.f32.mrf.mxu1  ;;  %3114 = vmatprep.subr.mxu0 %v14273_v30  ;;  %3447 = vmatprep.subr.mxu1 %v14273_v30 }
 0x31c   : > { %v1380_v25 = vpop.f32.mrf.mxu0  ;;  %2503 = vmatmul.mubr.f32.gmra.mxu0 %v10120_v33  ;;  %3449 = vmatpush2.msra.mxu1 %v14484_v26 }
 0x31d   : > { %v1967_v42 = vpop.f32.mrf.mxu1  ;;  %2924 = vmatmul.mubr.f32.gmra.mxu1 %v14652_v50  ;;  %2509 = vmatprep.mubr.f32.mxu0 %v10131_v55  ;;  %v14664_v55 = vand.u32 4294901760, %v10161_v5  ;;  %v14671_v50 = vld [vmem:[#allocation54_spill] sm:$0xff] }
 0x31e   : > { %v10574_v24 = vadd.f32 %v1967_v42, %v1350_v9  ;;  %v1382_v20 = vpop.f32.mrf.mxu0  ;;  %2931 = vmatprep.mubr.f32.mxu1 %v14653_v60  ;;  %3118 = vmatpush2.msra.mxu0 %v14654_v45  ;;  %v14657_v9 = vand.u32 4294901760, %v14488_v29 }
 0x31f   : > { %v1969_v3 = vpop.f32.mrf.mxu1  ;;  %3119 = vmatprep.subr.mxu0 %v14273_v30  ;;  %3450 = vmatprep.subr.mxu1 %v14273_v30  ;;  %v14672_v20 = vand.u32 4294901760, %v10200_v0 }
 0x320   : > { %v1395_v26 = vpop.f32.mrf.mxu0  ;;  %2512 = vmatmul.mubr.f32.gmra.mxu0 %v10150_v16  ;;  %3452 = vmatpush2.msra.mxu1 %v14487_v39  ;;  %v14667_v16 = vld [vmem:[#allocation44_spill] sm:$0xff] }
 0x321   : > { %v1974_v1 = vpop.f32.mrf.mxu1  ;;  %2935 = vmatmul.mubr.f32.gmra.mxu1 %v14655_v15  ;;  %2518 = vmatprep.mubr.f32.mxu0 %v10161_v5 }
 0x322   : > { %v10587_v43 = vadd.f32 %v1974_v1, %v1365_v14  ;;  %v1397_v23 = vpop.f32.mrf.mxu0  ;;  %2942 = vmatprep.mubr.f32.mxu1 %v14656_v28  ;;  %3123 = vmatpush2.msra.mxu0 %v14657_v9  ;;  %v14663_v14 = vand.u32 4294901760, %v9316_v56  ;;  %v14676_v28 = vld [vmem:[#allocation63_spill] sm:$0xff] }
 0x323   : > { %v1976_v59 = vpop.f32.mrf.mxu1  ;;  %3124 = vmatprep.subr.mxu0 %v14273_v30  ;;  %3453 = vmatprep.subr.mxu1 %v14273_v30 }
 0x324   : > { %v1410_v39 = vpop.f32.mrf.mxu0  ;;  %2521 = vmatmul.mubr.f32.gmra.mxu0 %v10177_v63  ;;  %3455 = vmatpush2.msra.mxu1 %v14489_v27  ;;  %v14661_v27 = vand.u32 4294901760, %v14491_v4  ;;  %v14677_v59 = vld [vmem:[#allocation64_spill] sm:$0xff] }
 0x325   : > { %v1981_v13 = vpop.f32.mrf.mxu1  ;;  %2946 = vmatmul.mubr.f32.gmra.mxu1 %v14658_v17  ;;  %3128 = vmatpush2.msra.mxu0 %v14659_v36 }
 0x326   : > { %v10601_v34 = vadd.f32 %v1981_v13, %v1380_v25  ;;  %v1412_v29 = vpop.f32.mrf.mxu0  ;;  %3129 = vmatprep.subr.mxu0 %v14273_v30  ;;  %2527 = vmatprep.mubr.f32.mxu0 %v10190_v40  ;;  %v14670_v25 = vand.u32 4294901760, %v10190_v40 }
 0x327   : > { %v1983_v62 = vpop.f32.mrf.mxu1  ;;  %2953 = vmatprep.mubr.f32.mxu1 %v14660_v12  ;;  %3133 = vmatpush2.msra.mxu0 %v14661_v27  ;;  %v14678_v29 = vld [vmem:[#allocation66_spill] sm:$0xff]  ;;  %v14679_v12 = vld [vmem:[#allocation68_spill] sm:$0xff] }
 0x328   : > { %v1425_v57 = vpop.f32.mrf.mxu0  ;;  %2530 = vmatmul.mubr.f32.gmra.mxu0 %v10200_v0  ;;  %3134 = vmatprep.subr.mxu0 %v14273_v30  ;;  %v14675_v0 = vld [vmem:[#allocation61_spill] sm:$0xff] }
 0x329   : > { %v1988_v33 = vpop.f32.mrf.mxu1  ;;  %2957 = vmatmul.mubr.f32.gmra.mxu1 %v14662_v19  ;;  %3138 = vmatpush2.msra.mxu0 %v14663_v14  ;;  %v14680_v14 = vld [vmem:[#allocation69_spill] sm:$0xff] }
 0x32a   : > { %v10615_v48 = vadd.f32 %v1988_v33, %v1395_v26  ;;  %v1427_v10 = vpop.f32.mrf.mxu0  ;;  %3139 = vmatprep.subr.mxu0 %v14273_v30  ;;  %2964 = vmatprep.mubr.f32.mxu1 %v14664_v55  ;;  %v14681_v55 = vld [vmem:[#allocation70_spill] sm:$0xff] }
 0x32b   : > { %v1990_v4 = vpop.f32.mrf.mxu1  ;;  %3143 = vmatpush2.msra.mxu0 %v14665_v35  ;;  %3145 = vmatprep.mubr.f32.mxu0 %v14666_v38 }
 0x32c   : > { %v1440_v31 = vpop.f32.mrf.mxu0  ;;  %3147 = vmatmul.mubr.f32.vlgmr.msra.gmra.mxu0 %v14667_v16  ;;  %3456 = vmatprep.subr.mxu1 %v14273_v30 }
 0x32d   : > { %v1995_v56 = vpop.f32.mrf.mxu1  ;;  %2968 = vmatmul.mubr.f32.gmra.mxu1 %v14668_v2  ;;  %3152 = vmatprep.mubr.f32.mxu0 %v14669_v6  ;;  %v14683_v2 = vld [vmem:[#allocation74_spill] sm:$0xff] }
 0x32e   : > { %v10628_v61 = vadd.f32 %v1995_v56, %v1410_v39  ;;  %v1442_v5 = vpop.f32.mrf.mxu0  ;;  %2975 = vmatprep.mubr.f32.mxu1 %v14670_v25  ;;  %3458 = vmatpush2.msra.mxu1 %v14495_v22  ;;  %v14673_v22 = vld [vmem:[#allocation55_spill] sm:$0xff] }
 0x32f   : > { %v1997_v41 = vpop.f32.mrf.mxu1  ;;  %3459 = vmatprep.subr.mxu1 %v14273_v30  ;;  %4587 = vmatprep.subr.mxu0 %v14273_v30 }
 0x330   : > { %v1455_v42 = vpop.f32.mrf.mxu0  ;;  %3154 = vmatmul.mubr.f32.gmra.mxu0 %v14671_v50  ;;  %3461 = vmatpush2.msra.mxu1 %v14497_v46  ;;  %v14674_v46 = vld [vmem:[#allocation58_spill] sm:$0xff] }
 0x331   : > { %v2002_v63 = vpop.f32.mrf.mxu1  ;;  %2979 = vmatmul.mubr.f32.gmra.mxu1 %v14672_v20  ;;  %3462 = vmatprep.subr.mxu1 %v14273_v30 }
 0x332   : > { %v10640_v40 = vadd.f32 %v2002_v63, %v1425_v57  ;;  %v1457_v60 = vpop.f32.mrf.mxu0  ;;  %3159 = vmatprep.mubr.f32.mxu0 %v14673_v22  ;;  %3464 = vmatpush2.msra.mxu1 %v9271_v8  ;;  %v14685_v63 = vld [vmem:[#allocation78_spill] sm:$0xff] }
 0x333   : > { %v2004_v45 = vpop.f32.mrf.mxu1  ;;  %3466 = vmatprep.mubr.f32.mxu1 %v14666_v38  ;;  %5164 = vmatprep.subr.mxu1 %v14273_v30 }
 0x334   : > { %v1470_v3 = vpop.f32.mrf.mxu0  ;;  %3161 = vmatmul.mubr.f32.gmra.mxu0 %v14674_v46 }
 0x335   : > { %v2009_v26 = vpop.f32.mrf.mxu1  ;;  %3468 = vmatmul.mubr.f32.vlgmr.msra.gmra.mxu1 %v14667_v16  ;;  %3166 = vmatprep.mubr.f32.mxu0 %v14675_v0  ;;  %v14682_v16 = vld [vmem:[#allocation73_spill] sm:$0xff] }
 0x336   : > { %v10649_v1 = vadd.f32 %v2009_v26, %v1440_v31  ;;  %v1472_v15 = vpop.f32.mrf.mxu0  ;;  %3473 = vmatprep.mubr.f32.mxu1 %v14669_v6  ;;  %v14687_v26 = vld [vmem:[#allocation82_spill] sm:$0xff] }
 0x337   : > { %v2011_v23 = vpop.f32.mrf.mxu1 }
 0x338   : > { %v1485_v8 = vpop.f32.mrf.mxu0  ;;  %3168 = vmatmul.mubr.f32.gmra.mxu0 %v14676_v28 }
 0x339   : > { %v2016_v9 = vpop.f32.mrf.mxu1  ;;  %3475 = vmatmul.mubr.f32.gmra.mxu1 %v14671_v50  ;;  %3173 = vmatprep.mubr.f32.mxu0 %v14677_v59 }
 0x33a   : > { %v10655_v39 = vadd.f32 %v2016_v9, %v1455_v42  ;;  %v1487_v13 = vpop.f32.mrf.mxu0  ;;  %3480 = vmatprep.mubr.f32.mxu1 %v14673_v22  ;;  %v14684_v42 = vld [vmem:[#allocation75_spill] sm:$0xff] }
 0x33b   : > { %v2018_v17 = vpop.f32.mrf.mxu1 }
 0x33c   : > { %v1500_v36 = vpop.f32.mrf.mxu0  ;;  %3175 = vmatmul.mubr.f32.gmra.mxu0 %v14678_v29 }
 0x33d   : > { %v2023_v62 = vpop.f32.mrf.mxu1  ;;  %3482 = vmatmul.mubr.f32.gmra.mxu1 %v14674_v46  ;;  %3180 = vmatprep.mubr.f32.mxu0 %v14679_v12 }
 0x33e   : > { %v10661_v27 = vadd.f32 %v2023_v62, %v1470_v3  ;;  %v1502_v57 = vpop.f32.mrf.mxu0  ;;  %3487 = vmatprep.mubr.f32.mxu1 %v14675_v0  ;;  %v14686_v3 = vld [vmem:[#allocation80_spill] sm:$0xff]  ;;  %v14690_v62 = vld [vmem:[#allocation87_spill] sm:$0xff] }
 0x33f   : > { %v2025_v33 = vpop.f32.mrf.mxu1  ;;  %v14691_v57 = vld [vmem:[#allocation88_spill] sm:$0xff] }
 0x340   : > { %v1515_v19 = vpop.f32.mrf.mxu0  ;;  %3182 = vmatmul.mubr.f32.gmra.mxu0 %v14680_v14 }
 0x341   : > { %v2030_v10 = vpop.f32.mrf.mxu1  ;;  %3489 = vmatmul.mubr.f32.gmra.mxu1 %v14676_v28  ;;  %3187 = vmatprep.mubr.f32.mxu0 %v14681_v55  ;;  %v14688_v28 = vld [vmem:[#allocation84_spill] sm:$0xff] }
 0x342   : > { %v10667_v4 = vadd.f32 %v2030_v10, %v1485_v8  ;;  %v1517_v35 = vpop.f32.mrf.mxu0  ;;  %3494 = vmatprep.mubr.f32.mxu1 %v14677_v59  ;;  %v14689_v59 = vld [vmem:[#allocation86_spill] sm:$0xff] }
 0x343   : > { %v2032_v38 = vpop.f32.mrf.mxu1 }
 0x344   : > { %v1530_v31 = vpop.f32.mrf.mxu0  ;;  %3189 = vmatmul.mubr.f32.gmra.mxu0 %v14682_v16  ;;  %v14693_v38 = vld [vmem:[#allocation93_spill] sm:$0xff] }
 0x345   : > { %v2037_v56 = vpop.f32.mrf.mxu1  ;;  %3496 = vmatmul.mubr.f32.gmra.mxu1 %v14678_v29  ;;  %3194 = vmatprep.mubr.f32.mxu0 %v14683_v2 }
 0x346   : > { %v10673_v6 = vadd.f32 %v2037_v56, %v1500_v36  ;;  %v1532_v5 = vpop.f32.mrf.mxu0  ;;  %3501 = vmatprep.mubr.f32.mxu1 %v14679_v12 }
 0x347   : > { %v2039_v25 = vpop.f32.mrf.mxu1  ;;  %v14694_v5 = vld [vmem:[#allocation94_spill] sm:$0xff] }
 0x348   : > { %v1545_v41 = vpop.f32.mrf.mxu0  ;;  %3196 = vmatmul.mubr.f32.gmra.mxu0 %v14684_v42 }
 0x349   : > { %v2044_v50 = vpop.f32.mrf.mxu1  ;;  %3503 = vmatmul.mubr.f32.gmra.mxu1 %v14680_v14  ;;  %3201 = vmatprep.mubr.f32.mxu0 %v14685_v63 }
 0x34a   : > { %v10679_v20 = vadd.f32 %v2044_v50, %v1515_v19  ;;  %v1547_v60 = vpop.f32.mrf.mxu0  ;;  %3508 = vmatprep.mubr.f32.mxu1 %v14681_v55  ;;  %v14692_v55 = vld [vmem:[#allocation92_spill] sm:$0xff] }
 0x34b   : > { %v2046_v22 = vpop.f32.mrf.mxu1 }
 0x34c   : > { %v1560_v45 = vpop.f32.mrf.mxu0  ;;  %3203 = vmatmul.mubr.f32.gmra.mxu0 %v14686_v3  ;;  %v14696_v22 = vld [vmem:[#allocation99_spill] sm:$0xff] }
 0x34d   : > { %v2051_v46 = vpop.f32.mrf.mxu1  ;;  %3510 = vmatmul.mubr.f32.gmra.mxu1 %v14682_v16  ;;  %3208 = vmatprep.mubr.f32.mxu0 %v14687_v26 }
 0x34e   : > { %v10685_v0 = vadd.f32 %v2051_v46, %v1530_v31  ;;  %v1562_v15 = vpop.f32.mrf.mxu0  ;;  %3515 = vmatprep.mubr.f32.mxu1 %v14683_v2 }
 0x34f   : > { %v2053_v23 = vpop.f32.mrf.mxu1 }
 0x350   : > { %v1575_v8 = vpop.f32.mrf.mxu0  ;;  %3210 = vmatmul.mubr.f32.gmra.mxu0 %v14688_v28 }
 0x351   : > { %v2058_v9 = vpop.f32.mrf.mxu1  ;;  %3517 = vmatmul.mubr.f32.gmra.mxu1 %v14684_v42  ;;  %3215 = vmatprep.mubr.f32.mxu0 %v14689_v59 }
 0x352   : > { %v10691_v13 = vadd.f32 %v2058_v9, %v1545_v41  ;;  %v1577_v17 = vpop.f32.mrf.mxu0  ;;  %3522 = vmatprep.mubr.f32.mxu1 %v14685_v63  ;;  %v14695_v41 = vld [vmem:[#allocation97_spill] sm:$0xff] }
 0x353   : > { %v2060_v36 = vpop.f32.mrf.mxu1  ;;  %v14699_v9 = vld [vmem:[#allocation105_spill] sm:$0xff] }
 0x354   : > { %v1590_v29 = vpop.f32.mrf.mxu0  ;;  %3217 = vmatmul.mubr.f32.gmra.mxu0 %v14690_v62 }
 0x355   : > { %v2065_v12 = vpop.f32.mrf.mxu1  ;;  %3524 = vmatmul.mubr.f32.gmra.mxu1 %v14686_v3  ;;  %3222 = vmatprep.mubr.f32.mxu0 %v14691_v57  ;;  %v14697_v3 = vld [vmem:[#allocation101_spill] sm:$0xff] }
 0x356   : > { %v10697_v33 = vadd.f32 %v2065_v12, %v1560_v45  ;;  %v1592_v19 = vpop.f32.mrf.mxu0  ;;  %3529 = vmatprep.mubr.f32.mxu1 %v14687_v26 }
 0x357   : > { %v2067_v14 = vpop.f32.mrf.mxu1 }
 0x358   : > { %v1605_v10 = vpop.f32.mrf.mxu0  ;;  %3224 = vmatmul.mubr.f32.gmra.mxu0 %v14692_v55 }
 0x359   : > { %v2072_v35 = vpop.f32.mrf.mxu1  ;;  %3531 = vmatmul.mubr.f32.gmra.mxu1 %v14688_v28  ;;  %3229 = vmatprep.mubr.f32.mxu0 %v14693_v38 }
 0x35a   : > { %v10703_v31 = vadd.f32 %v2072_v35, %v1575_v8  ;;  %v1607_v16 = vpop.f32.mrf.mxu0  ;;  %3536 = vmatprep.mubr.f32.mxu1 %v14689_v59  ;;  %v14698_v8 = vld [vmem:[#allocation103_spill] sm:$0xff]  ;;  %v14702_v35 = vld [vmem:[#allocation112_spill] sm:$0xff] }
 0x35b   : > { %v2074_v56 = vpop.f32.mrf.mxu1 }
 0x35c   : > { %v1620_v2 = vpop.f32.mrf.mxu0  ;;  %3231 = vmatmul.mubr.f32.gmra.mxu0 %v14694_v5  ;;  %v14703_v56 = vld [vmem:[#allocation113_spill] sm:$0xff] }
 0x35d   : > { %v2079_v25 = vpop.f32.mrf.mxu1  ;;  %3538 = vmatmul.mubr.f32.gmra.mxu1 %v14690_v62  ;;  %3236 = vmatprep.mubr.f32.mxu0 %v14695_v41  ;;  %v14700_v62 = vld [vmem:[#allocation106_spill] sm:$0xff] }
 0x35e   : > { %v10709_v42 = vadd.f32 %v2079_v25, %v1590_v29  ;;  %v1622_v50 = vpop.f32.mrf.mxu0  ;;  %3543 = vmatprep.mubr.f32.mxu1 %v14691_v57  ;;  %v14701_v57 = vld [vmem:[#allocation108_spill] sm:$0xff] }
 0x35f   : > { %v2081_v63 = vpop.f32.mrf.mxu1  ;;  %v14704_v50 = vld [vmem:[#allocation114_spill] sm:$0xff] }
 0x360   : > { %v1635_v60 = vpop.f32.mrf.mxu0  ;;  %3238 = vmatmul.mubr.f32.gmra.mxu0 %v14696_v22 }
 0x361   : > { %v2086_v45 = vpop.f32.mrf.mxu1  ;;  %3545 = vmatmul.mubr.f32.gmra.mxu1 %v14692_v55  ;;  %3243 = vmatprep.mubr.f32.mxu0 %v14697_v3 }
 0x362   : > { %v10715_v46 = vadd.f32 %v2086_v45, %v1605_v10  ;;  %v1637_v26 = vpop.f32.mrf.mxu0  ;;  %3550 = vmatprep.mubr.f32.mxu1 %v14693_v38 }
 0x363   : > { %v2088_v15 = vpop.f32.mrf.mxu1 }
 0x364   : > { %v1650_v23 = vpop.f32.mrf.mxu0  ;;  %3245 = vmatmul.mubr.f32.gmra.mxu0 %v14698_v8  ;;  %v14706_v15 = vld [vmem:[#allocation119_spill] sm:$0xff] }
 0x365   : > { %v2093_v28 = vpop.f32.mrf.mxu1  ;;  %3552 = vmatmul.mubr.f32.gmra.mxu1 %v14694_v5  ;;  %3250 = vmatprep.mubr.f32.mxu0 %v14699_v9 }
 0x366   : > { %v10721_v59 = vadd.f32 %v2093_v28, %v1620_v2  ;;  %v1652_v17 = vpop.f32.mrf.mxu0  ;;  %3557 = vmatprep.mubr.f32.mxu1 %v14695_v41  ;;  %v14707_v28 = vld [vmem:[#allocation121_spill] sm:$0xff] }
 0x367   : > { %v2095_v36 = vpop.f32.mrf.mxu1 }
 0x368   : > { %v1665_v29 = vpop.f32.mrf.mxu0  ;;  %3252 = vmatmul.mubr.f32.gmra.mxu0 %v14700_v62  ;;  %v8564_v36 = vmov 0  }
 0x369   : > { %v2100_v12 = vpop.f32.mrf.mxu1  ;;  %3559 = vmatmul.mubr.f32.gmra.mxu1 %v14696_v22  ;;  %3257 = vmatprep.mubr.f32.mxu0 %v14701_v57  ;;  %v14705_v22 = vld [vmem:[#allocation117_spill] sm:$0xff] }
 0x36a   : > { %v10727_v19 = vadd.f32 %v2100_v12, %v1635_v60  ;;  %v1667_v14 = vpop.f32.mrf.mxu0  ;;  %3564 = vmatprep.mubr.f32.mxu1 %v14697_v3  ;;  %8424 = vset.pattern.permute.xlu1 %v8564_v36 }
 0x36b   : > { %v2102_v10 = vpop.f32.mrf.mxu1  ;;  %8425 = vset.pattern.permute.xlu0 %v8564_v36 }
 0x36c   : > { %v2252_v55 = vpop.f32.mrf.mxu0  ;;  %3259 = vmatmul.mubr.f32.gmra.mxu0 %v14702_v35 }
 0x36d   : > { %v2107_v38 = vpop.f32.mrf.mxu1  ;;  %v2253_v16 = vadd.f32 %v2252_v55, %v10444_v54  ;;  %3566 = vmatmul.mubr.f32.gmra.mxu1 %v14698_v8  ;;  %3264 = vmatprep.mubr.f32.mxu0 %v14703_v56 }
 0x36e   : > { %v10734_v2 = vadd.f32 %v2107_v38, %v1650_v23  ;;  %v2254_v5 = vpop.f32.mrf.mxu0  ;;  %3571 = vmatprep.mubr.f32.mxu1 %v14699_v9  ;;  %v14710_v38 = vld [vmem:[#allocation126_spill] sm:$0xff] }
 0x36f   : > { %v2109_v25 = vpop.f32.mrf.mxu1 }
 0x370   : > { %v2261_v41 = vpop.f32.mrf.mxu0  ;;  %3266 = vmatmul.mubr.f32.gmra.mxu0 %v14704_v50 }
 0x371   : > { %v2114_v63 = vpop.f32.mrf.mxu1  ;;  %v2262_v60 = vadd.f32 %v2261_v41, %v10457_v11  ;;  %3573 = vmatmul.mubr.f32.gmra.mxu1 %v14700_v62  ;;  %3271 = vmatprep.mubr.f32.mxu0 %v14705_v22  ;;  %v14708_v62 = vld [vmem:[#allocation123_spill] sm:$0xff] }
 0x372   : > { %v10741_v54 = vadd.f32 %v2114_v63, %v1665_v29  ;;  %v2263_v45 = vpop.f32.mrf.mxu0  ;;  %3578 = vmatprep.mubr.f32.mxu1 %v14701_v57  ;;  %v14709_v57 = vld [vmem:[#allocation125_spill] sm:$0xff]  ;;  %v14712_v63 = vld [vmem:[#allocation132_spill] sm:$0xff] }
 0x373   : > { %v2116_v3 = vpop.f32.mrf.mxu1 }
 0x374   : > { %v2270_v26 = vpop.f32.mrf.mxu0  ;;  %3273 = vmatmul.mubr.f32.gmra.mxu0 %v14706_v15 }
 0x375   : > { %v2271_v23 = vadd.f32 %v2270_v26, %v10470_v53  ;;  %v2639_v8 = vpop.f32.mrf.mxu1  ;;  %3580 = vmatmul.mubr.f32.gmra.mxu1 %v14702_v35  ;;  %3278 = vmatprep.mubr.f32.mxu0 %v14707_v28 }
 0x376   : > { %v10748_v11 = vadd.f32 %v2639_v8, %v2253_v16  ;;  %v2272_v9 = vpop.f32.mrf.mxu0  ;;  %3585 = vmatprep.mubr.f32.mxu1 %v14703_v56 }
 0x377   : > { %v2641_v17 = vpop.f32.mrf.mxu1 }
 0x378   : > { %v2279_v29 = vpop.f32.mrf.mxu0  ;;  %3280 = vmatmul.mubr.f32.gmra.mxu0 %v14708_v62 }
 0x379   : > { %v2280_v12 = vadd.f32 %v2279_v29, %v10483_v44  ;;  %v2650_v53 = vpop.f32.mrf.mxu1  ;;  %3587 = vmatmul.mubr.f32.gmra.mxu1 %v14704_v50  ;;  %3285 = vmatprep.mubr.f32.mxu0 %v14709_v57  ;;  %v14711_v44 = vld [vmem:[#allocation128_spill] sm:$0xff] }
 0x37a   : > { %v10755_v14 = vadd.f32 %v2650_v53, %v2262_v60  ;;  %v2281_v10 = vpop.f32.mrf.mxu0  ;;  %3592 = vmatprep.mubr.f32.mxu1 %v14705_v22 }
 0x37b   : > { %v2652_v55 = vpop.f32.mrf.mxu1 }
 0x37c   : > { %v2288_v35 = vpop.f32.mrf.mxu0  ;;  %3287 = vmatmul.mubr.f32.gmra.mxu0 %v14710_v38 }
 0x37d   : > { %v2289_v16 = vadd.f32 %v2288_v35, %v10496_v18  ;;  %v2661_v56 = vpop.f32.mrf.mxu1  ;;  %3594 = vmatmul.mubr.f32.gmra.mxu1 %v14706_v15  ;;  %3292 = vmatprep.mubr.f32.mxu0 %v14711_v44  ;;  %v14713_v18 = vld [vmem:[#allocation133_spill] sm:$0xff] }
 0x37e   : > { %v10762_v5 = vadd.f32 %v2661_v56, %v2271_v23  ;;  %v2290_v25 = vpop.f32.mrf.mxu0  ;;  %3599 = vmatprep.mubr.f32.mxu1 %v14707_v28  ;;  %v14714_v23 = vld [vmem:[#allocation134_spill] sm:$0xff] }
 0x37f   : > { %v2663_v41 = vpop.f32.mrf.mxu1 }
 0x380   : > { %v2297_v50 = vpop.f32.mrf.mxu0  ;;  %3294 = vmatmul.mubr.f32.gmra.mxu0 %v14712_v63 }
 0x381   : > { %v2298_v60 = vadd.f32 %v2297_v50, %v10509_v47  ;;  %v2672_v22 = vpop.f32.mrf.mxu1  ;;  %3601 = vmatmul.mubr.f32.gmra.mxu1 %v14708_v62  ;;  %3299 = vmatprep.mubr.f32.mxu0 %v14713_v18  ;;  %v14715_v47 = vld [vmem:[#allocation137_spill] sm:$0xff]  ;;  %v14716_v62 = vld [vmem:[#allocation139_spill] sm:$0xff] }
 0x382   : > { %v10769_v45 = vadd.f32 %v2672_v22, %v2280_v12  ;;  %v2299_v3 = vpop.f32.mrf.mxu0  ;;  %3606 = vmatprep.mubr.f32.mxu1 %v14709_v57 }
 0x383   : > { %v2674_v26 = vpop.f32.mrf.mxu1 }
 0x384   : > { %v2306_v15 = vpop.f32.mrf.mxu0  ;;  %3301 = vmatmul.mubr.f32.gmra.mxu0 %v14714_v23 }
 0x385   : > { %v2307_v8 = vadd.f32 %v2306_v15, %v10522_v49  ;;  %v2683_v28 = vpop.f32.mrf.mxu1  ;;  %3608 = vmatmul.mubr.f32.gmra.mxu1 %v14710_v38  ;;  %3306 = vmatprep.mubr.f32.mxu0 %v14715_v47  ;;  %v14717_v49 = vld [vmem:[#allocation141_spill] sm:$0xff]  ;;  %v14718_v38 = vld [vmem:[#allocation143_spill] sm:$0xff] }
 0x386   : > { %v10776_v9 = vadd.f32 %v2683_v28, %v2289_v16  ;;  %v2308_v17 = vpop.f32.mrf.mxu0  ;;  %3613 = vmatprep.mubr.f32.mxu1 %v14711_v44 }
 0x387   : > { %v2685_v36 = vpop.f32.mrf.mxu1 }
 0x388   : > { %v2315_v29 = vpop.f32.mrf.mxu0  ;;  %3308 = vmatmul.mubr.f32.gmra.mxu0 %v14716_v62 }
 0x389   : > { %v2316_v12 = vadd.f32 %v2315_v29, %v10535_v7  ;;  %v2694_v53 = vpop.f32.mrf.mxu1  ;;  %3615 = vmatmul.mubr.f32.gmra.mxu1 %v14712_v63  ;;  %3313 = vmatprep.mubr.f32.mxu0 %v14717_v49  ;;  %v14719_v7 = vld [vmem:[#allocation145_spill] sm:$0xff]  ;;  %v14720_v63 = vld [vmem:[#allocation146_spill] sm:$0xff] }
 0x38a   : > { %v10783_v57 = vadd.f32 %v2694_v53, %v2298_v60  ;;  %v2317_v10 = vpop.f32.mrf.mxu0  ;;  %3620 = vmatprep.mubr.f32.mxu1 %v14713_v18 }
 0x38b   : > { %v2696_v55 = vpop.f32.mrf.mxu1 }
 0x38c   : > { %v2324_v35 = vpop.f32.mrf.mxu0  ;;  %3315 = vmatmul.mubr.f32.gmra.mxu0 %v14718_v38 }
 0x38d   : > { %v2325_v16 = vadd.f32 %v2324_v35, %v10548_v52  ;;  %v2705_v56 = vpop.f32.mrf.mxu1  ;;  %3622 = vmatmul.mubr.f32.gmra.mxu1 %v14714_v23  ;;  %3320 = vmatprep.mubr.f32.mxu0 %v14719_v7  ;;  %v14721_v52 = vld [vmem:[#allocation148_spill] sm:$0xff] }
 0x38e   : > { %v10790_v44 = vadd.f32 %v2705_v56, %v2307_v8  ;;  %v2326_v25 = vpop.f32.mrf.mxu0  ;;  %3627 = vmatprep.mubr.f32.mxu1 %v14715_v47 }
 0x38f   : > { %v2707_v41 = vpop.f32.mrf.mxu1 }
 0x390   : > { %v2333_v50 = vpop.f32.mrf.mxu0  ;;  %3322 = vmatmul.mubr.f32.gmra.mxu0 %v14720_v63 }
 0x391   : > { %v2334_v60 = vadd.f32 %v2333_v50, %v10561_v37  ;;  %v2716_v22 = vpop.f32.mrf.mxu1  ;;  %3629 = vmatmul.mubr.f32.gmra.mxu1 %v14716_v62  ;;  %3327 = vmatprep.mubr.f32.mxu0 %v14721_v52 }
 0x392   : > { %v10797_v18 = vadd.f32 %v2716_v22, %v2316_v12  ;;  %v2335_v3 = vpop.f32.mrf.mxu0  ;;  %3634 = vmatprep.mubr.f32.mxu1 %v14717_v49  ;;  %v14722_v49 = vld [vmem:[#allocation154_spill] sm:$0xff] }
 0x393   : > { %v2718_v26 = vpop.f32.mrf.mxu1  ;;  %v14726_v22 = vld [vmem:[#allocation158_spill] sm:$0xff] }
 0x394   : > { %v2342_v15 = vpop.f32.mrf.mxu0  ;;  %3329 = vmatmul.mubr.f32.gmra.mxu0 %v10035_v21 }
 0x395   : > { %v2343_v23 = vadd.f32 %v2342_v15, %v10574_v24  ;;  %v2727_v8 = vpop.f32.mrf.mxu1  ;;  %3636 = vmatmul.mubr.f32.gmra.mxu1 %v14718_v38  ;;  %3334 = vmatprep.mubr.f32.mxu0 %v10046_v58 }
 0x396   : > { %v10804_v37 = vadd.f32 %v2727_v8, %v2325_v16  ;;  %v2344_v28 = vpop.f32.mrf.mxu0  ;;  %3641 = vmatprep.mubr.f32.mxu1 %v14719_v7  ;;  %v14724_v7 = vld [vmem:[#allocation156_spill] sm:$0xff] }
 0x397   : > { %v2729_v47 = vpop.f32.mrf.mxu1 }
 0x398   : > { %v2351_v17 = vpop.f32.mrf.mxu0  ;;  %3336 = vmatmul.mubr.f32.gmra.mxu0 %v10055_v51 }
 0x399   : > { %v2352_v36 = vadd.f32 %v2351_v17, %v10587_v43  ;;  %v2738_v29 = vpop.f32.mrf.mxu1  ;;  %3643 = vmatmul.mubr.f32.gmra.mxu1 %v14720_v63  ;;  %3341 = vmatprep.mubr.f32.mxu0 %v10073_v32  ;;  %v14723_v43 = vld [vmem:[#allocation155_spill] sm:$0xff] }
 0x39a   : > { %v10811_v24 = vadd.f32 %v2738_v29, %v2334_v60  ;;  %v2353_v62 = vpop.f32.mrf.mxu0  ;;  %3648 = vmatprep.mubr.f32.mxu1 %v14721_v52 }
 0x39b   : > { %v2740_v12 = vpop.f32.mrf.mxu1 }
 0x39c   : > { %v2360_v53 = vpop.f32.mrf.mxu0  ;;  %3343 = vmatmul.mubr.f32.gmra.mxu0 %v14722_v49 }
 0x39d   : > { %v2361_v10 = vadd.f32 %v2360_v53, %v10601_v34  ;;  %v2749_v55 = vpop.f32.mrf.mxu1  ;;  %3650 = vmatmul.mubr.f32.gmra.mxu1 %v10035_v21  ;;  %3348 = vmatprep.mubr.f32.mxu0 %v14723_v43  ;;  %v14725_v34 = vld [vmem:[#allocation157_spill] sm:$0xff] }
 0x39e   : > { %v10818_v35 = vadd.f32 %v2749_v55, %v2343_v23  ;;  %v2362_v38 = vpop.f32.mrf.mxu0  ;;  %3655 = vmatprep.mubr.f32.mxu1 %v10046_v58  ;;  %v14728_v23 = vld [vmem:[#allocation35_spill] sm:$0xff] }
 0x39f   : > { %v2751_v16 = vpop.f32.mrf.mxu1 }
 0x3a0   : > { %v2369_v56 = vpop.f32.mrf.mxu0  ;;  %3350 = vmatmul.mubr.f32.gmra.mxu0 %v14724_v7 }
 0x3a1   : > { %v2370_v25 = vadd.f32 %v2369_v56, %v10615_v48  ;;  %v2760_v41 = vpop.f32.mrf.mxu1  ;;  %3657 = vmatmul.mubr.f32.gmra.mxu1 %v10055_v51  ;;  %3355 = vmatprep.mubr.f32.mxu0 %v14725_v34  ;;  %v14727_v48 = vld [vmem:[#allocation159_spill] sm:$0xff] }
 0x3a2   : > { %v10825_v50 = vadd.f32 %v2760_v41, %v2352_v36  ;;  %v2371_v21 = vpop.f32.mrf.mxu0  ;;  %3662 = vmatprep.mubr.f32.mxu1 %v10073_v32 }
 0x3a3   : > { %v2762_v63 = vpop.f32.mrf.mxu1 }
 0x3a4   : > { %v2378_v60 = vpop.f32.mrf.mxu0  ;;  %3357 = vmatmul.mubr.f32.gmra.mxu0 %v14726_v22 }
 0x3a5   : > { %v2379_v58 = vadd.f32 %v2378_v60, %v10628_v61  ;;  %v2771_v52 = vpop.f32.mrf.mxu1  ;;  %3664 = vmatmul.mubr.f32.gmra.mxu1 %v14722_v49  ;;  %3362 = vmatprep.mubr.f32.mxu0 %v14727_v48 }
 0x3a6   : > { %v10832_v3 = vadd.f32 %v2771_v52, %v2361_v10  ;;  %v2380_v51 = vpop.f32.mrf.mxu0  ;;  %3669 = vmatprep.mubr.f32.mxu1 %v14723_v43 }
 0x3a7   : > { %v2773_v26 = vpop.f32.mrf.mxu1 }
 0x3a8   : > { %v2387_v15 = vpop.f32.mrf.mxu0  ;;  %3364 = vmatmul.mubr.f32.gmra.mxu0 %v14728_v23 }
 0x3a9   : > { %v2388_v32 = vadd.f32 %v2387_v15, %v10640_v40  ;;  %v2782_v8 = vpop.f32.mrf.mxu1  ;;  %3671 = vmatmul.mubr.f32.gmra.mxu1 %v14724_v7 }
 0x3aa   : > { %v10838_v61 = vadd.f32 %v2782_v8, %v2370_v25  ;;  %v2389_v28 = vpop.f32.mrf.mxu0  ;;  %3676 = vmatprep.mubr.f32.mxu1 %v14725_v34 }
 0x3ab   : > { %v2784_v47 = vpop.f32.mrf.mxu1 }
 0x3ac   : > { %v2396_v17 = vpop.f32.mrf.mxu0 }
 0x3ad   : > { %v2397_v36 = vadd.f32 %v2396_v17, %v10649_v1  ;;  %v2793_v29 = vpop.f32.mrf.mxu1  ;;  %3678 = vmatmul.mubr.f32.gmra.mxu1 %v14726_v22 }
 0x3ae   : > { %v10843_v62 = vadd.f32 %v2793_v29, %v2379_v58  ;;  %v2398_v12 = vpop.f32.mrf.mxu0  ;;  %3683 = vmatprep.mubr.f32.mxu1 %v14727_v48 }
 0x3af   : > { %v2795_v40 = vpop.f32.mrf.mxu1 }
 0x3b0   : > { %v2405_v53 = vpop.f32.mrf.mxu0 }
 0x3b1   : > { %v2406_v49 = vadd.f32 %v2405_v53, %v10655_v39  ;;  %v2804_v10 = vpop.f32.mrf.mxu1  ;;  %3685 = vmatmul.mubr.f32.gmra.mxu1 %v14728_v23 }
 0x3b2   : > { %v10848_v55 = vadd.f32 %v2804_v10, %v2388_v32  ;;  %v2407_v43 = vpop.f32.mrf.mxu0 }
 0x3b3   : > { %v2806_v38 = vpop.f32.mrf.mxu1 }
 0x3b4   : > { %v2414_v1 = vpop.f32.mrf.mxu0 }
 0x3b5   : > { %v2415_v16 = vadd.f32 %v2414_v1, %v10661_v27  ;;  %v2815_v56 = vpop.f32.mrf.mxu1 }
 0x3b6   : > { %v10851_v7 = vadd.f32 %v2815_v56, %v2397_v36  ;;  %v2416_v25 = vpop.f32.mrf.mxu0 }
 0x3b7   : > { %v2817_v41 = vpop.f32.mrf.mxu1 }
 0x3b8   : > { %v2423_v34 = vpop.f32.mrf.mxu0 }
 0x3b9   : > { %v2424_v21 = vadd.f32 %v2423_v34, %v10667_v4  ;;  %v2826_v63 = vpop.f32.mrf.mxu1 }
 0x3ba   : > { %v10854_v39 = vadd.f32 %v2826_v63, %v2406_v49  ;;  %v2425_v60 = vpop.f32.mrf.mxu0 }
 0x3bb   : > { %v2828_v22 = vpop.f32.mrf.mxu1 }
 0x3bc   : > { %v2432_v58 = vpop.f32.mrf.mxu0 }
 0x3bd   : > { %v2433_v52 = vadd.f32 %v2432_v58, %v10673_v6  ;;  %v2837_v48 = vpop.f32.mrf.mxu1 }
 0x3be   : > { %v10857_v51 = vadd.f32 %v2837_v48, %v2415_v16  ;;  %v2434_v27 = vpop.f32.mrf.mxu0 }
 0x3bf   : > { %v2839_v26 = vpop.f32.mrf.mxu1 }
 0x3c0   : > { %v2441_v15 = vpop.f32.mrf.mxu0 }
 0x3c1   : > { %v2442_v23 = vadd.f32 %v2441_v15, %v10679_v20  ;;  %v2848_v32 = vpop.f32.mrf.mxu1 }
 0x3c2   : > { %v10860_v8 = vadd.f32 %v2848_v32, %v2424_v21  ;;  %v2443_v4 = vpop.f32.mrf.mxu0 }
 0x3c3   : > { %v2850_v28 = vpop.f32.mrf.mxu1 }
 0x3c4   : > { %v2450_v47 = vpop.f32.mrf.mxu0 }
 0x3c5   : > { %v2451_v17 = vadd.f32 %v2450_v47, %v10685_v0  ;;  %v2859_v36 = vpop.f32.mrf.mxu1 }
 0x3c6   : > { %v10863_v29 = vadd.f32 %v2859_v36, %v2433_v52  ;;  %v2452_v6 = vpop.f32.mrf.mxu0 }
 0x3c7   : > { %v2861_v12 = vpop.f32.mrf.mxu1 }
 0x3c8   : > { %v2459_v40 = vpop.f32.mrf.mxu0 }
 0x3c9   : > { %v2460_v53 = vadd.f32 %v2459_v40, %v10691_v13  ;;  %v2870_v49 = vpop.f32.mrf.mxu1 }
 0x3ca   : > { %v10866_v10 = vadd.f32 %v2870_v49, %v2442_v23  ;;  %v2461_v20 = vpop.f32.mrf.mxu0 }
 0x3cb   : > { %v2872_v43 = vpop.f32.mrf.mxu1 }
 0x3cc   : > { %v2468_v38 = vpop.f32.mrf.mxu0 }
 0x3cd   : > { %v2469_v1 = vadd.f32 %v2468_v38, %v10697_v33  ;;  %v2881_v16 = vpop.f32.mrf.mxu1 }
 0x3ce   : > { %v10869_v56 = vadd.f32 %v2881_v16, %v2451_v17  ;;  %v2470_v0 = vpop.f32.mrf.mxu0 }
 0x3cf   : > { %v2883_v25 = vpop.f32.mrf.mxu1 }
 0x3d0   : > { %v2477_v41 = vpop.f32.mrf.mxu0 }
 0x3d1   : > { %v2478_v34 = vadd.f32 %v2477_v41, %v10703_v31  ;;  %v2892_v21 = vpop.f32.mrf.mxu1 }
 0x3d2   : > { %v10872_v63 = vadd.f32 %v2892_v21, %v2460_v53  ;;  %v2479_v13 = vpop.f32.mrf.mxu0 }
 0x3d3   : > { %v2894_v60 = vpop.f32.mrf.mxu1 }
 0x3d4   : > { %v2486_v22 = vpop.f32.mrf.mxu0 }
 0x3d5   : > { %v2487_v58 = vadd.f32 %v2486_v22, %v10709_v42  ;;  %v2903_v52 = vpop.f32.mrf.mxu1 }
 0x3d6   : > { %v10875_v48 = vadd.f32 %v2903_v52, %v2469_v1  ;;  %v2488_v33 = vpop.f32.mrf.mxu0 }
 0x3d7   : > { %v2905_v27 = vpop.f32.mrf.mxu1 }
 0x3d8   : > { %v2495_v26 = vpop.f32.mrf.mxu0 }
 0x3d9   : > { %v2496_v15 = vadd.f32 %v2495_v26, %v10715_v46  ;;  %v2914_v23 = vpop.f32.mrf.mxu1 }
 0x3da   : > { %v10878_v32 = vadd.f32 %v2914_v23, %v2478_v34  ;;  %v2497_v31 = vpop.f32.mrf.mxu0 }
 0x3db   : > { %v2916_v4 = vpop.f32.mrf.mxu1 }
 0x3dc   : > { %v2504_v28 = vpop.f32.mrf.mxu0 }
 0x3dd   : > { %v2505_v47 = vadd.f32 %v2504_v28, %v10721_v59  ;;  %v2925_v17 = vpop.f32.mrf.mxu1 }
 0x3de   : > { %v10881_v36 = vadd.f32 %v2925_v17, %v2487_v58  ;;  %v2506_v42 = vpop.f32.mrf.mxu0 }
 0x3df   : > { %v2927_v6 = vpop.f32.mrf.mxu1 }
 0x3e0   : > { %v2513_v12 = vpop.f32.mrf.mxu0 }
 0x3e1   : > { %v2514_v40 = vadd.f32 %v2513_v12, %v10727_v19  ;;  %v2936_v53 = vpop.f32.mrf.mxu1 }
 0x3e2   : > { %v10884_v49 = vadd.f32 %v2936_v53, %v2496_v15  ;;  %v2515_v46 = vpop.f32.mrf.mxu0 }
 0x3e3   : > { %v2938_v20 = vpop.f32.mrf.mxu1 }
 0x3e4   : > { %v2522_v43 = vpop.f32.mrf.mxu0 }
 0x3e5   : > { %v2523_v38 = vadd.f32 %v2522_v43, %v10734_v2  ;;  %v2947_v1 = vpop.f32.mrf.mxu1 }
 0x3e6   : > { %v10887_v16 = vadd.f32 %v2947_v1, %v2505_v47  ;;  %v2524_v59 = vpop.f32.mrf.mxu0 }
 0x3e7   : > { %v2949_v0 = vpop.f32.mrf.mxu1 }
 0x3e8   : > { %v2531_v25 = vpop.f32.mrf.mxu0 }
 0x3e9   : > { %v2532_v41 = vadd.f32 %v2531_v25, %v10741_v54  ;;  %v2958_v34 = vpop.f32.mrf.mxu1 }
 0x3ea   : > { %v10890_v21 = vadd.f32 %v2958_v34, %v2514_v40  ;;  %v2533_v19 = vpop.f32.mrf.mxu0 }
 0x3eb   : > { %v2960_v13 = vpop.f32.mrf.mxu1 }
 0x3ec   : > { %v3148_v60 = vpop.f32.mrf.mxu0 }
 0x3ed   : > { %v2969_v22 = vpop.f32.mrf.mxu1  ;;  %v3149_v31 = vadd.f32 %v3148_v60, %v10748_v11 }
 0x3ee   : > { %v10892_v58 = vadd.f32 %v2969_v22, %v2523_v38  ;;  %v3150_v52 = vpop.f32.mrf.mxu0 }
 0x3ef   : > { %v2971_v33 = vpop.f32.mrf.mxu1 }
 0x3f0   : > { %v3155_v2 = vpop.f32.mrf.mxu0 }
 0x3f1   : > { %v2980_v27 = vpop.f32.mrf.mxu1  ;;  %v3156_v42 = vadd.f32 %v3155_v2, %v10755_v14 }
 0x3f2   : > { %v10894_v26 = vadd.f32 %v2980_v27, %v2532_v41  ;;  %v3157_v15 = vpop.f32.mrf.mxu0 }
 0x3f3   : > { %v2982_v23 = vpop.f32.mrf.mxu1 }
 0x3f4   : > { %v3162_v54 = vpop.f32.mrf.mxu0 }
 0x3f5   : > { %v3469_v4 = vpop.f32.mrf.mxu1  ;;  %v3163_v20 = vadd.f32 %v3162_v54, %v10762_v5 }
 0x3f6   : > { %v10897_v28 = vadd.f32 %v3469_v4, %v3149_v31  ;;  %v3164_v47 = vpop.f32.mrf.mxu0 }
 0x3f7   : > { %v3471_v17 = vpop.f32.mrf.mxu1 }
 0x3f8   : > { %14729 = vst [vmem:[#allocation40_spill] sm:$0xff] %v10897_v28  ;;  %3756 = vperm.xlu1 %8424, %v10897_v28   ;;  %v3169_v6 = vpop.f32.mrf.mxu0 }
 0x3f9   : > { %v3476_v12 = vpop.f32.mrf.mxu1  ;;  %v3170_v14 = vadd.f32 %v3169_v6, %v10769_v45 }
 0x3fa   : > { %v10901_v40 = vadd.f32 %v3476_v12, %v3156_v42  ;;  %v3171_v53 = vpop.f32.mrf.mxu0 }
 0x3fb   : > { %v3478_v46 = vpop.f32.mrf.mxu1 }
 0x3fc   : > { %14730 = vst [vmem:[#allocation36_spill] sm:$0xff] %v10901_v40  ;;  %3761 = vperm.xlu0 %8425, %v10901_v40   ;;  %v3176_v11 = vpop.f32.mrf.mxu0 }
 0x3fd   : > { %v3483_v43 = vpop.f32.mrf.mxu1  ;;  %v3177_v5 = vadd.f32 %v3176_v11, %v10776_v9 }
 0x3fe   : > { %v10905_v38 = vadd.f32 %v3483_v43, %v3163_v20  ;;  %v3178_v1 = vpop.f32.mrf.mxu0 }
 0x3ff   : > { %v3485_v59 = vpop.f32.mrf.mxu1 }
 0x400   : > { %14731 = vst [vmem:[#allocation41_spill] sm:$0xff] %v10905_v38  ;;  %3766 = vperm.xlu1 %8424, %v10905_v38   ;;  %v3183_v0 = vpop.f32.mrf.mxu0 }
 0x401   : > { %v3490_v25 = vpop.f32.mrf.mxu1  ;;  %v3184_v45 = vadd.f32 %v3183_v0, %v10783_v57 }
 0x402   : > { %v10909_v41 = vadd.f32 %v3490_v25, %v3170_v14  ;;  %v3185_v34 = vpop.f32.mrf.mxu0 }
 0x403   : > { %v3492_v19 = vpop.f32.mrf.mxu1 }
 0x404   : > { %14732 = vst [vmem:[#allocation39_spill] sm:$0xff] %v10909_v41  ;;  %3771 = vperm.xlu0 %8425, %v10909_v41   ;;  %v3190_v13 = vpop.f32.mrf.mxu0 }
 0x405   : > { %v3497_v60 = vpop.f32.mrf.mxu1  ;;  %v3191_v9 = vadd.f32 %v3190_v13, %v10790_v44 }
 0x406   : > { %v10913_v22 = vadd.f32 %v3497_v60, %v3177_v5  ;;  %v3192_v52 = vpop.f32.mrf.mxu0 }
 0x407   : > { %v3499_v33 = vpop.f32.mrf.mxu1 }
 0x408   : > { %14733 = vst [vmem:[#allocation46_spill] sm:$0xff] %v10913_v22  ;;  %3776 = vperm.xlu1 %8424, %v10913_v22   ;;  %v3197_v2 = vpop.f32.mrf.mxu0 }
 0x409   : > { %v3504_v27 = vpop.f32.mrf.mxu1  ;;  %v3198_v57 = vadd.f32 %v3197_v2, %v10797_v18 }
 0x40a   : > { %v10917_v15 = vadd.f32 %v3504_v27, %v3184_v45  ;;  %v3199_v23 = vpop.f32.mrf.mxu0 }
 0x40b   : > { %v3506_v31 = vpop.f32.mrf.mxu1 }
 0x40c   : > { %14734 = vst [vmem:[#allocation42_spill] sm:$0xff] %v10917_v15  ;;  %3781 = vperm.xlu0 %8425, %v10917_v15   ;;  %v3204_v54 = vpop.f32.mrf.mxu0 }
 0x40d   : > { %v3511_v4 = vpop.f32.mrf.mxu1  ;;  %v3205_v44 = vadd.f32 %v3204_v54, %v10804_v37 }
 0x40e   : > { %v10921_v47 = vadd.f32 %v3511_v4, %v3191_v9  ;;  %v3206_v17 = vpop.f32.mrf.mxu0 }
 0x40f   : > { %v3513_v42 = vpop.f32.mrf.mxu1 }
 0x410   : > { %14735 = vst [vmem:[#allocation49_spill] sm:$0xff] %v10921_v47  ;;  %3786 = vperm.xlu1 %8424, %v10921_v47   ;;  %v3211_v6 = vpop.f32.mrf.mxu0 }
 0x411   : > { %v3518_v12 = vpop.f32.mrf.mxu1  ;;  %v3212_v18 = vadd.f32 %v3211_v6, %v10811_v24 }
 0x412   : > { %v10925_v53 = vadd.f32 %v3518_v12, %v3198_v57  ;;  %v3213_v46 = vpop.f32.mrf.mxu0 }
 0x413   : > { %v3520_v20 = vpop.f32.mrf.mxu1 }
 0x414   : > { %14736 = vst [vmem:[#allocation47_spill] sm:$0xff] %v10925_v53  ;;  %3791 = vperm.xlu0 %8425, %v10925_v53   ;;  %v3218_v11 = vpop.f32.mrf.mxu0 }
 0x415   : > { %v3525_v43 = vpop.f32.mrf.mxu1  ;;  %v3219_v37 = vadd.f32 %v3218_v11, %v10818_v35 }
 0x416   : > { %v10929_v1 = vadd.f32 %v3525_v43, %v3205_v44  ;;  %v3220_v59 = vpop.f32.mrf.mxu0 }
 0x417   : > { %v3527_v14 = vpop.f32.mrf.mxu1 }
 0x418   : > { %14737 = vst [vmem:[#allocation56_spill] sm:$0xff] %v10929_v1  ;;  %3796 = vperm.xlu1 %8424, %v10929_v1   ;;  %v3225_v0 = vpop.f32.mrf.mxu0 }
 0x419   : > { %v3532_v25 = vpop.f32.mrf.mxu1  ;;  %v3226_v24 = vadd.f32 %v3225_v0, %v10825_v50 }
 0x41a   : > { %v10933_v34 = vadd.f32 %v3532_v25, %v3212_v18  ;;  %v3227_v19 = vpop.f32.mrf.mxu0 }
 0x41b   : > { %v3534_v5 = vpop.f32.mrf.mxu1 }
 0x41c   : > { %14738 = vst [vmem:[#allocation57_spill] sm:$0xff] %v10933_v34  ;;  %3801 = vperm.xlu0 %8425, %v10933_v34   ;;  %v3232_v13 = vpop.f32.mrf.mxu0 }
 0x41d   : > { %v3539_v60 = vpop.f32.mrf.mxu1  ;;  %v3233_v35 = vadd.f32 %v3232_v13, %v10832_v3 }
 0x41e   : > { %v10937_v52 = vadd.f32 %v3539_v60, %v3219_v37  ;;  %v3234_v33 = vpop.f32.mrf.mxu0 }
 0x41f   : > { %v3541_v45 = vpop.f32.mrf.mxu1 }
 0x420   : > { %14739 = vst [vmem:[#allocation48_spill] sm:$0xff] %v10937_v52  ;;  %3806 = vperm.xlu1 %8424, %v10937_v52   ;;  %v3239_v2 = vpop.f32.mrf.mxu0 }
 0x421   : > { %v3546_v27 = vpop.f32.mrf.mxu1  ;;  %v3240_v50 = vadd.f32 %v3239_v2, %v10838_v61 }
 0x422   : > { %v10941_v23 = vadd.f32 %v3546_v27, %v3226_v24  ;;  %v3241_v31 = vpop.f32.mrf.mxu0 }
 0x423   : > { %v3548_v9 = vpop.f32.mrf.mxu1 }
 0x424   : > { %14740 = vst [vmem:[#allocation51_spill] sm:$0xff] %v10941_v23  ;;  %3811 = vperm.xlu0 %8425, %v10941_v23   ;;  %v3246_v54 = vpop.f32.mrf.mxu0 }
 0x425   : > { %v3553_v4 = vpop.f32.mrf.mxu1  ;;  %v3247_v3 = vadd.f32 %v3246_v54, %v10843_v62 }
 0x426   : > { %v10945_v17 = vadd.f32 %v3553_v4, %v3233_v35  ;;  %v3248_v42 = vpop.f32.mrf.mxu0 }
 0x427   : > { %v3555_v57 = vpop.f32.mrf.mxu1 }
 0x428   : > { %14741 = vst [vmem:[#allocation53_spill] sm:$0xff] %v10945_v17  ;;  %3816 = vperm.xlu1 %8424, %v10945_v17   ;;  %v3253_v6 = vpop.f32.mrf.mxu0 }
 0x429   : > { %v3560_v12 = vpop.f32.mrf.mxu1  ;;  %v3254_v61 = vadd.f32 %v3253_v6, %v10848_v55 }
 0x42a   : > { %v10949_v46 = vadd.f32 %v3560_v12, %v3240_v50  ;;  %v3255_v20 = vpop.f32.mrf.mxu0 }
 0x42b   : > { %v3562_v44 = vpop.f32.mrf.mxu1 }
 0x42c   : > { %14742 = vst [vmem:[#allocation50_spill] sm:$0xff] %v10949_v46  ;;  %3821 = vperm.xlu1 %8424, %v10949_v46   ;;  %v3260_v11 = vpop.f32.mrf.mxu0 }
 0x42d   : > { %v3567_v43 = vpop.f32.mrf.mxu1  ;;  %v3261_v62 = vadd.f32 %v3260_v11, %v10851_v7 }
 0x42e   : > { %v10953_v59 = vadd.f32 %v3567_v43, %v3247_v3  ;;  %v3262_v14 = vpop.f32.mrf.mxu0 }
 0x42f   : > { %v3569_v18 = vpop.f32.mrf.mxu1 }
 0x430   : > { %14743 = vst [vmem:[#allocation59_spill] sm:$0xff] %v10953_v59  ;;  %3826 = vperm.xlu0 %8425, %v10953_v59   ;;  %v3267_v0 = vpop.f32.mrf.mxu0 }
 0x431   : > { %v3574_v25 = vpop.f32.mrf.mxu1  ;;  %v3268_v55 = vadd.f32 %v3267_v0, %v10854_v39 }
 0x432   : > { %v10957_v19 = vadd.f32 %v3574_v25, %v3254_v61  ;;  %v3269_v5 = vpop.f32.mrf.mxu0 }
 0x433   : > { %v3576_v37 = vpop.f32.mrf.mxu1 }
 0x434   : > { %14744 = vst [vmem:[#allocation52_spill] sm:$0xff] %v10957_v19  ;;  %3831 = vperm.xlu0 %8425, %v10957_v19   ;;  %v3274_v13 = vpop.f32.mrf.mxu0 }
 0x435   : > { %v3581_v60 = vpop.f32.mrf.mxu1  ;;  %v3275_v7 = vadd.f32 %v3274_v13, %v10857_v51 }
 0x436   : > { %v10961_v33 = vadd.f32 %v3581_v60, %v3261_v62  ;;  %v3276_v45 = vpop.f32.mrf.mxu0 }
 0x437   : > { %v3583_v24 = vpop.f32.mrf.mxu1 }
 0x438   : > { %14745 = vst [vmem:[#allocation60_spill] sm:$0xff] %v10961_v33  ;;  %3836 = vperm.xlu1 %8424, %v10961_v33   ;;  %v3281_v2 = vpop.f32.mrf.mxu0 }
 0x439   : > { %v3588_v27 = vpop.f32.mrf.mxu1  ;;  %v3282_v39 = vadd.f32 %v3281_v2, %v10860_v8 }
 0x43a   : > { %v10965_v31 = vadd.f32 %v3588_v27, %v3268_v55  ;;  %v3283_v9 = vpop.f32.mrf.mxu0 }
 0x43b   : > { %v3590_v35 = vpop.f32.mrf.mxu1 }
 0x43c   : > { %14746 = vst [vmem:[#allocation62_spill] sm:$0xff] %v10965_v31  ;;  %3841 = vperm.xlu0 %8425, %v10965_v31   ;;  %v3288_v54 = vpop.f32.mrf.mxu0 }
 0x43d   : > { %v3595_v4 = vpop.f32.mrf.mxu1  ;;  %v3289_v51 = vadd.f32 %v3288_v54, %v10863_v29 }
 0x43e   : > { %v10969_v42 = vadd.f32 %v3595_v4, %v3275_v7  ;;  %v3290_v57 = vpop.f32.mrf.mxu0 }
 0x43f   : > { %v3597_v50 = vpop.f32.mrf.mxu1 }
 0x440   : > { %14747 = vst [vmem:[#allocation65_spill] sm:$0xff] %v10969_v42  ;;  %3846 = vperm.xlu1 %8424, %v10969_v42   ;;  %v3295_v6 = vpop.f32.mrf.mxu0 }
 0x441   : > { %v3602_v12 = vpop.f32.mrf.mxu1  ;;  %v3296_v8 = vadd.f32 %v3295_v6, %v10866_v10 }
 0x442   : > { %v10973_v20 = vadd.f32 %v3602_v12, %v3282_v39  ;;  %v3297_v44 = vpop.f32.mrf.mxu0 }
 0x443   : > { %v3604_v3 = vpop.f32.mrf.mxu1 }
 0x444   : > { %14748 = vst [vmem:[#allocation67_spill] sm:$0xff] %v10973_v20  ;;  %3851 = vperm.xlu0 %8425, %v10973_v20   ;;  %v3302_v11 = vpop.f32.mrf.mxu0 }
 0x445   : > { %v3609_v43 = vpop.f32.mrf.mxu1  ;;  %v3303_v29 = vadd.f32 %v3302_v11, %v10869_v56 }
 0x446   : > { %v10977_v14 = vadd.f32 %v3609_v43, %v3289_v51  ;;  %v3304_v18 = vpop.f32.mrf.mxu0 }
 0x447   : > { %v3611_v61 = vpop.f32.mrf.mxu1 }
 0x448   : > { %14749 = vst [vmem:[#allocation71_spill] sm:$0xff] %v10977_v14  ;;  %3856 = vperm.xlu1 %8424, %v10977_v14   ;;  %v3309_v0 = vpop.f32.mrf.mxu0 }
 0x449   : > { %v3616_v25 = vpop.f32.mrf.mxu1  ;;  %v3310_v10 = vadd.f32 %v3309_v0, %v10872_v63 }
 0x44a   : > { %v10981_v5 = vadd.f32 %v3616_v25, %v3296_v8  ;;  %v3311_v37 = vpop.f32.mrf.mxu0 }
 0x44b   : > { %v3618_v62 = vpop.f32.mrf.mxu1 }
 0x44c   : > { %14750 = vst [vmem:[#allocation72_spill] sm:$0xff] %v10981_v5  ;;  %3861 = vperm.xlu0 %8425, %v10981_v5   ;;  %v3316_v13 = vpop.f32.mrf.mxu0 }
 0x44d   : > { %v3623_v60 = vpop.f32.mrf.mxu1  ;;  %v3317_v56 = vadd.f32 %v3316_v13, %v10875_v48 }
 0x44e   : > { %v10985_v45 = vadd.f32 %v3623_v60, %v3303_v29  ;;  %v3318_v24 = vpop.f32.mrf.mxu0 }
 0x44f   : > { %v3625_v55 = vpop.f32.mrf.mxu1 }
 0x450   : > { %14751 = vst [vmem:[#allocation76_spill] sm:$0xff] %v10985_v45  ;;  %3866 = vperm.xlu1 %8424, %v10985_v45   ;;  %v3323_v2 = vpop.f32.mrf.mxu0 }
 0x451   : > { %v3630_v27 = vpop.f32.mrf.mxu1  ;;  %v3324_v63 = vadd.f32 %v3323_v2, %v10878_v32 }
 0x452   : > { %v10989_v9 = vadd.f32 %v3630_v27, %v3310_v10  ;;  %v3325_v35 = vpop.f32.mrf.mxu0 }
 0x453   : > { %v3632_v7 = vpop.f32.mrf.mxu1 }
 0x454   : > { %14752 = vst [vmem:[#allocation77_spill] sm:$0xff] %v10989_v9  ;;  %3871 = vperm.xlu0 %8425, %v10989_v9   ;;  %v3330_v54 = vpop.f32.mrf.mxu0 }
 0x455   : > { %v3637_v4 = vpop.f32.mrf.mxu1  ;;  %v3331_v48 = vadd.f32 %v3330_v54, %v10881_v36 }
 0x456   : > { %v10993_v57 = vadd.f32 %v3637_v4, %v3317_v56  ;;  %v3332_v50 = vpop.f32.mrf.mxu0 }
 0x457   : > { %v3639_v39 = vpop.f32.mrf.mxu1 }
 0x458   : > { %14753 = vst [vmem:[#allocation9_spill] sm:$0xff] %v10993_v57  ;;  %3876 = vperm.xlu1 %8424, %v10993_v57   ;;  %v3337_v6 = vpop.f32.mrf.mxu0 }
 0x459   : > { %v3644_v12 = vpop.f32.mrf.mxu1  ;;  %v3338_v32 = vadd.f32 %v3337_v6, %v10884_v49 }
 0x45a   : > { %v10997_v44 = vadd.f32 %v3644_v12, %v3324_v63  ;;  %v3339_v3 = vpop.f32.mrf.mxu0  ;;  %v3722_v12 = vld [vmem:[%s8703_s14] sm:$0xff] }
 0x45b   : > { %v3646_v51 = vpop.f32.mrf.mxu1 }
 0x45c   : > { %14754 = vst [vmem:[#allocation79_spill] sm:$0xff] %v10997_v44  ;;  %3881 = vperm.xlu0 %8425, %v10997_v44   ;;  %v3344_v11 = vpop.f32.mrf.mxu0 }
 0x45d   : > { %v3651_v43 = vpop.f32.mrf.mxu1  ;;  %v3345_v36 = vadd.f32 %v3344_v11, %v10887_v16 }
 0x45e   : > { %v11001_v18 = vadd.f32 %v3651_v43, %v3331_v48  ;;  %v3346_v61 = vpop.f32.mrf.mxu0  ;;  %v8150_v48 = vld [vmem:[%s8703_s14 + $0x110] sm:$0xff]  ;;  %v3723_v43 = vld [vmem:[%s8703_s14 + $0x8] sm:$0xff] }
 0x45f   : > { %v3653_v8 = vpop.f32.mrf.mxu1 }
 0x460   : > { %14755 = vst [vmem:[#allocation81_spill] sm:$0xff] %v11001_v18  ;;  %3886 = vperm.xlu1 %8424, %v11001_v18   ;;  %v3351_v0 = vpop.f32.mrf.mxu0  ;;  %v8151_v8 = vld [vmem:[%s8703_s14 + $0x118] sm:$0xff] }
 0x461   : > { %v3658_v25 = vpop.f32.mrf.mxu1  ;;  %v3352_v49 = vadd.f32 %v3351_v0, %v10890_v21 }
 0x462   : > { %v11005_v37 = vadd.f32 %v3658_v25, %v3338_v32  ;;  %v3353_v62 = vpop.f32.mrf.mxu0 }
 0x463   : > { %v3660_v29 = vpop.f32.mrf.mxu1 }
 0x464   : > { %14756 = vst [vmem:[#allocation83_spill] sm:$0xff] %v11005_v37  ;;  %3891 = vperm.xlu0 %8425, %v11005_v37   ;;  %v3358_v13 = vpop.f32.mrf.mxu0  ;;  %v3724_v29 = vld [vmem:[%s8703_s14 + $0x10] sm:$0xff] }
 0x465   : > { %v3665_v60 = vpop.f32.mrf.mxu1  ;;  %v3359_v16 = vadd.f32 %v3358_v13, %v10892_v58  ;;  %v8152_v13 = vld [vmem:[%s8703_s14 + $0x120] sm:$0xff] }
 0x466   : > { %v11009_v24 = vadd.f32 %v3665_v60, %v3345_v36  ;;  %v3360_v55 = vpop.f32.mrf.mxu0 }
 0x467   : > { %v3667_v10 = vpop.f32.mrf.mxu1 }
 0x468   : > { %14757 = vst [vmem:[#allocation85_spill] sm:$0xff] %v11009_v24  ;;  %3896 = vperm.xlu1 %8424, %v11009_v24   ;;  %v3365_v2 = vpop.f32.mrf.mxu0 }
 0x469   : > { %v3672_v27 = vpop.f32.mrf.mxu1  ;;  %v3366_v21 = vadd.f32 %v3365_v2, %v10894_v26  ;;  %v3725_v2 = vld [vmem:[%s8703_s14 + $0x18] sm:$0xff] }
 0x46a   : > { %v11013_v35 = vadd.f32 %v3672_v27, %v3352_v49  ;;  %v3367_v7 = vpop.f32.mrf.mxu0 }
 0x46b   : > { %v3674_v56 = vpop.f32.mrf.mxu1  ;;  %v8153_v7 = vld [vmem:[%s8703_s14 + $0x128] sm:$0xff] }
 0x46c   : > { %14758 = vst [vmem:[#allocation89_spill] sm:$0xff] %v11013_v35  ;;  %3901 = vperm.xlu0 %8425, %v11013_v35  }
 0x46d   : > { %v3679_v54 = vpop.f32.mrf.mxu1 }
 0x46e   : > { %v11017_v4 = vadd.f32 %v3679_v54, %v3359_v16 }
 0x46f   : > { %v3681_v50 = vpop.f32.mrf.mxu1 }
 0x470   : > { %14759 = vst [vmem:[#allocation90_spill] sm:$0xff] %v11017_v4  ;;  %3906 = vperm.xlu1 %8424, %v11017_v4  }
 0x471   : > { %v3686_v39 = vpop.f32.mrf.mxu1 }
 0x472   : > { %v11021_v63 = vadd.f32 %v3686_v39, %v3366_v21  ;;  %v3726_v21 = vld [vmem:[%s8703_s14 + $0x20] sm:$0xff] }
 0x473   : > { %v3688_v6 = vpop.f32.mrf.mxu1  ;;  %v11024_v58 = vpop.permute.xlu1 %3756 }
 0x474   : > { %14760 = vst [vmem:[#allocation91_spill] sm:$0xff] %v11021_v63  ;;  %3911 = vperm.xlu0 %8425, %v11021_v63   ;;  %v3914_v11 = vsub.f32 %v3722_v12, %v11024_v58  ;;  %v8154_v6 = vld [vmem:[%s8703_s14 + $0x130] sm:$0xff] }
 0x476   : > { %v3978_v32 = vmul.f32 %v3914_v11, %v3914_v11 }
 0x477   : > { %v11027_v3 = vpop.permute.xlu0 %3761 }
 0x478   : > { %v3915_v0 = vsub.f32 %v3723_v43, %v11027_v3 }
 0x47a   : > { %v3979_v60 = vmul.f32 %v3915_v0, %v3915_v0 }
 0x47b   : > { %v3767_v51 = vpop.permute.xlu1 %3766 }
 0x47c   : > { %v4173_v26 = vsub.f32 %v8150_v48, %v3767_v51  ;;  %v3916_v55 = vsub.f32 %v3724_v29, %v3767_v51 }
 0x47e   : > { %v4237_v25 = vmul.f32 %v4173_v26, %v4173_v26  ;;  %v3980_v56 = vmul.f32 %v3916_v55, %v3916_v55  ;;  %v3727_v26 = vld [vmem:[%s8703_s14 + $0x28] sm:$0xff] }
 0x47f   : > { %v3772_v61 = vpop.permute.xlu0 %3771 }
 0x480   : > { %v4174_v62 = vsub.f32 %v8151_v8, %v3772_v61  ;;  %v3917_v16 = vsub.f32 %v3725_v2, %v3772_v61  ;;  %v8155_v8 = vld [vmem:[%s8703_s14 + $0x138] sm:$0xff] }
 0x482   : > { %v4238_v10 = vmul.f32 %v4174_v62, %v4174_v62  ;;  %v3981_v12 = vmul.f32 %v3917_v16, %v3917_v16  ;;  %v3728_v62 = vld [vmem:[%s8703_s14 + $0x30] sm:$0xff] }
 0x483   : > { %v3777_v36 = vpop.permute.xlu1 %3776 }
 0x484   : > { %v4175_v49 = vsub.f32 %v8152_v13, %v3777_v36  ;;  %v3918_v51 = vsub.f32 %v3726_v21, %v3777_v36  ;;  %v8156_v13 = vld [vmem:[%s8703_s14 + $0x140] sm:$0xff] }
 0x486   : > { %v4239_v54 = vmul.f32 %v4175_v49, %v4175_v49  ;;  %v3982_v61 = vmul.f32 %v3918_v51, %v3918_v51  ;;  %v3729_v49 = vld [vmem:[%s8703_s14 + $0x38] sm:$0xff] }
 0x487   : > { %v3782_v27 = vpop.permute.xlu0 %3781 }
 0x488   : > { %v4176_v50 = vsub.f32 %v8153_v7, %v3782_v27  ;;  %v8157_v7 = vld [vmem:[%s8703_s14 + $0x148] sm:$0xff] }
 0x48a   : > { %v4240_v48 = vmul.f32 %v4176_v50, %v4176_v50  ;;  %v3730_v50 = vld [vmem:[%s8703_s14 + $0x40] sm:$0xff] }
 0x48b   : > { %v3787_v39 = vpop.permute.xlu1 %3786 }
 0x48c   : > { %v4177_v11 = vsub.f32 %v8154_v6, %v3787_v39  ;;  %v8158_v6 = vld [vmem:[%s8703_s14 + $0x150] sm:$0xff] }
 0x48e   : > { %v4241_v0 = vmul.f32 %v4177_v11, %v4177_v11  ;;  %v3731_v11 = vld [vmem:[%s8703_s14 + $0x48] sm:$0xff] }
 0x48f   : > { %v3792_v43 = vpop.permute.xlu0 %3791 }
 0x493   : > { %4010 = vadd.xlane.f32.xlu0 %v3978_v32  ;;  %v3919_v32 = vsub.f32 %v3727_v26, %v3782_v27  ;;  %v3797_v29 = vpop.permute.xlu1 %3796 }
 0x494   : > { %4271 = vadd.xlane.f32.xlu1 %v4237_v25  ;;  %v4178_v25 = vsub.f32 %v8155_v8, %v3792_v43  ;;  %v3733_v8 = vld [vmem:[%s8703_s14 + $0x58] sm:$0xff] }
 0x495   : > { %v3983_v36 = vmul.f32 %v3919_v32, %v3919_v32 }
 0x496   : > { %v4242_v55 = vmul.f32 %v4178_v25, %v4178_v25  ;;  %v3732_v25 = vld [vmem:[%s8703_s14 + $0x50] sm:$0xff] }
 0x497   : > { %4012 = vadd.xlane.f32.xlu0 %v3979_v60  ;;  %v3920_v60 = vsub.f32 %v3728_v62, %v3787_v39  ;;  %v3802_v2 = vpop.permute.xlu0 %3801  ;;  %v8159_v62 = vld [vmem:[%s8703_s14 + $0x158] sm:$0xff] }
 0x498   : > { %4273 = vadd.xlane.f32.xlu1 %v4238_v10  ;;  %v4179_v10 = vsub.f32 %v8156_v13, %v3797_v29 }
 0x499   : > { %v3984_v27 = vmul.f32 %v3920_v60, %v3920_v60 }
 0x49a   : > { %v4243_v16 = vmul.f32 %v4179_v10, %v4179_v10  ;;  %v3734_v10 = vld [vmem:[%s8703_s14 + $0x60] sm:$0xff] }
 0x49b   : > { %4014 = vadd.xlane.f32.xlu0 %v3980_v56  ;;  %v3921_v56 = vsub.f32 %v3729_v49, %v3792_v43  ;;  %v3807_v21 = vpop.permute.xlu1 %3806  ;;  %v8160_v49 = vld [vmem:[%s8703_s14 + $0x160] sm:$0xff] }
 0x49c   : > { %4275 = vadd.xlane.f32.xlu1 %v4239_v54  ;;  %v4180_v54 = vsub.f32 %v8157_v7, %v3802_v2 }
 0x49d   : > { %v3985_v39 = vmul.f32 %v3921_v56, %v3921_v56 }
 0x49e   : > { %v4244_v51 = vmul.f32 %v4180_v54, %v4180_v54 }
 0x49f   : > { %4016 = vadd.xlane.f32.xlu0 %v3981_v12  ;;  %v3922_v12 = vsub.f32 %v3730_v50, %v3797_v29  ;;  %v3812_v26 = vpop.permute.xlu0 %3811  ;;  %v3735_v50 = vld [vmem:[%s8703_s14 + $0x68] sm:$0xff] }
 0x4a0   : > { %4277 = vadd.xlane.f32.xlu1 %v4240_v48  ;;  %v4181_v48 = vsub.f32 %v8158_v6, %v3807_v21  ;;  %v8161_v6 = vld [vmem:[%s8703_s14 + $0x168] sm:$0xff] }
 0x4a1   : > { %v3986_v43 = vmul.f32 %v3922_v12, %v3922_v12 }
 0x4a2   : > { %v4245_v32 = vmul.f32 %v4181_v48, %v4181_v48 }
 0x4a3   : > { %4018 = vadd.xlane.f32.xlu0 %v3982_v61  ;;  %v3923_v61 = vsub.f32 %v3731_v11, %v3802_v2  ;;  %v3817_v13 = vpop.permute.xlu1 %3816  ;;  %v3737_v11 = vld [vmem:[%s8703_s14 + $0x78] sm:$0xff] }
 0x4a4   : > { %4279 = vadd.xlane.f32.xlu1 %v4241_v0  ;;  %v3925_v0 = vsub.f32 %v3733_v8, %v3812_v26  ;;  %v4183_v54 = vsub.f32 %v8160_v49, %v3817_v13 }
 0x4a5   : > { %v3987_v29 = vmul.f32 %v3923_v61, %v3923_v61 }
 0x4a6   : > { %v3989_v60 = vmul.f32 %v3925_v0, %v3925_v0 }
 0x4a7   : > { %4020 = vadd.xlane.f32.xlu0 %v3983_v36  ;;  %v3924_v36 = vsub.f32 %v3732_v25, %v3807_v21  ;;  %v3822_v56 = vpop.permute.xlu1 %3821 }
 0x4a8   : > { %4281 = vadd.xlane.f32.xlu1 %v4242_v55  ;;  %v4182_v55 = vsub.f32 %v8159_v62, %v3812_v26  ;;  %v3927_v21 = vsub.f32 %v3735_v50, %v3822_v56  ;;  %v4184_v48 = vsub.f32 %v8161_v6, %v3822_v56  ;;  %v3736_v26 = vld [vmem:[%s8703_s14 + $0x70] sm:$0xff] }
 0x4a9   : > { %v3988_v2 = vmul.f32 %v3924_v36, %v3924_v36  ;;  %v8162_v62 = vld [vmem:[%s8703_s14 + $0x170] sm:$0xff] }
 0x4aa   : > { %v3991_v8 = vmul.f32 %v3927_v21, %v3927_v21  ;;  %v4248_v61 = vmul.f32 %v4184_v48, %v4184_v48  ;;  %v8148_v21 = vld [vmem:[%s8703_s14 + $0x100] sm:$0xff] }
 0x4ab   : > { %4022 = vadd.xlane.f32.xlu0 %v3984_v27  ;;  %v3827_v7 = vpop.permute.xlu0 %3826  ;;  %v3926_v27 = vsub.f32 %v3734_v10, %v3817_v13  ;;  %v8163_v10 = vld [vmem:[%s8703_s14 + $0x178] sm:$0xff] }
 0x4ac   : > { %4283 = vadd.xlane.f32.xlu1 %v4243_v16  ;;  %v4246_v16 = vmul.f32 %v4182_v55, %v4182_v55  ;;  %v4185_v36 = vsub.f32 %v8162_v62, %v3827_v7 }
 0x4ae   : > { %v4249_v49 = vmul.f32 %v4185_v36, %v4185_v36 }
 0x4af   : > { %4024 = vadd.xlane.f32.xlu0 %v3985_v39  ;;  %v3990_v39 = vmul.f32 %v3926_v27, %v3926_v27  ;;  %v3832_v12 = vpop.permute.xlu0 %3831 }
 0x4b0   : > { %4285 = vadd.xlane.f32.xlu1 %v4244_v51  ;;  %v4247_v51 = vmul.f32 %v4183_v54, %v4183_v54  ;;  %v3745_v54 = vld [vmem:[%s8703_s14 + $0xb8] sm:$0xff] }
 0x4b3   : > { %4026 = vadd.xlane.f32.xlu0 %v3986_v43  ;;  %v3929_v43 = vsub.f32 %v3737_v11, %v3832_v12  ;;  %v11058_v0 = vpop.permute.xlu1 %3836 }
 0x4b4   : > { %4287 = vadd.xlane.f32.xlu1 %v4245_v32  ;;  %v3928_v32 = vsub.f32 %v3736_v26, %v3827_v7  ;;  %v4171_v26 = vsub.f32 %v8148_v21, %v11024_v58 }
 0x4b5   : > { %v3993_v13 = vmul.f32 %v3929_v43, %v3929_v43  ;;  %v3747_v43 = vld [vmem:[%s8703_s14 + $0xc8] sm:$0xff] }
 0x4b7   : > { %4028 = vadd.xlane.f32.xlu0 %v3987_v29  ;;  %v11060_v25 = vpop.permute.xlu0 %3841  ;;  %v3992_v29 = vmul.f32 %v3928_v32, %v3928_v32 }
 0x4b8   : > { %4032 = vadd.xlane.f32.xlu1 %v3989_v60 }
 0x4bb   : > { %4030 = vadd.xlane.f32.xlu0 %v3988_v2  ;;  %v11063_v60 = vpop.permute.xlu1 %3846  ;;  %v4186_v2 = vsub.f32 %v8163_v10, %v3832_v12  ;;  %v3746_v12 = vld [vmem:[%s8703_s14 + $0xc0] sm:$0xff] }
 0x4bc   : > { %4289 = vadd.xlane.f32.xlu1 %v4246_v16  ;;  %v8149_v16 = vld [vmem:[%s8703_s14 + $0x108] sm:$0xff] }
 0x4bd   : > { %v4250_v7 = vmul.f32 %v4186_v2, %v4186_v2  ;;  %v4172_v50 = vsub.f32 %v8149_v16, %v11027_v3 }
 0x4bf   : > { %4034 = vadd.xlane.f32.xlu0 %v3990_v39  ;;  %v11065_v55 = vpop.permute.xlu0 %3851  ;;  %v4236_v48 = vmul.f32 %v4172_v50, %v4172_v50  ;;  %v3750_v50 = vld [vmem:[%s8703_s14 + $0xe0] sm:$0xff] }
 0x4c0   : > { %4291 = vadd.xlane.f32.xlu1 %v4247_v51 }
 0x4c3   : > { %4036 = vadd.xlane.f32.xlu0 %v3991_v8  ;;  %v11068_v27 = vpop.permute.xlu1 %3856 }
 0x4c4   : > { %4293 = vadd.xlane.f32.xlu1 %v4248_v61  ;;  %v4235_v61 = vmul.f32 %v4171_v26, %v4171_v26  ;;  %v3751_v26 = vld [vmem:[%s8703_s14 + $0xe8] sm:$0xff] }
 0x4c7   : > { %4040 = vadd.xlane.f32.xlu0 %v3993_v13  ;;  %v11070_v56 = vpop.permute.xlu0 %3861 }
 0x4c8   : > { %4038 = vadd.xlane.f32.xlu1 %v3992_v29  ;;  %v3748_v29 = vld [vmem:[%s8703_s14 + $0xd0] sm:$0xff] }
 0x4cb   : > { %v11075_v6 = vpop.permute.xlu1 %3866 }
 0x4cc   : > { %4295 = vadd.xlane.f32.xlu1 %v4249_v49  ;;  %v3749_v49 = vld [vmem:[%s8703_s14 + $0xd8] sm:$0xff] }
 0x4cf   : > { %v11077_v39 = vpop.permute.xlu0 %3871 }
 0x4d0   : > { %4297 = vadd.xlane.f32.xlu1 %v4250_v7  ;;  %v3937_v51 = vsub.f32 %v3745_v54, %v11077_v39  ;;  %v8176_v7 = vld [vmem:[%s8703_s14 + $0x1e0] sm:$0xff] }
 0x4d2   : > { %v4001_v11 = vmul.f32 %v3937_v51, %v3937_v51 }
 0x4d3   : > { %v11083_v8 = vpop.permute.xlu1 %3876 }
 0x4d4   : > { %4269 = vadd.xlane.f32.xlu1 %v4236_v48  ;;  %4056 = vadd.xlane.f32.xlu0 %v4001_v11  ;;  %v3938_v3 = vsub.f32 %v3746_v12, %v11083_v8  ;;  %v8177_v11 = vld [vmem:[%s8703_s14 + $0x1e8] sm:$0xff] }
 0x4d6   : > { %v4002_v32 = vmul.f32 %v3938_v3, %v3938_v3 }
 0x4d7   : > { %v11087_v62 = vpop.permute.xlu0 %3881 }
 0x4d8   : > { %4267 = vadd.xlane.f32.xlu1 %v4235_v61  ;;  %4058 = vadd.xlane.f32.xlu0 %v4002_v32  ;;  %v3939_v13 = vsub.f32 %v3747_v43, %v11087_v62 }
 0x4da   : > { %v4003_v58 = vmul.f32 %v3939_v13, %v3939_v13 }
 0x4db   : > { %v3887_v36 = vpop.permute.xlu1 %3886 }
 0x4dc   : > { %4060 = vadd.xlane.f32.xlu0 %v4003_v58  ;;  %v3940_v10 = vsub.f32 %v3748_v29, %v3887_v36  ;;  %v8178_v29 = vld [vmem:[%s8703_s14 + $0x1f0] sm:$0xff] }
 0x4dd   : > { %v3752_v58 = vld [vmem:[%s8703_s14 + $0xf0] sm:$0xff] }
 0x4de   : > { %v4004_v2 = vmul.f32 %v3940_v10, %v3940_v10 }
 0x4df   : > { %v3892_v16 = vpop.permute.xlu0 %3891 }
 0x4e0   : > { %4062 = vadd.xlane.f32.xlu0 %v4004_v2  ;;  %v3941_v54 = vsub.f32 %v3749_v49, %v3892_v16 }
 0x4e2   : > { %v4005_v21 = vmul.f32 %v3941_v54, %v3941_v54  ;;  %v8175_v54 = vld [vmem:[%s8703_s14 + $0x1d8] sm:$0xff] }
 0x4e3   : > { %v3897_v51 = vpop.permute.xlu1 %3896 }
 0x4e4   : > { %4064 = vadd.xlane.f32.xlu0 %v4005_v21  ;;  %v4199_v12 = vsub.f32 %v8176_v7, %v3897_v51  ;;  %v3942_v48 = vsub.f32 %v3750_v50, %v3897_v51  ;;  %v3753_v21 = vld [vmem:[%s8703_s14 + $0xf8] sm:$0xff] }
 0x4e6   : > { %v4263_v3 = vmul.f32 %v4199_v12, %v4199_v12  ;;  %v4006_v43 = vmul.f32 %v3942_v48, %v3942_v48  ;;  %v4198_v48 = vsub.f32 %v8175_v54, %v3892_v16 }
 0x4e7   : > { %v3902_v61 = vpop.permute.xlu0 %3901 }
 0x4e8   : > { %4323 = vadd.xlane.f32.xlu1 %v4263_v3  ;;  %4066 = vadd.xlane.f32.xlu0 %v4006_v43  ;;  %v4200_v32 = vsub.f32 %v8177_v11, %v3902_v61  ;;  %v3943_v13 = vsub.f32 %v3751_v26, %v3902_v61  ;;  %v8174_v26 = vld [vmem:[%s8703_s14 + $0x1d0] sm:$0xff]  ;;  %v4262_v61 = vmul.f32 %v4198_v48, %v4198_v48  ;;  %v8172_v48 = vld [vmem:[%s8703_s14 + $0x1c0] sm:$0xff] }
 0x4e9   : > { %v3744_v3 = vld [vmem:[%s8703_s14 + $0xb0] sm:$0xff] }
 0x4ea   : > { %v4264_v10 = vmul.f32 %v4200_v32, %v4200_v32  ;;  %v4007_v49 = vmul.f32 %v3943_v13, %v3943_v13  ;;  %v4197_v13 = vsub.f32 %v8174_v26, %v3887_v36  ;;  %v3741_v26 = vld [vmem:[%s8703_s14 + $0x98] sm:$0xff] }
 0x4eb   : > { %v3907_v2 = vpop.permute.xlu1 %3906 }
 0x4ec   : > { %4325 = vadd.xlane.f32.xlu1 %v4264_v10  ;;  %4068 = vadd.xlane.f32.xlu0 %v4007_v49  ;;  %v4201_v7 = vsub.f32 %v8178_v29, %v3907_v2  ;;  %v3944_v50 = vsub.f32 %v3752_v58, %v3907_v2  ;;  %v3936_v29 = vsub.f32 %v3744_v3, %v11075_v6  ;;  %v8179_v10 = vld [vmem:[%s8703_s14 + $0x1f8] sm:$0xff]  ;;  %v3743_v58 = vld [vmem:[%s8703_s14 + $0xa8] sm:$0xff] }
 0x4ed   : > { %v4261_v16 = vmul.f32 %v4197_v13, %v4197_v13  ;;  %v3935_v54 = vsub.f32 %v3743_v58, %v11070_v56  ;;  %v3740_v13 = vld [vmem:[%s8703_s14 + $0x90] sm:$0xff] }
 0x4ee   : > { %v4265_v51 = vmul.f32 %v4201_v7, %v4201_v7  ;;  %v4008_v12 = vmul.f32 %v3944_v50, %v3944_v50  ;;  %v4000_v49 = vmul.f32 %v3936_v29, %v3936_v29  ;;  %v8173_v7 = vld [vmem:[%s8703_s14 + $0x1c8] sm:$0xff]  ;;  %v3742_v50 = vld [vmem:[%s8703_s14 + $0xa0] sm:$0xff]  ;;  %v3932_v58 = vsub.f32 %v3740_v13, %v11063_v60 }
 0x4ef   : > { %v3912_v11 = vpop.permute.xlu0 %3911 }
 0x4f0   : > { %4327 = vadd.xlane.f32.xlu1 %v4265_v51  ;;  %4070 = vadd.xlane.f32.xlu0 %v4008_v12  ;;  %v3945_v43 = vsub.f32 %v3753_v21, %v3912_v11  ;;  %v4202_v2 = vsub.f32 %v8179_v10, %v3912_v11  ;;  %v3999_v21 = vmul.f32 %v3935_v54, %v3935_v54 }
 0x4f1   : > { %v4196_v51 = vsub.f32 %v8173_v7, %v11087_v62  ;;  %v3934_v12 = vsub.f32 %v3742_v50, %v11068_v27  ;;  %v8169_v50 = vld [vmem:[%s8703_s14 + $0x1a8] sm:$0xff] }
 0x4f2   : > { %v4009_v32 = vmul.f32 %v3945_v43, %v3945_v43  ;;  %v4266_v36 = vmul.f32 %v4202_v2, %v4202_v2  ;;  %v4195_v43 = vsub.f32 %v8172_v48, %v11083_v8  ;;  %v3996_v2 = vmul.f32 %v3932_v58, %v3932_v58  ;;  %v8167_v48 = vld [vmem:[%s8703_s14 + $0x198] sm:$0xff] }
 0x4f3   : > { %v4260_v11 = vmul.f32 %v4196_v51, %v4196_v51  ;;  %v3998_v3 = vmul.f32 %v3934_v12, %v3934_v12  ;;  %v4192_v51 = vsub.f32 %v8169_v50, %v11070_v56 }
 0x4f4   : > { %4321 = vadd.xlane.f32.xlu1 %v4262_v61  ;;  %4072 = vadd.xlane.f32.xlu0 %v4009_v32  ;;  %v3933_v61 = vsub.f32 %v3741_v26, %v11065_v55  ;;  %v8171_v32 = vld [vmem:[%s8703_s14 + $0x1b8] sm:$0xff]  ;;  %v4259_v62 = vmul.f32 %v4195_v43, %v4195_v43  ;;  %v8168_v26 = vld [vmem:[%s8703_s14 + $0x1a0] sm:$0xff] }
 0x4f5   : > { %v4194_v10 = vsub.f32 %v8171_v32, %v11077_v39  ;;  %v4191_v43 = vsub.f32 %v8168_v26, %v11068_v27  ;;  %v8166_v32 = vld [vmem:[%s8703_s14 + $0x190] sm:$0xff] }
 0x4f6   : > { %v3997_v29 = vmul.f32 %v3933_v61, %v3933_v61  ;;  %v8165_v61 = vld [vmem:[%s8703_s14 + $0x188] sm:$0xff] }
 0x4f7   : > { %v4258_v8 = vmul.f32 %v4194_v10, %v4194_v10  ;;  %v4188_v56 = vsub.f32 %v8165_v61, %v11060_v25  ;;  %v8164_v10 = vld [vmem:[%s8703_s14 + $0x180] sm:$0xff] }
 0x4f8   : > { %4319 = vadd.xlane.f32.xlu1 %v4261_v16  ;;  %4054 = vadd.xlane.f32.xlu0 %v4000_v49  ;;  %v8170_v16 = vld [vmem:[%s8703_s14 + $0x1b0] sm:$0xff]  ;;  %v3739_v49 = vld [vmem:[%s8703_s14 + $0x88] sm:$0xff] }
 0x4f9   : > { %v4193_v54 = vsub.f32 %v8170_v16, %v11075_v6  ;;  %v3931_v7 = vsub.f32 %v3739_v49, %v11060_v25  ;;  %v4256_v6 = vmul.f32 %v4192_v51, %v4192_v51  ;;  %v4252_v58 = vmul.f32 %v4188_v56, %v4188_v56  ;;  %v3949_v51 = vld [vmem:[#allocation3 + $0x18] sm:$0xff]  ;;  %v3951_v56 = vld [vmem:[#allocation3 + $0x28] sm:$0xff] }
 0x4fa   : > { %v4187_v49 = vsub.f32 %v8164_v10, %v11058_v0 }
 0x4fb   : > { %v4257_v39 = vmul.f32 %v4193_v54, %v4193_v54 }
 0x4fc   : > { %4329 = vadd.xlane.f32.xlu1 %v4266_v36  ;;  %4052 = vadd.xlane.f32.xlu0 %v3999_v21  ;;  %v3738_v36 = vld [vmem:[%s8703_s14 + $0x80] sm:$0xff]  ;;  %v3995_v21 = vmul.f32 %v3931_v7, %v3931_v7  ;;  %v4251_v27 = vmul.f32 %v4187_v49, %v4187_v49  ;;  %v3947_v7 = vld [vmem:[#allocation3 + $0x8] sm:$0xff] }
 0x4fd   : > { %v3930_v12 = vsub.f32 %v3738_v36, %v11058_v0  ;;  %v3948_v36 = vld [vmem:[#allocation3 + $0x10] sm:$0xff] }
 0x500   : > { %4317 = vadd.xlane.f32.xlu1 %v4260_v11  ;;  %4050 = vadd.xlane.f32.xlu0 %v3998_v3  ;;  %v3994_v11 = vmul.f32 %v3930_v12, %v3930_v12  ;;  %v4190_v3 = vsub.f32 %v8167_v48, %v11065_v55  ;;  %v3946_v55 = vld [vmem:[#allocation3] sm:$0xff] }
 0x502   : > { %v4254_v13 = vmul.f32 %v4190_v3, %v4190_v3 }
 0x504   : > { %4315 = vadd.xlane.f32.xlu1 %v4259_v62  ;;  %4048 = vadd.xlane.f32.xlu0 %v3997_v29  ;;  %v4255_v62 = vmul.f32 %v4191_v43, %v4191_v43  ;;  %v4189_v29 = vsub.f32 %v8166_v32, %v11063_v60 }
 0x506   : > { %v4253_v16 = vmul.f32 %v4189_v29, %v4189_v29 }
 0x508   : > { %4313 = vadd.xlane.f32.xlu1 %v4258_v8  ;;  %4046 = vadd.xlane.f32.xlu0 %v3996_v2 }
 0x50c   : > { %4311 = vadd.xlane.f32.xlu1 %v4257_v39  ;;  %4044 = vadd.xlane.f32.xlu0 %v3995_v21 }
 0x510   : > { %4309 = vadd.xlane.f32.xlu1 %v4256_v6  ;;  %4042 = vadd.xlane.f32.xlu0 %v3994_v11  ;;  %v3950_v6 = vld [vmem:[#allocation3 + $0x20] sm:$0xff]  ;;  %v4524_v11 = vld [vmem:[%s13561_s2 + $0x8] sm:$0xff] }
 0x511   : > { %v11143_v3 = vand.u32 4294901760, %v4524_v11 }
 0x513   : > { %14761 = vst [vmem:[#allocation95_spill] sm:$0xff] %v11143_v3  ;;  %5389 = vmatprep.mubr.f32.mxu1 %v11143_v3 }
 0x514   : > { %4305 = vadd.xlane.f32.xlu1 %v4254_v13  ;;  %4307 = vadd.xlane.f32.xlu0 %v4255_v62  ;;  %v11146_v13 = vsub.f32 %v4524_v11, %v11143_v3 }
 0x516   : > { %14762 = vst [vmem:[#allocation96_spill] sm:$0xff] %v11146_v13  ;;  %v13909_v10 = vand.u32 4294901760, %v11146_v13 }
 0x518   : > { %4301 = vadd.xlane.f32.xlu1 %v4252_v58  ;;  %4303 = vadd.xlane.f32.xlu0 %v4253_v16 }
 0x51c   : > { %v4011_v8 = vpop.xlane.xlu0 %4010  ;;  %4299 = vadd.xlane.f32.xlu0 %v4251_v27 }
 0x51d   : > { %v4074_v2 = vadd.f32 %v4011_v8, %v3946_v55  ;;  %v4272_v54 = vpop.xlane.xlu1 %4271  ;;  %v4686_v55 = vsub.f32 %v11146_v13, %v13909_v10  ;;  %v3952_v8 = vld [vmem:[#allocation3 + $0x30] sm:$0xff] }
 0x51f   : > { %4106 = vst.msk [vmem:[#allocation3] sm:$0xff] %vm925_vm3, %v4074_v2 }
 0x520   : > { %v4013_v25 = vpop.xlane.xlu0 %4012 }
 0x521   : > { %v4075_v60 = vadd.f32 %v4013_v25, %v3947_v7  ;;  %v4274_v50 = vpop.xlane.xlu1 %4273  ;;  %v4687_v7 = vand.u32 4294901760, %v4686_v55 }
 0x523   : > { %4107 = vst.msk [vmem:[#allocation3 + $0x8] sm:$0xff] %vm925_vm3, %v4075_v60  ;;  %4688 = vmatprep.mubr.f32.mxu0 %v4687_v7 }
 0x524   : > { %v4015_v39 = vpop.xlane.xlu0 %4014 }
 0x525   : > { %v4076_v21 = vadd.f32 %v4015_v39, %v3948_v36  ;;  %v4276_v0 = vpop.xlane.xlu1 %4275  ;;  %v3953_v39 = vld [vmem:[#allocation3 + $0x38] sm:$0xff] }
 0x527   : > { %4108 = vst.msk [vmem:[#allocation3 + $0x10] sm:$0xff] %vm925_vm3, %v4076_v21 }
 0x528   : > { %v4017_v12 = vpop.xlane.xlu0 %4016 }
 0x529   : > { %v4077_v48 = vadd.f32 %v4017_v12, %v3949_v51  ;;  %v4278_v26 = vpop.xlane.xlu1 %4277 }
 0x52b   : > { %4109 = vst.msk [vmem:[#allocation3 + $0x18] sm:$0xff] %vm925_vm3, %v4077_v48 }
 0x52c   : > { %v4019_v43 = vpop.xlane.xlu0 %4018 }
 0x52d   : > { %v4078_v61 = vadd.f32 %v4019_v43, %v3950_v6  ;;  %v4280_v32 = vpop.xlane.xlu1 %4279  ;;  %v3954_v6 = vld [vmem:[#allocation3 + $0x40] sm:$0xff] }
 0x52e   : > { %v4205_v62 = vld [vmem:[#allocation3 + $0x10] sm:$0xff] }
 0x52f   : > { %v4333_v29 = vadd.f32 %v4272_v54, %v4205_v62  ;;  %4110 = vst.msk [vmem:[#allocation3 + $0x20] sm:$0xff] %vm925_vm3, %v4078_v61 }
 0x530   : > { %v4021_v58 = vpop.xlane.xlu0 %4020 }
 0x531   : > { %4365 = vst.msk [vmem:[#allocation3 + $0x10] sm:$0xff] %vm925_vm3, %v4333_v29  ;;  %v4079_v16 = vadd.f32 %v4021_v58, %v3951_v56  ;;  %v4282_v49 = vpop.xlane.xlu1 %4281  ;;  %v3955_v29 = vld [vmem:[#allocation3 + $0x48] sm:$0xff]  ;;  %v3957_v58 = vld [vmem:[#allocation3 + $0x58] sm:$0xff] }
 0x532   : > { %v4206_v27 = vld [vmem:[#allocation3 + $0x18] sm:$0xff] }
 0x533   : > { %v4334_v2 = vadd.f32 %v4274_v50, %v4206_v27  ;;  %4111 = vst.msk [vmem:[#allocation3 + $0x28] sm:$0xff] %vm925_vm3, %v4079_v16 }
 0x534   : > { %v4023_v54 = vpop.xlane.xlu0 %4022 }
 0x535   : > { %4366 = vst.msk [vmem:[#allocation3 + $0x18] sm:$0xff] %vm925_vm3, %v4334_v2  ;;  %v4080_v25 = vadd.f32 %v4023_v54, %v3952_v8  ;;  %v4284_v60 = vpop.xlane.xlu1 %4283  ;;  %v3956_v2 = vld [vmem:[#allocation3 + $0x50] sm:$0xff] }
 0x536   : > { %v4207_v36 = vld [vmem:[#allocation3 + $0x20] sm:$0xff] }
 0x537   : > { %v4335_v21 = vadd.f32 %v4276_v0, %v4207_v36  ;;  %4112 = vst.msk [vmem:[#allocation3 + $0x30] sm:$0xff] %vm925_vm3, %v4080_v25 }
 0x538   : > { %v4025_v51 = vpop.xlane.xlu0 %4024 }
 0x539   : > { %4367 = vst.msk [vmem:[#allocation3 + $0x20] sm:$0xff] %vm925_vm3, %v4335_v21  ;;  %v4081_v12 = vadd.f32 %v4025_v51, %v3953_v39  ;;  %v4286_v48 = vpop.xlane.xlu1 %4285  ;;  %v3958_v39 = vld [vmem:[#allocation3 + $0x60] sm:$0xff] }
 0x53a   : > { %v4208_v50 = vld [vmem:[#allocation3 + $0x28] sm:$0xff] }
 0x53b   : > { %v4336_v11 = vadd.f32 %v4278_v26, %v4208_v50  ;;  %4113 = vst.msk [vmem:[#allocation3 + $0x38] sm:$0xff] %vm925_vm3, %v4081_v12 }
 0x53c   : > { %v4027_v43 = vpop.xlane.xlu0 %4026 }
 0x53d   : > { %4368 = vst.msk [vmem:[#allocation3 + $0x28] sm:$0xff] %vm925_vm3, %v4336_v11  ;;  %v4082_v61 = vadd.f32 %v4027_v43, %v3954_v6  ;;  %v4288_v62 = vpop.xlane.xlu1 %4287  ;;  %v3959_v6 = vld [vmem:[#allocation3 + $0x68] sm:$0xff] }
 0x53e   : > { %v4209_v56 = vld [vmem:[#allocation3 + $0x30] sm:$0xff] }
 0x53f   : > { %v4337_v0 = vadd.f32 %v4280_v32, %v4209_v56  ;;  %4114 = vst.msk [vmem:[#allocation3 + $0x40] sm:$0xff] %vm925_vm3, %v4082_v61 }
 0x540   : > { %v4029_v16 = vpop.xlane.xlu0 %4028 }
 0x541   : > { %4369 = vst.msk [vmem:[#allocation3 + $0x30] sm:$0xff] %vm925_vm3, %v4337_v0  ;;  %v4083_v55 = vadd.f32 %v4029_v16, %v3955_v29  ;;  %v4033_v27 = vpop.xlane.xlu1 %4032 }
 0x542   : > { %v4210_v8 = vld [vmem:[#allocation3 + $0x38] sm:$0xff]  ;;  %v4085_v26 = vadd.f32 %v4033_v27, %v3957_v58 }
 0x543   : > { %v4338_v7 = vadd.f32 %v4282_v49, %v4210_v8  ;;  %4115 = vst.msk [vmem:[#allocation3 + $0x48] sm:$0xff] %vm925_vm3, %v4083_v55  ;;  %v3961_v58 = vld [vmem:[#allocation3 + $0x78] sm:$0xff]  ;;  %v3960_v55 = vld [vmem:[#allocation3 + $0x70] sm:$0xff] }
 0x544   : > { %4117 = vst.msk [vmem:[#allocation3 + $0x58] sm:$0xff] %vm925_vm3, %v4085_v26  ;;  %v4031_v54 = vpop.xlane.xlu0 %4030 }
 0x545   : > { %4370 = vst.msk [vmem:[#allocation3 + $0x38] sm:$0xff] %vm925_vm3, %v4338_v7  ;;  %v4084_v32 = vadd.f32 %v4031_v54, %v3956_v2  ;;  %v4290_v25 = vpop.xlane.xlu1 %4289 }
 0x546   : > { %v4211_v36 = vld [vmem:[#allocation3 + $0x40] sm:$0xff] }
 0x547   : > { %v4339_v21 = vadd.f32 %v4284_v60, %v4211_v36  ;;  %4116 = vst.msk [vmem:[#allocation3 + $0x50] sm:$0xff] %vm925_vm3, %v4084_v32 }
 0x548   : > { %v4035_v51 = vpop.xlane.xlu0 %4034 }
 0x549   : > { %4371 = vst.msk [vmem:[#allocation3 + $0x40] sm:$0xff] %vm925_vm3, %v4339_v21  ;;  %v4086_v12 = vadd.f32 %v4035_v51, %v3958_v39  ;;  %v4292_v50 = vpop.xlane.xlu1 %4291  ;;  %v4439_v39 = vmul.f32 %v10945_v17, %v10945_v17  ;;  %v4440_v21 = vmul.f32 %v10949_v46, %v10949_v46 }
 0x54a   : > { %v4212_v49 = vld [vmem:[#allocation3 + $0x48] sm:$0xff] }
 0x54b   : > { %v4340_v11 = vadd.f32 %v4286_v48, %v4212_v49  ;;  %v4214_v43 = vld [vmem:[#allocation3 + $0x58] sm:$0xff]  ;;  %4118 = vst.msk [vmem:[#allocation3 + $0x60] sm:$0xff] %vm925_vm3, %v4086_v12 }
 0x54c   : > { %v4342_v61 = vadd.f32 %v4290_v25, %v4214_v43  ;;  %v4037_v56 = vpop.xlane.xlu0 %4036  ;;  %v4204_v43 = vld [vmem:[#allocation3 + $0x8] sm:$0xff] }
 0x54d   : > { %4372 = vst.msk [vmem:[#allocation3 + $0x48] sm:$0xff] %vm925_vm3, %v4340_v11  ;;  %v4087_v29 = vadd.f32 %v4037_v56, %v3959_v6  ;;  %v4294_v0 = vpop.xlane.xlu1 %4293  ;;  %v4438_v6 = vmul.f32 %v10941_v23, %v10941_v23  ;;  %v3973_v23 = vld [vmem:[#allocation3 + $0xd8] sm:$0xff] }
 0x54e   : > { %v4213_v60 = vld [vmem:[#allocation3 + $0x50] sm:$0xff]  ;;  %4374 = vst.msk [vmem:[#allocation3 + $0x58] sm:$0xff] %vm925_vm3, %v4342_v61 }
 0x54f   : > { %v4341_v16 = vadd.f32 %v4288_v62, %v4213_v60  ;;  %4119 = vst.msk [vmem:[#allocation3 + $0x68] sm:$0xff] %vm925_vm3, %v4087_v29  ;;  %v4437_v60 = vmul.f32 %v10937_v52, %v10937_v52 }
 0x550   : > { %v4041_v27 = vpop.xlane.xlu0 %4040 }
 0x551   : > { %4373 = vst.msk [vmem:[#allocation3 + $0x50] sm:$0xff] %vm925_vm3, %v4341_v16  ;;  %v4089_v48 = vadd.f32 %v4041_v27, %v3961_v58  ;;  %v4039_v8 = vpop.xlane.xlu1 %4038  ;;  %v4471_v58 = vmul.f32 0.0, %v4439_v39  ;;  %v4472_v16 = vmul.f32 0.0, %v4440_v21  ;;  %v3970_v27 = vld [vmem:[#allocation3 + $0xc0] sm:$0xff]  ;;  %v11197_v39 = vmul.f32 %v10897_v28, %v10897_v28 }
 0x552   : > { %v4215_v26 = vld [vmem:[#allocation3 + $0x60] sm:$0xff]  ;;  %v4088_v2 = vadd.f32 %v4039_v8, %v3960_v55  ;;  %v4442_v55 = vmul.f32 %v10957_v19, %v10957_v19  ;;  %v4435_v21 = vmul.f32 %v10929_v1, %v10929_v1 }
 0x553   : > { %v4343_v7 = vadd.f32 %v4292_v50, %v4215_v26  ;;  %4121 = vst.msk [vmem:[#allocation3 + $0x78] sm:$0xff] %vm925_vm3, %v4089_v48  ;;  %v3969_v50 = vld [vmem:[#allocation3 + $0xb8] sm:$0xff]  ;;  %v4441_v48 = vmul.f32 %v10953_v59, %v10953_v59  ;;  %v3972_v59 = vld [vmem:[#allocation3 + $0xd0] sm:$0xff] }
 0x554   : > { %4120 = vst.msk [vmem:[#allocation3 + $0x70] sm:$0xff] %vm925_vm3, %v4088_v2  ;;  %v4436_v2 = vmul.f32 %v10933_v34, %v10933_v34 }
 0x555   : > { %4375 = vst.msk [vmem:[#allocation3 + $0x60] sm:$0xff] %vm925_vm3, %v4343_v7  ;;  %v4296_v54 = vpop.xlane.xlu1 %4295  ;;  %v4406_v26 = vld [vmem:[#allocation3 + $0x58] sm:$0xff]  ;;  %v4470_v7 = vmul.f32 0.0, %v4438_v6 }
 0x556   : > { %v4216_v32 = vld [vmem:[#allocation3 + $0x68] sm:$0xff] }
 0x557   : > { %v4344_v62 = vadd.f32 %v4294_v0, %v4216_v32  ;;  %v4203_v32 = vld [vmem:[#allocation3] sm:$0xff]  ;;  %v4502_v6 = vsub.f32 %v4406_v26, %v4470_v7 }
 0x559   : > { %4376 = vst.msk [vmem:[#allocation3 + $0x68] sm:$0xff] %vm925_vm3, %v4344_v62  ;;  %v4298_v25 = vpop.xlane.xlu1 %4297 }
 0x55a   : > { %v4218_v36 = vld [vmem:[#allocation3 + $0x78] sm:$0xff] }
 0x55b   : > { %v4217_v51 = vld [vmem:[#allocation3 + $0x70] sm:$0xff]  ;;  %v4346_v12 = vadd.f32 %v4298_v25, %v4218_v36 }
 0x55c   : > { %v4345_v49 = vadd.f32 %v4296_v54, %v4217_v51  ;;  %v4407_v0 = vld [vmem:[#allocation3 + $0x60] sm:$0xff] }
 0x55d   : > { %4378 = vst.msk [vmem:[#allocation3 + $0x78] sm:$0xff] %vm925_vm3, %v4346_v12  ;;  %v4057_v11 = vpop.xlane.xlu0 %4056  ;;  %v4270_v61 = vpop.xlane.xlu1 %4269  ;;  %v4503_v36 = vsub.f32 %v4407_v0, %v4471_v58  ;;  %v4434_v0 = vmul.f32 %v10925_v53, %v10925_v53  ;;  %v4473_v58 = vmul.f32 0.0, %v4441_v48  ;;  %v4403_v48 = vld [vmem:[#allocation3 + $0x40] sm:$0xff]  ;;  %v4398_v53 = vld [vmem:[#allocation3 + $0x18] sm:$0xff] }
 0x55e   : > { %4377 = vst.msk [vmem:[#allocation3 + $0x70] sm:$0xff] %vm925_vm3, %v4345_v49  ;;  %v4097_v56 = vadd.f32 %v4057_v11, %v3969_v50  ;;  %v4332_v29 = vadd.f32 %v4270_v61, %v4204_v43  ;;  %v4405_v50 = vld [vmem:[#allocation3 + $0x50] sm:$0xff]  ;;  %v4469_v49 = vmul.f32 0.0, %v4437_v60  ;;  %v4474_v11 = vmul.f32 0.0, %v4442_v55  ;;  %v3971_v43 = vld [vmem:[#allocation3 + $0xc8] sm:$0xff] }
 0x55f   : > { %v4468_v55 = vmul.f32 0.0, %v4436_v2  ;;  %v11215_v7 = vand.u32 4294901760, %v4503_v36  ;;  %v11224_v2 = vand.u32 4294901760, %v4502_v6 }
 0x560   : > { %4129 = vst.msk [vmem:[#allocation3 + $0xb8] sm:$0xff] %vm925_vm3, %v4097_v56  ;;  %4364 = vst.msk [vmem:[#allocation3 + $0x8] sm:$0xff] %vm925_vm3, %v4332_v29  ;;  %v4408_v8 = vld [vmem:[#allocation3 + $0x68] sm:$0xff]  ;;  %v11205_v56 = vmul.f32 %v10905_v38, %v10905_v38  ;;  %v11209_v29 = vmul.f32 %v10909_v41, %v10909_v41 }
 0x561   : > { %v4059_v54 = vpop.xlane.xlu0 %4058  ;;  %v4268_v62 = vpop.xlane.xlu1 %4267  ;;  %v4504_v25 = vsub.f32 %v4408_v8, %v4472_v16  ;;  %v4404_v16 = vld [vmem:[#allocation3 + $0x48] sm:$0xff] }
 0x562   : > { %v4098_v51 = vadd.f32 %v4059_v54, %v3970_v27  ;;  %v4331_v12 = vadd.f32 %v4268_v62, %v4203_v32  ;;  %v4501_v54 = vsub.f32 %v4405_v50, %v4469_v49  ;;  %v4433_v32 = vmul.f32 %v10921_v47, %v10921_v47 }
 0x563   : > { %v11201_v61 = vand.u32 4294901760, %v4504_v25  ;;  %v4467_v62 = vmul.f32 0.0, %v4435_v21  ;;  %v4431_v50 = vmul.f32 %v10913_v22, %v10913_v22  ;;  %v4432_v49 = vmul.f32 %v10917_v15, %v10917_v15  ;;  %v4397_v22 = vld [vmem:[#allocation3 + $0x10] sm:$0xff] }
 0x564   : > { %4130 = vst.msk [vmem:[#allocation3 + $0xc0] sm:$0xff] %vm925_vm3, %v4098_v51  ;;  %4363 = vst.msk [vmem:[#allocation3] sm:$0xff] %vm925_vm3, %v4331_v12  ;;  %v4410_v60 = vld [vmem:[#allocation3 + $0x78] sm:$0xff]  ;;  %v4466_v21 = vmul.f32 0.0, %v4434_v0  ;;  %v4465_v46 = vmul.f32 0.0, %v4433_v32  ;;  %v4400_v32 = vld [vmem:[#allocation3 + $0x28] sm:$0xff] }
 0x565   : > { %v4061_v27 = vpop.xlane.xlu0 %4060  ;;  %v4506_v8 = vsub.f32 %v4410_v60, %v4474_v11  ;;  %v4409_v26 = vld [vmem:[#allocation3 + $0x70] sm:$0xff]  ;;  %v11222_v12 = vsub.f32 %v4504_v25, %v11201_v61  ;;  %v4500_v11 = vsub.f32 %v4404_v16, %v4468_v55  ;;  %v4402_v60 = vld [vmem:[#allocation3 + $0x38] sm:$0xff]  ;;  %v11238_v16 = vsub.f32 %v4503_v36, %v11215_v7 }
 0x566   : > { %v4099_v10 = vadd.f32 %v4061_v27, %v3971_v43  ;;  %v4505_v19 = vsub.f32 %v4409_v26, %v4473_v58  ;;  %v11240_v55 = vand.u32 4294901760, %v4501_v54  ;;  %v4499_v27 = vsub.f32 %v4403_v48, %v4467_v62  ;;  %v4401_v26 = vld [vmem:[#allocation3 + $0x30] sm:$0xff] }
 0x567   : > { %v11219_v51 = vand.u32 4294901760, %v4506_v8  ;;  %v4498_v0 = vsub.f32 %v4402_v60, %v4466_v21  ;;  %v11251_v52 = vand.u32 4294901760, %v4500_v11  ;;  %v4464_v48 = vmul.f32 0.0, %v4432_v49 }
 0x568   : > { %4131 = vst.msk [vmem:[#allocation3 + $0xc8] sm:$0xff] %vm925_vm3, %v4099_v10  ;;  %v11231_v43 = vand.u32 4294901760, %v4505_v19  ;;  %v4497_v60 = vsub.f32 %v4401_v26, %v4465_v46  ;;  %v11264_v62 = vand.u32 4294901760, %v4499_v27  ;;  %v4462_v47 = vmul.f32 0.0, %v11209_v29 }
 0x569   : > { %v4063_v58 = vpop.xlane.xlu0 %4062  ;;  %4589 = vmatpush1.msra.mxu0 %v11219_v51  ;;  %v11235_v25 = vsub.f32 %v4506_v8, %v11219_v51  ;;  %v11248_v8 = vsub.f32 %v4502_v6, %v11224_v2  ;;  %v11271_v26 = vand.u32 4294901760, %v4498_v0  ;;  %v4496_v34 = vsub.f32 %v4400_v32, %v4464_v48 }
 0x56a   : > { %v4100_v17 = vadd.f32 %v4063_v58, %v3972_v59  ;;  %4590 = vmatprep.subr.mxu0 %v14273_v30  ;;  %v11244_v10 = vsub.f32 %v4505_v19, %v11231_v43  ;;  %v4463_v59 = vmul.f32 0.0, %v4431_v50  ;;  %v11262_v58 = vsub.f32 %v4501_v54, %v11240_v55 }
 0x56b   : > { %4592 = vmatpush1.msra.mxu0 %v11231_v43  ;;  %v13917_v36 = vand.u32 4294901760, %v11235_v25  ;;  %14763 = vst [vmem:[#allocation11_spill] sm:$0xff] %v11271_v26  ;;  %v11275_v1 = vsub.f32 %v4500_v11, %v11251_v52  ;;  %v14764_v50 = vand.u32 4294901760, %v11222_v12  ;;  %v11295_v29 = vand.u32 4294901760, %v4497_v60 }
 0x56c   : > { %4132 = vst.msk [vmem:[#allocation3 + $0xd0] sm:$0xff] %vm925_vm3, %v4100_v17  ;;  %4593 = vmatprep.subr.mxu0 %v14273_v30  ;;  %v13920_v19 = vand.u32 4294901760, %v11244_v10  ;;  %v4399_v17 = vld [vmem:[#allocation3 + $0x20] sm:$0xff]  ;;  %v11305_v41 = vsub.f32 %v4498_v0, %v11271_v26 }
 0x56d   : > { %v4065_v21 = vpop.xlane.xlu0 %4064  ;;  %4595 = vmatpush1.msra.mxu0 %v11201_v61  ;;  %v5168_v6 = vsub.f32 %v11235_v25, %v13917_v36  ;;  %v3974_v36 = vld [vmem:[#allocation3 + $0xe0] sm:$0xff]  ;;  %v4495_v48 = vsub.f32 %v4399_v17, %v4463_v59  ;;  %14766 = vst [vmem:[#allocation98_spill] sm:$0xff] %v11295_v29  ;;  %v4461_v59 = vmul.f32 0.0, %v11205_v56  ;;  %v14771_v38 = vand.u32 4294901760, %v11275_v1 }
 0x56e   : > { %v4101_v49 = vadd.f32 %v4065_v21, %v3973_v23  ;;  %4596 = vmatprep.subr.mxu0 %v14273_v30  ;;  %v5175_v46 = vsub.f32 %v11244_v10, %v13920_v19  ;;  %v5182_v23 = vsub.f32 %v11222_v12, %v14764_v50  ;;  %v4428_v19 = vmul.f32 %v10901_v40, %v10901_v40 }
 0x56f   : > { %4598 = vmatpush1.msra.mxu0 %v11215_v7  ;;  %v5169_v54 = vand.u32 4294901760, %v5168_v6  ;;  %v11290_v50 = vsub.f32 %v4499_v27, %v11264_v62  ;;  %v14765_v21 = vand.u32 4294901760, %v11238_v16  ;;  %v4494_v27 = vsub.f32 %v4398_v53, %v4462_v47 }
 0x570   : > { %4133 = vst.msk [vmem:[#allocation3 + $0xd8] sm:$0xff] %vm925_vm3, %v4101_v49  ;;  %4599 = vmatprep.subr.mxu0 %v14273_v30  ;;  %v5176_v32 = vand.u32 4294901760, %v5175_v46  ;;  %v11301_v46 = vand.u32 4294901760, %v4496_v34  ;;  %v14768_v49 = vand.u32 4294901760, %v11248_v8  ;;  %v11314_v47 = vand.u32 4294901760, %v4495_v48 }
 0x571   : > { %v4067_v11 = vpop.xlane.xlu0 %4066  ;;  %4601 = vmatpush1.msra.mxu0 %v11224_v2  ;;  %5170 = vmatpush1.msra.mxu1 %v5169_v54  ;;  %v11287_v6 = vpop.xlane.xlu1 %4323  ;;  %v5189_v15 = vsub.f32 %v11238_v16, %v14765_v21  ;;  %v3975_v54 = vld [vmem:[#allocation3 + $0xe8] sm:$0xff]  ;;  %v5183_v21 = vand.u32 4294901760, %v5182_v23  ;;  %v4493_v53 = vsub.f32 %v4397_v22, %v4461_v59  ;;  %v4459_v40 = vmul.f32 0.0, %v11197_v39 }
 0x572   : > { %v4102_v17 = vadd.f32 %v4067_v11, %v3974_v36  ;;  %4602 = vmatprep.subr.mxu0 %v14273_v30  ;;  %5171 = vmatprep.subr.mxu1 %v14273_v30  ;;  %14767 = vst [vmem:[#allocation100_spill] sm:$0xff] %v11301_v46  ;;  %v5196_v56 = vsub.f32 %v11248_v8, %v14768_v49  ;;  %v4460_v11 = vmul.f32 0.0, %v4428_v19  ;;  %v4396_v23 = vld [vmem:[#allocation3 + $0x8] sm:$0xff]  ;;  %v14769_v19 = vand.u32 4294901760, %v11262_v58 }
 0x573   : > { %4604 = vmatpush1.msra.mxu0 %v11240_v55  ;;  %5177 = vmatpush1.msra.mxu1 %v5176_v32  ;;  %v5190_v49 = vand.u32 4294901760, %v5189_v15  ;;  %v11320_v36 = vsub.f32 %v4497_v60, %v11295_v29  ;;  %v11330_v59 = vsub.f32 %v4496_v34, %v11301_v46  ;;  %v11332_v15 = vand.u32 4294901760, %v4494_v27  ;;  %v4395_v60 = vld [vmem:[#allocation3] sm:$0xff] }
 0x574   : > { %4134 = vst.msk [vmem:[#allocation3 + $0xe0] sm:$0xff] %vm925_vm3, %v4102_v17  ;;  %4605 = vmatprep.subr.mxu0 %v14273_v30  ;;  %5178 = vmatprep.subr.mxu1 %v14273_v30  ;;  %v5203_v17 = vsub.f32 %v11262_v58, %v14769_v19  ;;  %v5197_v19 = vand.u32 4294901760, %v5196_v56  ;;  %v5210_v39 = vsub.f32 %v11275_v1, %v14771_v38  ;;  %v11345_v28 = vand.u32 4294901760, %v4493_v53 }
 0x575   : > { %v4069_v32 = vpop.xlane.xlu0 %4068  ;;  %4607 = vmatpush1.msra.mxu0 %v11251_v52  ;;  %5184 = vmatpush1.msra.mxu1 %v5183_v21  ;;  %v11317_v0 = vpop.xlane.xlu1 %4325  ;;  %14770 = vst [vmem:[#allocation102_spill] sm:$0xff] %v11332_v15  ;;  %v3976_v21 = vld [vmem:[#allocation3 + $0xf0] sm:$0xff]  ;;  %v11343_v34 = vsub.f32 %v4495_v48, %v11314_v47  ;;  %v11357_v48 = vsub.f32 %v4494_v27, %v11332_v15 }
 0x576   : > { %v4103_v22 = vadd.f32 %v4069_v32, %v3975_v54  ;;  %4608 = vmatprep.subr.mxu0 %v14273_v30  ;;  %5185 = vmatprep.subr.mxu1 %v14273_v30  ;;  %v4492_v32 = vsub.f32 %v4396_v23, %v4460_v11  ;;  %14772 = vst [vmem:[#allocation10_spill] sm:$0xff] %v11345_v28  ;;  %v5204_v38 = vand.u32 4294901760, %v5203_v17  ;;  %v14773_v11 = vand.u32 4294901760, %v11290_v50  ;;  %v3977_v17 = vld [vmem:[#allocation3 + $0xf8] sm:$0xff] }
 0x577   : > { %4610 = vmatpush1.msra.mxu0 %v11264_v62  ;;  %5191 = vmatpush1.msra.mxu1 %v5190_v49  ;;  %v4491_v54 = vsub.f32 %v4395_v60, %v4459_v40  ;;  %v11371_v27 = vsub.f32 %v4493_v53, %v11345_v28 }
 0x578   : > { %4135 = vst.msk [vmem:[#allocation3 + $0xe8] sm:$0xff] %vm925_vm3, %v4103_v22  ;;  %4611 = vmatprep.subr.mxu0 %v14273_v30  ;;  %5192 = vmatprep.subr.mxu1 %v14273_v30  ;;  %v5217_v23 = vsub.f32 %v11290_v50, %v14773_v11  ;;  %v11363_v22 = vand.u32 4294901760, %v4492_v32 }
 0x579   : > { %v4071_v49 = vpop.xlane.xlu0 %4070  ;;  %4613 = vmatpush1.msra.mxu0 %v11271_v26  ;;  %5198 = vmatpush1.msra.mxu1 %v5197_v19  ;;  %v11348_v56 = vpop.xlane.xlu1 %4327  ;;  %v5211_v19 = vand.u32 4294901760, %v5210_v39  ;;  %v14774_v26 = vand.u32 4294901760, %v11305_v41 }
 0x57a   : > { %v4104_v3 = vadd.f32 %v4071_v49, %v3976_v21  ;;  %4614 = vmatprep.subr.mxu0 %v14273_v30  ;;  %5199 = vmatprep.subr.mxu1 %v14273_v30  ;;  %14775 = vst [vmem:[#allocation104_spill] sm:$0xff] %v11363_v22  ;;  %v5218_v49 = vand.u32 4294901760, %v5217_v23  ;;  %v3968_v23 = vld [vmem:[#allocation3 + $0xb0] sm:$0xff] }
 0x57b   : > { %v4231_v13 = vld [vmem:[#allocation3 + $0xe0] sm:$0xff]  ;;  %4616 = vmatpush1.msra.mxu0 %v11295_v29  ;;  %5205 = vmatpush1.msra.mxu1 %v5204_v38  ;;  %v5224_v11 = vsub.f32 %v11305_v41, %v14774_v26  ;;  %v4230_v26 = vld [vmem:[#allocation3 + $0xd8] sm:$0xff]  ;;  %v14776_v38 = vand.u32 4294901760, %v11320_v36  ;;  %v14779_v29 = vand.u32 4294901760, %v11330_v59 }
 0x57c   : > { %v4359_v60 = vadd.f32 %v11287_v6, %v4231_v13  ;;  %4136 = vst.msk [vmem:[#allocation3 + $0xf0] sm:$0xff] %vm925_vm3, %v4104_v3  ;;  %4617 = vmatprep.subr.mxu0 %v14273_v30  ;;  %5206 = vmatprep.subr.mxu1 %v14273_v30  ;;  %v11377_v6 = vand.u32 4294901760, %v4491_v54 }
 0x57d   : > { %v4073_v21 = vpop.xlane.xlu0 %4072  ;;  %4619 = vmatpush1.msra.mxu0 %v11301_v46  ;;  %5212 = vmatpush1.msra.mxu1 %v5211_v19  ;;  %v4322_v39 = vpop.xlane.xlu1 %4321  ;;  %v5231_v13 = vsub.f32 %v11320_v36, %v14776_v38  ;;  %v5225_v46 = vand.u32 4294901760, %v5224_v11  ;;  %v11385_v38 = vsub.f32 %v4492_v32, %v11363_v22  ;;  %v5238_v3 = vsub.f32 %v11330_v59, %v14779_v29  ;;  %v4229_v32 = vld [vmem:[#allocation3 + $0xd0] sm:$0xff] }
 0x57e   : > { %14777 = vst [vmem:[#allocation14_spill] sm:$0xff] %v11377_v6  ;;  %4391 = vst.msk [vmem:[#allocation3 + $0xe0] sm:$0xff] %vm925_vm3, %v4359_v60  ;;  %v4105_v40 = vadd.f32 %v4073_v21, %v3977_v17  ;;  %v4358_v53 = vadd.f32 %v4322_v39, %v4230_v26  ;;  %4620 = vmatprep.subr.mxu0 %v14273_v30  ;;  %5213 = vmatprep.subr.mxu1 %v14273_v30  ;;  %v13939_v17 = vand.u32 4294901760, %v11357_v48 }
 0x57f   : > { %v4232_v19 = vld [vmem:[#allocation3 + $0xe8] sm:$0xff]  ;;  %4622 = vmatpush1.msra.mxu0 %v11314_v47  ;;  %5219 = vmatpush1.msra.mxu1 %v5218_v49  ;;  %14778 = vst [vmem:[#allocation107_spill] sm:$0xff] %v11385_v38  ;;  %v5232_v26 = vand.u32 4294901760, %v5231_v13  ;;  %v11398_v29 = vsub.f32 %v4491_v54, %v11377_v6  ;;  %v13938_v39 = vand.u32 4294901760, %v11371_v27  ;;  %v5239_v13 = vand.u32 4294901760, %v5238_v3 }
 0x580   : > { %v4360_v60 = vadd.f32 %v11317_v0, %v4232_v19  ;;  %4137 = vst.msk [vmem:[#allocation3 + $0xf8] sm:$0xff] %vm925_vm3, %v4105_v40  ;;  %4390 = vst.msk [vmem:[#allocation3 + $0xd8] sm:$0xff] %vm925_vm3, %v4358_v53  ;;  %4623 = vmatprep.subr.mxu0 %v14273_v30  ;;  %5220 = vmatprep.subr.mxu1 %v14273_v30  ;;  %v14780_v0 = vand.u32 4294901760, %v11343_v34  ;;  %v3967_v54 = vld [vmem:[#allocation3 + $0xa8] sm:$0xff]  ;;  %v5252_v19 = vsub.f32 %v11357_v48, %v13939_v17 }
 0x581   : > { %v4055_v11 = vpop.xlane.xlu0 %4054  ;;  %4625 = vmatpush1.msra.mxu0 %v11332_v15  ;;  %5226 = vmatpush1.msra.mxu1 %v5225_v46  ;;  %v4320_v21 = vpop.xlane.xlu1 %4319 }
 0x582   : > { %v5245_v40 = vsub.f32 %v11343_v34, %v14780_v0  ;;  %4392 = vst.msk [vmem:[#allocation3 + $0xe8] sm:$0xff] %vm925_vm3, %v4360_v60  ;;  %v4096_v49 = vadd.f32 %v4055_v11, %v3968_v23  ;;  %v4357_v53 = vadd.f32 %v4320_v21, %v4229_v32  ;;  %4626 = vmatprep.subr.mxu0 %v14273_v30  ;;  %v13940_v0 = vand.u32 4294901760, %v11385_v38 }
 0x583   : > { %5227 = vmatprep.subr.mxu1 %v14273_v30  ;;  %v4233_v46 = vld [vmem:[#allocation3 + $0xf0] sm:$0xff]  ;;  %4628 = vmatpush1.msra.mxu0 %v11345_v28  ;;  %v5259_v32 = vsub.f32 %v11371_v27, %v13938_v39  ;;  %v4456_v21 = vmul.f32 %v11013_v35, %v11013_v35 }
 0x584   : > { %5233 = vmatpush1.msra.mxu1 %v5232_v26  ;;  %v4361_v60 = vadd.f32 %v11348_v56, %v4233_v46  ;;  %4128 = vst.msk [vmem:[#allocation3 + $0xb0] sm:$0xff] %vm925_vm3, %v4096_v49  ;;  %4389 = vst.msk [vmem:[#allocation3 + $0xd0] sm:$0xff] %vm925_vm3, %v4357_v53  ;;  %4629 = vmatprep.subr.mxu0 %v14273_v30  ;;  %v5246_v11 = vand.u32 4294901760, %v5245_v40  ;;  %v13947_v56 = vand.u32 4294901760, %v11398_v29  ;;  %v3966_v53 = vld [vmem:[#allocation3 + $0xa0] sm:$0xff]  ;;  %v5253_v46 = vand.u32 4294901760, %v5252_v19 }
 0x585   : > { %5234 = vmatprep.subr.mxu1 %v14273_v30  ;;  %v4053_v23 = vpop.xlane.xlu0 %4052  ;;  %4631 = vmatpush1.msra.mxu0 %v11363_v22  ;;  %v4330_v3 = vpop.xlane.xlu1 %4329  ;;  %v4455_v49 = vmul.f32 %v11009_v24, %v11009_v24  ;;  %v4228_v19 = vld [vmem:[#allocation3 + $0xc8] sm:$0xff]  ;;  %v5260_v17 = vand.u32 4294901760, %v5259_v32  ;;  %v4488_v35 = vmul.f32 0.0, %v4456_v21  ;;  %v4453_v24 = vmul.f32 %v11001_v18, %v11001_v18 }
 0x586   : > { %5240 = vmatpush1.msra.mxu1 %v5239_v13  ;;  %4393 = vst.msk [vmem:[#allocation3 + $0xf0] sm:$0xff] %vm925_vm3, %v4361_v60  ;;  %v4095_v26 = vadd.f32 %v4053_v23, %v3967_v54  ;;  %4632 = vmatprep.subr.mxu0 %v14273_v30  ;;  %v5266_v13 = vsub.f32 %v11385_v38, %v13940_v0 }
 0x587   : > { %5241 = vmatprep.subr.mxu1 %v14273_v30  ;;  %v4234_v40 = vld [vmem:[#allocation3 + $0xf8] sm:$0xff]  ;;  %4634 = vmatpush1.msra.mxu0 %v11377_v6  ;;  %v4457_v54 = vmul.f32 %v11017_v4, %v11017_v4  ;;  %v4454_v23 = vmul.f32 %v11005_v37, %v11005_v37  ;;  %v5273_v0 = vsub.f32 %v11398_v29, %v13947_v56  ;;  %v4485_v22 = vmul.f32 0.0, %v4453_v24 }
 0x588   : > { %5247 = vmatpush1.msra.mxu1 %v5246_v11  ;;  %4127 = vst.msk [vmem:[#allocation3 + $0xa8] sm:$0xff] %vm925_vm3, %v4095_v26  ;;  %v4362_v60 = vadd.f32 %v4330_v3, %v4234_v40  ;;  %4635 = vmatprep.subr.mxu0 %v14273_v30  ;;  %v4423_v40 = vld [vmem:[#allocation3 + $0xe0] sm:$0xff]  ;;  %v3965_v37 = vld [vmem:[#allocation3 + $0x98] sm:$0xff]  ;;  %v5267_v32 = vand.u32 4294901760, %v5266_v13  ;;  %v4458_v56 = vmul.f32 %v11021_v63, %v11021_v63 }
 0x589   : > { %5248 = vmatprep.subr.mxu1 %v14273_v30  ;;  %v4051_v11 = vpop.xlane.xlu0 %4050  ;;  %v4318_v39 = vpop.xlane.xlu1 %4317  ;;  %v4424_v4 = vld [vmem:[#allocation3 + $0xe8] sm:$0xff]  ;;  %v4489_v6 = vmul.f32 0.0, %v4457_v54  ;;  %v4422_v21 = vld [vmem:[#allocation3 + $0xd8] sm:$0xff]  ;;  %v5274_v54 = vand.u32 4294901760, %v5273_v0 }
 0x58a   : > { %5254 = vmatpush1.msra.mxu1 %v5253_v46  ;;  %4394 = vst.msk [vmem:[#allocation3 + $0xf8] sm:$0xff] %vm925_vm3, %v4362_v60  ;;  %v4094_v3 = vadd.f32 %v4051_v11, %v3966_v53  ;;  %v4356_v26 = vadd.f32 %v4318_v39, %v4228_v19  ;;  %v4487_v46 = vmul.f32 0.0, %v4455_v49  ;;  %v4520_v39 = vsub.f32 %v4424_v4, %v4488_v35  ;;  %v3964_v35 = vld [vmem:[#allocation3 + $0x90] sm:$0xff]  ;;  %v4226_v24 = vld [vmem:[#allocation3 + $0xb8] sm:$0xff] }
 0x58b   : > { %5255 = vmatprep.subr.mxu1 %v14273_v30  ;;  %v4452_v53 = vmul.f32 %v10997_v44, %v10997_v44  ;;  %v4486_v60 = vmul.f32 0.0, %v4454_v23  ;;  %v4490_v28 = vmul.f32 0.0, %v4458_v56 }
 0x58c   : > { %5261 = vmatpush1.msra.mxu1 %v5260_v17  ;;  %4126 = vst.msk [vmem:[#allocation3 + $0xa0] sm:$0xff] %vm925_vm3, %v4094_v3  ;;  %4388 = vst.msk [vmem:[#allocation3 + $0xc8] sm:$0xff] %vm925_vm3, %v4356_v26  ;;  %v4227_v17 = vld [vmem:[#allocation3 + $0xc0] sm:$0xff]  ;;  %v4519_v19 = vsub.f32 %v4423_v40, %v4487_v46  ;;  %v4421_v26 = vld [vmem:[#allocation3 + $0xd0] sm:$0xff]  ;;  %v11459_v0 = vand.u32 4294901760, %v4520_v39 }
 0x58d   : > { %5262 = vmatprep.subr.mxu1 %v14273_v30  ;;  %v4049_v49 = vpop.xlane.xlu0 %4048  ;;  %v4316_v13 = vpop.xlane.xlu1 %4315  ;;  %v4425_v11 = vld [vmem:[#allocation3 + $0xf0] sm:$0xff]  ;;  %v4518_v4 = vsub.f32 %v4422_v21, %v4486_v60  ;;  %v4517_v56 = vsub.f32 %v4421_v26, %v4485_v22 }
 0x58e   : > { %5268 = vmatpush1.msra.mxu1 %v5267_v32  ;;  %v4093_v63 = vadd.f32 %v4049_v49, %v3965_v37  ;;  %v4355_v18 = vadd.f32 %v4316_v13, %v4227_v17  ;;  %v4521_v3 = vsub.f32 %v4425_v11, %v4489_v6  ;;  %14782 = vst [vmem:[#allocation109_spill] sm:$0xff] %v11459_v0  ;;  %v4484_v6 = vmul.f32 0.0, %v4452_v53  ;;  %v3963_v17 = vld [vmem:[#allocation3 + $0x88] sm:$0xff] }
 0x58f   : > { %5269 = vmatprep.subr.mxu1 %v14273_v30  ;;  %v4451_v37 = vmul.f32 %v10993_v57, %v10993_v57  ;;  %v11464_v21 = vand.u32 4294901760, %v4519_v19  ;;  %v11469_v13 = vand.u32 4294901760, %v4518_v4  ;;  %v11476_v11 = vsub.f32 %v4520_v39, %v11459_v0  ;;  %v4224_v57 = vld [vmem:[#allocation3 + $0xa8] sm:$0xff] }
 0x590   : > { %5275 = vmatpush1.msra.mxu1 %v5274_v54  ;;  %4125 = vst.msk [vmem:[#allocation3 + $0x98] sm:$0xff] %vm925_vm3, %v4093_v63  ;;  %4387 = vst.msk [vmem:[#allocation3 + $0xc0] sm:$0xff] %vm925_vm3, %v4355_v18  ;;  %v11457_v23 = vand.u32 4294901760, %v4521_v3 }
 0x591   : > { %5276 = vmatprep.subr.mxu1 %v14273_v30  ;;  %v4047_v40 = vpop.xlane.xlu0 %4046  ;;  %v4314_v46 = vpop.xlane.xlu1 %4313  ;;  %v4426_v32 = vld [vmem:[#allocation3 + $0xf8] sm:$0xff]  ;;  %14783 = vst [vmem:[#allocation16_spill] sm:$0xff] %v11464_v21  ;;  %14785 = vst [vmem:[#allocation13_spill] sm:$0xff] %v11469_v13 }
 0x592   : > { %14781 = vst [vmem:[#allocation12_spill] sm:$0xff] %v11457_v23  ;;  %v4092_v63 = vadd.f32 %v4047_v40, %v3964_v35  ;;  %v4354_v60 = vadd.f32 %v4314_v46, %v4226_v24  ;;  %v4522_v18 = vsub.f32 %v4426_v32, %v4490_v28  ;;  %v11467_v49 = vsub.f32 %v4521_v3, %v11457_v23  ;;  %v4225_v3 = vld [vmem:[#allocation3 + $0xb0] sm:$0xff] }
 0x593   : > { %v4420_v54 = vld [vmem:[#allocation3 + $0xc8] sm:$0xff]  ;;  %14787 = vst [vmem:[#allocation18_spill] sm:$0xff] %v11476_v11  ;;  %v4450_v28 = vmul.f32 %v10989_v9, %v10989_v9  ;;  %v11481_v40 = vsub.f32 %v4519_v19, %v11464_v21  ;;  %v11483_v24 = vand.u32 4294901760, %v4517_v56  ;;  %v4483_v32 = vmul.f32 0.0, %v4451_v37 }
 0x594   : > { %14784 = vst [vmem:[#allocation110_spill] sm:$0xff] %v11467_v49  ;;  %4124 = vst.msk [vmem:[#allocation3 + $0x90] sm:$0xff] %vm925_vm3, %v4092_v63  ;;  %v11473_v53 = vand.u32 4294901760, %v4522_v18  ;;  %v4516_v22 = vsub.f32 %v4420_v54, %v4484_v6  ;;  %v11492_v6 = vmul.f32 %v10961_v33, %v10961_v33  ;;  %v4449_v19 = vmul.f32 %v10985_v45, %v10985_v45  ;;  %v3962_v54 = vld [vmem:[#allocation3 + $0x80] sm:$0xff] }
 0x595   : > { %4386 = vst.msk [vmem:[#allocation3 + $0xb8] sm:$0xff] %vm925_vm3, %v4354_v60  ;;  %v4045_v26 = vpop.xlane.xlu0 %4044  ;;  %v4312_v35 = vpop.xlane.xlu1 %4311  ;;  %14788 = vst [vmem:[#allocation115_spill] sm:$0xff] %v11481_v40  ;;  %v11498_v46 = vsub.f32 %v4518_v4, %v11469_v13  ;;  %v4482_v4 = vmul.f32 0.0, %v4450_v28 }
 0x596   : > { %14786 = vst [vmem:[#allocation111_spill] sm:$0xff] %v11473_v53  ;;  %14789 = vst [vmem:[#allocation15_spill] sm:$0xff] %v11483_v24  ;;  %v4091_v63 = vadd.f32 %v4045_v26, %v3963_v17  ;;  %v4353_v60 = vadd.f32 %v4312_v35, %v4225_v3  ;;  %4637 = vmatpush2.msra.mxu0 %v11473_v53  ;;  %v11488_v39 = vsub.f32 %v4522_v18, %v11473_v53  ;;  %v4523_v35 = vld [vmem:[%s13561_s2] sm:$0xff] }
 0x597   : > { %4638 = vmatprep.subr.mxu0 %v14273_v30  ;;  %14790 = vst [vmem:[#allocation116_spill] sm:$0xff] %v11498_v46  ;;  %v4419_v37 = vld [vmem:[#allocation3 + $0xc0] sm:$0xff]  ;;  %v11504_v17 = vand.u32 4294901760, %v4516_v22  ;;  %v4222_v53 = vld [vmem:[#allocation3 + $0x98] sm:$0xff] }
 0x598   : > { %4123 = vst.msk [vmem:[#allocation3 + $0x88] sm:$0xff] %vm925_vm3, %v4091_v63  ;;  %4385 = vst.msk [vmem:[#allocation3 + $0xb0] sm:$0xff] %vm925_vm3, %v4353_v60  ;;  %4640 = vmatpush2.msra.mxu0 %v11457_v23  ;;  %v4515_v3 = vsub.f32 %v4419_v37, %v4483_v32  ;;  %v11512_v63 = vsub.f32 %v4517_v56, %v11483_v24  ;;  %v14793_v60 = vand.u32 4294901760, %v11467_v49  ;;  %v14794_v28 = vand.u32 4294901760, %v11488_v39 }
 0x599   : > { %14791 = vst [vmem:[#allocation20_spill] sm:$0xff] %v11504_v17  ;;  %v4043_v44 = vpop.xlane.xlu0 %4042  ;;  %v4310_v9 = vpop.xlane.xlu1 %4309  ;;  %4641 = vmatprep.subr.mxu0 %v14273_v30  ;;  %v11526_v56 = vmul.f32 %v10965_v31, %v10965_v31  ;;  %v4448_v23 = vmul.f32 %v10981_v5, %v10981_v5  ;;  %v4481_v31 = vmul.f32 0.0, %v4449_v19 }
 0x59a   : > { %14792 = vst [vmem:[#allocation118_spill] sm:$0xff] %v11512_v63  ;;  %v5287_v18 = vsub.f32 %v11467_v49, %v14793_v60  ;;  %v4090_v32 = vadd.f32 %v4043_v44, %v3962_v54  ;;  %v4352_v37 = vadd.f32 %v4310_v9, %v4224_v57  ;;  %4643 = vmatpush2.msra.mxu0 %v11459_v0  ;;  %v11522_v33 = vand.u32 4294901760, %v4515_v3  ;;  %v4223_v0 = vld [vmem:[#allocation3 + $0xa0] sm:$0xff] }
 0x59b   : > { %v5280_v45 = vsub.f32 %v11488_v39, %v14794_v28  ;;  %4644 = vmatprep.subr.mxu0 %v14273_v30  ;;  %v11532_v57 = vand.u32 4294901760, %v4523_v35  ;;  %v11538_v54 = vsub.f32 %v4516_v22, %v11504_v17  ;;  %v14798_v28 = vand.u32 4294901760, %v11476_v11 }
 0x59c   : > { %14795 = vst [vmem:[#allocation17_spill] sm:$0xff] %v11522_v33  ;;  %v4418_v60 = vld [vmem:[#allocation3 + $0xb8] sm:$0xff]  ;;  %4122 = vst.msk [vmem:[#allocation3 + $0x80] sm:$0xff] %vm925_vm3, %v4090_v32  ;;  %4646 = vmatpush2.msra.mxu0 %v11464_v21  ;;  %v11545_v32 = vsub.f32 %v4515_v3, %v11522_v33  ;;  %v5288_v19 = vand.u32 4294901760, %v5287_v18  ;;  %v14802_v3 = vand.u32 4294901760, %v11498_v46 }
 0x59d   : > { %14796 = vst [vmem:[#allocation120_spill] sm:$0xff] %v11532_v57  ;;  %4384 = vst.msk [vmem:[#allocation3 + $0xa8] sm:$0xff] %vm925_vm3, %v4352_v37  ;;  %v5281_v44 = vand.u32 4294901760, %v5280_v45  ;;  %v5294_v26 = vsub.f32 %v11476_v11, %v14798_v28  ;;  %v4514_v5 = vsub.f32 %v4418_v60, %v4482_v4  ;;  %v4308_v9 = vpop.xlane.xlu0 %4307  ;;  %v4306_v49 = vpop.xlane.xlu1 %4305  ;;  %4647 = vmatprep.subr.mxu0 %v14273_v30  ;;  %v14800_v45 = vand.u32 4294901760, %v11481_v40 }
 0x59e   : > { %14797 = vst [vmem:[#allocation22_spill] sm:$0xff] %v11538_v54  ;;  %14799 = vst [vmem:[#allocation122_spill] sm:$0xff] %v11545_v32  ;;  %v4351_v21 = vadd.f32 %v4308_v9, %v4223_v0  ;;  %v4350_v15 = vadd.f32 %v4306_v49, %v4222_v53  ;;  %4649 = vmatpush2.msra.mxu0 %v11469_v13  ;;  %v4446_v60 = vmul.f32 %v10973_v20, %v10973_v20 }
 0x59f   : > { %v5301_v22 = vsub.f32 %v11481_v40, %v14800_v45  ;;  %5282 = vmatpush2.msra.mxu1 %v5281_v44  ;;  %v11552_v4 = vand.u32 4294901760, %v4514_v5  ;;  %4650 = vmatprep.subr.mxu0 %v14273_v30  ;;  %v5308_v28 = vsub.f32 %v11498_v46, %v14802_v3  ;;  %v4417_v45 = vld [vmem:[#allocation3 + $0xb0] sm:$0xff]  ;;  %v11562_v0 = vsub.f32 %v4523_v35, %v11532_v57  ;;  %v4526_v44 = vld [vmem:[%s13561_s2 + $0x18] sm:$0xff]  ;;  %v4220_v37 = vld [vmem:[#allocation3 + $0x88] sm:$0xff] }
 0x5a0   : > { %5283 = vmatprep.subr.mxu1 %v14273_v30  ;;  %4383 = vst.msk [vmem:[#allocation3 + $0xa0] sm:$0xff] %vm925_vm3, %v4351_v21  ;;  %4382 = vst.msk [vmem:[#allocation3 + $0x98] sm:$0xff] %vm925_vm3, %v4350_v15  ;;  %4652 = vmatpush2.msra.mxu0 %v11483_v24  ;;  %v5295_v49 = vand.u32 4294901760, %v5294_v26  ;;  %v4513_v18 = vsub.f32 %v4417_v45, %v4481_v31  ;;  %v4447_v35 = vmul.f32 %v10977_v14, %v10977_v14  ;;  %v4221_v3 = vld [vmem:[#allocation3 + $0x90] sm:$0xff] }
 0x5a1   : > { %14801 = vst [vmem:[#allocation19_spill] sm:$0xff] %v11552_v4  ;;  %14803 = vst [vmem:[#allocation124_spill] sm:$0xff] %v11562_v0  ;;  %5289 = vmatpush2.msra.mxu1 %v5288_v19  ;;  %v11568_v53 = vsub.f32 %v4514_v5, %v11552_v4  ;;  %v4480_v21 = vmul.f32 0.0, %v4448_v23  ;;  %v4304_v15 = vpop.xlane.xlu0 %4303  ;;  %v4302_v20 = vpop.xlane.xlu1 %4301  ;;  %4653 = vmatprep.subr.mxu0 %v14273_v30  ;;  %v5302_v5 = vand.u32 4294901760, %v5301_v22  ;;  %v14806_v23 = vand.u32 4294901760, %v11512_v63  ;;  %v4525_v14 = vld [vmem:[%s13561_s2 + $0x10] sm:$0xff] }
 0x5a2   : > { %5290 = vmatprep.subr.mxu1 %v14273_v30  ;;  %v4349_v26 = vadd.f32 %v4304_v15, %v4221_v3  ;;  %v4348_v19 = vadd.f32 %v4302_v20, %v4220_v37  ;;  %4655 = vmatpush2.msra.mxu0 %v11504_v17  ;;  %v11580_v45 = vand.u32 4294901760, %v4513_v18  ;;  %v4445_v22 = vmul.f32 %v10969_v42, %v10969_v42 }
 0x5a3   : > { %14804 = vst [vmem:[#allocation24_spill] sm:$0xff] %v11568_v53  ;;  %5296 = vmatpush2.msra.mxu1 %v5295_v49  ;;  %v5315_v9 = vsub.f32 %v11512_v63, %v14806_v23  ;;  %4656 = vmatprep.subr.mxu0 %v14273_v30  ;;  %v11594_v3 = vand.u32 4294901760, %v4526_v44  ;;  %v5309_v15 = vand.u32 4294901760, %v5308_v28  ;;  %v14809_v42 = vand.u32 4294901760, %v11538_v54  ;;  %v4219_v24 = vld [vmem:[#allocation3 + $0x80] sm:$0xff] }
 0x5a4   : > { %14805 = vst [vmem:[#allocation127_spill] sm:$0xff] %v11580_v45  ;;  %5297 = vmatprep.subr.mxu1 %v14273_v30  ;;  %v4416_v20 = vld [vmem:[#allocation3 + $0xa8] sm:$0xff]  ;;  %4381 = vst.msk [vmem:[#allocation3 + $0x90] sm:$0xff] %vm925_vm3, %v4349_v26  ;;  %4658 = vmatpush2.msra.mxu0 %v11522_v33  ;;  %v11600_v23 = vsub.f32 %v4513_v18, %v11580_v45  ;;  %v4478_v17 = vmul.f32 0.0, %v4446_v60  ;;  %v4479_v49 = vmul.f32 0.0, %v4447_v35  ;;  %v14810_v26 = vand.u32 4294901760, %v11545_v32 }
 0x5a5   : > { %14807 = vst [vmem:[#allocation21_spill] sm:$0xff] %v11594_v3  ;;  %4380 = vst.msk [vmem:[#allocation3 + $0x88] sm:$0xff] %vm925_vm3, %v4348_v19  ;;  %5303 = vmatpush2.msra.mxu1 %v5302_v5  ;;  %v4512_v31 = vsub.f32 %v4416_v20, %v4480_v21  ;;  %v5322_v37 = vsub.f32 %v11538_v54, %v14809_v42  ;;  %v4300_v13 = vpop.xlane.xlu0 %4299  ;;  %4659 = vmatprep.subr.mxu0 %v14273_v30  ;;  %v11610_v5 = vand.u32 4294901760, %v4525_v14  ;;  %v4528_v35 = vld [vmem:[%s13561_s2 + $0x28] sm:$0xff] }
 0x5a6   : > { %14808 = vst [vmem:[#allocation129_spill] sm:$0xff] %v11600_v23  ;;  %5304 = vmatprep.subr.mxu1 %v14273_v30  ;;  %v5329_v28 = vsub.f32 %v11545_v32, %v14810_v26  ;;  %v4347_v18 = vadd.f32 %v4300_v13, %v4219_v24  ;;  %4661 = vmatpush2.msra.mxu0 %v11552_v4  ;;  %v5316_v21 = vand.u32 4294901760, %v5315_v9  ;;  %v11620_v19 = vmul.f32 0.0, %v11492_v6 }
 0x5a7   : > { %14811 = vst [vmem:[#allocation26_spill] sm:$0xff] %v11610_v5  ;;  %5310 = vmatpush2.msra.mxu1 %v5309_v15  ;;  %v11613_v42 = vand.u32 4294901760, %v4512_v31  ;;  %4662 = vmatprep.subr.mxu0 %v14273_v30  ;;  %v4415_v13 = vld [vmem:[#allocation3 + $0xa0] sm:$0xff]  ;;  %v4414_v24 = vld [vmem:[#allocation3 + $0x98] sm:$0xff]  ;;  %v14813_v20 = vand.u32 4294901760, %v11568_v53  ;;  %v14814_v15 = vand.u32 4294901760, %v11562_v0  ;;  %v11633_v60 = vsub.f32 %v4526_v44, %v11594_v3 }
 0x5a8   : > { %5311 = vmatprep.subr.mxu1 %v14273_v30  ;;  %4379 = vst.msk [vmem:[#allocation3 + $0x80] sm:$0xff] %vm925_vm3, %v4347_v18  ;;  %4664 = vmatpush2.msra.mxu0 %v11580_v45  ;;  %v5323_v4 = vand.u32 4294901760, %v5322_v37  ;;  %v4511_v33 = vsub.f32 %v4415_v13, %v4479_v49  ;;  %v4510_v32 = vsub.f32 %v4414_v24, %v4478_v17  ;;  %v5330_v44 = vand.u32 4294901760, %v5329_v28  ;;  %v4530_v45 = vld [vmem:[%s13561_s2 + $0x38] sm:$0xff] }
 0x5a9   : > { %14812 = vst [vmem:[#allocation130_spill] sm:$0xff] %v11613_v42  ;;  %v5336_v9 = vsub.f32 %v11568_v53, %v14813_v20  ;;  %v11630_v26 = vsub.f32 %v11562_v0, %v14814_v15  ;;  %14815 = vst [vmem:[#allocation23_spill] sm:$0xff] %v11633_v60  ;;  %5317 = vmatpush2.msra.mxu1 %v5316_v21  ;;  %v11638_v6 = vsub.f32 %v4512_v31, %v11613_v42  ;;  %v4527_v20 = vld [vmem:[%s13561_s2 + $0x20] sm:$0xff] }
 0x5aa   : > { %v4477_v15 = vmul.f32 0.0, %v4445_v22  ;;  %4665 = vmatprep.subr.mxu0 %v14273_v30  ;;  %5318 = vmatprep.subr.mxu1 %v14273_v30  ;;  %v11646_v18 = vsub.f32 %v4525_v14, %v11610_v5  ;;  %v11648_v21 = vand.u32 4294901760, %v4528_v35  ;;  %v11651_v31 = vand.u32 4294901760, %v4511_v33 }
 0x5ab   : > { %14816 = vst [vmem:[#allocation131_spill] sm:$0xff] %v11638_v6  ;;  %4667 = vmatpush2.msra.mxu0 %v11613_v42  ;;  %5324 = vmatpush2.msra.mxu1 %v5323_v4  ;;  %v11653_v17 = vand.u32 4294901760, %v4510_v32  ;;  %v14821_v37 = vand.u32 4294901760, %v11600_v23  ;;  %v4476_v28 = vmul.f32 0.0, %v11526_v56  ;;  %v4413_v14 = vld [vmem:[#allocation3 + $0x90] sm:$0xff]  ;;  %v4693_v4 = vand.u32 4294901760, %v11630_v26 }
 0x5ac   : > { %14817 = vst [vmem:[#allocation28_spill] sm:$0xff] %v11646_v18  ;;  %14818 = vst [vmem:[#allocation135_spill] sm:$0xff] %v11648_v21  ;;  %4668 = vmatprep.subr.mxu0 %v14273_v30  ;;  %5325 = vmatprep.subr.mxu1 %v14273_v30  ;;  %v4412_v13 = vld [vmem:[#allocation3 + $0x88] sm:$0xff]  ;;  %v11664_v0 = vand.u32 4294901760, %v4527_v20  ;;  %v5337_v49 = vand.u32 4294901760, %v5336_v9  ;;  %v4509_v42 = vsub.f32 %v4413_v14, %v4477_v15  ;;  %v14825_v24 = vand.u32 4294901760, %v11638_v6 }
 0x5ad   : > { %14819 = vst [vmem:[#allocation25_spill] sm:$0xff] %v11651_v31  ;;  %14820 = vst [vmem:[#allocation136_spill] sm:$0xff] %v11653_v17  ;;  %v5343_v22 = vsub.f32 %v11600_v23, %v14821_v37  ;;  %4670 = vmatpush2.msra.mxu0 %v11651_v31  ;;  %v11668_v37 = vsub.f32 %v4511_v33, %v11651_v31  ;;  %5331 = vmatpush2.msra.mxu1 %v5330_v44  ;;  %v11703_v44 = vand.u32 4294901760, %v4530_v45 }
 0x5ae   : > { %14822 = vst [vmem:[#allocation30_spill] sm:$0xff] %v11664_v0  ;;  %v11671_v56 = vsub.f32 %v4510_v32, %v11653_v17  ;;  %4671 = vmatprep.subr.mxu0 %v14273_v30  ;;  %5332 = vmatprep.subr.mxu1 %v14273_v30  ;;  %v4508_v26 = vsub.f32 %v4412_v13, %v4476_v28  ;;  %v11686_v9 = vand.u32 4294901760, %v4509_v42  ;;  %v4529_v28 = vld [vmem:[%s13561_s2 + $0x30] sm:$0xff] }
 0x5af   : > { %14823 = vst [vmem:[#allocation138_spill] sm:$0xff] %v11668_v37  ;;  %v5350_v33 = vsub.f32 %v11638_v6, %v14825_v24  ;;  %v11683_v32 = vsub.f32 %v4528_v35, %v11648_v21  ;;  %4673 = vmatpush2.msra.mxu0 %v11653_v17  ;;  %5338 = vmatpush2.msra.mxu1 %v5337_v49  ;;  %v5344_v15 = vand.u32 4294901760, %v5343_v22  ;;  %v4411_v13 = vld [vmem:[#allocation3 + $0x80] sm:$0xff]  ;;  %v14829_v49 = vand.u32 4294901760, %v11633_v60 }
 0x5b0   : > { %14824 = vst [vmem:[#allocation140_spill] sm:$0xff] %v11671_v56  ;;  %14827 = vst [vmem:[#allocation142_spill] sm:$0xff] %v11686_v9  ;;  %4674 = vmatprep.subr.mxu0 %v14273_v30  ;;  %5339 = vmatprep.subr.mxu1 %v14273_v30  ;;  %v11695_v35 = vand.u32 4294901760, %v4508_v26  ;;  %v11701_v22 = vsub.f32 %v4527_v20, %v11664_v0  ;;  %v11707_v31 = vsub.f32 %v4509_v42, %v11686_v9 }
 0x5b1   : > { %14826 = vst [vmem:[#allocation32_spill] sm:$0xff] %v11683_v32  ;;  %v4701_v24 = vsub.f32 %v11633_v60, %v14829_v49  ;;  %14831 = vst [vmem:[#allocation147_spill] sm:$0xff] %v11703_v44  ;;  %4676 = vmatpush2.msra.mxu0 %v11686_v9  ;;  %5345 = vmatpush2.msra.mxu1 %v5344_v15  ;;  %v5351_v14 = vand.u32 4294901760, %v5350_v33  ;;  %v4507_v17 = vsub.f32 %v4411_v13, %v11620_v19  ;;  %v4531_v15 = vld [vmem:[%s13561_s2 + $0x40] sm:$0xff] }
 0x5b2   : > { %14828 = vst [vmem:[#allocation144_spill] sm:$0xff] %v11695_v35  ;;  %14830 = vst [vmem:[#allocation34_spill] sm:$0xff] %v11701_v22  ;;  %v14833_v6 = vand.u32 4294901760, %v11668_v37  ;;  %4677 = vmatprep.subr.mxu0 %v14273_v30  ;;  %5346 = vmatprep.subr.mxu1 %v14273_v30  ;;  %v11716_v20 = vsub.f32 %v4508_v26, %v11695_v35  ;;  %v14835_v49 = vand.u32 4294901760, %v11671_v56  ;;  %v11722_v33 = vand.u32 4294901760, %v4529_v28 }
 0x5b3   : > { %14832 = vst [vmem:[#allocation31_spill] sm:$0xff] %v11707_v31  ;;  %4679 = vmatpush2.msra.mxu0 %v11695_v35  ;;  %5352 = vmatpush2.msra.mxu1 %v5351_v14  ;;  %v11725_v19 = vand.u32 4294901760, %v4507_v17  ;;  %v14838_v60 = vand.u32 4294901760, %v11646_v18  ;;  %v14841_v35 = vand.u32 4294901760, %v11707_v31 }
 0x5b4   : > { %v5357_v23 = vsub.f32 %v11668_v37, %v14833_v6  ;;  %14834 = vst [vmem:[#allocation149_spill] sm:$0xff] %v11716_v20  ;;  %v5364_v42 = vsub.f32 %v11671_v56, %v14835_v49  ;;  %14836 = vst [vmem:[#allocation37_spill] sm:$0xff] %v11722_v33  ;;  %v4532_v49 = vld [vmem:[%s13561_s2 + $0x48] sm:$0xff]  ;;  %4680 = vmatprep.subr.mxu0 %v14273_v30  ;;  %5353 = vmatprep.subr.mxu1 %v14273_v30 }
 0x5b5   : > { %14837 = vst [vmem:[#allocation150_spill] sm:$0xff] %v11725_v19  ;;  %v4707_v26 = vsub.f32 %v11646_v18, %v14838_v60  ;;  %4682 = vmatpush2.msra.mxu0 %v11725_v19  ;;  %v11743_v13 = vsub.f32 %v4507_v17, %v11725_v19  ;;  %v4702_v18 = vand.u32 4294901760, %v4701_v24  ;;  %v5371_v9 = vsub.f32 %v11707_v31, %v14841_v35 }
 0x5b6   : > { %v5358_v6 = vand.u32 4294901760, %v5357_v23  ;;  %v11739_v23 = vsub.f32 %v4530_v45, %v11703_v44  ;;  %v5365_v60 = vand.u32 4294901760, %v5364_v42  ;;  %4694 = vmatmul.mubr.f32.vlgmr.msra.gmra.mxu0 %v4693_v4  ;;  %v14842_v45 = vand.u32 4294901760, %v11716_v20  ;;  %5613 = vmatprep.subr.mxu0 %v14273_v30 }
 0x5b7   : > { %14840 = vst [vmem:[#allocation151_spill] sm:$0xff] %v11743_v13  ;;  %v14843_v17 = vand.u32 4294901760, %v11683_v32  ;;  %v11759_v24 = vsub.f32 %v4529_v28, %v11722_v33  ;;  %v5372_v35 = vand.u32 4294901760, %v5371_v9  ;;  %v4708_v4 = vand.u32 4294901760, %v4707_v26  ;;  %5616 = vmatpush1.msra.mxu0 %v11235_v25  ;;  %4703 = vmatprep.mubr.f32.mxu0 %v4702_v18  ;;  %v4534_v26 = vld [vmem:[%s13561_s2 + $0x58] sm:$0xff] }
 0x5b8   : > { %14839 = vst [vmem:[#allocation33_spill] sm:$0xff] %v11739_v23  ;;  %5359 = vmatpush2.msra.mxu1 %v5358_v6  ;;  %v5378_v14 = vsub.f32 %v11716_v20, %v14842_v45  ;;  %v11761_v6 = vand.u32 4294901760, %v4532_v49  ;;  %v14016_v19 = vand.u32 4294901760, %v11743_v13  ;;  %v14846_v45 = vand.u32 4294901760, %v11701_v22  ;;  %5617 = vmatprep.subr.mxu0 %v14273_v30 }
 0x5b9   : > { %5360 = vmatprep.subr.mxu1 %v14273_v30  ;;  %v4716_v42 = vsub.f32 %v11683_v32, %v14843_v17  ;;  %14844 = vst [vmem:[#allocation38_spill] sm:$0xff] %v11759_v24  ;;  %v11771_v32 = vand.u32 4294901760, %v4531_v15  ;;  %5620 = vmatpush1.msra.mxu0 %v11244_v10 }
 0x5ba   : > { %14845 = vst [vmem:[#allocation152_spill] sm:$0xff] %v11761_v6  ;;  %5366 = vmatpush2.msra.mxu1 %v5365_v60  ;;  %v4722_v17 = vsub.f32 %v11701_v22, %v14846_v45  ;;  %v5385_v9 = vsub.f32 %v11743_v13, %v14016_v19  ;;  %v5379_v60 = vand.u32 4294901760, %v5378_v14  ;;  %v11783_v22 = vsub.f32 %v4532_v49, %v11761_v6  ;;  %v4533_v19 = vld [vmem:[%s13561_s2 + $0x50] sm:$0xff] }
 0x5bb   : > { %5367 = vmatprep.subr.mxu1 %v14273_v30  ;;  %14847 = vst [vmem:[#allocation27_spill] sm:$0xff] %v11771_v32  ;;  %v4717_v45 = vand.u32 4294901760, %v4716_v42  ;;  %4709 = vmatmul.mubr.f32.gmra.mxu0 %v4708_v4  ;;  %v14849_v14 = vand.u32 4294901760, %v11739_v23  ;;  %v11794_v28 = vsub.f32 %v4531_v15, %v11771_v32  ;;  %v11796_v49 = vand.u32 4294901760, %v4534_v26  ;;  %v4536_v15 = vld [vmem:[%s13561_s2 + $0x68] sm:$0xff] }
 0x5bc   : > { %5373 = vmatpush2.msra.mxu1 %v5372_v35  ;;  %14848 = vst [vmem:[#allocation153_spill] sm:$0xff] %v11783_v22  ;;  %v5386_v18 = vand.u32 4294901760, %v5385_v9  ;;  %5621 = vmatprep.subr.mxu0 %v14273_v30  ;;  %v4723_v35 = vand.u32 4294901760, %v4722_v17  ;;  %v14852_v4 = vand.u32 4294901760, %v11759_v24  ;;  %v14023_v9 = vand.u32 4294901760, %v11783_v22 }
 0x5bd   : > { %5374 = vmatprep.subr.mxu1 %v14273_v30  ;;  %v4731_v42 = vsub.f32 %v11739_v23, %v14849_v14  ;;  %14850 = vst [vmem:[#allocation29_spill] sm:$0xff] %v11794_v28  ;;  %14851 = vst [vmem:[#allocation43_spill] sm:$0xff] %v11796_v49  ;;  %5624 = vmatpush1.msra.mxu0 %v11222_v12  ;;  %v11814_v23 = vsub.f32 %v4534_v26, %v11796_v49 }
 0x5be   : > { %5380 = vmatpush2.msra.mxu1 %v5379_v60  ;;  %5625 = vmatprep.subr.mxu0 %v14273_v30  ;;  %v4737_v17 = vsub.f32 %v11759_v24, %v14852_v4  ;;  %v11805_v60 = vand.u32 4294901760, %v4533_v19  ;;  %v11829_v4 = vand.u32 4294901760, %v4536_v15 }
 0x5bf   : > { %5381 = vmatprep.subr.mxu1 %v14273_v30  ;;  %4718 = vmatprep.mubr.f32.mxu0 %v4717_v45  ;;  %v4732_v14 = vand.u32 4294901760, %v4731_v42  ;;  %v14024_v45 = vand.u32 4294901760, %v11794_v28  ;;  %14854 = vst [vmem:[#allocation45_spill] sm:$0xff] %v11814_v23  ;;  %v4746_v42 = vsub.f32 %v11783_v22, %v14023_v9 }
 0x5c0   : > { %14853 = vst [vmem:[#allocation44_spill] sm:$0xff] %v11805_v60  ;;  %5387 = vmatpush2.msra.mxu1 %v5386_v18  ;;  %5628 = vmatpush1.msra.mxu0 %v11238_v16  ;;  %v4535_v18 = vld [vmem:[%s13561_s2 + $0x60] sm:$0xff]  ;;  %v11827_v26 = vsub.f32 %v4533_v19, %v11805_v60  ;;  %14856 = vst [vmem:[#allocation55_spill] sm:$0xff] %v11829_v4  ;;  %v4538_v19 = vld [vmem:[%s13561_s2 + $0x78] sm:$0xff] }
 0x5c1   : > { %4724 = vmatmul.mubr.f32.gmra.mxu0 %v4723_v35  ;;  %5391 = vmatmul.mubr.f32.vlgmr.msra.gmra.mxu1 %v11532_v57  ;;  %v4738_v35 = vand.u32 4294901760, %v4737_v17  ;;  %v4752_v17 = vsub.f32 %v11794_v28, %v14024_v45  ;;  %v11838_v24 = vand.u32 4294901760, %v4535_v18  ;;  %v11848_v45 = vsub.f32 %v4536_v15, %v11829_v4  ;;  %v4537_v57 = vld [vmem:[%s13561_s2 + $0x70] sm:$0xff]  ;;  %v4539_v28 = vld [vmem:[%s13561_s2 + $0x80] sm:$0xff] }
 0x5c2   : > { %5629 = vmatprep.subr.mxu0 %v14273_v30  ;;  %6030 = vmatprep.subr.mxu1 %v14273_v30  ;;  %14855 = vst [vmem:[#allocation54_spill] sm:$0xff] %v11827_v26  ;;  %v11872_v22 = vand.u32 4294901760, %v4537_v57 }
 0x5c3   : > { %5632 = vmatpush1.msra.mxu0 %v11248_v8  ;;  %6032 = vmatpush1.msra.mxu1 %v11219_v51  ;;  %14857 = vst [vmem:[#allocation58_spill] sm:$0xff] %v11838_v24  ;;  %14858 = vst [vmem:[#allocation61_spill] sm:$0xff] %v11848_v45  ;;  %v11861_v15 = vsub.f32 %v4535_v18, %v11838_v24  ;;  %v4540_v18 = vld [vmem:[%s13561_s2 + $0x88] sm:$0xff] }
 0x5c4   : > { %5633 = vmatprep.subr.mxu0 %v14273_v30  ;;  %6033 = vmatprep.subr.mxu1 %v14273_v30  ;;  %14863 = vst [vmem:[#allocation66_spill] sm:$0xff] %v11872_v22 }
 0x5c5   : > { %4733 = vmatprep.mubr.f32.mxu0 %v4732_v14  ;;  %5396 = vmatprep.mubr.f32.mxu1 %v11594_v3  ;;  %v4747_v14 = vand.u32 4294901760, %v4746_v42  ;;  %v14859_v42 = vand.u32 4294901760, %v11814_v23  ;;  %14860 = vst [vmem:[#allocation63_spill] sm:$0xff] %v11861_v15  ;;  %v14862_v3 = vand.u32 4294901760, %v11827_v26 }
 0x5c6   : > { %5636 = vmatpush1.msra.mxu0 %v11262_v58  ;;  %6035 = vmatpush1.msra.mxu1 %v11231_v43 }
 0x5c7   : > { %4739 = vmatmul.mubr.f32.gmra.mxu0 %v4738_v35  ;;  %5398 = vmatmul.mubr.f32.gmra.mxu1 %v11610_v5  ;;  %v4753_v35 = vand.u32 4294901760, %v4752_v17  ;;  %v4761_v9 = vsub.f32 %v11814_v23, %v14859_v42  ;;  %v11863_v5 = vand.u32 4294901760, %v4538_v19  ;;  %v4767_v17 = vsub.f32 %v11827_v26, %v14862_v3  ;;  %v4541_v26 = vld [vmem:[%s13561_s2 + $0x90] sm:$0xff] }
 0x5c8   : > { %5637 = vmatprep.subr.mxu0 %v14273_v30  ;;  %6036 = vmatprep.subr.mxu1 %v14273_v30  ;;  %v11906_v23 = vand.u32 4294901760, %v4539_v28 }
 0x5c9   : > { %5640 = vmatpush1.msra.mxu0 %v11275_v1  ;;  %6038 = vmatpush1.msra.mxu1 %v11201_v61  ;;  %14861 = vst [vmem:[#allocation64_spill] sm:$0xff] %v11863_v5  ;;  %v11882_v3 = vsub.f32 %v4538_v19, %v11863_v5  ;;  %v11895_v19 = vsub.f32 %v4537_v57, %v11872_v22  ;;  %v4542_v57 = vld [vmem:[%s13561_s2 + $0x98] sm:$0xff] }
 0x5ca   : > { %5641 = vmatprep.subr.mxu0 %v14273_v30  ;;  %6039 = vmatprep.subr.mxu1 %v14273_v30  ;;  %14869 = vst [vmem:[#allocation73_spill] sm:$0xff] %v11906_v23 }
 0x5cb   : > { %4748 = vmatprep.mubr.f32.mxu0 %v4747_v14  ;;  %5403 = vmatprep.mubr.f32.mxu1 %v11648_v21  ;;  %v4762_v14 = vand.u32 4294901760, %v4761_v9  ;;  %14864 = vst [vmem:[#allocation68_spill] sm:$0xff] %v11882_v3  ;;  %v14865_v9 = vand.u32 4294901760, %v11848_v45  ;;  %14866 = vst [vmem:[#allocation69_spill] sm:$0xff] %v11895_v19  ;;  %v14868_v21 = vand.u32 4294901760, %v11861_v15 }
 0x5cc   : > { %5644 = vmatpush1.msra.mxu0 %v11290_v50  ;;  %6041 = vmatpush1.msra.mxu1 %v11215_v7 }
 0x5cd   : > { %4754 = vmatmul.mubr.f32.gmra.mxu0 %v4753_v35  ;;  %5405 = vmatmul.mubr.f32.gmra.mxu1 %v11664_v0  ;;  %v4768_v35 = vand.u32 4294901760, %v4767_v17  ;;  %v4776_v42 = vsub.f32 %v11848_v45, %v14865_v9  ;;  %v11897_v0 = vand.u32 4294901760, %v4540_v18  ;;  %v4782_v17 = vsub.f32 %v11861_v15, %v14868_v21  ;;  %v4543_v15 = vld [vmem:[%s13561_s2 + $0xa0] sm:$0xff] }
 0x5ce   : > { %5645 = vmatprep.subr.mxu0 %v14273_v30  ;;  %6042 = vmatprep.subr.mxu1 %v14273_v30  ;;  %v11940_v45 = vand.u32 4294901760, %v4541_v26 }
 0x5cf   : > { %5648 = vmatpush1.msra.mxu0 %v11305_v41  ;;  %6044 = vmatpush1.msra.mxu1 %v11224_v2  ;;  %14867 = vst [vmem:[#allocation70_spill] sm:$0xff] %v11897_v0  ;;  %v11916_v21 = vsub.f32 %v4540_v18, %v11897_v0  ;;  %v11929_v18 = vsub.f32 %v4539_v28, %v11906_v23  ;;  %v4544_v28 = vld [vmem:[%s13561_s2 + $0xa8] sm:$0xff] }
 0x5d0   : > { %5649 = vmatprep.subr.mxu0 %v14273_v30  ;;  %6045 = vmatprep.subr.mxu1 %v14273_v30  ;;  %14875 = vst [vmem:[#allocation80_spill] sm:$0xff] %v11940_v45 }
 0x5d1   : > { %4763 = vmatprep.mubr.f32.mxu0 %v4762_v14  ;;  %5410 = vmatprep.mubr.f32.mxu1 %v11703_v44  ;;  %v4777_v14 = vand.u32 4294901760, %v4776_v42  ;;  %14870 = vst [vmem:[#allocation74_spill] sm:$0xff] %v11916_v21  ;;  %v14871_v42 = vand.u32 4294901760, %v11882_v3  ;;  %14872 = vst [vmem:[#allocation75_spill] sm:$0xff] %v11929_v18  ;;  %v14874_v44 = vand.u32 4294901760, %v11895_v19 }
 0x5d2   : > { %5652 = vmatpush1.msra.mxu0 %v11320_v36  ;;  %6047 = vmatpush1.msra.mxu1 %v11240_v55 }
 0x5d3   : > { %4769 = vmatmul.mubr.f32.gmra.mxu0 %v4768_v35  ;;  %5412 = vmatmul.mubr.f32.gmra.mxu1 %v11722_v33  ;;  %v4783_v35 = vand.u32 4294901760, %v4782_v17  ;;  %v4791_v9 = vsub.f32 %v11882_v3, %v14871_v42  ;;  %v11931_v33 = vand.u32 4294901760, %v4542_v57  ;;  %v4797_v17 = vsub.f32 %v11895_v19, %v14874_v44  ;;  %v4545_v3 = vld [vmem:[%s13561_s2 + $0xb0] sm:$0xff] }
 0x5d4   : > { %5653 = vmatprep.subr.mxu0 %v14273_v30  ;;  %6048 = vmatprep.subr.mxu1 %v14273_v30  ;;  %v14881_v19 = vand.u32 4294901760, %v11929_v18 }
 0x5d5   : > { %5656 = vmatpush1.msra.mxu0 %v11330_v59  ;;  %6050 = vmatpush1.msra.mxu1 %v11251_v52  ;;  %14873 = vst [vmem:[#allocation78_spill] sm:$0xff] %v11931_v33  ;;  %v11950_v44 = vsub.f32 %v4542_v57, %v11931_v33  ;;  %v11963_v57 = vsub.f32 %v4541_v26, %v11940_v45  ;;  %v14883_v26 = vld [vmem:[#allocation98_spill] sm:$0xff] }
 0x5d6   : > { %5657 = vmatprep.subr.mxu0 %v14273_v30  ;;  %6051 = vmatprep.subr.mxu1 %v14273_v30 }
 0x5d7   : > { %4778 = vmatprep.mubr.f32.mxu0 %v4777_v14  ;;  %5417 = vmatprep.mubr.f32.mxu1 %v11761_v6  ;;  %v4792_v14 = vand.u32 4294901760, %v4791_v9  ;;  %14876 = vst [vmem:[#allocation82_spill] sm:$0xff] %v11950_v44  ;;  %v14877_v6 = vld [vmem:[#allocation11_spill] sm:$0xff]  ;;  %v14878_v9 = vand.u32 4294901760, %v11916_v21  ;;  %14879 = vst [vmem:[#allocation84_spill] sm:$0xff] %v11963_v57 }
 0x5d8   : > { %5660 = vmatpush1.msra.mxu0 %v11343_v34  ;;  %6053 = vmatpush1.msra.mxu1 %v11264_v62 }
 0x5d9   : > { %4784 = vmatmul.mubr.f32.gmra.mxu0 %v4783_v35  ;;  %5419 = vmatmul.mubr.f32.gmra.mxu1 %v11771_v32  ;;  %v4798_v35 = vand.u32 4294901760, %v4797_v17  ;;  %v4806_v42 = vsub.f32 %v11916_v21, %v14878_v9  ;;  %v11965_v32 = vand.u32 4294901760, %v4544_v28  ;;  %v4812_v17 = vsub.f32 %v11929_v18, %v14881_v19  ;;  %v4546_v9 = vld [vmem:[%s13561_s2 + $0xb8] sm:$0xff]  ;;  %v14885_v18 = vld [vmem:[#allocation100_spill] sm:$0xff] }
 0x5da   : > { %5661 = vmatprep.subr.mxu0 %v14273_v30  ;;  %6054 = vmatprep.subr.mxu1 %v14273_v30  ;;  %v14889_v21 = vand.u32 4294901760, %v11963_v57 }
 0x5db   : > { %5664 = vmatpush1.msra.mxu0 %v11357_v48  ;;  %6056 = vmatpush1.msra.mxu1 %v14877_v6  ;;  %14880 = vst [vmem:[#allocation86_spill] sm:$0xff] %v11965_v32  ;;  %v11974_v6 = vand.u32 4294901760, %v4543_v15  ;;  %v11984_v19 = vsub.f32 %v4544_v28, %v11965_v32 }
 0x5dc   : > { %5665 = vmatprep.subr.mxu0 %v14273_v30  ;;  %6057 = vmatprep.subr.mxu1 %v14273_v30 }
 0x5dd   : > { %4793 = vmatprep.mubr.f32.mxu0 %v4792_v14  ;;  %5424 = vmatprep.mubr.f32.mxu1 %v11796_v49  ;;  %14882 = vst [vmem:[#allocation87_spill] sm:$0xff] %v11974_v6  ;;  %v4807_v14 = vand.u32 4294901760, %v4806_v42  ;;  %14884 = vst [vmem:[#allocation88_spill] sm:$0xff] %v11984_v19  ;;  %v14886_v42 = vand.u32 4294901760, %v11950_v44  ;;  %v11997_v28 = vsub.f32 %v4543_v15, %v11974_v6  ;;  %v4548_v15 = vld [vmem:[%s13561_s2 + $0xc8] sm:$0xff] }
 0x5de   : > { %5668 = vmatpush1.msra.mxu0 %v11371_v27  ;;  %6059 = vmatpush1.msra.mxu1 %v14883_v26 }
 0x5df   : > { %4799 = vmatmul.mubr.f32.gmra.mxu0 %v4798_v35  ;;  %5426 = vmatmul.mubr.f32.gmra.mxu1 %v11805_v60  ;;  %v4813_v35 = vand.u32 4294901760, %v4812_v17  ;;  %v4821_v49 = vsub.f32 %v11950_v44, %v14886_v42  ;;  %14887 = vst [vmem:[#allocation92_spill] sm:$0xff] %v11997_v28  ;;  %v11999_v60 = vand.u32 4294901760, %v4546_v9  ;;  %v4827_v17 = vsub.f32 %v11963_v57, %v14889_v21  ;;  %v4549_v44 = vld [vmem:[%s13561_s2 + $0xd0] sm:$0xff] }
 0x5e0   : > { %5669 = vmatprep.subr.mxu0 %v14273_v30  ;;  %6060 = vmatprep.subr.mxu1 %v14273_v30  ;;  %v14896_v57 = vand.u32 4294901760, %v11997_v28 }
 0x5e1   : > { %5672 = vmatpush1.msra.mxu0 %v11385_v38  ;;  %6062 = vmatpush1.msra.mxu1 %v14885_v18  ;;  %14888 = vst [vmem:[#allocation93_spill] sm:$0xff] %v11999_v60  ;;  %v12008_v38 = vand.u32 4294901760, %v4545_v3  ;;  %v12018_v21 = vsub.f32 %v4546_v9, %v11999_v60  ;;  %v4547_v18 = vld [vmem:[%s13561_s2 + $0xc0] sm:$0xff] }
 0x5e2   : > { %5673 = vmatprep.subr.mxu0 %v14273_v30  ;;  %6063 = vmatprep.subr.mxu1 %v14273_v30 }
 0x5e3   : > { %4808 = vmatprep.mubr.f32.mxu0 %v4807_v14  ;;  %5431 = vmatprep.mubr.f32.mxu1 %v11829_v4  ;;  %14890 = vst [vmem:[#allocation94_spill] sm:$0xff] %v12008_v38  ;;  %v4822_v14 = vand.u32 4294901760, %v4821_v49  ;;  %14891 = vst [vmem:[#allocation97_spill] sm:$0xff] %v12018_v21  ;;  %v14892_v4 = vld [vmem:[#allocation102_spill] sm:$0xff]  ;;  %v14893_v49 = vand.u32 4294901760, %v11984_v19  ;;  %v12031_v9 = vsub.f32 %v4545_v3, %v12008_v38 }
 0x5e4   : > { %5676 = vmatpush1.msra.mxu0 %v11398_v29  ;;  %6065 = vmatpush1.msra.mxu1 %v11314_v47  ;;  %v14899_v3 = vld [vmem:[#allocation10_spill] sm:$0xff] }
 0x5e5   : > { %4814 = vmatmul.mubr.f32.gmra.mxu0 %v4813_v35  ;;  %5433 = vmatmul.mubr.f32.gmra.mxu1 %v11838_v24  ;;  %v4828_v35 = vand.u32 4294901760, %v4827_v17  ;;  %v4836_v42 = vsub.f32 %v11984_v19, %v14893_v49  ;;  %14894 = vst [vmem:[#allocation99_spill] sm:$0xff] %v12031_v9  ;;  %v12033_v24 = vand.u32 4294901760, %v4548_v15  ;;  %v4842_v17 = vsub.f32 %v11997_v28, %v14896_v57  ;;  %v14898_v49 = vld [vmem:[#allocation110_spill] sm:$0xff]  ;;  %v4550_v19 = vld [vmem:[%s13561_s2 + $0xd8] sm:$0xff]  ;;  %v14901_v28 = vld [vmem:[#allocation104_spill] sm:$0xff] }
 0x5e6   : > { %5677 = vmatprep.subr.mxu0 %v14273_v30  ;;  %6066 = vmatprep.subr.mxu1 %v14273_v30 }
 0x5e7   : > { %5680 = vmatpush2.msra.mxu0 %v11488_v39  ;;  %6068 = vmatpush1.msra.mxu1 %v14892_v4  ;;  %14895 = vst [vmem:[#allocation101_spill] sm:$0xff] %v12033_v24  ;;  %v12042_v4 = vand.u32 4294901760, %v4547_v18  ;;  %v12052_v57 = vsub.f32 %v4548_v15, %v12033_v24 }
 0x5e8   : > { %5681 = vmatprep.subr.mxu0 %v14273_v30  ;;  %6069 = vmatprep.subr.mxu1 %v14273_v30 }
 0x5e9   : > { %4823 = vmatprep.mubr.f32.mxu0 %v4822_v14  ;;  %5438 = vmatprep.mubr.f32.mxu1 %v11863_v5  ;;  %14897 = vst [vmem:[#allocation103_spill] sm:$0xff] %v12042_v4  ;;  %v4837_v14 = vand.u32 4294901760, %v4836_v42  ;;  %14900 = vst [vmem:[#allocation105_spill] sm:$0xff] %v12052_v57  ;;  %v14902_v42 = vand.u32 4294901760, %v12018_v21  ;;  %v12065_v15 = vsub.f32 %v4547_v18, %v12042_v4  ;;  %v14907_v18 = vld [vmem:[#allocation14_spill] sm:$0xff] }
 0x5ea   : > { %5684 = vmatpush2.msra.mxu0 %v14898_v49  ;;  %6071 = vmatpush1.msra.mxu1 %v14899_v3  ;;  %v12076_v3 = vand.u32 4294901760, %v4549_v44 }
 0x5eb   : > { %4829 = vmatmul.mubr.f32.gmra.mxu0 %v4828_v35  ;;  %5440 = vmatmul.mubr.f32.gmra.mxu1 %v11872_v22  ;;  %v4843_v35 = vand.u32 4294901760, %v4842_v17  ;;  %v4851_v5 = vsub.f32 %v12018_v21, %v14902_v42  ;;  %14903 = vst [vmem:[#allocation106_spill] sm:$0xff] %v12065_v15  ;;  %v12067_v22 = vand.u32 4294901760, %v4550_v19  ;;  %v4552_v42 = vld [vmem:[%s13561_s2 + $0xe8] sm:$0xff]  ;;  %v14913_v21 = vand.u32 4294901760, %v12065_v15 }
 0x5ec   : > { %5685 = vmatprep.subr.mxu0 %v14273_v30  ;;  %6072 = vmatprep.subr.mxu1 %v14273_v30  ;;  %14906 = vst [vmem:[#allocation112_spill] sm:$0xff] %v12076_v3 }
 0x5ed   : > { %5688 = vmatpush2.msra.mxu0 %v11476_v11  ;;  %6074 = vmatpush1.msra.mxu1 %v14901_v28  ;;  %14904 = vst [vmem:[#allocation108_spill] sm:$0xff] %v12067_v22  ;;  %v14905_v11 = vand.u32 4294901760, %v12031_v9  ;;  %v4551_v28 = vld [vmem:[%s13561_s2 + $0xe0] sm:$0xff] }
 0x5ee   : > { %5689 = vmatprep.subr.mxu0 %v14273_v30  ;;  %6075 = vmatprep.subr.mxu1 %v14273_v30 }
 0x5ef   : > { %4838 = vmatprep.mubr.f32.mxu0 %v4837_v14  ;;  %5445 = vmatprep.mubr.f32.mxu1 %v11897_v0  ;;  %v4857_v17 = vsub.f32 %v12031_v9, %v14905_v11  ;;  %v4852_v14 = vand.u32 4294901760, %v4851_v5  ;;  %v12086_v11 = vsub.f32 %v4550_v19, %v12067_v22  ;;  %v14909_v9 = vld [vmem:[#allocation111_spill] sm:$0xff]  ;;  %v14910_v5 = vand.u32 4294901760, %v12052_v57 }
 0x5f0   : > { %5692 = vmatpush2.msra.mxu0 %v11481_v40  ;;  %6077 = vmatpush1.msra.mxu1 %v14907_v18  ;;  %v12099_v19 = vsub.f32 %v4549_v44, %v12076_v3  ;;  %v14915_v44 = vld [vmem:[#allocation12_spill] sm:$0xff] }
 0x5f1   : > { %4844 = vmatmul.mubr.f32.gmra.mxu0 %v4843_v35  ;;  %5447 = vmatmul.mubr.f32.gmra.mxu1 %v11906_v23  ;;  %14908 = vst [vmem:[#allocation113_spill] sm:$0xff] %v12086_v11  ;;  %v4858_v35 = vand.u32 4294901760, %v4857_v17  ;;  %v4866_v0 = vsub.f32 %v12052_v57, %v14910_v5  ;;  %v12101_v23 = vand.u32 4294901760, %v4552_v42  ;;  %v4872_v17 = vsub.f32 %v12065_v15, %v14913_v21  ;;  %v4554_v5 = vld [vmem:[%s13561_s2 + $0xf8] sm:$0xff]  ;;  %v14917_v15 = vld [vmem:[#allocation109_spill] sm:$0xff] }
 0x5f2   : > { %5693 = vmatprep.subr.mxu0 %v14273_v30  ;;  %6078 = vmatprep.subr.mxu1 %v14273_v30  ;;  %14911 = vst [vmem:[#allocation114_spill] sm:$0xff] %v12099_v19  ;;  %v14921_v57 = vand.u32 4294901760, %v12099_v19 }
 0x5f3   : > { %5696 = vmatpush2.msra.mxu0 %v11498_v46  ;;  %6080 = vmatpush2.msra.mxu1 %v14909_v9  ;;  %14912 = vst [vmem:[#allocation117_spill] sm:$0xff] %v12101_v23  ;;  %v12110_v46 = vand.u32 4294901760, %v4551_v28  ;;  %v12120_v21 = vsub.f32 %v4552_v42, %v12101_v23  ;;  %v4553_v9 = vld [vmem:[%s13561_s2 + $0xf0] sm:$0xff] }
 0x5f4   : > { %5697 = vmatprep.subr.mxu0 %v14273_v30  ;;  %6081 = vmatprep.subr.mxu1 %v14273_v30 }
 0x5f5   : > { %4853 = vmatprep.mubr.f32.mxu0 %v4852_v14  ;;  %5452 = vmatprep.mubr.f32.mxu1 %v11931_v33  ;;  %14914 = vst [vmem:[#allocation119_spill] sm:$0xff] %v12110_v46  ;;  %v4867_v14 = vand.u32 4294901760, %v4866_v0  ;;  %14916 = vst [vmem:[#allocation121_spill] sm:$0xff] %v12120_v21  ;;  %v14918_v0 = vand.u32 4294901760, %v12086_v11  ;;  %v12133_v42 = vsub.f32 %v4551_v28, %v12110_v46  ;;  %v14924_v28 = vld [vmem:[#allocation16_spill] sm:$0xff] }
 0x5f6   : > { %5700 = vmatpush2.msra.mxu0 %v11512_v63  ;;  %6083 = vmatpush2.msra.mxu1 %v14915_v44  ;;  %v4564_v63 = vld [vmem:[%s13561_s2 + $0x148] sm:$0xff] }
 0x5f7   : > { %4859 = vmatmul.mubr.f32.gmra.mxu0 %v4858_v35  ;;  %5454 = vmatmul.mubr.f32.gmra.mxu1 %v11940_v45  ;;  %v4873_v35 = vand.u32 4294901760, %v4872_v17  ;;  %v4881_v33 = vsub.f32 %v12086_v11, %v14918_v0  ;;  %14919 = vst [vmem:[#allocation123_spill] sm:$0xff] %v12133_v42  ;;  %v12135_v45 = vand.u32 4294901760, %v4554_v5  ;;  %v4887_v17 = vsub.f32 %v12099_v19, %v14921_v57  ;;  %v14923_v0 = vld [vmem:[#allocation122_spill] sm:$0xff]  ;;  %v4556_v11 = vld [vmem:[%s13561_s2 + $0x108] sm:$0xff] }
 0x5f8   : > { %5701 = vmatprep.subr.mxu0 %v14273_v30  ;;  %6084 = vmatprep.subr.mxu1 %v14273_v30  ;;  %v14926_v19 = vld [vmem:[#allocation13_spill] sm:$0xff] }
 0x5f9   : > { %5704 = vmatpush2.msra.mxu0 %v11538_v54  ;;  %6086 = vmatpush2.msra.mxu1 %v14917_v15  ;;  %14920 = vst [vmem:[#allocation125_spill] sm:$0xff] %v12135_v45  ;;  %v12144_v54 = vand.u32 4294901760, %v4553_v9  ;;  %v12154_v57 = vsub.f32 %v4554_v5, %v12135_v45  ;;  %v4555_v15 = vld [vmem:[%s13561_s2 + $0x100] sm:$0xff] }
 0x5fa   : > { %5705 = vmatprep.subr.mxu0 %v14273_v30  ;;  %6087 = vmatprep.subr.mxu1 %v14273_v30 }
 0x5fb   : > { %4868 = vmatprep.mubr.f32.mxu0 %v4867_v14  ;;  %5459 = vmatprep.mubr.f32.mxu1 %v11965_v32  ;;  %14922 = vst [vmem:[#allocation126_spill] sm:$0xff] %v12144_v54  ;;  %v4882_v14 = vand.u32 4294901760, %v4881_v33  ;;  %14925 = vst [vmem:[#allocation128_spill] sm:$0xff] %v12154_v57  ;;  %v14927_v33 = vand.u32 4294901760, %v12120_v21  ;;  %v12167_v5 = vsub.f32 %v4553_v9, %v12144_v54 }
 0x5fc   : > { %5708 = vmatpush2.msra.mxu0 %v14923_v0  ;;  %6089 = vmatpush2.msra.mxu1 %v14924_v28  ;;  %v4558_v28 = vld [vmem:[%s13561_s2 + $0x118] sm:$0xff] }
 0x5fd   : > { %4874 = vmatmul.mubr.f32.gmra.mxu0 %v4873_v35  ;;  %5461 = vmatmul.mubr.f32.gmra.mxu1 %v11974_v6  ;;  %v4888_v35 = vand.u32 4294901760, %v4887_v17  ;;  %v4896_v32 = vsub.f32 %v12120_v21, %v14927_v33  ;;  %14928 = vst [vmem:[#allocation132_spill] sm:$0xff] %v12167_v5  ;;  %v12169_v6 = vand.u32 4294901760, %v4556_v11  ;;  %v14930_v17 = vand.u32 4294901760, %v12133_v42 }
 0x5fe   : > { %5709 = vmatprep.subr.mxu0 %v14273_v30  ;;  %6090 = vmatprep.subr.mxu1 %v14273_v30  ;;  %v12181_v21 = vand.u32 4294901760, %v4555_v15  ;;  %v12185_v0 = vand.u32 4294901760, %v4558_v28 }
 0x5ff   : > { %5712 = vmatpush2.msra.mxu0 %v11568_v53  ;;  %6092 = vmatpush2.msra.mxu1 %v14926_v19  ;;  %14929 = vst [vmem:[#allocation133_spill] sm:$0xff] %v12169_v6  ;;  %v4902_v33 = vsub.f32 %v12133_v42, %v14930_v17  ;;  %v14932_v19 = vld [vmem:[#allocation129_spill] sm:$0xff]  ;;  %v14933_v53 = vld [vmem:[#allocation15_spill] sm:$0xff]  ;;  %v12193_v9 = vsub.f32 %v4556_v11, %v12169_v6 }
 0x600   : > { %5713 = vmatprep.subr.mxu0 %v14273_v30  ;;  %6093 = vmatprep.subr.mxu1 %v14273_v30  ;;  %14931 = vst [vmem:[#allocation134_spill] sm:$0xff] %v12181_v21  ;;  %14934 = vst [vmem:[#allocation137_spill] sm:$0xff] %v12185_v0  ;;  %v4560_v42 = vld [vmem:[%s13561_s2 + $0x128] sm:$0xff]  ;;  %v12206_v11 = vsub.f32 %v4555_v15, %v12181_v21  ;;  %v12213_v44 = vsub.f32 %v4558_v28, %v12185_v0  ;;  %v4562_v28 = vld [vmem:[%s13561_s2 + $0x138] sm:$0xff] }
 0x601   : > { %4883 = vmatprep.mubr.f32.mxu0 %v4882_v14  ;;  %5466 = vmatprep.mubr.f32.mxu1 %v11999_v60  ;;  %v4557_v14 = vld [vmem:[%s13561_s2 + $0x110] sm:$0xff]  ;;  %v4897_v60 = vand.u32 4294901760, %v4896_v32  ;;  %14935 = vst [vmem:[#allocation139_spill] sm:$0xff] %v12193_v9  ;;  %v14938_v32 = vand.u32 4294901760, %v12154_v57 }
 0x602   : > { %5716 = vmatpush2.msra.mxu0 %v14932_v19  ;;  %6095 = vmatpush2.msra.mxu1 %v14933_v53  ;;  %v14936_v53 = vld [vmem:[#allocation131_spill] sm:$0xff]  ;;  %v14937_v19 = vld [vmem:[#allocation20_spill] sm:$0xff]  ;;  %14939 = vst [vmem:[#allocation141_spill] sm:$0xff] %v12206_v11  ;;  %14941 = vst [vmem:[#allocation145_spill] sm:$0xff] %v12213_v44 }
 0x603   : > { %4889 = vmatmul.mubr.f32.gmra.mxu0 %v4888_v35  ;;  %5468 = vmatmul.mubr.f32.gmra.mxu1 %v12008_v38  ;;  %v4903_v35 = vand.u32 4294901760, %v4902_v33  ;;  %v4911_v17 = vsub.f32 %v12154_v57, %v14938_v32  ;;  %v12208_v38 = vand.u32 4294901760, %v4557_v14  ;;  %v4559_v33 = vld [vmem:[%s13561_s2 + $0x120] sm:$0xff]  ;;  %v14942_v32 = vand.u32 4294901760, %v12167_v5 }
 0x604   : > { %5717 = vmatprep.subr.mxu0 %v14273_v30  ;;  %6096 = vmatprep.subr.mxu1 %v14273_v30  ;;  %v12235_v57 = vand.u32 4294901760, %v4559_v33 }
 0x605   : > { %5720 = vmatpush2.msra.mxu0 %v14936_v53  ;;  %6098 = vmatpush2.msra.mxu1 %v14937_v19  ;;  %14940 = vst [vmem:[#allocation143_spill] sm:$0xff] %v12208_v38  ;;  %v4917_v15 = vsub.f32 %v12167_v5, %v14942_v32  ;;  %v12223_v19 = vand.u32 4294901760, %v4560_v42  ;;  %v14944_v53 = vld [vmem:[#allocation17_spill] sm:$0xff]  ;;  %v12233_v32 = vsub.f32 %v4557_v14, %v12208_v38  ;;  %v4561_v5 = vld [vmem:[%s13561_s2 + $0x130] sm:$0xff] }
 0x606   : > { %5721 = vmatprep.subr.mxu0 %v14273_v30  ;;  %6099 = vmatprep.subr.mxu1 %v14273_v30  ;;  %14946 = vst [vmem:[#allocation154_spill] sm:$0xff] %v12235_v57 }
 0x607   : > { %4898 = vmatprep.mubr.f32.mxu0 %v4897_v60  ;;  %5473 = vmatprep.mubr.f32.mxu1 %v12033_v24  ;;  %14943 = vst [vmem:[#allocation146_spill] sm:$0xff] %v12223_v19  ;;  %v4912_v60 = vand.u32 4294901760, %v4911_v17  ;;  %14945 = vst [vmem:[#allocation148_spill] sm:$0xff] %v12233_v32  ;;  %v14948_v17 = vld [vmem:[#allocation19_spill] sm:$0xff]  ;;  %v4918_v14 = vand.u32 4294901760, %v4917_v15  ;;  %v14949_v24 = vand.u32 4294901760, %v12193_v9 }
 0x608   : > { %5724 = vmatpush2.msra.mxu0 %v11668_v37  ;;  %6101 = vmatpush2.msra.mxu1 %v14944_v53  ;;  %v12243_v53 = vand.u32 4294901760, %v4562_v28  ;;  %v12251_v37 = vsub.f32 %v4560_v42, %v12223_v19  ;;  %v14952_v15 = vand.u32 4294901760, %v12206_v11 }
 0x609   : > { %4904 = vmatmul.mubr.f32.gmra.mxu0 %v4903_v35  ;;  %5475 = vmatmul.mubr.f32.gmra.mxu1 %v12042_v4  ;;  %v4926_v4 = vsub.f32 %v12193_v9, %v14949_v24  ;;  %v12258_v35 = vand.u32 4294901760, %v4561_v5  ;;  %v12266_v9 = vsub.f32 %v4559_v33, %v12235_v57 }
 0x60a   : > { %5725 = vmatprep.subr.mxu0 %v14273_v30  ;;  %6102 = vmatprep.subr.mxu1 %v14273_v30  ;;  %14947 = vst [vmem:[#allocation155_spill] sm:$0xff] %v12243_v53  ;;  %14950 = vst [vmem:[#allocation156_spill] sm:$0xff] %v12251_v37  ;;  %v4932_v24 = vsub.f32 %v12206_v11, %v14952_v15  ;;  %v4563_v15 = vld [vmem:[%s13561_s2 + $0x140] sm:$0xff]  ;;  %v4566_v11 = vld [vmem:[%s13561_s2 + $0x158] sm:$0xff] }
 0x60b   : > { %5728 = vmatpush2.msra.mxu0 %v11671_v56  ;;  %6104 = vmatpush2.msra.mxu1 %v14948_v17  ;;  %14951 = vst [vmem:[#allocation157_spill] sm:$0xff] %v12258_v35  ;;  %14953 = vst [vmem:[#allocation158_spill] sm:$0xff] %v12266_v9  ;;  %v14954_v17 = vld [vmem:[#allocation127_spill] sm:$0xff]  ;;  %v14955_v56 = vand.u32 4294901760, %v12213_v44  ;;  %v4927_v33 = vand.u32 4294901760, %v4926_v4  ;;  %v14960_v4 = vand.u32 4294901760, %v12233_v32 }
 0x60c   : > { %5729 = vmatprep.subr.mxu0 %v14273_v30  ;;  %6105 = vmatprep.subr.mxu1 %v14273_v30 }
 0x60d   : > { %4913 = vmatprep.mubr.f32.mxu0 %v4912_v60  ;;  %5480 = vmatprep.mubr.f32.mxu1 %v12067_v22  ;;  %v4941_v18 = vsub.f32 %v12213_v44, %v14955_v56  ;;  %v12274_v60 = vsub.f32 %v4562_v28, %v12243_v53  ;;  %v12276_v22 = vand.u32 4294901760, %v4564_v63  ;;  %v12289_v56 = vsub.f32 %v4561_v5, %v12258_v35  ;;  %v14959_v28 = vld [vmem:[#allocation130_spill] sm:$0xff] }
 0x60e   : > { %5732 = vmatpush2.msra.mxu0 %v11707_v31  ;;  %6107 = vmatpush2.msra.mxu1 %v14954_v17  ;;  %v4947_v42 = vsub.f32 %v12233_v32, %v14960_v4  ;;  %v12297_v44 = vand.u32 4294901760, %v4563_v15  ;;  %v4565_v17 = vld [vmem:[%s13561_s2 + $0x150] sm:$0xff]  ;;  %v4568_v4 = vld [vmem:[%s13561_s2 + $0x168] sm:$0xff] }
 0x60f   : > { %14956 = vst [vmem:[#allocation159_spill] sm:$0xff] %v12274_v60  ;;  %14957 = vst [vmem:[#allocation35_spill] sm:$0xff] %v12276_v22  ;;  %4919 = vmatmul.mubr.f32.gmra.mxu0 %v4918_v14  ;;  %5482 = vmatmul.mubr.f32.gmra.mxu1 %v12076_v3  ;;  %v4933_v14 = vand.u32 4294901760, %v4932_v24  ;;  %v4942_v5 = vand.u32 4294901760, %v4941_v18  ;;  %v12306_v24 = vsub.f32 %v4564_v63, %v12276_v22  ;;  %v14964_v3 = vand.u32 4294901760, %v12251_v37  ;;  %v14965_v18 = vld [vmem:[#allocation25_spill] sm:$0xff] }
 0x610   : > { %5733 = vmatprep.subr.mxu0 %v14273_v30  ;;  %6108 = vmatprep.subr.mxu1 %v14273_v30  ;;  %14958 = vst [vmem:[#allocation98_spill] sm:$0xff] %v12289_v56  ;;  %14961 = vst [vmem:[#allocation110_spill] sm:$0xff] %v12297_v44  ;;  %v4948_v31 = vand.u32 4294901760, %v4947_v42  ;;  %v12327_v40 = vsub.f32 %v4563_v15, %v12297_v44  ;;  %v14970_v63 = vand.u32 4294901760, %v12274_v60  ;;  %v14972_v15 = vld [vmem:[#allocation136_spill] sm:$0xff] }
 0x611   : > { %5736 = vmatpush2.msra.mxu0 %v11716_v20  ;;  %6110 = vmatpush2.msra.mxu1 %v14959_v28  ;;  %14962 = vst [vmem:[#allocation160_spill] sm:$0xff] %v12306_v24  ;;  %v12308_v20 = vand.u32 4294901760, %v4566_v11  ;;  %v4956_v32 = vsub.f32 %v12251_v37, %v14964_v3  ;;  %v12320_v28 = vand.u32 4294901760, %v4565_v17  ;;  %v12329_v3 = vand.u32 4294901760, %v4568_v4 }
 0x612   : > { %5737 = vmatprep.subr.mxu0 %v14273_v30  ;;  %6111 = vmatprep.subr.mxu1 %v14273_v30  ;;  %14968 = vst [vmem:[#allocation163_spill] sm:$0xff] %v12327_v40  ;;  %v4971_v37 = vsub.f32 %v12274_v60, %v14970_v63  ;;  %v14973_v63 = vand.u32 4294901760, %v12289_v56  ;;  %v14975_v60 = vld [vmem:[#allocation142_spill] sm:$0xff] }
 0x613   : > { %14963 = vst [vmem:[#allocation161_spill] sm:$0xff] %v12308_v20  ;;  %4928 = vmatprep.mubr.f32.mxu0 %v4927_v33  ;;  %5487 = vmatprep.mubr.f32.mxu1 %v12101_v23  ;;  %14966 = vst [vmem:[#allocation162_spill] sm:$0xff] %v12320_v28  ;;  %v14967_v33 = vand.u32 4294901760, %v12266_v9  ;;  %v12337_v42 = vsub.f32 %v4566_v11, %v12308_v20 }
 0x614   : > { %5740 = vmatpush2.msra.mxu0 %v11743_v13  ;;  %6113 = vmatpush2.msra.mxu1 %v14965_v18  ;;  %14969 = vst [vmem:[#allocation164_spill] sm:$0xff] %v12329_v3  ;;  %v4977_v11 = vsub.f32 %v12289_v56, %v14973_v63  ;;  %v4972_v63 = vand.u32 4294901760, %v4971_v37  ;;  %v4578_v13 = vld [vmem:[%s13561_s2 + $0x1b8] sm:$0xff] }
 0x615   : > { %4934 = vmatmul.mubr.f32.gmra.mxu0 %v4933_v14  ;;  %5489 = vmatmul.mubr.f32.gmra.mxu1 %v12110_v46  ;;  %v4962_v23 = vsub.f32 %v12266_v9, %v14967_v33  ;;  %14971 = vst [vmem:[#allocation165_spill] sm:$0xff] %v12337_v42  ;;  %v4567_v33 = vld [vmem:[%s13561_s2 + $0x160] sm:$0xff]  ;;  %v4957_v46 = vand.u32 4294901760, %v4956_v32  ;;  %v12352_v14 = vsub.f32 %v4565_v17, %v12320_v28  ;;  %v14978_v17 = vand.u32 4294901760, %v12306_v24  ;;  %v4572_v32 = vld [vmem:[%s13561_s2 + $0x188] sm:$0xff] }
 0x616   : > { %6114 = vmatprep.subr.mxu1 %v14273_v30  ;;  %4943 = vmatprep.mubr.f32.mxu0 %v4942_v5  ;;  %v4570_v5 = vld [vmem:[%s13561_s2 + $0x178] sm:$0xff]  ;;  %v12358_v9 = vsub.f32 %v4568_v4, %v12329_v3  ;;  %v14980_v4 = vld [vmem:[#allocation144_spill] sm:$0xff]  ;;  %v4978_v37 = vand.u32 4294901760, %v4977_v11 }
 0x617   : > { %6116 = vmatpush2.msra.mxu1 %v14972_v15  ;;  %5494 = vmatprep.mubr.f32.mxu1 %v12135_v45  ;;  %14974 = vst [vmem:[#allocation166_spill] sm:$0xff] %v12352_v14  ;;  %v4963_v45 = vand.u32 4294901760, %v4962_v23  ;;  %v12360_v15 = vand.u32 4294901760, %v4567_v33  ;;  %v4986_v56 = vsub.f32 %v12306_v24, %v14978_v17  ;;  %v4569_v23 = vld [vmem:[%s13561_s2 + $0x170] sm:$0xff]  ;;  %v4571_v11 = vld [vmem:[%s13561_s2 + $0x180] sm:$0xff] }
 0x618   : > { %6117 = vmatprep.subr.mxu1 %v14273_v30  ;;  %6479 = vmatprep.subr.mxu0 %v14273_v30  ;;  %14976 = vst [vmem:[#allocation167_spill] sm:$0xff] %v12358_v9  ;;  %v12388_v18 = vand.u32 4294901760, %v4569_v23 }
 0x619   : > { %6119 = vmatpush2.msra.mxu1 %v14975_v60  ;;  %4949 = vmatmul.mubr.f32.gmra.mxu0 %v4948_v31  ;;  %14977 = vst [vmem:[#allocation168_spill] sm:$0xff] %v12360_v15  ;;  %v12368_v31 = vand.u32 4294901760, %v4570_v5  ;;  %v14981_v60 = vld [vmem:[#allocation150_spill] sm:$0xff]  ;;  %v4987_v17 = vand.u32 4294901760, %v4986_v56 }
 0x61a   : > { %5496 = vmatmul.mubr.f32.gmra.mxu1 %v12144_v54  ;;  %6120 = vmatprep.subr.mxu1 %v14273_v30  ;;  %v14982_v54 = vand.u32 4294901760, %v12327_v40  ;;  %14984 = vst [vmem:[#allocation171_spill] sm:$0xff] %v12388_v18 }
 0x61b   : > { %14979 = vst [vmem:[#allocation169_spill] sm:$0xff] %v12368_v31  ;;  %6122 = vmatpush2.msra.mxu1 %v14980_v4  ;;  %4958 = vmatprep.mubr.f32.mxu0 %v4957_v46  ;;  %v12386_v4 = vsub.f32 %v4567_v33, %v12360_v15  ;;  %v12400_v46 = vand.u32 4294901760, %v4572_v32  ;;  %v4574_v33 = vld [vmem:[%s13561_s2 + $0x198] sm:$0xff] }
 0x61c   : > { %6123 = vmatprep.subr.mxu1 %v14273_v30  ;;  %5501 = vmatprep.mubr.f32.mxu1 %v12169_v6  ;;  %v4992_v24 = vsub.f32 %v12327_v40, %v14982_v54  ;;  %v12398_v54 = vsub.f32 %v4570_v5, %v12368_v31  ;;  %v14989_v5 = vand.u32 4294901760, %v12358_v9  ;;  %v12417_v40 = vsub.f32 %v4569_v23, %v12388_v18  ;;  %v4576_v23 = vld [vmem:[%s13561_s2 + $0x1a8] sm:$0xff] }
 0x61d   : > { %6125 = vmatpush2.msra.mxu1 %v14981_v60  ;;  %4964 = vmatmul.mubr.f32.gmra.mxu0 %v4963_v45  ;;  %14983 = vst [vmem:[#allocation170_spill] sm:$0xff] %v12386_v4  ;;  %v14985_v45 = vand.u32 4294901760, %v12337_v42  ;;  %14987 = vst [vmem:[#allocation173_spill] sm:$0xff] %v12400_v46 }
 0x61e   : > { %5503 = vmatmul.mubr.f32.gmra.mxu1 %v12181_v21  ;;  %4973 = vmatprep.mubr.f32.mxu0 %v4972_v63  ;;  %14986 = vst [vmem:[#allocation172_spill] sm:$0xff] %v12398_v54  ;;  %v14988_v63 = vand.u32 4294901760, %v12352_v14  ;;  %v12410_v21 = vand.u32 4294901760, %v4571_v11  ;;  %14990 = vst [vmem:[#allocation174_spill] sm:$0xff] %v12417_v40 }
 0x61f   : > { %v5001_v6 = vsub.f32 %v12337_v42, %v14985_v45  ;;  %5508 = vmatprep.mubr.f32.mxu1 %v12185_v0  ;;  %6864 = vmatprep.subr.mxu1 %v14273_v30  ;;  %v4993_v45 = vand.u32 4294901760, %v4992_v24  ;;  %v5016_v42 = vsub.f32 %v12358_v9, %v14989_v5  ;;  %v14177_v0 = vand.u32 4294901760, %v12386_v4  ;;  %v4573_v24 = vld [vmem:[%s13561_s2 + $0x190] sm:$0xff] }
 0x620   : > { %v5007_v56 = vsub.f32 %v12352_v14, %v14988_v63  ;;  %v12422_v63 = vsub.f32 %v4572_v32, %v12400_v46 }
 0x621   : > { %4979 = vmatmul.mubr.f32.gmra.mxu0 %v4978_v37  ;;  %v5002_v60 = vand.u32 4294901760, %v5001_v6  ;;  %v12424_v37 = vand.u32 4294901760, %v4574_v33  ;;  %v12434_v6 = vsub.f32 %v4571_v11, %v12410_v21  ;;  %v5022_v32 = vsub.f32 %v12386_v4, %v14177_v0 }
 0x622   : > { %5510 = vmatmul.mubr.f32.gmra.mxu1 %v12208_v38  ;;  %4988 = vmatprep.mubr.f32.mxu0 %v4987_v17  ;;  %14991 = vst [vmem:[#allocation175_spill] sm:$0xff] %v12422_v63  ;;  %v5008_v5 = vand.u32 4294901760, %v5007_v56  ;;  %v5017_v17 = vand.u32 4294901760, %v5016_v42  ;;  %v12440_v38 = vand.u32 4294901760, %v4573_v24  ;;  %v14993_v11 = vand.u32 4294901760, %v12398_v54 }
 0x623   : > { %5515 = vmatprep.mubr.f32.mxu1 %v12223_v19  ;;  %14992 = vst [vmem:[#allocation176_spill] sm:$0xff] %v12434_v6  ;;  %v4575_v19 = vld [vmem:[%s13561_s2 + $0x1a0] sm:$0xff]  ;;  %v12453_v0 = vand.u32 4294901760, %v4576_v23  ;;  %v5023_v4 = vand.u32 4294901760, %v5022_v32 }
 0x624   : > { %v5031_v56 = vsub.f32 %v12398_v54, %v14993_v11  ;;  %v14995_v11 = vand.u32 4294901760, %v12417_v40  ;;  %v12468_v54 = vand.u32 4294901760, %v4578_v13 }
 0x625   : > { %4994 = vmatmul.mubr.f32.gmra.mxu0 %v4993_v45  ;;  %v12451_v45 = vsub.f32 %v4574_v33, %v12424_v37  ;;  %v12466_v33 = vsub.f32 %v4573_v24, %v12440_v38  ;;  %v12476_v32 = vsub.f32 %v4576_v23, %v12453_v0  ;;  %v4577_v24 = vld [vmem:[%s13561_s2 + $0x1b0] sm:$0xff] }
 0x626   : > { %5517 = vmatmul.mubr.f32.gmra.mxu1 %v12235_v57  ;;  %5003 = vmatprep.mubr.f32.mxu0 %v5002_v60  ;;  %v12460_v60 = vand.u32 4294901760, %v4575_v19  ;;  %v5037_v42 = vsub.f32 %v12417_v40, %v14995_v11  ;;  %v5032_v9 = vand.u32 4294901760, %v5031_v56  ;;  %v14999_v56 = vand.u32 4294901760, %v12434_v6 }
 0x627   : > { %14994 = vst [vmem:[#allocation177_spill] sm:$0xff] %v12451_v45  ;;  %5522 = vmatprep.mubr.f32.mxu1 %v12243_v53  ;;  %14996 = vst [vmem:[#allocation178_spill] sm:$0xff] %v12466_v33  ;;  %v14997_v53 = vand.u32 4294901760, %v12422_v63 }
 0x628   : > { %14998 = vst [vmem:[#allocation179_spill] sm:$0xff] %v12476_v32  ;;  %v5052_v11 = vsub.f32 %v12434_v6, %v14999_v56  ;;  %v5038_v23 = vand.u32 4294901760, %v5037_v42 }
 0x629   : > { %5009 = vmatmul.mubr.f32.gmra.mxu0 %v5008_v5  ;;  %v5046_v57 = vsub.f32 %v12422_v63, %v14997_v53  ;;  %v12489_v53 = vsub.f32 %v4575_v19, %v12460_v60  ;;  %v12495_v63 = vand.u32 4294901760, %v4577_v24  ;;  %v15001_v19 = vand.u32 4294901760, %v12451_v45 }
 0x62a   : > { %5524 = vmatmul.mubr.f32.gmra.mxu1 %v12258_v35  ;;  %5018 = vmatprep.mubr.f32.mxu0 %v5017_v17  ;;  %v4580_v17 = vld [vmem:[%s13561_s2 + $0x1c8] sm:$0xff]  ;;  %v12493_v35 = vsub.f32 %v4578_v13, %v12468_v54  ;;  %v4582_v13 = vld [vmem:[%s13561_s2 + $0x1d8] sm:$0xff] }
 0x62b   : > { %5529 = vmatprep.mubr.f32.mxu1 %v12276_v22  ;;  %v4579_v22 = vld [vmem:[%s13561_s2 + $0x1c0] sm:$0xff]  ;;  %v5047_v56 = vand.u32 4294901760, %v5046_v57  ;;  %v12505_v5 = vand.u32 4294901760, %v4580_v17  ;;  %v5053_v57 = vand.u32 4294901760, %v5052_v11  ;;  %v12528_v11 = vand.u32 4294901760, %v4582_v13 }
 0x62c   : > { %15000 = vst [vmem:[#allocation180_spill] sm:$0xff] %v12493_v35  ;;  %v12512_v40 = vand.u32 4294901760, %v4579_v22  ;;  %v14214_v42 = vand.u32 4294901760, %v12493_v35 }
 0x62d   : > { %5024 = vmatmul.mubr.f32.gmra.mxu0 %v5023_v4  ;;  %v5061_v4 = vsub.f32 %v12451_v45, %v15001_v19  ;;  %v15004_v45 = vand.u32 4294901760, %v12476_v32 }
 0x62e   : > { %5531 = vmatmul.mubr.f32.gmra.mxu1 %v12297_v44  ;;  %5033 = vmatprep.mubr.f32.mxu0 %v5032_v9  ;;  %v15002_v9 = vand.u32 4294901760, %v12466_v33  ;;  %v12519_v44 = vsub.f32 %v4577_v24, %v12495_v63  ;;  %v4584_v24 = vld [vmem:[%s13561_s2 + $0x1e8] sm:$0xff] }
 0x62f   : > { %5536 = vmatprep.mubr.f32.mxu1 %v12308_v20  ;;  %v5062_v20 = vand.u32 4294901760, %v5061_v4  ;;  %v5076_v6 = vsub.f32 %v12476_v32, %v15004_v45  ;;  %v12541_v45 = vsub.f32 %v4579_v22, %v12512_v40  ;;  %v12554_v22 = vand.u32 4294901760, %v4584_v24 }
 0x630   : > { %v5067_v19 = vsub.f32 %v12466_v33, %v15002_v9  ;;  %15003 = vst [vmem:[#allocation181_spill] sm:$0xff] %v12519_v44  ;;  %v4581_v9 = vld [vmem:[%s13561_s2 + $0x1d0] sm:$0xff]  ;;  %v14219_v32 = vand.u32 4294901760, %v12519_v44 }
 0x631   : > { %5039 = vmatmul.mubr.f32.gmra.mxu0 %v5038_v23  ;;  %v12526_v23 = vsub.f32 %v4580_v17, %v12505_v5  ;;  %v5077_v33 = vand.u32 4294901760, %v5076_v6 }
 0x632   : > { %5538 = vmatmul.mubr.f32.gmra.mxu1 %v12320_v28  ;;  %5048 = vmatprep.mubr.f32.mxu0 %v5047_v56  ;;  %v15006_v56 = vand.u32 4294901760, %v12489_v53  ;;  %v5068_v17 = vand.u32 4294901760, %v5067_v19  ;;  %v5091_v28 = vsub.f32 %v12493_v35, %v14214_v42  ;;  %v4586_v19 = vld [vmem:[%s13561_s2 + $0x1f8] sm:$0xff] }
 0x633   : > { %15005 = vst [vmem:[#allocation182_spill] sm:$0xff] %v12526_v23  ;;  %5543 = vmatprep.mubr.f32.mxu1 %v12329_v3  ;;  %v12547_v3 = vand.u32 4294901760, %v4581_v9 }
 0x634   : > { %v5082_v4 = vsub.f32 %v12489_v53, %v15006_v56  ;;  %v12552_v56 = vsub.f32 %v4582_v13, %v12528_v11  ;;  %v5092_v6 = vand.u32 4294901760, %v5091_v28  ;;  %v5097_v13 = vsub.f32 %v12519_v44, %v14219_v32 }
 0x635   : > { %5054 = vmatmul.mubr.f32.gmra.mxu0 %v5053_v57  ;;  %v4583_v57 = vld [vmem:[%s13561_s2 + $0x1e0] sm:$0xff]  ;;  %v12568_v14 = vsub.f32 %v4581_v9, %v12547_v3  ;;  %v12578_v28 = vsub.f32 %v4584_v24, %v12554_v22  ;;  %v4585_v9 = vld [vmem:[%s13561_s2 + $0x1f0] sm:$0xff]  ;;  %v15008_v32 = vand.u32 4294901760, %v12541_v45 }
 0x636   : > { %5545 = vmatmul.mubr.f32.gmra.mxu1 %v12360_v15  ;;  %5063 = vmatprep.mubr.f32.mxu0 %v5062_v20  ;;  %v5083_v42 = vand.u32 4294901760, %v5082_v4  ;;  %v12570_v15 = vand.u32 4294901760, %v4583_v57  ;;  %v12593_v24 = vand.u32 4294901760, %v4585_v9  ;;  %v15009_v44 = vand.u32 4294901760, %v12552_v56 }
 0x637   : > { %5550 = vmatprep.mubr.f32.mxu1 %v12368_v31  ;;  %v15007_v31 = vand.u32 4294901760, %v12526_v23  ;;  %v14230_v35 = vand.u32 4294901760, %v12578_v28 }
 0x638   : > { %v12591_v20 = vsub.f32 %v4583_v57, %v12570_v15 }
 0x639   : > { %5069 = vmatmul.mubr.f32.gmra.mxu0 %v5068_v17  ;;  %v5106_v4 = vsub.f32 %v12526_v23, %v15007_v31  ;;  %v12580_v17 = vand.u32 4294901760, %v4586_v19  ;;  %v5126_v31 = vand.u32 4294901760, %v12568_v14 }
 0x63a   : > { %5552 = vmatmul.mubr.f32.gmra.mxu1 %v12388_v18  ;;  %5078 = vmatprep.mubr.f32.mxu0 %v5077_v33  ;;  %v5112_v33 = vsub.f32 %v12541_v45, %v15008_v32  ;;  %v5098_v18 = vand.u32 4294901760, %v5097_v13  ;;  %v12609_v13 = vsub.f32 %v4585_v9, %v12593_v24 }
 0x63b   : > { %5557 = vmatprep.mubr.f32.mxu1 %v12400_v46  ;;  %v5107_v23 = vand.u32 4294901760, %v5106_v4  ;;  %v5121_v46 = vsub.f32 %v12552_v56, %v15009_v44  ;;  %v12601_v32 = vsub.f32 %v4586_v19, %v12580_v17  ;;  %v5127_v57 = vsub.f32 %v12568_v14, %v5126_v31 }
 0x63c   : > { %v5136_v19 = vsub.f32 %v12578_v28, %v14230_v35  ;;  %v5156_v9 = vand.u32 4294901760, %v12609_v13 }
 0x63d   : > { %5084 = vmatmul.mubr.f32.gmra.mxu0 %v5083_v42  ;;  %v5113_v42 = vand.u32 4294901760, %v5112_v33  ;;  %v5122_v44 = vand.u32 4294901760, %v5121_v46  ;;  %v5128_v4 = vand.u32 4294901760, %v5127_v57 }
 0x63e   : > { %5559 = vmatmul.mubr.f32.gmra.mxu1 %v12410_v21  ;;  %5093 = vmatprep.mubr.f32.mxu0 %v5092_v6  ;;  %v5141_v6 = vand.u32 4294901760, %v12591_v20  ;;  %v5137_v46 = vand.u32 4294901760, %v5136_v19  ;;  %v15010_v19 = vld [vmem:[#allocation96_spill] sm:$0xff] }
 0x63f   : > { %5564 = vmatprep.mubr.f32.mxu1 %v12424_v37 }
 0x640   : > { %v5142_v33 = vsub.f32 %v12591_v20, %v5141_v6 }
 0x641   : > { %5099 = vmatmul.mubr.f32.gmra.mxu0 %v5098_v18  ;;  %v5150_v18 = vand.u32 4294901760, %v12601_v32 }
 0x642   : > { %5566 = vmatmul.mubr.f32.gmra.mxu1 %v12440_v38  ;;  %5108 = vmatprep.mubr.f32.mxu0 %v5107_v23  ;;  %v5143_v35 = vand.u32 4294901760, %v5142_v33  ;;  %v15012_v33 = vand.u32 4294901760, %v11235_v25  ;;  %v15017_v25 = vld [vmem:[#allocation32_spill] sm:$0xff] }
 0x643   : > { %5571 = vmatprep.mubr.f32.mxu1 %v12453_v0  ;;  %v5151_v23 = vsub.f32 %v12601_v32, %v5150_v18 }
 0x645   : > { %5114 = vmatmul.mubr.f32.gmra.mxu0 %v5113_v42  ;;  %v5157_v42 = vsub.f32 %v12609_v13, %v5156_v9  ;;  %v5152_v57 = vand.u32 4294901760, %v5151_v23  ;;  %v15015_v23 = vld [vmem:[#allocation28_spill] sm:$0xff] }
 0x646   : > { %5573 = vmatmul.mubr.f32.gmra.mxu1 %v12460_v60  ;;  %5123 = vmatprep.mubr.f32.mxu0 %v5122_v44 }
 0x647   : > { %5578 = vmatprep.mubr.f32.mxu1 %v12468_v54  ;;  %v5158_v44 = vand.u32 4294901760, %v5157_v42  ;;  %v15016_v42 = vand.u32 4294901760, %v11222_v12  ;;  %v15022_v12 = vand.u32 4294901760, %v11248_v8  ;;  %v15026_v8 = vld [vmem:[#allocation38_spill] sm:$0xff] }
 0x649   : > { %5129 = vmatmul.mubr.f32.gmra.mxu0 %v5128_v4  ;;  %v15011_v4 = vld [vmem:[#allocation124_spill] sm:$0xff] }
 0x64a   : > { %5580 = vmatmul.mubr.f32.gmra.mxu1 %v12495_v63  ;;  %5138 = vmatprep.mubr.f32.mxu0 %v5137_v46  ;;  %v15014_v46 = vld [vmem:[#allocation23_spill] sm:$0xff] }
 0x64b   : > { %5585 = vmatprep.mubr.f32.mxu1 %v12505_v5 }
 0x64d   : > { %5144 = vmatmul.mubr.f32.gmra.mxu0 %v5143_v35  ;;  %v15013_v35 = vand.u32 4294901760, %v11244_v10  ;;  %v15019_v10 = vand.u32 4294901760, %v15010_v19 }
 0x64e   : > { %5587 = vmatmul.mubr.f32.gmra.mxu1 %v12512_v40  ;;  %5153 = vmatprep.mubr.f32.mxu0 %v5152_v57  ;;  %v15018_v57 = vand.u32 4294901760, %v11238_v16  ;;  %v15023_v16 = vand.u32 4294901760, %v11262_v58  ;;  %v15030_v58 = vld [vmem:[#allocation153_spill] sm:$0xff] }
 0x64f   : > { %5592 = vmatprep.mubr.f32.mxu1 %v12528_v11 }
 0x651   : > { %5159 = vmatmul.mubr.f32.gmra.mxu0 %v5158_v44  ;;  %v15020_v44 = vld [vmem:[#allocation34_spill] sm:$0xff] }
 0x652   : > { %5594 = vmatmul.mubr.f32.gmra.mxu1 %v12547_v3  ;;  %5743 = vmatprep.mubr.f32.mxu0 %v15010_v19  ;;  %v15024_v19 = vld [vmem:[#allocation33_spill] sm:$0xff] }
 0x653   : > { %5599 = vmatprep.mubr.f32.mxu1 %v12554_v22 }
 0x655   : > { %5746 = vmatmul.mubr.f32.vlgmr.msra.gmra.mxu0 %v15011_v4 }
 0x656   : > { %5601 = vmatmul.mubr.f32.gmra.mxu1 %v12570_v15  ;;  %6483 = vmatpush1.msra.mxu0 %v15012_v33  ;;  %v15021_v33 = vand.u32 4294901760, %v15011_v4  ;;  %v15028_v4 = vand.u32 4294901760, %v11275_v1  ;;  %v15032_v1 = vld [vmem:[#allocation29_spill] sm:$0xff] }
 0x657   : > { %6484 = vmatprep.subr.mxu0 %v14273_v30  ;;  %5606 = vmatprep.mubr.f32.mxu1 %v12580_v17 }
 0x658   : > { %6488 = vmatpush1.msra.mxu0 %v15013_v35  ;;  %5752 = vmatprep.mubr.f32.mxu0 %v15014_v46  ;;  %v15025_v35 = vand.u32 4294901760, %v15014_v46  ;;  %v15031_v46 = vand.u32 4294901760, %v15017_v25 }
 0x659   : > { %6489 = vmatprep.subr.mxu0 %v14273_v30  ;;  %5755 = vmatmul.mubr.f32.gmra.mxu0 %v15015_v23 }
 0x65a   : > { %5608 = vmatmul.mubr.f32.gmra.mxu1 %v12593_v24  ;;  %6493 = vmatpush1.msra.mxu0 %v15016_v42  ;;  %v15037_v42 = vand.u32 4294901760, %v15024_v19 }
 0x65b   : > { %6494 = vmatprep.subr.mxu0 %v14273_v30  ;;  %5761 = vmatprep.mubr.f32.mxu0 %v15017_v25  ;;  %v15040_v25 = vand.u32 4294901760, %v11330_v59  ;;  %v15044_v59 = vld [vmem:[#allocation63_spill] sm:$0xff] }
 0x65c   : > { %6498 = vmatpush1.msra.mxu0 %v15018_v57  ;;  %6129 = vmatprep.mubr.f32.mxu1 %v15019_v10  ;;  %v15043_v57 = vand.u32 4294901760, %v15030_v58  ;;  %v15046_v10 = vand.u32 4294901760, %v11357_v48  ;;  %v15051_v48 = vld [vmem:[#allocation69_spill] sm:$0xff] }
 0x65d   : > { %6499 = vmatprep.subr.mxu0 %v14273_v30  ;;  %5764 = vmatmul.mubr.f32.gmra.mxu0 %v15020_v44 }
 0x65e   : > { %6133 = vmatmul.mubr.f32.vlgmr.msra.gmra.mxu1 %v15021_v33  ;;  %6503 = vmatpush1.msra.mxu0 %v15022_v12  ;;  %v15049_v33 = vld [vmem:[#allocation68_spill] sm:$0xff] }
 0x65f   : > { %6866 = vmatpush1.msra.mxu1 %v11219_v51  ;;  %6504 = vmatprep.subr.mxu0 %v14273_v30  ;;  %v15027_v51 = vand.u32 4294901760, %v15015_v23  ;;  %v15034_v23 = vand.u32 4294901760, %v11305_v41  ;;  %v15038_v41 = vld [vmem:[#allocation54_spill] sm:$0xff] }
 0x660   : > { %6867 = vmatprep.subr.mxu1 %v14273_v30  ;;  %6508 = vmatpush1.msra.mxu0 %v15023_v16 }
 0x661   : > { %6869 = vmatpush1.msra.mxu1 %v11231_v43  ;;  %5770 = vmatprep.mubr.f32.mxu0 %v15024_v19  ;;  %v15029_v43 = vand.u32 4294901760, %v11290_v50  ;;  %v15036_v50 = vld [vmem:[#allocation45_spill] sm:$0xff]  ;;  %v15052_v19 = vand.u32 4294901760, %v15038_v41 }
 0x662   : > { %6140 = vmatprep.mubr.f32.mxu1 %v15025_v35  ;;  %6509 = vmatprep.subr.mxu0 %v14273_v30  ;;  %v15050_v16 = vand.u32 4294901760, %v15036_v50  ;;  %v15053_v35 = vld [vmem:[#allocation107_spill] sm:$0xff] }
 0x663   : > { %6870 = vmatprep.subr.mxu1 %v14273_v30  ;;  %5773 = vmatmul.mubr.f32.gmra.mxu0 %v15026_v8 }
 0x664   : > { %6144 = vmatmul.mubr.f32.gmra.mxu1 %v15027_v51  ;;  %6513 = vmatpush1.msra.mxu0 %v15028_v4  ;;  %v15056_v51 = vand.u32 4294901760, %v11398_v29  ;;  %v15060_v29 = vand.u32 4294901760, %v15044_v59 }
 0x665   : > { %6872 = vmatpush1.msra.mxu1 %v11201_v61  ;;  %6514 = vmatprep.subr.mxu0 %v14273_v30  ;;  %v15033_v61 = vand.u32 4294901760, %v15020_v44  ;;  %v15048_v44 = vand.u32 4294901760, %v11371_v27  ;;  %v15054_v27 = vand.u32 4294901760, %v15053_v35 }
 0x666   : > { %6873 = vmatprep.subr.mxu1 %v14273_v30  ;;  %6518 = vmatpush1.msra.mxu0 %v15029_v43 }
 0x667   : > { %6875 = vmatpush1.msra.mxu1 %v11215_v7  ;;  %5779 = vmatprep.mubr.f32.mxu0 %v15030_v58  ;;  %v15035_v7 = vand.u32 4294901760, %v11320_v36  ;;  %v15042_v36 = vld [vmem:[#allocation61_spill] sm:$0xff]  ;;  %v15057_v58 = vld [vmem:[#allocation74_spill] sm:$0xff] }
 0x668   : > { %6151 = vmatprep.mubr.f32.mxu1 %v15031_v46  ;;  %6519 = vmatprep.subr.mxu0 %v14273_v30  ;;  %v15058_v46 = vand.u32 4294901760, %v15042_v36 }
 0x669   : > { %6876 = vmatprep.subr.mxu1 %v14273_v30  ;;  %5782 = vmatmul.mubr.f32.gmra.mxu0 %v15032_v1 }
 0x66a   : > { %6155 = vmatmul.mubr.f32.gmra.mxu1 %v15033_v61  ;;  %6523 = vmatpush1.msra.mxu0 %v15034_v23 }
 0x66b   : > { %6878 = vmatpush1.msra.mxu1 %v11224_v2  ;;  %6524 = vmatprep.subr.mxu0 %v14273_v30  ;;  %v15039_v2 = vand.u32 4294901760, %v15026_v8 }
 0x66c   : > { %6879 = vmatprep.subr.mxu1 %v14273_v30  ;;  %6528 = vmatpush1.msra.mxu0 %v15035_v7  ;;  %v15061_v7 = vand.u32 4294901760, %v11488_v39  ;;  %v15066_v39 = vand.u32 4294901760, %v15049_v33 }
 0x66d   : > { %6881 = vmatpush1.msra.mxu1 %v11240_v55  ;;  %5788 = vmatprep.mubr.f32.mxu0 %v15036_v50  ;;  %v15041_v55 = vand.u32 4294901760, %v11343_v34  ;;  %v15047_v34 = vld [vmem:[#allocation11_spill] sm:$0xff]  ;;  %v15062_v50 = vld [vmem:[#allocation102_spill] sm:$0xff] }
 0x66e   : > { %6162 = vmatprep.mubr.f32.mxu1 %v15037_v42  ;;  %6529 = vmatprep.subr.mxu0 %v14273_v30 }
 0x66f   : > { %6882 = vmatprep.subr.mxu1 %v14273_v30  ;;  %5791 = vmatmul.mubr.f32.gmra.mxu0 %v15038_v41 }
 0x670   : > { %6166 = vmatmul.mubr.f32.gmra.mxu1 %v15039_v2  ;;  %6533 = vmatpush1.msra.mxu0 %v15040_v25  ;;  %v15063_v2 = vand.u32 4294901760, %v14898_v49  ;;  %v15069_v49 = vld [vmem:[#allocation18_spill] sm:$0xff] }
 0x671   : > { %6884 = vmatpush1.msra.mxu1 %v11251_v52  ;;  %6534 = vmatprep.subr.mxu0 %v14273_v30  ;;  %v15045_v52 = vand.u32 4294901760, %v15032_v1  ;;  %v15059_v1 = vld [vmem:[#allocation75_spill] sm:$0xff] }
 0x672   : > { %6885 = vmatprep.subr.mxu1 %v14273_v30  ;;  %6538 = vmatpush1.msra.mxu0 %v15041_v55  ;;  %v15064_v55 = vld [vmem:[#allocation10_spill] sm:$0xff] }
 0x673   : > { %6887 = vmatpush1.msra.mxu1 %v11264_v62  ;;  %5797 = vmatprep.mubr.f32.mxu0 %v15042_v36  ;;  %v15065_v36 = vld [vmem:[#allocation82_spill] sm:$0xff] }
 0x674   : > { %6173 = vmatprep.mubr.f32.mxu1 %v15043_v57  ;;  %6539 = vmatprep.subr.mxu0 %v14273_v30  ;;  %v15067_v57 = vld [vmem:[#allocation84_spill] sm:$0xff] }
 0x675   : > { %6888 = vmatprep.subr.mxu1 %v14273_v30  ;;  %5800 = vmatmul.mubr.f32.gmra.mxu0 %v15044_v59 }
 0x676   : > { %6177 = vmatmul.mubr.f32.gmra.mxu1 %v15045_v52  ;;  %6543 = vmatpush1.msra.mxu0 %v15046_v10  ;;  %v4695_v62 = vpop.f32.mrf.mxu0  ;;  %v15068_v10 = vand.u32 4294901760, %v15051_v48 }
 0x677   : > { %6890 = vmatpush1.msra.mxu1 %v15047_v34  ;;  %6544 = vmatprep.subr.mxu0 %v14273_v30  ;;  %v4696_v4 = vadd.f32 1e-05, %v4695_v62  ;;  %v15070_v34 = vand.u32 4294901760, %v15069_v49  ;;  %v15089_v49 = vld [vmem:[#allocation22_spill] sm:$0xff] }
 0x678   : > { %6891 = vmatprep.subr.mxu1 %v14273_v30  ;;  %6548 = vmatpush1.msra.mxu0 %v15048_v44  ;;  %v4697_v12 = vpop.f32.mrf.mxu0  ;;  %v15071_v44 = vld [vmem:[#allocation104_spill] sm:$0xff] }
 0x679   : > { %6893 = vmatpush1.msra.mxu1 %v14883_v26  ;;  %5806 = vmatprep.mubr.f32.mxu0 %v15049_v33  ;;  %v15055_v26 = vld [vmem:[#allocation100_spill] sm:$0xff] }
 0x67a   : > { %6184 = vmatprep.mubr.f32.mxu1 %v15050_v16  ;;  %6549 = vmatprep.subr.mxu0 %v14273_v30  ;;  %v15072_v16 = vld [vmem:[#allocation115_spill] sm:$0xff] }
 0x67b   : > { %6894 = vmatprep.subr.mxu1 %v14273_v30  ;;  %5809 = vmatmul.mubr.f32.gmra.mxu0 %v15051_v48  ;;  %v4710_v8 = vpop.f32.mrf.mxu0  ;;  %v15075_v48 = vld [vmem:[#allocation88_spill] sm:$0xff] }
 0x67c   : > { %6188 = vmatmul.mubr.f32.gmra.mxu1 %v15052_v19  ;;  %6553 = vmatpush1.msra.mxu0 %v15054_v27  ;;  %v4711_v25 = vadd.f32 1e-05, %v4710_v8  ;;  %v15073_v19 = vand.u32 4294901760, %v15072_v16  ;;  %v15074_v27 = vld [vmem:[#allocation14_spill] sm:$0xff]  ;;  %v15076_v8 = vand.u32 4294901760, %v15057_v58 }
 0x67d   : > { %6896 = vmatpush1.msra.mxu1 %v15055_v26  ;;  %6554 = vmatprep.subr.mxu0 %v14273_v30  ;;  %v4712_v43 = vpop.f32.mrf.mxu0  ;;  %v15077_v26 = vld [vmem:[#allocation92_spill] sm:$0xff] }
 0x67e   : > { %6897 = vmatprep.subr.mxu1 %v14273_v30  ;;  %6558 = vmatpush1.msra.mxu0 %v15056_v51  ;;  %v15078_v43 = vand.u32 4294901760, %v15059_v1 }
 0x67f   : > { %6899 = vmatpush1.msra.mxu1 %v11314_v47  ;;  %5815 = vmatprep.mubr.f32.mxu0 %v15057_v58 }
 0x680   : > { %6195 = vmatprep.mubr.f32.mxu1 %v15058_v46  ;;  %6559 = vmatprep.subr.mxu0 %v14273_v30  ;;  %v15079_v46 = vld [vmem:[#allocation116_spill] sm:$0xff] }
 0x681   : > { %6900 = vmatprep.subr.mxu1 %v14273_v30  ;;  %5818 = vmatmul.mubr.f32.gmra.mxu0 %v15059_v1  ;;  %v4725_v61 = vpop.f32.mrf.mxu0  ;;  %v5392_v23 = vpop.f32.mrf.mxu1  ;;  %v15085_v1 = vld [vmem:[#allocation97_spill] sm:$0xff] }
 0x682   : > { %6199 = vmatmul.mubr.f32.gmra.mxu1 %v15060_v29  ;;  %6563 = vmatpush2.msra.mxu0 %v15061_v7  ;;  %v12758_v47 = vadd.f32 %v5392_v23, %v4696_v4  ;;  %v4726_v35 = vadd.f32 1e-05, %v4725_v61  ;;  %v15080_v61 = vand.u32 4294901760, %v15079_v46  ;;  %v15081_v29 = vld [vmem:[#allocation111_spill] sm:$0xff]  ;;  %v15098_v46 = vand.u32 4294901760, %v15077_v26 }
 0x683   : > { %6902 = vmatpush1.msra.mxu1 %v15062_v50  ;;  %6564 = vmatprep.subr.mxu0 %v14273_v30  ;;  %v4727_v42 = vpop.f32.mrf.mxu0  ;;  %v5394_v41 = vpop.f32.mrf.mxu1  ;;  %v15082_v50 = vld [vmem:[#allocation118_spill] sm:$0xff] }
 0x684   : > { %6903 = vmatprep.subr.mxu1 %v14273_v30  ;;  %6568 = vmatpush2.msra.mxu0 %v15063_v2  ;;  %v15083_v42 = vand.u32 4294901760, %v15082_v50  ;;  %v15084_v2 = vld [vmem:[#allocation12_spill] sm:$0xff]  ;;  %v15102_v50 = vld [vmem:[#allocation129_spill] sm:$0xff] }
 0x685   : > { %6905 = vmatpush1.msra.mxu1 %v15064_v55  ;;  %5824 = vmatprep.mubr.f32.mxu0 %v15065_v36  ;;  %v15087_v55 = vld [vmem:[#allocation99_spill] sm:$0xff] }
 0x686   : > { %6206 = vmatprep.mubr.f32.mxu1 %v15066_v39  ;;  %6569 = vmatprep.subr.mxu0 %v14273_v30 }
 0x687   : > { %6906 = vmatprep.subr.mxu1 %v14273_v30  ;;  %5827 = vmatmul.mubr.f32.gmra.mxu0 %v15067_v57  ;;  %v4740_v59 = vpop.f32.mrf.mxu0  ;;  %v5399_v52 = vpop.f32.mrf.mxu1 }
 0x688   : > { %6210 = vmatmul.mubr.f32.gmra.mxu1 %v15068_v10  ;;  %6573 = vmatpush2.msra.mxu0 %v15070_v34  ;;  %v12776_v62 = vadd.f32 %v5399_v52, %v4711_v25  ;;  %v4741_v41 = vadd.f32 1e-05, %v4740_v59  ;;  %v15086_v25 = vand.u32 4294901760, %v15065_v36  ;;  %v15088_v10 = vand.u32 4294901760, %v15067_v57  ;;  %v15095_v57 = vld [vmem:[#allocation105_spill] sm:$0xff] }
 0x689   : > { %6908 = vmatpush1.msra.mxu1 %v15071_v44  ;;  %6574 = vmatprep.subr.mxu0 %v14273_v30  ;;  %v4742_v33 = vpop.f32.mrf.mxu0  ;;  %v5401_v12 = vpop.f32.mrf.mxu1  ;;  %v15090_v59 = vand.u32 4294901760, %v15089_v49  ;;  %v15091_v44 = vld [vmem:[#allocation109_spill] sm:$0xff] }
 0x68a   : > { %6909 = vmatprep.subr.mxu1 %v14273_v30  ;;  %6578 = vmatpush2.msra.mxu0 %v15073_v19  ;;  %v15092_v12 = vld [vmem:[#allocation122_spill] sm:$0xff] }
 0x68b   : > { %6911 = vmatpush1.msra.mxu1 %v15074_v27  ;;  %5833 = vmatprep.mubr.f32.mxu0 %v15075_v48  ;;  %v15093_v16 = vand.u32 4294901760, %v15092_v12  ;;  %v15096_v27 = vand.u32 4294901760, %v15075_v48 }
 0x68c   : > { %6217 = vmatprep.mubr.f32.mxu1 %v15076_v8  ;;  %6579 = vmatprep.subr.mxu0 %v14273_v30  ;;  %v15097_v8 = vld [vmem:[#allocation106_spill] sm:$0xff] }
 0x68d   : > { %6912 = vmatprep.subr.mxu1 %v14273_v30  ;;  %5836 = vmatmul.mubr.f32.gmra.mxu0 %v15077_v26  ;;  %v4755_v51 = vpop.f32.mrf.mxu0  ;;  %v5406_v4 = vpop.f32.mrf.mxu1  ;;  %v15105_v26 = vld [vmem:[#allocation113_spill] sm:$0xff] }
 0x68e   : > { %6221 = vmatmul.mubr.f32.gmra.mxu1 %v15078_v43  ;;  %6583 = vmatpush2.msra.mxu0 %v15080_v61  ;;  %v12794_v23 = vadd.f32 %v5406_v4, %v4726_v35  ;;  %v4756_v19 = vadd.f32 1e-05, %v4755_v51  ;;  %v15094_v35 = vld [vmem:[#allocation16_spill] sm:$0xff] }
 0x68f   : > { %6914 = vmatpush2.msra.mxu1 %v15081_v29  ;;  %6584 = vmatprep.subr.mxu0 %v14273_v30  ;;  %v4757_v58 = vpop.f32.mrf.mxu0  ;;  %v5408_v7 = vpop.f32.mrf.mxu1  ;;  %v15099_v61 = vld [vmem:[#allocation24_spill] sm:$0xff] }
 0x690   : > { %6915 = vmatprep.subr.mxu1 %v14273_v30  ;;  %6588 = vmatpush2.msra.mxu0 %v15083_v42  ;;  %v15100_v51 = vand.u32 4294901760, %v15099_v61  ;;  %v15101_v58 = vld [vmem:[#allocation13_spill] sm:$0xff]  ;;  %v15103_v42 = vand.u32 4294901760, %v15102_v50  ;;  %v15121_v50 = vld [vmem:[#allocation19_spill] sm:$0xff] }
 0x691   : > { %6917 = vmatpush2.msra.mxu1 %v15084_v2  ;;  %5842 = vmatprep.mubr.f32.mxu0 %v15085_v1  ;;  %v15104_v2 = vld [vmem:[#allocation15_spill] sm:$0xff] }
 0x692   : > { %6228 = vmatprep.mubr.f32.mxu1 %v15086_v25  ;;  %6589 = vmatprep.subr.mxu0 %v14273_v30  ;;  %v15106_v25 = vand.u32 4294901760, %v15085_v1 }
 0x693   : > { %6918 = vmatprep.subr.mxu1 %v14273_v30  ;;  %5845 = vmatmul.mubr.f32.gmra.mxu0 %v15087_v55  ;;  %v4770_v39 = vpop.f32.mrf.mxu0  ;;  %v5413_v52 = vpop.f32.mrf.mxu1 }
 0x694   : > { %6232 = vmatmul.mubr.f32.gmra.mxu1 %v15088_v10  ;;  %6593 = vmatpush2.msra.mxu0 %v15090_v59  ;;  %v12812_v34 = vadd.f32 %v5413_v52, %v4741_v41  ;;  %v4771_v41 = vadd.f32 1e-05, %v4770_v39  ;;  %v15107_v52 = vld [vmem:[#allocation114_spill] sm:$0xff]  ;;  %v15108_v59 = vand.u32 4294901760, %v15087_v55  ;;  %v15115_v55 = vld [vmem:[#allocation121_spill] sm:$0xff] }
 0x695   : > { %6920 = vmatpush2.msra.mxu1 %v15091_v44  ;;  %6594 = vmatprep.subr.mxu0 %v14273_v30  ;;  %v4772_v36 = vpop.f32.mrf.mxu0  ;;  %v5415_v33 = vpop.f32.mrf.mxu1  ;;  %v15109_v44 = vld [vmem:[#allocation131_spill] sm:$0xff] }
 0x696   : > { %6921 = vmatprep.subr.mxu1 %v14273_v30  ;;  %6598 = vmatpush2.msra.mxu0 %v15093_v16  ;;  %v15110_v39 = vand.u32 4294901760, %v15109_v44  ;;  %v15111_v33 = vld [vmem:[#allocation20_spill] sm:$0xff]  ;;  %v15112_v16 = vld [vmem:[#allocation138_spill] sm:$0xff] }
 0x697   : > { %6923 = vmatpush2.msra.mxu1 %v15094_v35  ;;  %5851 = vmatprep.mubr.f32.mxu0 %v15095_v57  ;;  %v15127_v44 = vld [vmem:[#allocation132_spill] sm:$0xff] }
 0x698   : > { %6239 = vmatprep.mubr.f32.mxu1 %v15096_v27  ;;  %6599 = vmatprep.subr.mxu0 %v14273_v30  ;;  %v15114_v27 = vld [vmem:[#allocation17_spill] sm:$0xff] }
 0x699   : > { %6924 = vmatprep.subr.mxu1 %v14273_v30  ;;  %5854 = vmatmul.mubr.f32.gmra.mxu0 %v15097_v8  ;;  %v4785_v4 = vpop.f32.mrf.mxu0  ;;  %v5420_v43 = vpop.f32.mrf.mxu1 }
 0x69a   : > { %6243 = vmatmul.mubr.f32.gmra.mxu1 %v15098_v46  ;;  %6603 = vmatpush2.msra.mxu0 %v15100_v51  ;;  %v12830_v29 = vadd.f32 %v5420_v43, %v4756_v19  ;;  %v15113_v19 = vand.u32 4294901760, %v15112_v16  ;;  %v4786_v35 = vadd.f32 1e-05, %v4785_v4  ;;  %v15116_v43 = vand.u32 4294901760, %v15095_v57  ;;  %v15117_v46 = vld [vmem:[#allocation123_spill] sm:$0xff] }
 0x69b   : > { %6926 = vmatpush2.msra.mxu1 %v15101_v58  ;;  %6604 = vmatprep.subr.mxu0 %v14273_v30  ;;  %v4787_v48 = vpop.f32.mrf.mxu0  ;;  %v5422_v7 = vpop.f32.mrf.mxu1  ;;  %v15118_v58 = vand.u32 4294901760, %v15097_v8  ;;  %v15125_v8 = vld [vmem:[#allocation128_spill] sm:$0xff] }
 0x69c   : > { %6927 = vmatprep.subr.mxu1 %v14273_v30  ;;  %6608 = vmatpush2.msra.mxu0 %v15103_v42  ;;  %v15119_v48 = vld [vmem:[#allocation140_spill] sm:$0xff] }
 0x69d   : > { %6929 = vmatpush2.msra.mxu1 %v15104_v2  ;;  %5860 = vmatprep.mubr.f32.mxu0 %v15105_v26  ;;  %v15120_v4 = vand.u32 4294901760, %v15119_v48  ;;  %v15136_v48 = vand.u32 4294901760, %v15115_v55 }
 0x69e   : > { %6250 = vmatprep.mubr.f32.mxu1 %v15106_v25  ;;  %6609 = vmatprep.subr.mxu0 %v14273_v30 }
 0x69f   : > { %6930 = vmatprep.subr.mxu1 %v14273_v30  ;;  %5863 = vmatmul.mubr.f32.gmra.mxu0 %v15107_v52  ;;  %v4800_v10 = vpop.f32.mrf.mxu0  ;;  %v5427_v49 = vpop.f32.mrf.mxu1 }
 0x6a0   : > { %6254 = vmatmul.mubr.f32.gmra.mxu1 %v15108_v59  ;;  %6613 = vmatpush2.msra.mxu0 %v15110_v39  ;;  %v12848_v36 = vadd.f32 %v5427_v49, %v4771_v41  ;;  %v15122_v41 = vld [vmem:[#allocation31_spill] sm:$0xff]  ;;  %v4801_v25 = vadd.f32 1e-05, %v4800_v10  ;;  %v15126_v59 = vand.u32 4294901760, %v15105_v26 }
 0x6a1   : > { %6932 = vmatpush2.msra.mxu1 %v15111_v33  ;;  %6614 = vmatprep.subr.mxu0 %v14273_v30  ;;  %v4802_v1 = vpop.f32.mrf.mxu0  ;;  %v5429_v12 = vpop.f32.mrf.mxu1  ;;  %v15123_v2 = vand.u32 4294901760, %v15122_v41  ;;  %v15124_v49 = vld [vmem:[#allocation127_spill] sm:$0xff]  ;;  %v15139_v41 = vld [vmem:[#allocation136_spill] sm:$0xff] }
 0x6a2   : > { %6933 = vmatprep.subr.mxu1 %v14273_v30  ;;  %6618 = vmatpush2.msra.mxu0 %v15113_v19  ;;  %v15128_v1 = vand.u32 4294901760, %v15107_v52  ;;  %v15129_v12 = vld [vmem:[#allocation149_spill] sm:$0xff]  ;;  %v15131_v19 = vld [vmem:[#allocation130_spill] sm:$0xff]  ;;  %v15135_v52 = vld [vmem:[#allocation139_spill] sm:$0xff] }
 0x6a3   : > { %6935 = vmatpush2.msra.mxu1 %v15114_v27  ;;  %5869 = vmatprep.mubr.f32.mxu0 %v15115_v55  ;;  %v15130_v10 = vand.u32 4294901760, %v15129_v12  ;;  %v15132_v27 = vld [vmem:[#allocation151_spill] sm:$0xff]  ;;  %v15141_v55 = vand.u32 4294901760, %v15125_v8  ;;  %v15145_v12 = vld [vmem:[#allocation156_spill] sm:$0xff] }
 0x6a4   : > { %6261 = vmatprep.mubr.f32.mxu1 %v15116_v43  ;;  %6619 = vmatprep.subr.mxu0 %v14273_v30  ;;  %v15133_v43 = vand.u32 4294901760, %v15132_v27  ;;  %v15149_v27 = vld [vmem:[#allocation158_spill] sm:$0xff] }
 0x6a5   : > { %6936 = vmatprep.subr.mxu1 %v14273_v30  ;;  %5872 = vmatmul.mubr.f32.gmra.mxu0 %v15117_v46  ;;  %v4815_v61 = vpop.f32.mrf.mxu0  ;;  %v5434_v51 = vpop.f32.mrf.mxu1 }
 0x6a6   : > { %6265 = vmatmul.mubr.f32.gmra.mxu1 %v15118_v58  ;;  %6623 = vmatpush2.msra.mxu0 %v15120_v4  ;;  %v12866_v7 = vadd.f32 %v5434_v51, %v4786_v35  ;;  %v4816_v51 = vadd.f32 1e-05, %v4815_v61  ;;  %v15134_v58 = vld [vmem:[#allocation25_spill] sm:$0xff] }
 0x6a7   : > { %6938 = vmatpush2.msra.mxu1 %v15121_v50  ;;  %6624 = vmatprep.subr.mxu0 %v14273_v30  ;;  %v4817_v57 = vpop.f32.mrf.mxu0  ;;  %v5436_v42 = vpop.f32.mrf.mxu1  ;;  %v15137_v4 = vld [vmem:[#allocation141_spill] sm:$0xff]  ;;  %v15138_v50 = vand.u32 4294901760, %v15117_v46  ;;  %v15143_v46 = vld [vmem:[#allocation148_spill] sm:$0xff] }
 0x6a8   : > { %6939 = vmatprep.subr.mxu1 %v14273_v30  ;;  %6628 = vmatpush2.msra.mxu0 %v15123_v2  ;;  %v15140_v2 = vld [vmem:[#allocation145_spill] sm:$0xff] }
 0x6a9   : > { %6941 = vmatpush2.msra.mxu1 %v15124_v49  ;;  %5878 = vmatprep.mubr.f32.mxu0 %v15125_v8 }
 0x6aa   : > { %6272 = vmatprep.mubr.f32.mxu1 %v15126_v59  ;;  %6629 = vmatprep.subr.mxu0 %v14273_v30  ;;  %v15142_v59 = vld [vmem:[#allocation142_spill] sm:$0xff] }
 0x6ab   : > { %6942 = vmatprep.subr.mxu1 %v14273_v30  ;;  %5881 = vmatmul.mubr.f32.gmra.mxu0 %v15127_v44  ;;  %v4830_v39 = vpop.f32.mrf.mxu0  ;;  %v5441_v33 = vpop.f32.mrf.mxu1 }
 0x6ac   : > { %6276 = vmatmul.mubr.f32.gmra.mxu1 %v15128_v1  ;;  %6633 = vmatpush2.msra.mxu0 %v15130_v10  ;;  %v12884_v16 = vadd.f32 %v5441_v33, %v4801_v25  ;;  %v4831_v33 = vadd.f32 1e-05, %v4830_v39  ;;  %v15144_v1 = vand.u32 4294901760, %v15127_v44  ;;  %v15146_v10 = vld [vmem:[#allocation144_spill] sm:$0xff]  ;;  %v15148_v39 = vld [vmem:[#allocation150_spill] sm:$0xff] }
 0x6ad   : > { %6944 = vmatpush2.msra.mxu1 %v15131_v19  ;;  %6634 = vmatprep.subr.mxu0 %v14273_v30  ;;  %v4832_v26 = vpop.f32.mrf.mxu0  ;;  %v5443_v35 = vpop.f32.mrf.mxu1  ;;  %v15147_v19 = vand.u32 4294901760, %v15135_v52 }
 0x6ae   : > { %6945 = vmatprep.subr.mxu1 %v14273_v30  ;;  %6638 = vmatpush2.msra.mxu0 %v15133_v43 }
 0x6af   : > { %6947 = vmatpush2.msra.mxu1 %v15134_v58  ;;  %5887 = vmatprep.mubr.f32.mxu0 %v15135_v52  ;;  %v15151_v58 = vld [vmem:[#allocation159_spill] sm:$0xff]  ;;  %v15152_v52 = vand.u32 4294901760, %v15140_v2 }
 0x6b0   : > { %6283 = vmatprep.mubr.f32.mxu1 %v15136_v48  ;;  %6948 = vmatprep.subr.mxu1 %v14273_v30 }
 0x6b1   : > { %5890 = vmatmul.mubr.f32.gmra.mxu0 %v15137_v4  ;;  %6287 = vmatmul.mubr.f32.gmra.mxu1 %v15138_v50  ;;  %v4845_v57 = vpop.f32.mrf.mxu0  ;;  %v5448_v42 = vpop.f32.mrf.mxu1  ;;  %v15153_v50 = vld [vmem:[#allocation98_spill] sm:$0xff] }
 0x6b2   : > { %6950 = vmatpush2.msra.mxu1 %v15139_v41  ;;  %5896 = vmatprep.mubr.f32.mxu0 %v15140_v2  ;;  %v12901_v61 = vadd.f32 %v5448_v42, %v4816_v51  ;;  %v15150_v51 = vand.u32 4294901760, %v15137_v4  ;;  %v4846_v48 = vadd.f32 1e-05, %v4845_v57  ;;  %v15154_v41 = vand.u32 4294901760, %v15143_v46 }
 0x6b3   : > { %6951 = vmatprep.subr.mxu1 %v14273_v30  ;;  %6294 = vmatprep.mubr.f32.mxu1 %v15141_v55  ;;  %v4847_v25 = vpop.f32.mrf.mxu0  ;;  %v5450_v49 = vpop.f32.mrf.mxu1  ;;  %v15155_v55 = vld [vmem:[#allocation160_spill] sm:$0xff]  ;;  %v15156_v4 = vand.u32 4294901760, %v15145_v12  ;;  %v15158_v2 = vand.u32 4294901760, %v15149_v27 }
 0x6b4   : > { %6953 = vmatpush2.msra.mxu1 %v15142_v59 }
 0x6b5   : > { %6954 = vmatprep.subr.mxu1 %v14273_v30  ;;  %5899 = vmatmul.mubr.f32.gmra.mxu0 %v15143_v46  ;;  %v15160_v46 = vand.u32 4294901760, %v15151_v58 }
 0x6b6   : > { %6298 = vmatmul.mubr.f32.gmra.mxu1 %v15144_v1  ;;  %5905 = vmatprep.mubr.f32.mxu0 %v15145_v12  ;;  %v15159_v1 = vld [vmem:[#allocation165_spill] sm:$0xff] }
 0x6b7   : > { %6956 = vmatpush2.msra.mxu1 %v15146_v10  ;;  %6305 = vmatprep.mubr.f32.mxu1 %v15147_v19  ;;  %v4860_v8 = vpop.f32.mrf.mxu0  ;;  %v5455_v26 = vpop.f32.mrf.mxu1 }
 0x6b8   : > { %6957 = vmatprep.subr.mxu1 %v14273_v30  ;;  %v12916_v35 = vadd.f32 %v5455_v26, %v4831_v33  ;;  %v4861_v57 = vadd.f32 1e-05, %v4860_v8  ;;  %v15157_v33 = vld [vmem:[#allocation163_spill] sm:$0xff]  ;;  %v15162_v8 = vand.u32 4294901760, %v15153_v50 }
 0x6b9   : > { %6959 = vmatpush2.msra.mxu1 %v15148_v39  ;;  %5908 = vmatmul.mubr.f32.gmra.mxu0 %v15149_v27  ;;  %v4862_v43 = vpop.f32.mrf.mxu0  ;;  %v5457_v44 = vpop.f32.mrf.mxu1  ;;  %v15161_v39 = vld [vmem:[#allocation166_spill] sm:$0xff] }
 0x6ba   : > { %6309 = vmatmul.mubr.f32.gmra.mxu1 %v15150_v51  ;;  %5914 = vmatprep.mubr.f32.mxu0 %v15151_v58  ;;  %v15163_v44 = vld [vmem:[#allocation167_spill] sm:$0xff]  ;;  %v15164_v51 = vand.u32 4294901760, %v15155_v55 }
 0x6bb   : > { %6316 = vmatprep.mubr.f32.mxu1 %v15152_v52 }
 0x6bd   : > { %5917 = vmatmul.mubr.f32.gmra.mxu0 %v15153_v50  ;;  %v4875_v30 = vpop.f32.mrf.mxu0  ;;  %v5462_v42 = vpop.f32.mrf.mxu1  ;;  %v15168_v50 = vand.u32 4294901760, %v15159_v1 }
 0x6be   : > { %6320 = vmatmul.mubr.f32.gmra.mxu1 %v15154_v41  ;;  %5923 = vmatprep.mubr.f32.mxu0 %v15155_v55  ;;  %v12929_v25 = vadd.f32 %v5462_v42, %v4846_v48  ;;  %v4876_v27 = vadd.f32 1e-05, %v4875_v30  ;;  %v15165_v48 = vld [vmem:[#allocation170_spill] sm:$0xff]  ;;  %v15166_v42 = vand.u32 4294901760, %v15157_v33  ;;  %v15167_v41 = vld [vmem:[#allocation172_spill] sm:$0xff]  ;;  %v15170_v55 = vand.u32 4294901760, %v15161_v39 }
 0x6bf   : > { %6327 = vmatprep.mubr.f32.mxu1 %v15156_v4  ;;  %v4877_v49 = vpop.f32.mrf.mxu0  ;;  %v5464_v59 = vpop.f32.mrf.mxu1 }
 0x6c1   : > { %5926 = vmatmul.mubr.f32.gmra.mxu0 %v15157_v33  ;;  %v15172_v33 = vand.u32 4294901760, %v15163_v44 }
 0x6c2   : > { %6331 = vmatmul.mubr.f32.gmra.mxu1 %v15158_v2  ;;  %5932 = vmatprep.mubr.f32.mxu0 %v15159_v1  ;;  %v15171_v2 = vld [vmem:[#allocation175_spill] sm:$0xff] }
 0x6c3   : > { %6338 = vmatprep.mubr.f32.mxu1 %v15160_v46  ;;  %v4890_v10 = vpop.f32.mrf.mxu0  ;;  %v5469_v19 = vpop.f32.mrf.mxu1 }
 0x6c4   : > { %v12939_v26 = vadd.f32 %v5469_v19, %v4861_v57  ;;  %v4891_v30 = vadd.f32 1e-05, %v4890_v10  ;;  %v15169_v57 = vld [vmem:[#allocation174_spill] sm:$0xff]  ;;  %v15174_v10 = vand.u32 4294901760, %v15165_v48 }
 0x6c5   : > { %5935 = vmatmul.mubr.f32.gmra.mxu0 %v15161_v39  ;;  %v4892_v12 = vpop.f32.mrf.mxu0  ;;  %v5471_v43 = vpop.f32.mrf.mxu1 }
 0x6c6   : > { %6342 = vmatmul.mubr.f32.gmra.mxu1 %v15162_v8  ;;  %5941 = vmatprep.mubr.f32.mxu0 %v15163_v44  ;;  %v15173_v43 = vld [vmem:[#allocation176_spill] sm:$0xff] }
 0x6c7   : > { %6349 = vmatprep.mubr.f32.mxu1 %v15164_v51  ;;  %v15176_v51 = vand.u32 4294901760, %v15167_v41 }
 0x6c9   : > { %5944 = vmatmul.mubr.f32.gmra.mxu0 %v15165_v48  ;;  %v4905_v58 = vpop.f32.mrf.mxu0  ;;  %v5476_v52 = vpop.f32.mrf.mxu1  ;;  %v15180_v48 = vand.u32 4294901760, %v15171_v2 }
 0x6ca   : > { %6353 = vmatmul.mubr.f32.gmra.mxu1 %v15166_v42  ;;  %5950 = vmatprep.mubr.f32.mxu0 %v15167_v41  ;;  %v12951_v4 = vadd.f32 %v5476_v52, %v4876_v27  ;;  %v15175_v27 = vld [vmem:[#allocation177_spill] sm:$0xff]  ;;  %v4906_v39 = vadd.f32 1e-05, %v4905_v58  ;;  %v15177_v52 = vld [vmem:[#allocation178_spill] sm:$0xff] }
 0x6cb   : > { %6360 = vmatprep.mubr.f32.mxu1 %v15168_v50  ;;  %v4907_v49 = vpop.f32.mrf.mxu0  ;;  %v5478_v59 = vpop.f32.mrf.mxu1  ;;  %v15178_v50 = vand.u32 4294901760, %v15169_v57 }
 0x6cc   : > { %v15179_v49 = vld [vmem:[#allocation179_spill] sm:$0xff] }
 0x6cd   : > { %5953 = vmatmul.mubr.f32.gmra.mxu0 %v15169_v57 }
 0x6ce   : > { %6364 = vmatmul.mubr.f32.gmra.mxu1 %v15170_v55  ;;  %5959 = vmatprep.mubr.f32.mxu0 %v15171_v2 }
 0x6cf   : > { %6371 = vmatprep.mubr.f32.mxu1 %v15172_v33  ;;  %v4920_v46 = vpop.f32.mrf.mxu0  ;;  %v5483_v19 = vpop.f32.mrf.mxu1  ;;  %v15181_v33 = vand.u32 4294901760, %v15173_v43 }
 0x6d0   : > { %v12961_v12 = vadd.f32 %v5483_v19, %v4891_v30  ;;  %v4921_v30 = vadd.f32 1e-05, %v4920_v46  ;;  %v15182_v19 = vld [vmem:[#allocation180_spill] sm:$0xff]  ;;  %v15184_v46 = vld [vmem:[#allocation181_spill] sm:$0xff] }
 0x6d1   : > { %5962 = vmatmul.mubr.f32.gmra.mxu0 %v15173_v43  ;;  %v4922_v1 = vpop.f32.mrf.mxu0  ;;  %v5485_v8 = vpop.f32.mrf.mxu1 }
 0x6d2   : > { %6375 = vmatmul.mubr.f32.gmra.mxu1 %v15174_v10  ;;  %5968 = vmatprep.mubr.f32.mxu0 %v15175_v27  ;;  %v15183_v1 = vand.u32 4294901760, %v15175_v27 }
 0x6d3   : > { %6382 = vmatprep.mubr.f32.mxu1 %v15176_v51 }
 0x6d5   : > { %5971 = vmatmul.mubr.f32.gmra.mxu0 %v15177_v52  ;;  %v4935_v44 = vpop.f32.mrf.mxu0  ;;  %v5490_v42 = vpop.f32.mrf.mxu1 }
 0x6d6   : > { %6386 = vmatmul.mubr.f32.gmra.mxu1 %v15178_v50  ;;  %5977 = vmatprep.mubr.f32.mxu0 %v15179_v49  ;;  %v12973_v59 = vadd.f32 %v5490_v42, %v4906_v39  ;;  %v4936_v8 = vadd.f32 1e-05, %v4935_v44  ;;  %v15185_v42 = vand.u32 4294901760, %v15177_v52  ;;  %v15186_v50 = vld [vmem:[#allocation182_spill] sm:$0xff] }
 0x6d7   : > { %6393 = vmatprep.mubr.f32.mxu1 %v15180_v48  ;;  %v4937_v55 = vpop.f32.mrf.mxu0  ;;  %v5492_v58 = vpop.f32.mrf.mxu1  ;;  %v15187_v48 = vand.u32 4294901760, %v15179_v49 }
 0x6d9   : > { %5980 = vmatmul.mubr.f32.gmra.mxu0 %v12489_v53  ;;  %v4950_v41 = vpop.f32.mrf.mxu0 }
 0x6da   : > { %6397 = vmatmul.mubr.f32.gmra.mxu1 %v15181_v33  ;;  %5986 = vmatprep.mubr.f32.mxu0 %v15182_v19  ;;  %v5497_v57 = vpop.f32.mrf.mxu1  ;;  %v4951_v55 = vadd.f32 1e-05, %v4950_v41  ;;  %v15188_v33 = vand.u32 4294901760, %v12489_v53 }
 0x6db   : > { %6404 = vmatprep.mubr.f32.mxu1 %v15183_v1  ;;  %v12983_v10 = vadd.f32 %v5497_v57, %v4921_v30  ;;  %v4952_v2 = vpop.f32.mrf.mxu0  ;;  %v15189_v57 = vand.u32 4294901760, %v15182_v19 }
 0x6dc   : > { %v5499_v39 = vpop.f32.mrf.mxu1 }
 0x6dd   : > { %5989 = vmatmul.mubr.f32.gmra.mxu0 %v15184_v46  ;;  %v4965_v51 = vpop.f32.mrf.mxu0  ;;  %v15190_v39 = vand.u32 4294901760, %v15184_v46 }
 0x6de   : > { %6408 = vmatmul.mubr.f32.gmra.mxu1 %v15185_v42  ;;  %5995 = vmatprep.mubr.f32.mxu0 %v15186_v50  ;;  %v5504_v43 = vpop.f32.mrf.mxu1  ;;  %v4966_v1 = vadd.f32 1e-05, %v4965_v51  ;;  %v15191_v42 = vand.u32 4294901760, %v15186_v50 }
 0x6df   : > { %6415 = vmatprep.mubr.f32.mxu1 %v15187_v48  ;;  %v12991_v27 = vadd.f32 %v5504_v43, %v4936_v8  ;;  %v4967_v44 = vpop.f32.mrf.mxu0 }
 0x6e0   : > { %v5506_v30 = vpop.f32.mrf.mxu1  ;;  %v15192_v44 = vand.u32 4294901760, %v12541_v45 }
 0x6e1   : > { %5998 = vmatmul.mubr.f32.gmra.mxu0 %v12541_v45  ;;  %v4980_v58 = vpop.f32.mrf.mxu0  ;;  %v15193_v30 = vand.u32 4294901760, %v12552_v56 }
 0x6e2   : > { %6419 = vmatmul.mubr.f32.gmra.mxu1 %v15188_v33  ;;  %6004 = vmatprep.mubr.f32.mxu0 %v12552_v56  ;;  %v5511_v52 = vpop.f32.mrf.mxu1  ;;  %v4981_v43 = vadd.f32 1e-05, %v4980_v58 }
 0x6e3   : > { %6426 = vmatprep.mubr.f32.mxu1 %v15189_v57  ;;  %v12999_v49 = vadd.f32 %v5511_v52, %v4951_v55  ;;  %v4982_v41 = vpop.f32.mrf.mxu0 }
 0x6e4   : > { %v5513_v8 = vpop.f32.mrf.mxu1  ;;  %v15195_v41 = vand.u32 4294901760, %v12578_v28 }
 0x6e5   : > { %6007 = vmatmul.mubr.f32.gmra.mxu0 %v12568_v14  ;;  %v4995_v2 = vpop.f32.mrf.mxu0 }
 0x6e6   : > { %6430 = vmatmul.mubr.f32.gmra.mxu1 %v15190_v39  ;;  %6013 = vmatprep.mubr.f32.mxu0 %v12578_v28  ;;  %v5518_v53 = vpop.f32.mrf.mxu1  ;;  %v4996_v33 = vadd.f32 1e-05, %v4995_v2 }
 0x6e7   : > { %6437 = vmatprep.mubr.f32.mxu1 %v15191_v42  ;;  %v13007_v19 = vadd.f32 %v5518_v53, %v4966_v1  ;;  %v4997_v51 = vpop.f32.mrf.mxu0  ;;  %v15194_v1 = vld [vmem:[#allocation95_spill] sm:$0xff]  ;;  %v15196_v53 = vld [vmem:[#allocation120_spill] sm:$0xff] }
 0x6e8   : > { %v5520_v48 = vpop.f32.mrf.mxu1 }
 0x6e9   : > { %6016 = vmatmul.mubr.f32.gmra.mxu0 %v12591_v20  ;;  %v5010_v55 = vpop.f32.mrf.mxu0 }
 0x6ea   : > { %6441 = vmatmul.mubr.f32.gmra.mxu1 %v15192_v44  ;;  %6022 = vmatprep.mubr.f32.mxu0 %v12601_v32  ;;  %v5525_v46 = vpop.f32.mrf.mxu1  ;;  %v5011_v8 = vadd.f32 1e-05, %v5010_v55  ;;  %v15198_v55 = vld [vmem:[#allocation26_spill] sm:$0xff] }
 0x6eb   : > { %6448 = vmatprep.mubr.f32.mxu1 %v15193_v30  ;;  %v13015_v50 = vadd.f32 %v5525_v46, %v4981_v43  ;;  %v5012_v58 = vpop.f32.mrf.mxu0  ;;  %v15197_v43 = vld [vmem:[#allocation21_spill] sm:$0xff]  ;;  %v15199_v46 = vld [vmem:[#allocation135_spill] sm:$0xff] }
 0x6ec   : > { %v5527_v52 = vpop.f32.mrf.mxu1 }
 0x6ed   : > { %6025 = vmatmul.mubr.f32.gmra.mxu0 %v12609_v13  ;;  %v5025_v57 = vpop.f32.mrf.mxu0  ;;  %v15201_v52 = vld [vmem:[#allocation147_spill] sm:$0xff] }
 0x6ee   : > { %6452 = vmatmul.mubr.f32.gmra.mxu1 %v5126_v31  ;;  %6640 = vmatprep.mubr.f32.mxu0 %v15194_v1  ;;  %v5532_v45 = vpop.f32.mrf.mxu1  ;;  %v5026_v31 = vadd.f32 1e-05, %v5025_v57 }
 0x6ef   : > { %6459 = vmatprep.mubr.f32.mxu1 %v15195_v41  ;;  %v13023_v56 = vadd.f32 %v5532_v45, %v4996_v33  ;;  %v5027_v2 = vpop.f32.mrf.mxu0  ;;  %v15200_v33 = vld [vmem:[#allocation30_spill] sm:$0xff]  ;;  %v15202_v41 = vld [vmem:[#allocation37_spill] sm:$0xff] }
 0x6f0   : > { %v5534_v39 = vpop.f32.mrf.mxu1  ;;  %v15203_v2 = vld [vmem:[#allocation152_spill] sm:$0xff] }
 0x6f1   : > { %6642 = vmatmul.mubr.f32.vlgmr.msra.gmra.mxu0 %v15196_v53  ;;  %v5040_v42 = vpop.f32.mrf.mxu0 }
 0x6f2   : > { %6463 = vmatmul.mubr.f32.gmra.mxu1 %v5141_v6  ;;  %6647 = vmatprep.mubr.f32.mxu0 %v15197_v43  ;;  %v5539_v14 = vpop.f32.mrf.mxu1  ;;  %v5041_v6 = vadd.f32 1e-05, %v5040_v42 }
 0x6f3   : > { %6470 = vmatprep.mubr.f32.mxu1 %v5150_v18  ;;  %v13031_v28 = vadd.f32 %v5539_v14, %v5011_v8  ;;  %v5042_v51 = vpop.f32.mrf.mxu0 }
 0x6f4   : > { %v5541_v48 = vpop.f32.mrf.mxu1 }
 0x6f5   : > { %6649 = vmatmul.mubr.f32.gmra.mxu0 %v15198_v55  ;;  %v5055_v44 = vpop.f32.mrf.mxu0  ;;  %v15205_v48 = vld [vmem:[#allocation43_spill] sm:$0xff] }
 0x6f6   : > { %6474 = vmatmul.mubr.f32.gmra.mxu1 %v5156_v9  ;;  %6654 = vmatprep.mubr.f32.mxu0 %v15199_v46  ;;  %v5546_v20 = vpop.f32.mrf.mxu1  ;;  %v5056_v13 = vadd.f32 1e-05, %v5055_v44 }
 0x6f7   : > { %6961 = vmatprep.mubr.f32.mxu1 %v15194_v1  ;;  %v13038_v30 = vadd.f32 %v5546_v20, %v5026_v31  ;;  %v5057_v32 = vpop.f32.mrf.mxu0  ;;  %v15204_v31 = vld [vmem:[#allocation27_spill] sm:$0xff] }
 0x6f8   : > { %v5548_v18 = vpop.f32.mrf.mxu1  ;;  %v15206_v32 = vld [vmem:[#allocation44_spill] sm:$0xff] }
 0x6f9   : > { %6656 = vmatmul.mubr.f32.gmra.mxu0 %v15200_v33  ;;  %v5070_v58 = vpop.f32.mrf.mxu0 }
 0x6fa   : > { %6963 = vmatmul.mubr.f32.vlgmr.msra.gmra.mxu1 %v15196_v53  ;;  %6661 = vmatprep.mubr.f32.mxu0 %v15201_v52  ;;  %v5553_v57 = vpop.f32.mrf.mxu1  ;;  %v5071_v53 = vadd.f32 1e-05, %v5070_v58  ;;  %v15207_v58 = vld [vmem:[#allocation55_spill] sm:$0xff] }
 0x6fb   : > { %6968 = vmatprep.mubr.f32.mxu1 %v15197_v43  ;;  %v13044_v9 = vadd.f32 %v5553_v57, %v5041_v6  ;;  %v5072_v45 = vpop.f32.mrf.mxu0 }
 0x6fc   : > { %v5555_v1 = vpop.f32.mrf.mxu1 }
 0x6fd   : > { %6663 = vmatmul.mubr.f32.gmra.mxu0 %v15202_v41  ;;  %v5085_v8 = vpop.f32.mrf.mxu0  ;;  %v15208_v1 = vld [vmem:[#allocation58_spill] sm:$0xff] }
 0x6fe   : > { %6970 = vmatmul.mubr.f32.gmra.mxu1 %v15198_v55  ;;  %6668 = vmatprep.mubr.f32.mxu0 %v15203_v2  ;;  %v5560_v39 = vpop.f32.mrf.mxu1  ;;  %v5086_v55 = vadd.f32 1e-05, %v5085_v8 }
 0x6ff   : > { %6975 = vmatprep.mubr.f32.mxu1 %v15199_v46  ;;  %v13050_v42 = vadd.f32 %v5560_v39, %v5056_v13  ;;  %v5087_v14 = vpop.f32.mrf.mxu0  ;;  %v15209_v39 = vld [vmem:[#allocation64_spill] sm:$0xff] }
 0x700   : > { %v5562_v43 = vpop.f32.mrf.mxu1 }
 0x701   : > { %6670 = vmatmul.mubr.f32.gmra.mxu0 %v15204_v31  ;;  %v5100_v51 = vpop.f32.mrf.mxu0 }
 0x702   : > { %6977 = vmatmul.mubr.f32.gmra.mxu1 %v15200_v33  ;;  %6675 = vmatprep.mubr.f32.mxu0 %v15205_v48  ;;  %v5567_v44 = vpop.f32.mrf.mxu1  ;;  %v5101_v33 = vadd.f32 1e-05, %v5100_v51  ;;  %v15210_v51 = vld [vmem:[#allocation66_spill] sm:$0xff] }
 0x703   : > { %6982 = vmatprep.mubr.f32.mxu1 %v15201_v52  ;;  %v13056_v20 = vadd.f32 %v5567_v44, %v5071_v53  ;;  %v5102_v6 = vpop.f32.mrf.mxu0 }
 0x704   : > { %v5569_v46 = vpop.f32.mrf.mxu1 }
 0x705   : > { %6677 = vmatmul.mubr.f32.gmra.mxu0 %v15206_v32  ;;  %v5115_v18 = vpop.f32.mrf.mxu0 }
 0x706   : > { %6984 = vmatmul.mubr.f32.gmra.mxu1 %v15202_v41  ;;  %6682 = vmatprep.mubr.f32.mxu0 %v15207_v58  ;;  %v5574_v57 = vpop.f32.mrf.mxu1  ;;  %v5116_v41 = vadd.f32 1e-05, %v5115_v18  ;;  %v15212_v18 = vld [vmem:[#allocation73_spill] sm:$0xff] }
 0x707   : > { %6989 = vmatprep.mubr.f32.mxu1 %v15203_v2  ;;  %v13062_v13 = vadd.f32 %v5574_v57, %v5086_v55  ;;  %v5117_v45 = vpop.f32.mrf.mxu0  ;;  %v15211_v55 = vld [vmem:[#allocation70_spill] sm:$0xff] }
 0x708   : > { %v5576_v52 = vpop.f32.mrf.mxu1  ;;  %v15213_v45 = vld [vmem:[#allocation78_spill] sm:$0xff] }
 0x709   : > { %6684 = vmatmul.mubr.f32.gmra.mxu0 %v15208_v1  ;;  %v5130_v8 = vpop.f32.mrf.mxu0 }
 0x70a   : > { %6991 = vmatmul.mubr.f32.gmra.mxu1 %v15204_v31  ;;  %6689 = vmatprep.mubr.f32.mxu0 %v15209_v39  ;;  %v5581_v53 = vpop.f32.mrf.mxu1  ;;  %v5131_v31 = vadd.f32 1e-05, %v5130_v8  ;;  %v15214_v8 = vld [vmem:[#allocation80_spill] sm:$0xff] }
 0x70b   : > { %6996 = vmatprep.mubr.f32.mxu1 %v15205_v48  ;;  %v13068_v14 = vadd.f32 %v5581_v53, %v5101_v33  ;;  %v5132_v43 = vpop.f32.mrf.mxu0 }
 0x70c   : > { %v5583_v2 = vpop.f32.mrf.mxu1 }
 0x70d   : > { %6691 = vmatmul.mubr.f32.gmra.mxu0 %v15210_v51  ;;  %v5145_v44 = vpop.f32.mrf.mxu0  ;;  %v15215_v2 = vld [vmem:[#allocation86_spill] sm:$0xff] }
 0x70e   : > { %6998 = vmatmul.mubr.f32.gmra.mxu1 %v15206_v32  ;;  %6696 = vmatprep.mubr.f32.mxu0 %v15211_v55  ;;  %v5588_v6 = vpop.f32.mrf.mxu1  ;;  %v5146_v32 = vadd.f32 1e-05, %v5145_v44 }
 0x70f   : > { %7003 = vmatprep.mubr.f32.mxu1 %v15207_v58  ;;  %v13074_v46 = vadd.f32 %v5588_v6, %v5116_v41  ;;  %v5147_v57 = vpop.f32.mrf.mxu0 }
 0x710   : > { %v5590_v48 = vpop.f32.mrf.mxu1 }
 0x711   : > { %6698 = vmatmul.mubr.f32.gmra.mxu0 %v15212_v18  ;;  %v5160_v33 = vpop.f32.mrf.mxu0 }
 0x712   : > { %7005 = vmatmul.mubr.f32.gmra.mxu1 %v15208_v1  ;;  %6703 = vmatprep.mubr.f32.mxu0 %v15213_v45  ;;  %v5595_v52 = vpop.f32.mrf.mxu1  ;;  %v5161_v57 = vadd.f32 1e-05, %v5160_v33 }
 0x713   : > { %7010 = vmatprep.mubr.f32.mxu1 %v15209_v39  ;;  %v13080_v53 = vadd.f32 %v5595_v52, %v5131_v31  ;;  %v5162_v43 = vpop.f32.mrf.mxu0  ;;  %v15216_v31 = vld [vmem:[#allocation87_spill] sm:$0xff] }
 0x714   : > { %v5597_v58 = vpop.f32.mrf.mxu1  ;;  %v15217_v43 = vld [vmem:[#allocation93_spill] sm:$0xff] }
 0x715   : > { %6705 = vmatmul.mubr.f32.gmra.mxu0 %v15214_v8  ;;  %v5747_v41 = vpop.f32.mrf.mxu0 }
 0x716   : > { %7012 = vmatmul.mubr.f32.gmra.mxu1 %v15210_v51  ;;  %6710 = vmatprep.mubr.f32.mxu0 %v15215_v2  ;;  %v5602_v6 = vpop.f32.mrf.mxu1  ;;  %v5748_v1 = vadd.f32 %v5747_v41, %v12758_v47 }
 0x717   : > { %7017 = vmatprep.mubr.f32.mxu1 %v15211_v55  ;;  %v13087_v48 = vadd.f32 %v5602_v6, %v5146_v32  ;;  %v5749_v39 = vpop.f32.mrf.mxu0  ;;  %v15218_v32 = vld [vmem:[#allocation94_spill] sm:$0xff]  ;;  %v15219_v6 = vld [vmem:[#allocation101_spill] sm:$0xff] }
 0x718   : > { %v5604_v44 = vpop.f32.mrf.mxu1 }
 0x719   : > { %6712 = vmatmul.mubr.f32.gmra.mxu0 %v15216_v31  ;;  %v5756_v52 = vpop.f32.mrf.mxu0 }
 0x71a   : > { %7019 = vmatmul.mubr.f32.gmra.mxu1 %v15212_v18  ;;  %6717 = vmatprep.mubr.f32.mxu0 %v15217_v43  ;;  %v5609_v51 = vpop.f32.mrf.mxu1  ;;  %v5757_v58 = vadd.f32 %v5756_v52, %v12776_v62  ;;  %v15221_v52 = vld [vmem:[#allocation108_spill] sm:$0xff] }
 0x71b   : > { %7024 = vmatprep.mubr.f32.mxu1 %v15213_v45  ;;  %v13094_v47 = vadd.f32 %v5609_v51, %v5161_v57  ;;  %v5758_v55 = vpop.f32.mrf.mxu0  ;;  %v15220_v57 = vld [vmem:[#allocation103_spill] sm:$0xff] }
 0x71c   : > { %v5611_v33 = vpop.f32.mrf.mxu1 }
 0x71d   : > { %6719 = vmatmul.mubr.f32.gmra.mxu0 %v15218_v32  ;;  %v5765_v41 = vpop.f32.mrf.mxu0 }
 0x71e   : > { %7026 = vmatmul.mubr.f32.gmra.mxu1 %v15214_v8  ;;  %6724 = vmatprep.mubr.f32.mxu0 %v15219_v6  ;;  %v5766_v18 = vadd.f32 %v5765_v41, %v12794_v23  ;;  %v6134_v39 = vpop.f32.mrf.mxu1  ;;  %v15222_v23 = vld [vmem:[#allocation112_spill] sm:$0xff] }
 0x71f   : > { %7031 = vmatprep.mubr.f32.mxu1 %v15215_v2  ;;  %v13101_v44 = vadd.f32 %v6134_v39, %v5748_v1  ;;  %v5767_v62 = vpop.f32.mrf.mxu0  ;;  %v15223_v1 = vld [vmem:[#allocation117_spill] sm:$0xff] }
 0x720   : > { %v6136_v45 = vpop.f32.mrf.mxu1 }
 0x721   : > { %6726 = vmatmul.mubr.f32.gmra.mxu0 %v15220_v57 }
 0x722   : > { %7033 = vmatmul.mubr.f32.gmra.mxu1 %v15216_v31  ;;  %6731 = vmatprep.mubr.f32.mxu0 %v15221_v52  ;;  %v15224_v31 = vld [vmem:[#allocation119_spill] sm:$0xff] }
 0x723   : > { %7038 = vmatprep.mubr.f32.mxu1 %v15217_v43  ;;  %v5774_v8 = vpop.f32.mrf.mxu0  ;;  %v15225_v43 = vld [vmem:[#allocation125_spill] sm:$0xff] }
 0x724   : > { %v5775_v51 = vadd.f32 %v5774_v8, %v12812_v34  ;;  %v6145_v55 = vpop.f32.mrf.mxu1  ;;  %v15226_v8 = vld [vmem:[#allocation126_spill] sm:$0xff] }
 0x725   : > { %6733 = vmatmul.mubr.f32.gmra.mxu0 %v15222_v23  ;;  %v13109_v33 = vadd.f32 %v6145_v55, %v5757_v58  ;;  %v5776_v2 = vpop.f32.mrf.mxu0 }
 0x726   : > { %7040 = vmatmul.mubr.f32.gmra.mxu1 %v15218_v32  ;;  %6738 = vmatprep.mubr.f32.mxu0 %v15223_v1  ;;  %v6147_v41 = vpop.f32.mrf.mxu1 }
 0x727   : > { %7045 = vmatprep.mubr.f32.mxu1 %v15219_v6  ;;  %v15227_v6 = vld [vmem:[#allocation133_spill] sm:$0xff] }
 0x729   : > { %6740 = vmatmul.mubr.f32.gmra.mxu0 %v15224_v31  ;;  %v5783_v39 = vpop.f32.mrf.mxu0 }
 0x72a   : > { %7047 = vmatmul.mubr.f32.gmra.mxu1 %v15220_v57  ;;  %6745 = vmatprep.mubr.f32.mxu0 %v15225_v43  ;;  %v5784_v34 = vadd.f32 %v5783_v39, %v12830_v29  ;;  %v6156_v62 = vpop.f32.mrf.mxu1  ;;  %v15228_v29 = vld [vmem:[#allocation134_spill] sm:$0xff] }
 0x72b   : > { %7052 = vmatprep.mubr.f32.mxu1 %v15221_v52  ;;  %v13119_v58 = vadd.f32 %v6156_v62, %v5766_v18  ;;  %v5785_v32 = vpop.f32.mrf.mxu0  ;;  %v15229_v52 = vld [vmem:[#allocation137_spill] sm:$0xff] }
 0x72c   : > { %v6158_v45 = vpop.f32.mrf.mxu1 }
 0x72d   : > { %6747 = vmatmul.mubr.f32.gmra.mxu0 %v15226_v8 }
 0x72e   : > { %7054 = vmatmul.mubr.f32.gmra.mxu1 %v15222_v23  ;;  %6752 = vmatprep.mubr.f32.mxu0 %v15227_v6  ;;  %v15230_v23 = vld [vmem:[#allocation143_spill] sm:$0xff] }
 0x72f   : > { %7059 = vmatprep.mubr.f32.mxu1 %v15223_v1  ;;  %v5792_v57 = vpop.f32.mrf.mxu0  ;;  %v15231_v1 = vld [vmem:[#allocation146_spill] sm:$0xff] }
 0x730   : > { %v5793_v55 = vadd.f32 %v5792_v57, %v12848_v36  ;;  %v6167_v2 = vpop.f32.mrf.mxu1  ;;  %v15232_v57 = vld [vmem:[#allocation154_spill] sm:$0xff] }
 0x731   : > { %6754 = vmatmul.mubr.f32.gmra.mxu0 %v15228_v29  ;;  %v13127_v41 = vadd.f32 %v6167_v2, %v5775_v51  ;;  %v5794_v18 = vpop.f32.mrf.mxu0 }
 0x732   : > { %7061 = vmatmul.mubr.f32.gmra.mxu1 %v15224_v31  ;;  %6759 = vmatprep.mubr.f32.mxu0 %v15229_v52  ;;  %v6169_v39 = vpop.f32.mrf.mxu1 }
 0x733   : > { %7066 = vmatprep.mubr.f32.mxu1 %v15225_v43  ;;  %v15233_v43 = vld [vmem:[#allocation155_spill] sm:$0xff] }
 0x735   : > { %6761 = vmatmul.mubr.f32.gmra.mxu0 %v15230_v23  ;;  %v5801_v62 = vpop.f32.mrf.mxu0 }
 0x736   : > { %7068 = vmatmul.mubr.f32.gmra.mxu1 %v15226_v8  ;;  %6766 = vmatprep.mubr.f32.mxu0 %v15231_v1  ;;  %v5802_v36 = vadd.f32 %v5801_v62, %v12866_v7  ;;  %v6178_v32 = vpop.f32.mrf.mxu1  ;;  %v15234_v7 = vld [vmem:[#allocation157_spill] sm:$0xff] }
 0x737   : > { %7073 = vmatprep.mubr.f32.mxu1 %v15227_v6  ;;  %v13137_v51 = vadd.f32 %v6178_v32, %v5784_v34  ;;  %v5803_v31 = vpop.f32.mrf.mxu0  ;;  %v15235_v6 = vld [vmem:[#allocation35_spill] sm:$0xff] }
 0x738   : > { %v6180_v45 = vpop.f32.mrf.mxu1 }
 0x739   : > { %6768 = vmatmul.mubr.f32.gmra.mxu0 %v15232_v57 }
 0x73a   : > { %7075 = vmatmul.mubr.f32.gmra.mxu1 %v15228_v29  ;;  %6773 = vmatprep.mubr.f32.mxu0 %v15233_v43  ;;  %v15236_v29 = vld [vmem:[#allocation110_spill] sm:$0xff] }
 0x73b   : > { %7080 = vmatprep.mubr.f32.mxu1 %v15229_v52  ;;  %v5810_v8 = vpop.f32.mrf.mxu0  ;;  %v15237_v52 = vld [vmem:[#allocation161_spill] sm:$0xff] }
 0x73c   : > { %v5811_v2 = vadd.f32 %v5810_v8, %v12884_v16  ;;  %v6189_v18 = vpop.f32.mrf.mxu1  ;;  %v15238_v8 = vld [vmem:[#allocation162_spill] sm:$0xff] }
 0x73d   : > { %6775 = vmatmul.mubr.f32.gmra.mxu0 %v15234_v7  ;;  %v13145_v39 = vadd.f32 %v6189_v18, %v5793_v55  ;;  %v5812_v34 = vpop.f32.mrf.mxu0 }
 0x73e   : > { %7082 = vmatmul.mubr.f32.gmra.mxu1 %v15230_v23  ;;  %6780 = vmatprep.mubr.f32.mxu0 %v15235_v6  ;;  %v6191_v62 = vpop.f32.mrf.mxu1 }
 0x73f   : > { %7087 = vmatprep.mubr.f32.mxu1 %v15231_v1  ;;  %v15239_v1 = vld [vmem:[#allocation164_spill] sm:$0xff] }
 0x741   : > { %6782 = vmatmul.mubr.f32.gmra.mxu0 %v15236_v29  ;;  %v5819_v32 = vpop.f32.mrf.mxu0 }
 0x742   : > { %7089 = vmatmul.mubr.f32.gmra.mxu1 %v15232_v57  ;;  %6787 = vmatprep.mubr.f32.mxu0 %v15237_v52  ;;  %v5820_v16 = vadd.f32 %v5819_v32, %v12901_v61  ;;  %v6200_v31 = vpop.f32.mrf.mxu1  ;;  %v15240_v61 = vld [vmem:[#allocation168_spill] sm:$0xff] }
 0x743   : > { %7094 = vmatprep.mubr.f32.mxu1 %v15233_v43  ;;  %v13155_v55 = vadd.f32 %v6200_v31, %v5802_v36  ;;  %v5821_v23 = vpop.f32.mrf.mxu0  ;;  %v15241_v43 = vld [vmem:[#allocation169_spill] sm:$0xff] }
 0x744   : > { %v6202_v45 = vpop.f32.mrf.mxu1 }
 0x745   : > { %6789 = vmatmul.mubr.f32.gmra.mxu0 %v15238_v8 }
 0x746   : > { %7096 = vmatmul.mubr.f32.gmra.mxu1 %v15234_v7  ;;  %6794 = vmatprep.mubr.f32.mxu0 %v15239_v1  ;;  %v15242_v7 = vld [vmem:[#allocation171_spill] sm:$0xff] }
 0x747   : > { %7101 = vmatprep.mubr.f32.mxu1 %v15235_v6  ;;  %v5828_v57 = vpop.f32.mrf.mxu0  ;;  %v15243_v6 = vld [vmem:[#allocation173_spill] sm:$0xff] }
 0x748   : > { %v5829_v18 = vadd.f32 %v5828_v57, %v12916_v35  ;;  %v6211_v34 = vpop.f32.mrf.mxu1 }
 0x749   : > { %6796 = vmatmul.mubr.f32.gmra.mxu0 %v15240_v61  ;;  %v13163_v62 = vadd.f32 %v6211_v34, %v5811_v2  ;;  %v5830_v36 = vpop.f32.mrf.mxu0 }
 0x74a   : > { %7103 = vmatmul.mubr.f32.gmra.mxu1 %v15236_v29  ;;  %6801 = vmatprep.mubr.f32.mxu0 %v15241_v43  ;;  %v6213_v32 = vpop.f32.mrf.mxu1 }
 0x74b   : > { %7108 = vmatprep.mubr.f32.mxu1 %v15237_v52 }
 0x74d   : > { %6803 = vmatmul.mubr.f32.gmra.mxu0 %v15242_v7  ;;  %v5837_v31 = vpop.f32.mrf.mxu0 }
 0x74e   : > { %7110 = vmatmul.mubr.f32.gmra.mxu1 %v15238_v8  ;;  %6808 = vmatprep.mubr.f32.mxu0 %v15243_v6  ;;  %v5838_v35 = vadd.f32 %v5837_v31, %v12929_v25  ;;  %v6222_v23 = vpop.f32.mrf.mxu1 }
 0x74f   : > { %7115 = vmatprep.mubr.f32.mxu1 %v15239_v1  ;;  %v13173_v2 = vadd.f32 %v6222_v23, %v5820_v16  ;;  %v5839_v29 = vpop.f32.mrf.mxu0 }
 0x750   : > { %v6224_v45 = vpop.f32.mrf.mxu1 }
 0x751   : > { %6810 = vmatmul.mubr.f32.gmra.mxu0 %v12410_v21 }
 0x752   : > { %7117 = vmatmul.mubr.f32.gmra.mxu1 %v15240_v61  ;;  %6815 = vmatprep.mubr.f32.mxu0 %v12424_v37 }
 0x753   : > { %7122 = vmatprep.mubr.f32.mxu1 %v15241_v43  ;;  %v5846_v52 = vpop.f32.mrf.mxu0 }
 0x754   : > { %v5847_v8 = vadd.f32 %v5846_v52, %v12939_v26  ;;  %v6233_v57 = vpop.f32.mrf.mxu1 }
 0x755   : > { %6817 = vmatmul.mubr.f32.gmra.mxu0 %v12440_v38  ;;  %v13181_v25 = vadd.f32 %v6233_v57, %v5829_v18  ;;  %v5848_v16 = vpop.f32.mrf.mxu0 }
 0x756   : > { %7124 = vmatmul.mubr.f32.gmra.mxu1 %v15242_v7  ;;  %6822 = vmatprep.mubr.f32.mxu0 %v12453_v0  ;;  %v6235_v1 = vpop.f32.mrf.mxu1 }
 0x757   : > { %7129 = vmatprep.mubr.f32.mxu1 %v15243_v6 }
 0x759   : > { %6824 = vmatmul.mubr.f32.gmra.mxu0 %v12460_v60  ;;  %v5855_v34 = vpop.f32.mrf.mxu0 }
 0x75a   : > { %7131 = vmatmul.mubr.f32.gmra.mxu1 %v12410_v21  ;;  %6829 = vmatprep.mubr.f32.mxu0 %v12468_v54  ;;  %v5856_v26 = vadd.f32 %v5855_v34, %v12951_v4  ;;  %v6244_v61 = vpop.f32.mrf.mxu1 }
 0x75b   : > { %7136 = vmatprep.mubr.f32.mxu1 %v12424_v37  ;;  %v13191_v18 = vadd.f32 %v6244_v61, %v5838_v35  ;;  %v5857_v36 = vpop.f32.mrf.mxu0 }
 0x75c   : > { %v6246_v43 = vpop.f32.mrf.mxu1 }
 0x75d   : > { %6831 = vmatmul.mubr.f32.gmra.mxu0 %v12495_v63 }
 0x75e   : > { %7138 = vmatmul.mubr.f32.gmra.mxu1 %v12440_v38  ;;  %6836 = vmatprep.mubr.f32.mxu0 %v12505_v5 }
 0x75f   : > { %7143 = vmatprep.mubr.f32.mxu1 %v12453_v0  ;;  %v5864_v21 = vpop.f32.mrf.mxu0 }
 0x760   : > { %v5865_v32 = vadd.f32 %v5864_v21, %v12961_v12  ;;  %v6255_v7 = vpop.f32.mrf.mxu1 }
 0x761   : > { %6838 = vmatmul.mubr.f32.gmra.mxu0 %v12512_v40  ;;  %v13199_v4 = vadd.f32 %v6255_v7, %v5847_v8  ;;  %v5866_v37 = vpop.f32.mrf.mxu0 }
 0x762   : > { %7145 = vmatmul.mubr.f32.gmra.mxu1 %v12460_v60  ;;  %6843 = vmatprep.mubr.f32.mxu0 %v12528_v11  ;;  %v6257_v31 = vpop.f32.mrf.mxu1 }
 0x763   : > { %7150 = vmatprep.mubr.f32.mxu1 %v12468_v54 }
 0x765   : > { %6845 = vmatmul.mubr.f32.gmra.mxu0 %v12547_v3  ;;  %v5873_v38 = vpop.f32.mrf.mxu0 }
 0x766   : > { %7152 = vmatmul.mubr.f32.gmra.mxu1 %v12495_v63  ;;  %6850 = vmatprep.mubr.f32.mxu0 %v12554_v22  ;;  %v5874_v0 = vadd.f32 %v5873_v38, %v12973_v59  ;;  %v6266_v12 = vpop.f32.mrf.mxu1 }
 0x767   : > { %7157 = vmatprep.mubr.f32.mxu1 %v12505_v5  ;;  %v13209_v6 = vadd.f32 %v6266_v12, %v5856_v26  ;;  %v5875_v60 = vpop.f32.mrf.mxu0 }
 0x768   : > { %v6268_v35 = vpop.f32.mrf.mxu1 }
 0x769   : > { %6852 = vmatmul.mubr.f32.gmra.mxu0 %v12570_v15 }
 0x76a   : > { %7159 = vmatmul.mubr.f32.gmra.mxu1 %v12512_v40  ;;  %6857 = vmatprep.mubr.f32.mxu0 %v12580_v17 }
 0x76b   : > { %7164 = vmatprep.mubr.f32.mxu1 %v12528_v11  ;;  %v5882_v54 = vpop.f32.mrf.mxu0 }
 0x76c   : > { %v5883_v63 = vadd.f32 %v5882_v54, %v12983_v10  ;;  %v6277_v23 = vpop.f32.mrf.mxu1 }
 0x76d   : > { %v13216_v59 = vadd.f32 %v6277_v23, %v5865_v32  ;;  %6859 = vmatmul.mubr.f32.gmra.mxu0 %v12593_v24  ;;  %v5884_v5 = vpop.f32.mrf.mxu0 }
 0x76e   : > { %7166 = vmatmul.mubr.f32.gmra.mxu1 %v12547_v3  ;;  %v6279_v29 = vpop.f32.mrf.mxu1 }
 0x76f   : > { %7171 = vmatprep.mubr.f32.mxu1 %v12554_v22 }
 0x771   : > { %v5891_v45 = vpop.f32.mrf.mxu0  ;;  %v6288_v40 = vpop.f32.mrf.mxu1 }
 0x772   : > { %v5892_v52 = vadd.f32 %v5891_v45, %v12991_v27  ;;  %v13222_v8 = vadd.f32 %v6288_v40, %v5874_v0  ;;  %7173 = vmatmul.mubr.f32.gmra.mxu1 %v12570_v15 }
 0x773   : > { %v5893_v11 = vpop.f32.mrf.mxu0  ;;  %v6290_v10 = vpop.f32.mrf.mxu1  ;;  %7178 = vmatprep.mubr.f32.mxu1 %v12580_v17 }
 0x775   : > { %v5900_v57 = vpop.f32.mrf.mxu0 }
 0x776   : > { %v5901_v16 = vadd.f32 %v5900_v57, %v12999_v49  ;;  %v6299_v1 = vpop.f32.mrf.mxu1  ;;  %7180 = vmatmul.mubr.f32.gmra.mxu1 %v12593_v24 }
 0x777   : > { %v13228_v3 = vadd.f32 %v6299_v1, %v5883_v63  ;;  %v5902_v22 = vpop.f32.mrf.mxu0 }
 0x778   : > { %v6301_v34 = vpop.f32.mrf.mxu1 }
 0x779   : > { %v5909_v26 = vpop.f32.mrf.mxu0 }
 0x77a   : > { %v5910_v27 = vadd.f32 %v5909_v26, %v13007_v19  ;;  %v6310_v61 = vpop.f32.mrf.mxu1 }
 0x77b   : > { %v13231_v36 = vadd.f32 %v6310_v61, %v5892_v52  ;;  %v5911_v15 = vpop.f32.mrf.mxu0 }
 0x77c   : > { %v6312_v43 = vpop.f32.mrf.mxu1 }
 0x77d   : > { %v5918_v21 = vpop.f32.mrf.mxu0 }
 0x77e   : > { %v5919_v17 = vadd.f32 %v5918_v21, %v13015_v50  ;;  %v6321_v32 = vpop.f32.mrf.mxu1 }
 0x77f   : > { %v13234_v49 = vadd.f32 %v6321_v32, %v5901_v16  ;;  %v5920_v7 = vpop.f32.mrf.mxu0 }
 0x780   : > { %v6323_v24 = vpop.f32.mrf.mxu1 }
 0x781   : > { %v5927_v37 = vpop.f32.mrf.mxu0 }
 0x782   : > { %v5928_v31 = vadd.f32 %v5927_v37, %v13023_v56  ;;  %v6332_v38 = vpop.f32.mrf.mxu1 }
 0x783   : > { %v13237_v0 = vadd.f32 %v6332_v38, %v5910_v27  ;;  %v5929_v19 = vpop.f32.mrf.mxu0 }
 0x784   : > { %v6334_v12 = vpop.f32.mrf.mxu1 }
 0x785   : > { %v5936_v60 = vpop.f32.mrf.mxu0 }
 0x786   : > { %v5937_v35 = vadd.f32 %v5936_v60, %v13031_v28  ;;  %v6343_v54 = vpop.f32.mrf.mxu1 }
 0x787   : > { %v13240_v63 = vadd.f32 %v6343_v54, %v5919_v17  ;;  %v5938_v50 = vpop.f32.mrf.mxu0 }
 0x788   : > { %v6345_v23 = vpop.f32.mrf.mxu1 }
 0x789   : > { %v5945_v5 = vpop.f32.mrf.mxu0 }
 0x78a   : > { %v5946_v29 = vadd.f32 %v5945_v5, %v13038_v30  ;;  %v6354_v45 = vpop.f32.mrf.mxu1 }
 0x78b   : > { %v13243_v40 = vadd.f32 %v6354_v45, %v5928_v31  ;;  %v5947_v56 = vpop.f32.mrf.mxu0 }
 0x78c   : > { %v6356_v52 = vpop.f32.mrf.mxu1 }
 0x78d   : > { %v5954_v11 = vpop.f32.mrf.mxu0 }
 0x78e   : > { %v5955_v10 = vadd.f32 %v5954_v11, %v13044_v9  ;;  %v6365_v57 = vpop.f32.mrf.mxu1 }
 0x78f   : > { %v13246_v16 = vadd.f32 %v6365_v57, %v5937_v35  ;;  %v5956_v28 = vpop.f32.mrf.mxu0 }
 0x790   : > { %v6367_v1 = vpop.f32.mrf.mxu1 }
 0x791   : > { %v5963_v22 = vpop.f32.mrf.mxu0 }
 0x792   : > { %v5964_v34 = vadd.f32 %v5963_v22, %v13050_v42  ;;  %v6376_v26 = vpop.f32.mrf.mxu1 }
 0x793   : > { %v13249_v27 = vadd.f32 %v6376_v26, %v5946_v29  ;;  %v5965_v30 = vpop.f32.mrf.mxu0 }
 0x794   : > { %v6378_v61 = vpop.f32.mrf.mxu1 }
 0x795   : > { %v5972_v15 = vpop.f32.mrf.mxu0 }
 0x796   : > { %v5973_v43 = vadd.f32 %v5972_v15, %v13056_v20  ;;  %v6387_v21 = vpop.f32.mrf.mxu1 }
 0x797   : > { %v13252_v17 = vadd.f32 %v6387_v21, %v5955_v10  ;;  %v5974_v9 = vpop.f32.mrf.mxu0 }
 0x798   : > { %v6389_v32 = vpop.f32.mrf.mxu1 }
 0x799   : > { %v5981_v7 = vpop.f32.mrf.mxu0 }
 0x79a   : > { %v5982_v24 = vadd.f32 %v5981_v7, %v13062_v13  ;;  %v6398_v37 = vpop.f32.mrf.mxu1 }
 0x79b   : > { %v13255_v31 = vadd.f32 %v6398_v37, %v5964_v34  ;;  %v5983_v42 = vpop.f32.mrf.mxu0 }
 0x79c   : > { %v6400_v38 = vpop.f32.mrf.mxu1 }
 0x79d   : > { %v5990_v19 = vpop.f32.mrf.mxu0 }
 0x79e   : > { %v5991_v12 = vadd.f32 %v5990_v19, %v13068_v14  ;;  %v6409_v60 = vpop.f32.mrf.mxu1 }
 0x79f   : > { %v13258_v35 = vadd.f32 %v6409_v60, %v5973_v43  ;;  %v5992_v20 = vpop.f32.mrf.mxu0 }
 0x7a0   : > { %v6411_v54 = vpop.f32.mrf.mxu1 }
 0x7a1   : > { %v5999_v50 = vpop.f32.mrf.mxu0 }
 0x7a2   : > { %v6000_v23 = vadd.f32 %v5999_v50, %v13074_v46  ;;  %v6420_v5 = vpop.f32.mrf.mxu1 }
 0x7a3   : > { %v13261_v29 = vadd.f32 %v6420_v5, %v5982_v24  ;;  %v6001_v13 = vpop.f32.mrf.mxu0 }
 0x7a4   : > { %v6422_v45 = vpop.f32.mrf.mxu1 }
 0x7a5   : > { %v6008_v56 = vpop.f32.mrf.mxu0 }
 0x7a6   : > { %v6009_v52 = vadd.f32 %v6008_v56, %v13080_v53  ;;  %v6431_v11 = vpop.f32.mrf.mxu1 }
 0x7a7   : > { %v13264_v10 = vadd.f32 %v6431_v11, %v5991_v12  ;;  %v6010_v14 = vpop.f32.mrf.mxu0 }
 0x7a8   : > { %v6433_v57 = vpop.f32.mrf.mxu1 }
 0x7a9   : > { %v6017_v28 = vpop.f32.mrf.mxu0 }
 0x7aa   : > { %v6018_v1 = vadd.f32 %v6017_v28, %v13087_v48  ;;  %v6442_v22 = vpop.f32.mrf.mxu1 }
 0x7ab   : > { %v13267_v34 = vadd.f32 %v6442_v22, %v6000_v23  ;;  %v6019_v46 = vpop.f32.mrf.mxu0 }
 0x7ac   : > { %v6444_v26 = vpop.f32.mrf.mxu1 }
 0x7ad   : > { %v6026_v30 = vpop.f32.mrf.mxu0 }
 0x7ae   : > { %v6027_v61 = vadd.f32 %v6026_v30, %v13094_v47  ;;  %v6453_v15 = vpop.f32.mrf.mxu1 }
 0x7af   : > { %v13270_v43 = vadd.f32 %v6453_v15, %v6009_v52  ;;  %v6028_v53 = vpop.f32.mrf.mxu0 }
 0x7b0   : > { %v6455_v21 = vpop.f32.mrf.mxu1  ;;  %v7217_v53 = vld [vmem:[%s8692_s9] sm:$0xff] }
 0x7b1   : > { %v6643_v9 = vpop.f32.mrf.mxu0 }
 0x7b2   : > { %v6464_v32 = vpop.f32.mrf.mxu1  ;;  %v6644_v60 = vadd.f32 %v6643_v9, %v13101_v44 }
 0x7b3   : > { %v13272_v7 = vadd.f32 %v6464_v32, %v6018_v1  ;;  %v6645_v24 = vpop.f32.mrf.mxu0 }
 0x7b4   : > { %v6466_v37 = vpop.f32.mrf.mxu1 }
 0x7b5   : > { %v6650_v48 = vpop.f32.mrf.mxu0 }
 0x7b6   : > { %v6475_v42 = vpop.f32.mrf.mxu1  ;;  %v6651_v5 = vadd.f32 %v6650_v48, %v13109_v33 }
 0x7b7   : > { %v13274_v38 = vadd.f32 %v6475_v42, %v6027_v61  ;;  %v6652_v19 = vpop.f32.mrf.mxu0  ;;  %v7218_v42 = vld [vmem:[%s8692_s9 + $0x8] sm:$0xff] }
 0x7b8   : > { %v6477_v12 = vpop.f32.mrf.mxu1 }
 0x7b9   : > { %v6657_v47 = vpop.f32.mrf.mxu0 }
 0x7ba   : > { %v6964_v20 = vpop.f32.mrf.mxu1  ;;  %v6658_v14 = vadd.f32 %v6657_v47, %v13119_v58 }
 0x7bb   : > { %v6965_v54 = vadd.f32 %v6964_v20, %v6644_v60  ;;  %v6659_v50 = vpop.f32.mrf.mxu0  ;;  %v15244_v20 = vld [vmem:[#allocation40_spill] sm:$0xff] }
 0x7bc   : > { %v6966_v23 = vpop.f32.mrf.mxu1 }
 0x7bd   : > { %8426 = vrsqrt.f32 %v6965_v54  ;;  %v6664_v13 = vpop.f32.mrf.mxu0 }
 0x7be   : > { %v6971_v45 = vpop.f32.mrf.mxu1  ;;  %v6665_v46 = vadd.f32 %v6664_v13, %v13127_v41  ;;  %v7219_v13 = vld [vmem:[%s8692_s9 + $0x10] sm:$0xff] }
 0x7bf   : > { %v6972_v56 = vadd.f32 %v6971_v45, %v6651_v5  ;;  %v6666_v52 = vpop.f32.mrf.mxu0  ;;  %v7281_v45 = vld [vmem:[%s8697_s18] sm:$0xff] }
 0x7c0   : > { %v6973_v11 = vpop.f32.mrf.mxu1 }
 0x7c1   : > { %8428 = vrsqrt.f32 %v6972_v56  ;;  %v6671_v57 = vpop.f32.mrf.mxu0 }
 0x7c2   : > { %v6978_v28 = vpop.f32.mrf.mxu1  ;;  %v6672_v21 = vadd.f32 %v6671_v57, %v13137_v51 }
 0x7c3   : > { %v6979_v44 = vadd.f32 %v6978_v28, %v6658_v14  ;;  %v6673_v1 = vpop.f32.mrf.mxu0 }
 0x7c4   : > { %v6980_v22 = vpop.f32.mrf.mxu1  ;;  %v15245_v1 = vld [vmem:[#allocation36_spill] sm:$0xff] }
 0x7c5   : > { %8430 = vrsqrt.f32 %v6979_v44  ;;  %v6678_v33 = vpop.f32.mrf.mxu0 }
 0x7c6   : > { %v6985_v26 = vpop.f32.mrf.mxu1  ;;  %v6679_v19 = vadd.f32 %v6678_v33, %v13145_v39  ;;  %v7282_v33 = vld [vmem:[%s8697_s18 + $0x8] sm:$0xff] }
 0x7c7   : > { %v6986_v30 = vadd.f32 %v6985_v26, %v6665_v46  ;;  %v6680_v61 = vpop.f32.mrf.mxu0  ;;  %v7283_v26 = vld [vmem:[%s8697_s18 + $0x10] sm:$0xff] }
 0x7c8   : > { %v6987_v15 = vpop.f32.mrf.mxu1 }
 0x7c9   : > { %8432 = vrsqrt.f32 %v6986_v30  ;;  %v6685_v58 = vpop.f32.mrf.mxu0  ;;  %v7220_v30 = vld [vmem:[%s8692_s9 + $0x18] sm:$0xff] }
 0x7ca   : > { %v8427_v9 = vpop.eup %8426  ;;  %v6992_v32 = vpop.f32.mrf.mxu1  ;;  %v6686_v56 = vadd.f32 %v6685_v58, %v13155_v55  ;;  %v15246_v55 = vld [vmem:[#allocation41_spill] sm:$0xff] }
 0x7cb   : > { %v6993_v24 = vadd.f32 %v6992_v32, %v6672_v21  ;;  %v6687_v37 = vpop.f32.mrf.mxu0  ;;  %v7249_v48 = vmul.f32 %v8427_v9, %v7217_v53 }
 0x7cc   : > { %v6994_v41 = vpop.f32.mrf.mxu1 }
 0x7cd   : > { %8434 = vrsqrt.f32 %v6993_v24  ;;  %7411 = vperm.xlu1 %8424, %v7249_v48   ;;  %v6692_v12 = vpop.f32.mrf.mxu0  ;;  %v7313_v51 = vmul.f32 %v7249_v48, %v15244_v20 }
 0x7ce   : > { %v8429_v60 = vpop.eup %8428  ;;  %v6999_v47 = vpop.f32.mrf.mxu1  ;;  %v6693_v61 = vadd.f32 %v6692_v12, %v13163_v62 }
 0x7cf   : > { %v7000_v54 = vadd.f32 %v6999_v47, %v6679_v19  ;;  %v6694_v50 = vpop.f32.mrf.mxu0  ;;  %v7250_v23 = vmul.f32 %v8429_v60, %v7218_v42  ;;  %v7345_v44 = vsub.f32 %v7281_v45, %v7313_v51  ;;  %v7221_v42 = vld [vmem:[%s8692_s9 + $0x20] sm:$0xff]  ;;  %v7222_v45 = vld [vmem:[%s8692_s9 + $0x28] sm:$0xff] }
 0x7d0   : > { %v7001_v5 = vpop.f32.mrf.mxu1 }
 0x7d1   : > { %8436 = vrsqrt.f32 %v7000_v54  ;;  %7416 = vperm.xlu0 %8425, %v7250_v23   ;;  %v6699_v39 = vpop.f32.mrf.mxu0  ;;  %v7314_v22 = vmul.f32 %v7250_v23, %v15245_v1  ;;  %v15247_v54 = vld [vmem:[#allocation39_spill] sm:$0xff] }
 0x7d2   : > { %v8431_v52 = vpop.eup %8430  ;;  %v7006_v11 = vpop.f32.mrf.mxu1  ;;  %v6700_v62 = vadd.f32 %v6699_v39, %v13173_v2  ;;  %v7284_v5 = vld [vmem:[%s8697_s18 + $0x18] sm:$0xff]  ;;  %v15248_v39 = vld [vmem:[#allocation46_spill] sm:$0xff] }
 0x7d3   : > { %v7007_v14 = vadd.f32 %v7006_v11, %v6686_v56  ;;  %v6701_v57 = vpop.f32.mrf.mxu0  ;;  %v7251_v28 = vmul.f32 %v8431_v52, %v7219_v13  ;;  %v7346_v24 = vsub.f32 %v7282_v33, %v7314_v22  ;;  %v7285_v13 = vld [vmem:[%s8697_s18 + $0x20] sm:$0xff]  ;;  %v7223_v33 = vld [vmem:[%s8692_s9 + $0x30] sm:$0xff] }
 0x7d4   : > { %v7008_v46 = vpop.f32.mrf.mxu1 }
 0x7d5   : > { %8438 = vrsqrt.f32 %v7007_v14  ;;  %v7315_v15 = vmul.f32 %v7251_v28, %v15246_v55  ;;  %7421 = vperm.xlu1 %8424, %v7251_v28   ;;  %7603 = vperm.xlu0 %8425, %v7345_v44   ;;  %v6706_v53 = vpop.f32.mrf.mxu0 }
 0x7d6   : > { %v8433_v21 = vpop.eup %8432  ;;  %v7013_v58 = vpop.f32.mrf.mxu1  ;;  %v6707_v56 = vadd.f32 %v6706_v53, %v13181_v25 }
 0x7d7   : > { %v7014_v9 = vadd.f32 %v7013_v58, %v6693_v61  ;;  %v6708_v32 = vpop.f32.mrf.mxu0  ;;  %v7347_v37 = vsub.f32 %v7283_v26, %v7315_v15  ;;  %v7252_v48 = vmul.f32 %v8433_v21, %v7220_v30  ;;  %v15249_v21 = vld [vmem:[#allocation42_spill] sm:$0xff] }
 0x7d8   : > { %v7015_v41 = vpop.f32.mrf.mxu1  ;;  %v7286_v32 = vld [vmem:[%s8697_s18 + $0x28] sm:$0xff] }
 0x7d9   : > { %8440 = vrsqrt.f32 %v7014_v9  ;;  %7608 = vperm.xlu1 %8424, %v7346_v24   ;;  %7613 = vperm.xlu0 %8425, %v7347_v37   ;;  %v6713_v19 = vpop.f32.mrf.mxu0  ;;  %v7316_v50 = vmul.f32 %v7252_v48, %v15247_v54  ;;  %v7287_v24 = vld [vmem:[%s8697_s18 + $0x30] sm:$0xff]  ;;  %v7224_v37 = vld [vmem:[%s8692_s9 + $0x38] sm:$0xff]  ;;  %v15250_v41 = vld [vmem:[#allocation49_spill] sm:$0xff] }
 0x7da   : > { %v8435_v12 = vpop.eup %8434  ;;  %v7020_v60 = vpop.f32.mrf.mxu1  ;;  %v6714_v25 = vadd.f32 %v6713_v19, %v13191_v18 }
 0x7db   : > { %v7021_v47 = vadd.f32 %v7020_v60, %v6700_v62  ;;  %v6715_v20 = vpop.f32.mrf.mxu0  ;;  %v7253_v51 = vmul.f32 %v8435_v12, %v7221_v42  ;;  %v7348_v44 = vsub.f32 %v7284_v5, %v7316_v50  ;;  %v7225_v50 = vld [vmem:[%s8692_s9 + $0x40] sm:$0xff] }
 0x7dc   : > { %v7022_v23 = vpop.f32.mrf.mxu1 }
 0x7dd   : > { %8442 = vrsqrt.f32 %v7021_v47  ;;  %7426 = vperm.xlu1 %8424, %v7252_v48   ;;  %7431 = vperm.xlu0 %8425, %v7253_v51   ;;  %v6720_v2 = vpop.f32.mrf.mxu0  ;;  %v7317_v52 = vmul.f32 %v7253_v51, %v15248_v39  ;;  %v15251_v39 = vld [vmem:[#allocation47_spill] sm:$0xff] }
 0x7de   : > { %v8437_v11 = vpop.eup %8436  ;;  %v7027_v14 = vpop.f32.mrf.mxu1  ;;  %v6721_v48 = vadd.f32 %v6720_v2, %v13199_v4 }
 0x7df   : > { %v7028_v57 = vadd.f32 %v7027_v14, %v6707_v56  ;;  %v6722_v28 = vpop.f32.mrf.mxu0  ;;  %v7349_v1 = vsub.f32 %v7285_v13, %v7317_v52  ;;  %v7254_v22 = vmul.f32 %v8437_v11, %v7222_v45  ;;  %v7288_v14 = vld [vmem:[%s8697_s18 + $0x38] sm:$0xff] }
 0x7e0   : > { %v7029_v46 = vpop.f32.mrf.mxu1  ;;  %v7226_v28 = vld [vmem:[%s8692_s9 + $0x48] sm:$0xff] }
 0x7e1   : > { %8444 = vrsqrt.f32 %v7028_v57  ;;  %7618 = vperm.xlu1 %8424, %v7348_v44   ;;  %7623 = vperm.xlu0 %8425, %v7349_v1   ;;  %v6727_v26 = vpop.f32.mrf.mxu0  ;;  %v7318_v58 = vmul.f32 %v7254_v22, %v15249_v21  ;;  %v7289_v57 = vld [vmem:[%s8697_s18 + $0x40] sm:$0xff] }
 0x7e2   : > { %v8439_v30 = vpop.eup %8438  ;;  %v7034_v61 = vpop.f32.mrf.mxu1  ;;  %v6728_v4 = vadd.f32 %v6727_v26, %v13209_v6  ;;  %v15252_v1 = vld [vmem:[#allocation56_spill] sm:$0xff] }
 0x7e3   : > { %v7035_v55 = vadd.f32 %v7034_v61, %v6714_v25  ;;  %v6729_v15 = vpop.f32.mrf.mxu0  ;;  %v7255_v53 = vmul.f32 %v8439_v30, %v7223_v33  ;;  %v7350_v47 = vsub.f32 %v7286_v32, %v7318_v58 }
 0x7e4   : > { %v7036_v9 = vpop.f32.mrf.mxu1 }
 0x7e5   : > { %8446 = vrsqrt.f32 %v7035_v55  ;;  %7436 = vperm.xlu1 %8424, %v7254_v22   ;;  %7441 = vperm.xlu0 %8425, %v7255_v53   ;;  %v6734_v18 = vpop.f32.mrf.mxu0  ;;  %v7319_v42 = vmul.f32 %v7255_v53, %v15250_v41  ;;  %v7227_v53 = vld [vmem:[%s8692_s9 + $0x50] sm:$0xff] }
 0x7e6   : > { %v8441_v62 = vpop.eup %8440  ;;  %v7041_v19 = vpop.f32.mrf.mxu1  ;;  %v6735_v44 = vadd.f32 %v6734_v18, %v13216_v59 }
 0x7e7   : > { %v7042_v12 = vadd.f32 %v7041_v19, %v6721_v48  ;;  %v6736_v60 = vpop.f32.mrf.mxu0  ;;  %v7351_v20 = vsub.f32 %v7287_v24, %v7319_v42  ;;  %v7256_v51 = vmul.f32 %v8441_v62, %v7224_v37  ;;  %v15253_v48 = vld [vmem:[#allocation57_spill] sm:$0xff]  ;;  %v7291_v62 = vld [vmem:[%s8697_s18 + $0x50] sm:$0xff]  ;;  %v7228_v19 = vld [vmem:[%s8692_s9 + $0x58] sm:$0xff] }
 0x7e8   : > { %v7043_v54 = vpop.f32.mrf.mxu1  ;;  %v7290_v42 = vld [vmem:[%s8697_s18 + $0x48] sm:$0xff]  ;;  %v15254_v60 = vld [vmem:[#allocation48_spill] sm:$0xff] }
 0x7e9   : > { %8448 = vrsqrt.f32 %v7042_v12  ;;  %7628 = vperm.xlu1 %8424, %v7350_v47   ;;  %7633 = vperm.xlu0 %8425, %v7351_v20   ;;  %v6741_v23 = vpop.f32.mrf.mxu0  ;;  %v7320_v52 = vmul.f32 %v7256_v51, %v15251_v39 }
 0x7ea   : > { %v8443_v5 = vpop.eup %8442  ;;  %v7048_v13 = vpop.f32.mrf.mxu1  ;;  %v6742_v59 = vadd.f32 %v6741_v23, %v13222_v8 }
 0x7eb   : > { %v7049_v45 = vadd.f32 %v7048_v13, %v6728_v4  ;;  %v6743_v56 = vpop.f32.mrf.mxu0  ;;  %v7257_v2 = vmul.f32 %v8443_v5, %v7225_v50  ;;  %v7352_v30 = vsub.f32 %v7288_v14, %v7320_v52 }
 0x7ec   : > { %v7050_v11 = vpop.f32.mrf.mxu1 }
 0x7ed   : > { %8450 = vrsqrt.f32 %v7049_v45  ;;  %7446 = vperm.xlu1 %8424, %v7256_v51   ;;  %7451 = vperm.xlu0 %8425, %v7257_v2   ;;  %v6748_v6 = vpop.f32.mrf.mxu0  ;;  %v7321_v22 = vmul.f32 %v7257_v2, %v15252_v1  ;;  %v7229_v45 = vld [vmem:[%s8692_s9 + $0x60] sm:$0xff] }
 0x7ee   : > { %v8445_v46 = vpop.eup %8444  ;;  %v7055_v33 = vpop.f32.mrf.mxu1  ;;  %v6749_v12 = vadd.f32 %v6748_v6, %v13228_v3  ;;  %v7292_v6 = vld [vmem:[%s8697_s18 + $0x58] sm:$0xff]  ;;  %v7293_v1 = vld [vmem:[%s8697_s18 + $0x60] sm:$0xff] }
 0x7ef   : > { %v7056_v25 = vadd.f32 %v7055_v33, %v6735_v44  ;;  %v6750_v26 = vpop.f32.mrf.mxu0  ;;  %v7353_v61 = vsub.f32 %v7289_v57, %v7321_v22  ;;  %v7258_v55 = vmul.f32 %v8445_v46, %v7226_v28  ;;  %v15255_v57 = vld [vmem:[#allocation51_spill] sm:$0xff]  ;;  %v7230_v22 = vld [vmem:[%s8692_s9 + $0x68] sm:$0xff] }
 0x7f0   : > { %v7057_v15 = vpop.f32.mrf.mxu1  ;;  %v15256_v33 = vld [vmem:[#allocation53_spill] sm:$0xff] }
 0x7f1   : > { %8452 = vrsqrt.f32 %v7056_v25  ;;  %7638 = vperm.xlu1 %8424, %v7352_v30   ;;  %7643 = vperm.xlu0 %8425, %v7353_v61   ;;  %v6755_v21 = vpop.f32.mrf.mxu0  ;;  %v7322_v18 = vmul.f32 %v7258_v55, %v15253_v48 }
 0x7f2   : > { %v8447_v58 = vpop.eup %8446  ;;  %v7062_v9 = vpop.f32.mrf.mxu1  ;;  %v6756_v3 = vadd.f32 %v6755_v21, %v13231_v36 }
 0x7f3   : > { %v7063_v32 = vadd.f32 %v7062_v9, %v6742_v59  ;;  %v6757_v24 = vpop.f32.mrf.mxu0  ;;  %v7259_v37 = vmul.f32 %v8447_v58, %v7227_v53  ;;  %v7354_v4 = vsub.f32 %v7290_v42, %v7322_v18  ;;  %v7231_v58 = vld [vmem:[%s8692_s9 + $0x70] sm:$0xff] }
 0x7f4   : > { %v7064_v41 = vpop.f32.mrf.mxu1 }
 0x7f5   : > { %8454 = vrsqrt.f32 %v7063_v32  ;;  %7456 = vperm.xlu1 %8424, %v7258_v55   ;;  %7461 = vperm.xlu0 %8425, %v7259_v37   ;;  %v6762_v8 = vpop.f32.mrf.mxu0  ;;  %v7323_v47 = vmul.f32 %v7259_v37, %v15254_v60  ;;  %v15257_v41 = vld [vmem:[#allocation50_spill] sm:$0xff] }
 0x7f6   : > { %v8449_v20 = vpop.eup %8448  ;;  %v7069_v51 = vpop.f32.mrf.mxu1  ;;  %v6763_v46 = vadd.f32 %v6762_v8, %v13234_v49  ;;  %v7232_v8 = vld [vmem:[%s8692_s9 + $0x78] sm:$0xff] }
 0x7f7   : > { %v7070_v54 = vadd.f32 %v7069_v51, %v6749_v12  ;;  %v6764_v50 = vpop.f32.mrf.mxu0  ;;  %v7355_v23 = vsub.f32 %v7291_v62, %v7323_v47  ;;  %v7260_v5 = vmul.f32 %v8449_v20, %v7228_v19  ;;  %v7294_v19 = vld [vmem:[%s8697_s18 + $0x68] sm:$0xff]  ;;  %v7295_v12 = vld [vmem:[%s8697_s18 + $0x70] sm:$0xff]  ;;  %v15258_v47 = vld [vmem:[#allocation59_spill] sm:$0xff] }
 0x7f8   : > { %v7071_v13 = vpop.f32.mrf.mxu1 }
 0x7f9   : > { %8456 = vrsqrt.f32 %v7070_v54  ;;  %7648 = vperm.xlu1 %8424, %v7354_v4   ;;  %7653 = vperm.xlu0 %8425, %v7355_v23   ;;  %v6769_v56 = vpop.f32.mrf.mxu0  ;;  %v7324_v28 = vmul.f32 %v7260_v5, %v15255_v57  ;;  %v15259_v57 = vld [vmem:[#allocation52_spill] sm:$0xff] }
 0x7fa   : > { %v8451_v2 = vpop.eup %8450  ;;  %v7076_v39 = vpop.f32.mrf.mxu1  ;;  %v6770_v49 = vadd.f32 %v6769_v56, %v13237_v0 }
 0x7fb   : > { %v7077_v52 = vadd.f32 %v7076_v39, %v6756_v3  ;;  %v6771_v11 = vpop.f32.mrf.mxu0  ;;  %v7261_v14 = vmul.f32 %v8451_v2, %v7229_v45  ;;  %v7356_v15 = vsub.f32 %v7292_v6, %v7324_v28  ;;  %v7233_v3 = vld [vmem:[%s8692_s9 + $0x80] sm:$0xff]  ;;  %v7296_v6 = vld [vmem:[%s8697_s18 + $0x78] sm:$0xff] }
 0x7fc   : > { %v7078_v44 = vpop.f32.mrf.mxu1 }
 0x7fd   : > { %8458 = vrsqrt.f32 %v7077_v52  ;;  %7466 = vperm.xlu1 %8424, %v7260_v5   ;;  %7471 = vperm.xlu0 %8425, %v7261_v14   ;;  %v6776_v36 = vpop.f32.mrf.mxu0  ;;  %v7325_v25 = vmul.f32 %v7261_v14, %v15256_v33 }
 0x7fe   : > { %v8453_v26 = vpop.eup %8452  ;;  %v7083_v30 = vpop.f32.mrf.mxu1  ;;  %v6777_v60 = vadd.f32 %v6776_v36, %v13240_v63  ;;  %v15260_v36 = vld [vmem:[#allocation60_spill] sm:$0xff] }
 0x7ff   : > { %v7084_v61 = vadd.f32 %v7083_v30, %v6763_v46  ;;  %v6778_v55 = vpop.f32.mrf.mxu0  ;;  %v7357_v53 = vsub.f32 %v7293_v1, %v7325_v25  ;;  %v7262_v59 = vmul.f32 %v8453_v26, %v7230_v22  ;;  %v7297_v1 = vld [vmem:[%s8697_s18 + $0x80] sm:$0xff]  ;;  %v7234_v22 = vld [vmem:[%s8692_s9 + $0x88] sm:$0xff] }
 0x800   : > { %v7085_v21 = vpop.f32.mrf.mxu1 }
 0x801   : > { %8460 = vrsqrt.f32 %v7084_v61  ;;  %7658 = vperm.xlu1 %8424, %v7356_v15   ;;  %7663 = vperm.xlu0 %8425, %v7357_v53   ;;  %v6783_v9 = vpop.f32.mrf.mxu0  ;;  %v7326_v42 = vmul.f32 %v7262_v59, %v15257_v41  ;;  %v7235_v21 = vld [vmem:[%s8692_s9 + $0x90] sm:$0xff] }
 0x802   : > { %v8455_v32 = vpop.eup %8454  ;;  %v7090_v24 = vpop.f32.mrf.mxu1  ;;  %v6784_v63 = vadd.f32 %v6783_v9, %v13243_v40 }
 0x803   : > { %v7091_v37 = vadd.f32 %v7090_v24, %v6770_v49  ;;  %v6785_v48 = vpop.f32.mrf.mxu0  ;;  %v7263_v18 = vmul.f32 %v8455_v32, %v7231_v58  ;;  %v7358_v23 = vsub.f32 %v7294_v19, %v7326_v42  ;;  %v7298_v42 = vld [vmem:[%s8697_s18 + $0x88] sm:$0xff]  ;;  %v7236_v19 = vld [vmem:[%s8692_s9 + $0x98] sm:$0xff] }
 0x804   : > { %v7092_v62 = vpop.f32.mrf.mxu1  ;;  %v15261_v48 = vld [vmem:[#allocation62_spill] sm:$0xff] }
 0x805   : > { %8462 = vrsqrt.f32 %v7091_v37  ;;  %7476 = vperm.xlu1 %8424, %v7262_v59   ;;  %7481 = vperm.xlu0 %8425, %v7263_v18   ;;  %v6790_v0 = vpop.f32.mrf.mxu0  ;;  %v7327_v20 = vmul.f32 %v7263_v18, %v15258_v47  ;;  %v7299_v62 = vld [vmem:[%s8697_s18 + $0x90] sm:$0xff] }
 0x806   : > { %v8457_v51 = vpop.eup %8456  ;;  %v7097_v54 = vpop.f32.mrf.mxu1  ;;  %v6791_v46 = vadd.f32 %v6790_v0, %v13246_v16 }
 0x807   : > { %v7098_v50 = vadd.f32 %v7097_v54, %v6777_v60  ;;  %v6792_v4 = vpop.f32.mrf.mxu0  ;;  %v7359_v5 = vsub.f32 %v7295_v12, %v7327_v20  ;;  %v7264_v13 = vmul.f32 %v8457_v51, %v7232_v8  ;;  %v15262_v8 = vld [vmem:[#allocation65_spill] sm:$0xff] }
 0x808   : > { %v7099_v45 = vpop.f32.mrf.mxu1 }
 0x809   : > { %8464 = vrsqrt.f32 %v7098_v50  ;;  %7668 = vperm.xlu1 %8424, %v7358_v23   ;;  %7673 = vperm.xlu0 %8425, %v7359_v5   ;;  %v6797_v56 = vpop.f32.mrf.mxu0  ;;  %v7328_v28 = vmul.f32 %v7264_v13, %v15259_v57  ;;  %v7237_v5 = vld [vmem:[%s8692_s9 + $0xa0] sm:$0xff] }
 0x80a   : > { %v8459_v2 = vpop.eup %8458  ;;  %v7104_v39 = vpop.f32.mrf.mxu1  ;;  %v6798_v16 = vadd.f32 %v6797_v56, %v13249_v27  ;;  %v7301_v57 = vld [vmem:[%s8697_s18 + $0xa0] sm:$0xff] }
 0x80b   : > { %v7105_v52 = vadd.f32 %v7104_v39, %v6784_v63  ;;  %v6799_v11 = vpop.f32.mrf.mxu0  ;;  %v7265_v14 = vmul.f32 %v8459_v2, %v7233_v3  ;;  %v7360_v55 = vsub.f32 %v7296_v6, %v7328_v28  ;;  %v15263_v39 = vld [vmem:[#allocation67_spill] sm:$0xff]  ;;  %v7238_v28 = vld [vmem:[%s8692_s9 + $0xa8] sm:$0xff] }
 0x80c   : > { %v7106_v44 = vpop.f32.mrf.mxu1  ;;  %v15264_v6 = vld [vmem:[#allocation71_spill] sm:$0xff] }
 0x80d   : > { %8466 = vrsqrt.f32 %v7105_v52  ;;  %7486 = vperm.xlu1 %8424, %v7264_v13   ;;  %7491 = vperm.xlu0 %8425, %v7265_v14   ;;  %v6804_v40 = vpop.f32.mrf.mxu0  ;;  %v7329_v33 = vmul.f32 %v7265_v14, %v15260_v36  ;;  %v7300_v14 = vld [vmem:[%s8697_s18 + $0x98] sm:$0xff] }
 0x80e   : > { %v8461_v25 = vpop.eup %8460  ;;  %v7111_v26 = vpop.f32.mrf.mxu1  ;;  %v6805_v12 = vadd.f32 %v6804_v40, %v13252_v17 }
 0x80f   : > { %v7112_v30 = vadd.f32 %v7111_v26, %v6791_v46  ;;  %v6806_v61 = vpop.f32.mrf.mxu0  ;;  %v7361_v15 = vsub.f32 %v7297_v1, %v7329_v33  ;;  %v7266_v53 = vmul.f32 %v8461_v25, %v7234_v22 }
 0x810   : > { %v7113_v59 = vpop.f32.mrf.mxu1  ;;  %v7239_v61 = vld [vmem:[%s8692_s9 + $0xb0] sm:$0xff] }
 0x811   : > { %8468 = vrsqrt.f32 %v7112_v30  ;;  %7678 = vperm.xlu1 %8424, %v7360_v55   ;;  %7683 = vperm.xlu0 %8425, %v7361_v15   ;;  %v6811_v58 = vpop.f32.mrf.mxu0  ;;  %v7330_v18 = vmul.f32 %v7266_v53, %v15261_v48 }
 0x812   : > { %v8463_v49 = vpop.eup %8462  ;;  %v7118_v9 = vpop.f32.mrf.mxu1  ;;  %v6812_v17 = vadd.f32 %v6811_v58, %v13255_v31  ;;  %v15265_v58 = vld [vmem:[#allocation72_spill] sm:$0xff] }
 0x813   : > { %v7119_v32 = vadd.f32 %v7118_v9, %v6798_v16  ;;  %v6813_v24 = vpop.f32.mrf.mxu0  ;;  %v7267_v37 = vmul.f32 %v8463_v49, %v7235_v21  ;;  %v7362_v54 = vsub.f32 %v7298_v42, %v7330_v18  ;;  %v15266_v18 = vld [vmem:[#allocation76_spill] sm:$0xff] }
 0x814   : > { %v7120_v41 = vpop.f32.mrf.mxu1  ;;  %v7303_v24 = vld [vmem:[%s8697_s18 + $0xb0] sm:$0xff] }
 0x815   : > { %8470 = vrsqrt.f32 %v7119_v32  ;;  %7496 = vperm.xlu1 %8424, %v7266_v53   ;;  %7501 = vperm.xlu0 %8425, %v7267_v37   ;;  %v6818_v27 = vpop.f32.mrf.mxu0  ;;  %v7331_v60 = vmul.f32 %v7267_v37, %v15262_v8  ;;  %v7302_v32 = vld [vmem:[%s8697_s18 + $0xa8] sm:$0xff]  ;;  %v7240_v37 = vld [vmem:[%s8692_s9 + $0xb8] sm:$0xff] }
 0x816   : > { %v8465_v0 = vpop.eup %8464  ;;  %v7125_v47 = vpop.f32.mrf.mxu1  ;;  %v6819_v44 = vadd.f32 %v6818_v27, %v13258_v35 }
 0x817   : > { %v7126_v20 = vadd.f32 %v7125_v47, %v6805_v12  ;;  %v6820_v51 = vpop.f32.mrf.mxu0  ;;  %v7363_v50 = vsub.f32 %v7299_v62, %v7331_v60  ;;  %v7268_v4 = vmul.f32 %v8465_v0, %v7236_v19  ;;  %v7241_v47 = vld [vmem:[%s8692_s9 + $0xc0] sm:$0xff] }
 0x818   : > { %v7127_v23 = vpop.f32.mrf.mxu1 }
 0x819   : > { %8472 = vrsqrt.f32 %v7126_v20  ;;  %7688 = vperm.xlu1 %8424, %v7362_v54   ;;  %7693 = vperm.xlu0 %8425, %v7363_v50   ;;  %v6825_v13 = vpop.f32.mrf.mxu0  ;;  %v7332_v52 = vmul.f32 %v7268_v4, %v15263_v39 }
 0x81a   : > { %v8467_v45 = vpop.eup %8466  ;;  %v7132_v3 = vpop.f32.mrf.mxu1  ;;  %v6826_v35 = vadd.f32 %v6825_v13, %v13261_v29 }
 0x81b   : > { %v7133_v63 = vadd.f32 %v7132_v3, %v6812_v17  ;;  %v6827_v56 = vpop.f32.mrf.mxu0  ;;  %v7269_v2 = vmul.f32 %v8467_v45, %v7237_v5  ;;  %v7364_v33 = vsub.f32 %v7300_v14, %v7332_v52  ;;  %v15267_v5 = vld [vmem:[#allocation77_spill] sm:$0xff]  ;;  %v7304_v45 = vld [vmem:[%s8697_s18 + $0xb8] sm:$0xff]  ;;  %v7305_v3 = vld [vmem:[%s8697_s18 + $0xc0] sm:$0xff] }
 0x81c   : > { %v7134_v11 = vpop.f32.mrf.mxu1 }
 0x81d   : > { %8474 = vrsqrt.f32 %v7133_v63  ;;  %7506 = vperm.xlu1 %8424, %v7268_v4   ;;  %7511 = vperm.xlu0 %8425, %v7269_v2   ;;  %v6832_v31 = vpop.f32.mrf.mxu0  ;;  %v7333_v1 = vmul.f32 %v7269_v2, %v15264_v6  ;;  %v7242_v63 = vld [vmem:[%s8692_s9 + $0xc8] sm:$0xff] }
 0x81e   : > { %v8469_v22 = vpop.eup %8468  ;;  %v7139_v46 = vpop.f32.mrf.mxu1  ;;  %v6833_v48 = vadd.f32 %v6832_v31, %v13264_v10  ;;  %v15268_v2 = vld [vmem:[#allocation9_spill] sm:$0xff] }
 0x81f   : > { %v7140_v40 = vadd.f32 %v7139_v46, %v6819_v44  ;;  %v6834_v36 = vpop.f32.mrf.mxu0  ;;  %v7365_v25 = vsub.f32 %v7301_v57, %v7333_v1  ;;  %v7270_v26 = vmul.f32 %v8469_v22, %v7238_v28  ;;  %v7243_v1 = vld [vmem:[%s8692_s9 + $0xd0] sm:$0xff] }
 0x820   : > { %v7141_v30 = vpop.f32.mrf.mxu1 }
 0x821   : > { %8476 = vrsqrt.f32 %v7140_v40  ;;  %7698 = vperm.xlu1 %8424, %v7364_v33   ;;  %7703 = vperm.xlu0 %8425, %v7365_v25   ;;  %v6839_v55 = vpop.f32.mrf.mxu0  ;;  %v7334_v49 = vmul.f32 %v7270_v26, %v15265_v58  ;;  %v15269_v33 = vld [vmem:[#allocation79_spill] sm:$0xff]  ;;  %v7306_v30 = vld [vmem:[%s8697_s18 + $0xc8] sm:$0xff] }
 0x822   : > { %v8471_v15 = vpop.eup %8470  ;;  %v7146_v53 = vpop.f32.mrf.mxu1  ;;  %v6840_v10 = vadd.f32 %v6839_v55, %v13267_v34 }
 0x823   : > { %v7147_v59 = vadd.f32 %v7146_v53, %v6826_v35  ;;  %v6841_v21 = vpop.f32.mrf.mxu0  ;;  %v7271_v16 = vmul.f32 %v8471_v15, %v7239_v61  ;;  %v7366_v27 = vsub.f32 %v7302_v32, %v7334_v49  ;;  %v7307_v61 = vld [vmem:[%s8697_s18 + $0xd0] sm:$0xff]  ;;  %v7244_v35 = vld [vmem:[%s8692_s9 + $0xd8] sm:$0xff] }
 0x824   : > { %v7148_v9 = vpop.f32.mrf.mxu1 }
 0x825   : > { %8478 = vrsqrt.f32 %v7147_v59  ;;  %7516 = vperm.xlu1 %8424, %v7270_v26   ;;  %7521 = vperm.xlu0 %8425, %v7271_v16   ;;  %v6846_v29 = vpop.f32.mrf.mxu0  ;;  %v7335_v41 = vmul.f32 %v7271_v16, %v15266_v18  ;;  %v7245_v9 = vld [vmem:[%s8692_s9 + $0xe0] sm:$0xff] }
 0x826   : > { %v8473_v42 = vpop.eup %8472  ;;  %v7153_v62 = vpop.f32.mrf.mxu1  ;;  %v6847_v56 = vadd.f32 %v6846_v29, %v13270_v43  ;;  %v7308_v29 = vld [vmem:[%s8697_s18 + $0xd8] sm:$0xff]  ;;  %v7309_v18 = vld [vmem:[%s8697_s18 + $0xe0] sm:$0xff] }
 0x827   : > { %v7154_v19 = vadd.f32 %v7153_v62, %v6833_v48  ;;  %v6848_v12 = vpop.f32.mrf.mxu0  ;;  %v7367_v8 = vsub.f32 %v7303_v24, %v7335_v41  ;;  %v7272_v60 = vmul.f32 %v8473_v42, %v7240_v37  ;;  %v15271_v37 = vld [vmem:[#allocation83_spill] sm:$0xff]  ;;  %v7246_v41 = vld [vmem:[%s8692_s9 + $0xe8] sm:$0xff] }
 0x828   : > { %v7155_v0 = vpop.f32.mrf.mxu1  ;;  %v15272_v42 = vld [vmem:[#allocation85_spill] sm:$0xff] }
 0x829   : > { %8480 = vrsqrt.f32 %v7154_v19  ;;  %7708 = vperm.xlu1 %8424, %v7366_v27   ;;  %7713 = vperm.xlu0 %8425, %v7367_v8   ;;  %v6853_v20 = vpop.f32.mrf.mxu0  ;;  %v7336_v17 = vmul.f32 %v7272_v60, %v15267_v5 }
 0x82a   : > { %v8475_v51 = vpop.eup %8474  ;;  %v7160_v54 = vpop.f32.mrf.mxu1  ;;  %v6854_v43 = vadd.f32 %v6853_v20, %v13272_v7  ;;  %v15270_v7 = vld [vmem:[#allocation81_spill] sm:$0xff] }
 0x82b   : > { %v7161_v50 = vadd.f32 %v7160_v54, %v6840_v10  ;;  %v6855_v4 = vpop.f32.mrf.mxu0  ;;  %v7273_v23 = vmul.f32 %v8475_v51, %v7241_v47  ;;  %v7368_v57 = vsub.f32 %v7304_v45, %v7336_v17  ;;  %v15273_v10 = vld [vmem:[#allocation89_spill] sm:$0xff]  ;;  %v7311_v54 = vld [vmem:[%s8697_s18 + $0xf0] sm:$0xff] }
 0x82c   : > { %v7162_v13 = vpop.f32.mrf.mxu1  ;;  %v7310_v51 = vld [vmem:[%s8697_s18 + $0xe8] sm:$0xff]  ;;  %v15274_v4 = vld [vmem:[#allocation90_spill] sm:$0xff] }
 0x82d   : > { %8482 = vrsqrt.f32 %v7161_v50  ;;  %7526 = vperm.xlu1 %8424, %v7272_v60   ;;  %7531 = vperm.xlu0 %8425, %v7273_v23   ;;  %v6860_v34 = vpop.f32.mrf.mxu0  ;;  %v7337_v39 = vmul.f32 %v7273_v23, %v15268_v2  ;;  %v7247_v60 = vld [vmem:[%s8692_s9 + $0xf0] sm:$0xff]  ;;  %v7248_v50 = vld [vmem:[%s8692_s9 + $0xf8] sm:$0xff] }
 0x82e   : > { %v8477_v52 = vpop.eup %8476  ;;  %v7167_v11 = vpop.f32.mrf.mxu1  ;;  %v6861_v55 = vadd.f32 %v6860_v34, %v13274_v38  ;;  %v8180_v34 = vld [vmem:[%s8703_s14 + $0x100] sm:$0xff] }
 0x82f   : > { %v7168_v14 = vadd.f32 %v7167_v11, %v6847_v56  ;;  %v7369_v28 = vsub.f32 %v7305_v3, %v7337_v39  ;;  %v7274_v44 = vmul.f32 %v8477_v52, %v7242_v63  ;;  %v6862_v31 = vpop.f32.mrf.mxu0  ;;  %v15275_v3 = vld [vmem:[#allocation91_spill] sm:$0xff]  ;;  %v7377_v56 = vld [vmem:[%s8703_s14] sm:$0xff] }
 0x830   : > { %v7169_v6 = vpop.f32.mrf.mxu1  ;;  %v7312_v52 = vld [vmem:[%s8697_s18 + $0xf8] sm:$0xff]  ;;  %v7379_v31 = vld [vmem:[%s8703_s14 + $0x10] sm:$0xff] }
 0x831   : > { %8484 = vrsqrt.f32 %v7168_v14  ;;  %7718 = vperm.xlu1 %8424, %v7368_v57   ;;  %7723 = vperm.xlu0 %8425, %v7369_v28   ;;  %v7338_v25 = vmul.f32 %v7274_v44, %v15269_v33  ;;  %v7378_v57 = vld [vmem:[%s8703_s14 + $0x8] sm:$0xff]  ;;  %v8182_v6 = vld [vmem:[%s8703_s14 + $0x110] sm:$0xff] }
 0x832   : > { %v8479_v22 = vpop.eup %8478  ;;  %v7174_v46 = vpop.f32.mrf.mxu1 }
 0x833   : > { %v7175_v40 = vadd.f32 %v7174_v46, %v6854_v43  ;;  %v7275_v36 = vmul.f32 %v8479_v22, %v7243_v1  ;;  %v7370_v16 = vsub.f32 %v7306_v30, %v7338_v25 }
 0x834   : > { %v7176_v26 = vpop.f32.mrf.mxu1 }
 0x835   : > { %8486 = vrsqrt.f32 %v7175_v40  ;;  %7536 = vperm.xlu1 %8424, %v7274_v44   ;;  %7541 = vperm.xlu0 %8425, %v7275_v36   ;;  %v7339_v15 = vmul.f32 %v7275_v36, %v15270_v7  ;;  %v8181_v44 = vld [vmem:[%s8703_s14 + $0x108] sm:$0xff] }
 0x836   : > { %v8481_v53 = vpop.eup %8480  ;;  %v7181_v59 = vpop.f32.mrf.mxu1 }
 0x837   : > { %v7182_v21 = vadd.f32 %v7181_v59, %v6861_v55  ;;  %v7371_v58 = vsub.f32 %v7307_v61, %v7339_v15  ;;  %v7276_v49 = vmul.f32 %v8481_v53, %v7244_v35  ;;  %v7380_v15 = vld [vmem:[%s8703_s14 + $0x18] sm:$0xff] }
 0x838   : > { %v7183_v32 = vpop.f32.mrf.mxu1  ;;  %v8183_v53 = vld [vmem:[%s8703_s14 + $0x118] sm:$0xff] }
 0x839   : > { %8488 = vrsqrt.f32 %v7182_v21  ;;  %7728 = vperm.xlu1 %8424, %v7370_v16   ;;  %7733 = vperm.xlu0 %8425, %v7371_v58   ;;  %v7340_v48 = vmul.f32 %v7276_v49, %v15271_v37  ;;  %v7381_v21 = vld [vmem:[%s8703_s14 + $0x20] sm:$0xff] }
 0x83a   : > { %v8483_v38 = vpop.eup %8482  ;;  %v8184_v16 = vld [vmem:[%s8703_s14 + $0x120] sm:$0xff] }
 0x83b   : > { %v7277_v24 = vmul.f32 %v8483_v38, %v7245_v9  ;;  %v7372_v12 = vsub.f32 %v7308_v29, %v7340_v48 }
 0x83d   : > { %7546 = vperm.xlu1 %8424, %v7276_v49   ;;  %7551 = vperm.xlu0 %8425, %v7277_v24   ;;  %v7341_v62 = vmul.f32 %v7277_v24, %v15272_v42  ;;  %v7382_v42 = vld [vmem:[%s8703_s14 + $0x28] sm:$0xff] }
 0x83e   : > { %v8485_v19 = vpop.eup %8484 }
 0x83f   : > { %v7373_v27 = vsub.f32 %v7309_v18, %v7341_v62  ;;  %v7278_v8 = vmul.f32 %v8485_v19, %v7246_v41  ;;  %v8185_v62 = vld [vmem:[%s8703_s14 + $0x128] sm:$0xff] }
 0x841   : > { %7738 = vperm.xlu1 %8424, %v7372_v12   ;;  %7743 = vperm.xlu0 %8425, %v7373_v27   ;;  %v7342_v20 = vmul.f32 %v7278_v8, %v15273_v10  ;;  %v7383_v12 = vld [vmem:[%s8703_s14 + $0x30] sm:$0xff] }
 0x842   : > { %v8487_v0 = vpop.eup %8486  ;;  %v8186_v27 = vld [vmem:[%s8703_s14 + $0x130] sm:$0xff] }
 0x843   : > { %v7279_v47 = vmul.f32 %v8487_v0, %v7247_v60  ;;  %v7374_v17 = vsub.f32 %v7310_v51, %v7342_v20 }
 0x845   : > { %7556 = vperm.xlu1 %8424, %v7278_v8   ;;  %7561 = vperm.xlu0 %8425, %v7279_v47   ;;  %v7343_v23 = vmul.f32 %v7279_v47, %v15274_v4 }
 0x846   : > { %v8489_v5 = vpop.eup %8488 }
 0x847   : > { %v7375_v13 = vsub.f32 %v7311_v54, %v7343_v23  ;;  %v7280_v45 = vmul.f32 %v8489_v5, %v7248_v50  ;;  %v7384_v5 = vld [vmem:[%s8703_s14 + $0x38] sm:$0xff] }
 0x848   : > { %v7412_v2 = vpop.permute.xlu1 %7411 }
 0x849   : > { %7748 = vperm.xlu1 %8424, %v7374_v17   ;;  %7753 = vperm.xlu0 %8425, %v7375_v13   ;;  %v7344_v63 = vmul.f32 %v7280_v45, %v15275_v3  ;;  %v7569_v11 = vmul.f32 %v7412_v2, %v7377_v56  ;;  %v7857_v14 = vmul.f32 %v8180_v34, %v7412_v2  ;;  %v8187_v17 = vld [vmem:[%s8703_s14 + $0x138] sm:$0xff]  ;;  %v8188_v3 = vld [vmem:[%s8703_s14 + $0x140] sm:$0xff] }
 0x84b   : > { %v7376_v28 = vsub.f32 %v7312_v52, %v7344_v63 }
 0x84c   : > { %v7417_v39 = vpop.permute.xlu0 %7416 }
 0x84d   : > { %7566 = vperm.xlu1 %8424, %v7280_v45   ;;  %v7570_v40 = vmul.f32 %v7417_v39, %v7378_v57  ;;  %v7858_v36 = vmul.f32 %v8181_v44, %v7417_v39  ;;  %v7385_v45 = vld [vmem:[%s8703_s14 + $0x40] sm:$0xff] }
 0x850   : > { %v7422_v1 = vpop.permute.xlu1 %7421  ;;  %v7604_v43 = vpop.permute.xlu0 %7603 }
 0x851   : > { %v7761_v22 = vadd.f32 %v7604_v43, %v7569_v11  ;;  %v7889_v46 = vadd.f32 %v7857_v14, %v7604_v43  ;;  %7758 = vperm.xlu1 %8424, %v7376_v28   ;;  %v7571_v33 = vmul.f32 %v7422_v1, %v7379_v31  ;;  %v7859_v25 = vmul.f32 %v8182_v6, %v7422_v1  ;;  %v7386_v31 = vld [vmem:[%s8703_s14 + $0x48] sm:$0xff]  ;;  %v7387_v43 = vld [vmem:[%s8703_s14 + $0x50] sm:$0xff] }
 0x852   : > { %v8189_v6 = vld [vmem:[%s8703_s14 + $0x148] sm:$0xff] }
 0x853   : > { %7793 = vst [vmem:[%s8703_s14] sm:$0xff] %v7761_v22  ;;  %8212 = vst [vmem:[%s8703_s14 + $0x100] sm:$0xff] %v7889_v46  ;;  %v8190_v22 = vld [vmem:[%s8703_s14 + $0x150] sm:$0xff] }
 0x854   : > { %v7609_v26 = vpop.permute.xlu1 %7608  ;;  %v7614_v30 = vpop.permute.xlu0 %7613 }
 0x855   : > { %v7762_v61 = vadd.f32 %v7609_v26, %v7570_v40  ;;  %v7890_v35 = vadd.f32 %v7858_v36, %v7609_v26  ;;  %v7763_v55 = vadd.f32 %v7614_v30, %v7571_v33  ;;  %v7891_v7 = vadd.f32 %v7859_v25, %v7614_v30 }
 0x857   : > { %7794 = vst [vmem:[%s8703_s14 + $0x8] sm:$0xff] %v7762_v61  ;;  %8213 = vst [vmem:[%s8703_s14 + $0x108] sm:$0xff] %v7890_v35 }
 0x858   : > { %7795 = vst [vmem:[%s8703_s14 + $0x10] sm:$0xff] %v7763_v55  ;;  %8214 = vst [vmem:[%s8703_s14 + $0x110] sm:$0xff] %v7891_v7  ;;  %v7427_v59 = vpop.permute.xlu1 %7426  ;;  %v7432_v58 = vpop.permute.xlu0 %7431 }
 0x859   : > { %v7572_v49 = vmul.f32 %v7427_v59, %v7380_v15  ;;  %v7860_v9 = vmul.f32 %v8183_v53, %v7427_v59  ;;  %v7573_v32 = vmul.f32 %v7432_v58, %v7381_v21  ;;  %v7861_v38 = vmul.f32 %v8184_v16, %v7432_v58  ;;  %v7388_v15 = vld [vmem:[%s8703_s14 + $0x58] sm:$0xff]  ;;  %v7389_v21 = vld [vmem:[%s8703_s14 + $0x60] sm:$0xff] }
 0x85a   : > { %v8191_v53 = vld [vmem:[%s8703_s14 + $0x158] sm:$0xff]  ;;  %v8192_v16 = vld [vmem:[%s8703_s14 + $0x160] sm:$0xff] }
 0x85c   : > { %v7619_v24 = vpop.permute.xlu1 %7618  ;;  %v7624_v37 = vpop.permute.xlu0 %7623 }
 0x85d   : > { %v7764_v48 = vadd.f32 %v7619_v24, %v7572_v49  ;;  %v7892_v29 = vadd.f32 %v7860_v9, %v7619_v24  ;;  %v7765_v18 = vadd.f32 %v7624_v37, %v7573_v32  ;;  %v7893_v41 = vadd.f32 %v7861_v38, %v7624_v37 }
 0x85f   : > { %7796 = vst [vmem:[%s8703_s14 + $0x18] sm:$0xff] %v7764_v48  ;;  %8215 = vst [vmem:[%s8703_s14 + $0x118] sm:$0xff] %v7892_v29 }
 0x860   : > { %7797 = vst [vmem:[%s8703_s14 + $0x20] sm:$0xff] %v7765_v18  ;;  %8216 = vst [vmem:[%s8703_s14 + $0x120] sm:$0xff] %v7893_v41  ;;  %v7437_v19 = vpop.permute.xlu1 %7436  ;;  %v7442_v8 = vpop.permute.xlu0 %7441 }
 0x861   : > { %v7574_v60 = vmul.f32 %v7437_v19, %v7382_v42  ;;  %v7862_v0 = vmul.f32 %v8185_v62, %v7437_v19  ;;  %v7575_v47 = vmul.f32 %v7442_v8, %v7383_v12  ;;  %v7863_v10 = vmul.f32 %v8186_v27, %v7442_v8  ;;  %v7390_v42 = vld [vmem:[%s8703_s14 + $0x68] sm:$0xff]  ;;  %v7391_v12 = vld [vmem:[%s8703_s14 + $0x70] sm:$0xff] }
 0x862   : > { %v8193_v62 = vld [vmem:[%s8703_s14 + $0x168] sm:$0xff]  ;;  %v8194_v27 = vld [vmem:[%s8703_s14 + $0x170] sm:$0xff] }
 0x864   : > { %v7629_v20 = vpop.permute.xlu1 %7628  ;;  %v7634_v51 = vpop.permute.xlu0 %7633 }
 0x865   : > { %v7766_v54 = vadd.f32 %v7629_v20, %v7574_v60  ;;  %v7894_v50 = vadd.f32 %v7862_v0, %v7629_v20  ;;  %v7767_v4 = vadd.f32 %v7634_v51, %v7575_v47  ;;  %v7895_v23 = vadd.f32 %v7863_v10, %v7634_v51 }
 0x867   : > { %7798 = vst [vmem:[%s8703_s14 + $0x28] sm:$0xff] %v7766_v54  ;;  %8217 = vst [vmem:[%s8703_s14 + $0x128] sm:$0xff] %v7894_v50 }
 0x868   : > { %7799 = vst [vmem:[%s8703_s14 + $0x30] sm:$0xff] %v7767_v4  ;;  %8218 = vst [vmem:[%s8703_s14 + $0x130] sm:$0xff] %v7895_v23  ;;  %v7447_v13 = vpop.permute.xlu1 %7446  ;;  %v7452_v63 = vpop.permute.xlu0 %7451 }
 0x869   : > { %v7576_v56 = vmul.f32 %v7447_v13, %v7384_v5  ;;  %v7864_v34 = vmul.f32 %v8187_v17, %v7447_v13  ;;  %v7577_v2 = vmul.f32 %v7452_v63, %v7385_v45  ;;  %v7865_v39 = vmul.f32 %v8188_v3, %v7452_v63  ;;  %v7392_v5 = vld [vmem:[%s8703_s14 + $0x78] sm:$0xff]  ;;  %v7393_v45 = vld [vmem:[%s8703_s14 + $0x80] sm:$0xff] }
 0x86a   : > { %v8195_v17 = vld [vmem:[%s8703_s14 + $0x178] sm:$0xff]  ;;  %v8196_v3 = vld [vmem:[%s8703_s14 + $0x180] sm:$0xff] }
 0x86c   : > { %v7639_v52 = vpop.permute.xlu1 %7638  ;;  %v7644_v11 = vpop.permute.xlu0 %7643 }
 0x86d   : > { %v7768_v14 = vadd.f32 %v7639_v52, %v7576_v56  ;;  %v7896_v57 = vadd.f32 %v7864_v34, %v7639_v52  ;;  %v7769_v28 = vadd.f32 %v7644_v11, %v7577_v2  ;;  %v7897_v44 = vadd.f32 %v7865_v39, %v7644_v11 }
 0x86f   : > { %7800 = vst [vmem:[%s8703_s14 + $0x38] sm:$0xff] %v7768_v14  ;;  %8219 = vst [vmem:[%s8703_s14 + $0x138] sm:$0xff] %v7896_v57 }
 0x870   : > { %7801 = vst [vmem:[%s8703_s14 + $0x40] sm:$0xff] %v7769_v28  ;;  %8220 = vst [vmem:[%s8703_s14 + $0x140] sm:$0xff] %v7897_v44  ;;  %v7457_v1 = vpop.permute.xlu1 %7456  ;;  %v7462_v46 = vpop.permute.xlu0 %7461 }
 0x871   : > { %v7578_v40 = vmul.f32 %v7457_v1, %v7386_v31  ;;  %v7866_v36 = vmul.f32 %v8189_v6, %v7457_v1  ;;  %v7579_v33 = vmul.f32 %v7462_v46, %v7387_v43  ;;  %v7867_v25 = vmul.f32 %v8190_v22, %v7462_v46  ;;  %v7394_v31 = vld [vmem:[%s8703_s14 + $0x88] sm:$0xff]  ;;  %v7395_v43 = vld [vmem:[%s8703_s14 + $0x90] sm:$0xff] }
 0x872   : > { %v8197_v6 = vld [vmem:[%s8703_s14 + $0x188] sm:$0xff]  ;;  %v8198_v22 = vld [vmem:[%s8703_s14 + $0x190] sm:$0xff] }
 0x874   : > { %v7649_v26 = vpop.permute.xlu1 %7648  ;;  %v7654_v30 = vpop.permute.xlu0 %7653 }
 0x875   : > { %v7770_v61 = vadd.f32 %v7649_v26, %v7578_v40  ;;  %v7898_v35 = vadd.f32 %v7866_v36, %v7649_v26  ;;  %v7771_v55 = vadd.f32 %v7654_v30, %v7579_v33  ;;  %v7899_v7 = vadd.f32 %v7867_v25, %v7654_v30 }
 0x877   : > { %7802 = vst [vmem:[%s8703_s14 + $0x48] sm:$0xff] %v7770_v61  ;;  %8221 = vst [vmem:[%s8703_s14 + $0x148] sm:$0xff] %v7898_v35 }
 0x878   : > { %7803 = vst [vmem:[%s8703_s14 + $0x50] sm:$0xff] %v7771_v55  ;;  %8222 = vst [vmem:[%s8703_s14 + $0x150] sm:$0xff] %v7899_v7  ;;  %v7467_v59 = vpop.permute.xlu1 %7466  ;;  %v7472_v58 = vpop.permute.xlu0 %7471 }
 0x879   : > { %v7580_v49 = vmul.f32 %v7467_v59, %v7388_v15  ;;  %v7868_v9 = vmul.f32 %v8191_v53, %v7467_v59  ;;  %v7581_v32 = vmul.f32 %v7472_v58, %v7389_v21  ;;  %v7869_v38 = vmul.f32 %v8192_v16, %v7472_v58  ;;  %v7396_v15 = vld [vmem:[%s8703_s14 + $0x98] sm:$0xff]  ;;  %v7397_v21 = vld [vmem:[%s8703_s14 + $0xa0] sm:$0xff] }
 0x87a   : > { %v8199_v53 = vld [vmem:[%s8703_s14 + $0x198] sm:$0xff]  ;;  %v8200_v16 = vld [vmem:[%s8703_s14 + $0x1a0] sm:$0xff] }
 0x87c   : > { %v7659_v24 = vpop.permute.xlu1 %7658  ;;  %v7664_v37 = vpop.permute.xlu0 %7663 }
 0x87d   : > { %v7772_v48 = vadd.f32 %v7659_v24, %v7580_v49  ;;  %v7900_v29 = vadd.f32 %v7868_v9, %v7659_v24  ;;  %v7773_v18 = vadd.f32 %v7664_v37, %v7581_v32  ;;  %v7901_v41 = vadd.f32 %v7869_v38, %v7664_v37 }
 0x87f   : > { %7804 = vst [vmem:[%s8703_s14 + $0x58] sm:$0xff] %v7772_v48  ;;  %8223 = vst [vmem:[%s8703_s14 + $0x158] sm:$0xff] %v7900_v29 }
 0x880   : > { %7805 = vst [vmem:[%s8703_s14 + $0x60] sm:$0xff] %v7773_v18  ;;  %8224 = vst [vmem:[%s8703_s14 + $0x160] sm:$0xff] %v7901_v41  ;;  %v7477_v19 = vpop.permute.xlu1 %7476  ;;  %v7482_v8 = vpop.permute.xlu0 %7481 }
 0x881   : > { %v7582_v60 = vmul.f32 %v7477_v19, %v7390_v42  ;;  %v7870_v0 = vmul.f32 %v8193_v62, %v7477_v19  ;;  %v7583_v47 = vmul.f32 %v7482_v8, %v7391_v12  ;;  %v7871_v10 = vmul.f32 %v8194_v27, %v7482_v8  ;;  %v7398_v42 = vld [vmem:[%s8703_s14 + $0xa8] sm:$0xff]  ;;  %v7399_v12 = vld [vmem:[%s8703_s14 + $0xb0] sm:$0xff] }
 0x882   : > { %v8201_v62 = vld [vmem:[%s8703_s14 + $0x1a8] sm:$0xff]  ;;  %v8202_v27 = vld [vmem:[%s8703_s14 + $0x1b0] sm:$0xff] }
 0x884   : > { %v7669_v20 = vpop.permute.xlu1 %7668  ;;  %v7674_v51 = vpop.permute.xlu0 %7673 }
 0x885   : > { %v7774_v54 = vadd.f32 %v7669_v20, %v7582_v60  ;;  %v7902_v50 = vadd.f32 %v7870_v0, %v7669_v20  ;;  %v7775_v4 = vadd.f32 %v7674_v51, %v7583_v47  ;;  %v7903_v23 = vadd.f32 %v7871_v10, %v7674_v51 }
 0x887   : > { %7806 = vst [vmem:[%s8703_s14 + $0x68] sm:$0xff] %v7774_v54  ;;  %8225 = vst [vmem:[%s8703_s14 + $0x168] sm:$0xff] %v7902_v50 }
 0x888   : > { %7807 = vst [vmem:[%s8703_s14 + $0x70] sm:$0xff] %v7775_v4  ;;  %8226 = vst [vmem:[%s8703_s14 + $0x170] sm:$0xff] %v7903_v23  ;;  %v7487_v13 = vpop.permute.xlu1 %7486  ;;  %v7492_v63 = vpop.permute.xlu0 %7491 }
 0x889   : > { %v7584_v56 = vmul.f32 %v7487_v13, %v7392_v5  ;;  %v7872_v34 = vmul.f32 %v8195_v17, %v7487_v13  ;;  %v7585_v2 = vmul.f32 %v7492_v63, %v7393_v45  ;;  %v7873_v39 = vmul.f32 %v8196_v3, %v7492_v63  ;;  %v7400_v5 = vld [vmem:[%s8703_s14 + $0xb8] sm:$0xff]  ;;  %v7401_v45 = vld [vmem:[%s8703_s14 + $0xc0] sm:$0xff] }
 0x88a   : > { %v8203_v17 = vld [vmem:[%s8703_s14 + $0x1b8] sm:$0xff]  ;;  %v8204_v3 = vld [vmem:[%s8703_s14 + $0x1c0] sm:$0xff] }
 0x88c   : > { %v7679_v52 = vpop.permute.xlu1 %7678  ;;  %v7684_v11 = vpop.permute.xlu0 %7683 }
 0x88d   : > { %v7776_v14 = vadd.f32 %v7679_v52, %v7584_v56  ;;  %v7904_v57 = vadd.f32 %v7872_v34, %v7679_v52  ;;  %v7777_v28 = vadd.f32 %v7684_v11, %v7585_v2  ;;  %v7905_v44 = vadd.f32 %v7873_v39, %v7684_v11 }
 0x88f   : > { %7808 = vst [vmem:[%s8703_s14 + $0x78] sm:$0xff] %v7776_v14  ;;  %8227 = vst [vmem:[%s8703_s14 + $0x178] sm:$0xff] %v7904_v57 }
 0x890   : > { %7809 = vst [vmem:[%s8703_s14 + $0x80] sm:$0xff] %v7777_v28  ;;  %8228 = vst [vmem:[%s8703_s14 + $0x180] sm:$0xff] %v7905_v44  ;;  %v7497_v1 = vpop.permute.xlu1 %7496  ;;  %v7502_v46 = vpop.permute.xlu0 %7501 }
 0x891   : > { %v7586_v40 = vmul.f32 %v7497_v1, %v7394_v31  ;;  %v7874_v36 = vmul.f32 %v8197_v6, %v7497_v1  ;;  %v7587_v33 = vmul.f32 %v7502_v46, %v7395_v43  ;;  %v7875_v25 = vmul.f32 %v8198_v22, %v7502_v46  ;;  %v7402_v31 = vld [vmem:[%s8703_s14 + $0xc8] sm:$0xff]  ;;  %v7403_v43 = vld [vmem:[%s8703_s14 + $0xd0] sm:$0xff] }
 0x892   : > { %v8205_v6 = vld [vmem:[%s8703_s14 + $0x1c8] sm:$0xff]  ;;  %v8206_v22 = vld [vmem:[%s8703_s14 + $0x1d0] sm:$0xff] }
 0x894   : > { %v7689_v26 = vpop.permute.xlu1 %7688  ;;  %v7694_v30 = vpop.permute.xlu0 %7693 }
 0x895   : > { %v7778_v61 = vadd.f32 %v7689_v26, %v7586_v40  ;;  %v7906_v35 = vadd.f32 %v7874_v36, %v7689_v26  ;;  %v7779_v55 = vadd.f32 %v7694_v30, %v7587_v33  ;;  %v7907_v7 = vadd.f32 %v7875_v25, %v7694_v30 }
 0x897   : > { %7810 = vst [vmem:[%s8703_s14 + $0x88] sm:$0xff] %v7778_v61  ;;  %8229 = vst [vmem:[%s8703_s14 + $0x188] sm:$0xff] %v7906_v35 }
 0x898   : > { %7811 = vst [vmem:[%s8703_s14 + $0x90] sm:$0xff] %v7779_v55  ;;  %8230 = vst [vmem:[%s8703_s14 + $0x190] sm:$0xff] %v7907_v7  ;;  %v7507_v59 = vpop.permute.xlu1 %7506  ;;  %v7512_v58 = vpop.permute.xlu0 %7511 }
 0x899   : > { %v7588_v49 = vmul.f32 %v7507_v59, %v7396_v15  ;;  %v7876_v9 = vmul.f32 %v8199_v53, %v7507_v59  ;;  %v7589_v32 = vmul.f32 %v7512_v58, %v7397_v21  ;;  %v7877_v38 = vmul.f32 %v8200_v16, %v7512_v58  ;;  %v7404_v15 = vld [vmem:[%s8703_s14 + $0xd8] sm:$0xff]  ;;  %v7405_v21 = vld [vmem:[%s8703_s14 + $0xe0] sm:$0xff] }
 0x89a   : > { %v8207_v53 = vld [vmem:[%s8703_s14 + $0x1d8] sm:$0xff]  ;;  %v8208_v16 = vld [vmem:[%s8703_s14 + $0x1e0] sm:$0xff] }
 0x89c   : > { %v7699_v24 = vpop.permute.xlu1 %7698  ;;  %v7704_v37 = vpop.permute.xlu0 %7703 }
 0x89d   : > { %v7780_v48 = vadd.f32 %v7699_v24, %v7588_v49  ;;  %v7908_v29 = vadd.f32 %v7876_v9, %v7699_v24  ;;  %v7781_v18 = vadd.f32 %v7704_v37, %v7589_v32  ;;  %v7909_v41 = vadd.f32 %v7877_v38, %v7704_v37 }
 0x89f   : > { %7812 = vst [vmem:[%s8703_s14 + $0x98] sm:$0xff] %v7780_v48  ;;  %8231 = vst [vmem:[%s8703_s14 + $0x198] sm:$0xff] %v7908_v29 }
 0x8a0   : > { %7813 = vst [vmem:[%s8703_s14 + $0xa0] sm:$0xff] %v7781_v18  ;;  %8232 = vst [vmem:[%s8703_s14 + $0x1a0] sm:$0xff] %v7909_v41  ;;  %v7517_v19 = vpop.permute.xlu1 %7516  ;;  %v7522_v8 = vpop.permute.xlu0 %7521 }
 0x8a1   : > { %v7590_v60 = vmul.f32 %v7517_v19, %v7398_v42  ;;  %v7878_v0 = vmul.f32 %v8201_v62, %v7517_v19  ;;  %v7591_v47 = vmul.f32 %v7522_v8, %v7399_v12  ;;  %v7879_v10 = vmul.f32 %v8202_v27, %v7522_v8  ;;  %v7406_v42 = vld [vmem:[%s8703_s14 + $0xe8] sm:$0xff]  ;;  %v7407_v12 = vld [vmem:[%s8703_s14 + $0xf0] sm:$0xff] }
 0x8a2   : > { %v8209_v62 = vld [vmem:[%s8703_s14 + $0x1e8] sm:$0xff]  ;;  %v8210_v27 = vld [vmem:[%s8703_s14 + $0x1f0] sm:$0xff] }
 0x8a4   : > { %v7709_v20 = vpop.permute.xlu1 %7708  ;;  %v7714_v51 = vpop.permute.xlu0 %7713 }
 0x8a5   : > { %v7782_v54 = vadd.f32 %v7709_v20, %v7590_v60  ;;  %v7910_v50 = vadd.f32 %v7878_v0, %v7709_v20  ;;  %v7783_v4 = vadd.f32 %v7714_v51, %v7591_v47  ;;  %v7911_v23 = vadd.f32 %v7879_v10, %v7714_v51 }
 0x8a7   : > { %7814 = vst [vmem:[%s8703_s14 + $0xa8] sm:$0xff] %v7782_v54  ;;  %8233 = vst [vmem:[%s8703_s14 + $0x1a8] sm:$0xff] %v7910_v50 }
 0x8a8   : > { %7815 = vst [vmem:[%s8703_s14 + $0xb0] sm:$0xff] %v7783_v4  ;;  %8234 = vst [vmem:[%s8703_s14 + $0x1b0] sm:$0xff] %v7911_v23  ;;  %v7527_v13 = vpop.permute.xlu1 %7526  ;;  %v7532_v63 = vpop.permute.xlu0 %7531 }
 0x8a9   : > { %v7592_v56 = vmul.f32 %v7527_v13, %v7400_v5  ;;  %v7880_v34 = vmul.f32 %v8203_v17, %v7527_v13  ;;  %v7593_v2 = vmul.f32 %v7532_v63, %v7401_v45  ;;  %v7881_v39 = vmul.f32 %v8204_v3, %v7532_v63  ;;  %v7408_v5 = vld [vmem:[%s8703_s14 + $0xf8] sm:$0xff] }
 0x8aa   : > { %v8211_v17 = vld [vmem:[%s8703_s14 + $0x1f8] sm:$0xff] }
 0x8ac   : > { %v7719_v52 = vpop.permute.xlu1 %7718  ;;  %v7724_v11 = vpop.permute.xlu0 %7723 }
 0x8ad   : > { %v7784_v14 = vadd.f32 %v7719_v52, %v7592_v56  ;;  %v7912_v57 = vadd.f32 %v7880_v34, %v7719_v52  ;;  %v7785_v28 = vadd.f32 %v7724_v11, %v7593_v2  ;;  %v7913_v44 = vadd.f32 %v7881_v39, %v7724_v11 }
 0x8af   : > { %7816 = vst [vmem:[%s8703_s14 + $0xb8] sm:$0xff] %v7784_v14  ;;  %8235 = vst [vmem:[%s8703_s14 + $0x1b8] sm:$0xff] %v7912_v57 }
 0x8b0   : > { %7817 = vst [vmem:[%s8703_s14 + $0xc0] sm:$0xff] %v7785_v28  ;;  %8236 = vst [vmem:[%s8703_s14 + $0x1c0] sm:$0xff] %v7913_v44  ;;  %v7537_v1 = vpop.permute.xlu1 %7536  ;;  %v7542_v46 = vpop.permute.xlu0 %7541 }
 0x8b1   : > { %v7594_v40 = vmul.f32 %v7537_v1, %v7402_v31  ;;  %v7882_v36 = vmul.f32 %v8205_v6, %v7537_v1  ;;  %v7595_v33 = vmul.f32 %v7542_v46, %v7403_v43  ;;  %v7883_v25 = vmul.f32 %v8206_v22, %v7542_v46 }
 0x8b4   : > { %v7729_v26 = vpop.permute.xlu1 %7728  ;;  %v7734_v30 = vpop.permute.xlu0 %7733 }
 0x8b5   : > { %v7786_v61 = vadd.f32 %v7729_v26, %v7594_v40  ;;  %v7914_v35 = vadd.f32 %v7882_v36, %v7729_v26  ;;  %v7787_v55 = vadd.f32 %v7734_v30, %v7595_v33  ;;  %v7915_v7 = vadd.f32 %v7883_v25, %v7734_v30 }
 0x8b7   : > { %7818 = vst [vmem:[%s8703_s14 + $0xc8] sm:$0xff] %v7786_v61  ;;  %8237 = vst [vmem:[%s8703_s14 + $0x1c8] sm:$0xff] %v7914_v35 }
 0x8b8   : > { %7819 = vst [vmem:[%s8703_s14 + $0xd0] sm:$0xff] %v7787_v55  ;;  %8238 = vst [vmem:[%s8703_s14 + $0x1d0] sm:$0xff] %v7915_v7  ;;  %v7547_v59 = vpop.permute.xlu1 %7546  ;;  %v7552_v58 = vpop.permute.xlu0 %7551 }
 0x8b9   : > { %v7596_v49 = vmul.f32 %v7547_v59, %v7404_v15  ;;  %v7884_v9 = vmul.f32 %v8207_v53, %v7547_v59  ;;  %v7597_v32 = vmul.f32 %v7552_v58, %v7405_v21  ;;  %v7885_v38 = vmul.f32 %v8208_v16, %v7552_v58 }
 0x8bc   : > { %v7739_v24 = vpop.permute.xlu1 %7738  ;;  %v7744_v37 = vpop.permute.xlu0 %7743 }
 0x8bd   : > { %v7788_v48 = vadd.f32 %v7739_v24, %v7596_v49  ;;  %v7916_v29 = vadd.f32 %v7884_v9, %v7739_v24  ;;  %v7789_v18 = vadd.f32 %v7744_v37, %v7597_v32  ;;  %v7917_v41 = vadd.f32 %v7885_v38, %v7744_v37 }
 0x8bf   : > { %7820 = vst [vmem:[%s8703_s14 + $0xd8] sm:$0xff] %v7788_v48  ;;  %8239 = vst [vmem:[%s8703_s14 + $0x1d8] sm:$0xff] %v7916_v29 }
 0x8c0   : > { %7821 = vst [vmem:[%s8703_s14 + $0xe0] sm:$0xff] %v7789_v18  ;;  %8240 = vst [vmem:[%s8703_s14 + $0x1e0] sm:$0xff] %v7917_v41  ;;  %v7557_v19 = vpop.permute.xlu1 %7556  ;;  %v7562_v8 = vpop.permute.xlu0 %7561 }
 0x8c1   : > { %v7598_v60 = vmul.f32 %v7557_v19, %v7406_v42  ;;  %v7886_v0 = vmul.f32 %v8209_v62, %v7557_v19  ;;  %v7599_v47 = vmul.f32 %v7562_v8, %v7407_v12  ;;  %v7887_v10 = vmul.f32 %v8210_v27, %v7562_v8 }
 0x8c4   : > { %v7749_v20 = vpop.permute.xlu1 %7748  ;;  %v7754_v51 = vpop.permute.xlu0 %7753 }
 0x8c5   : > { %v7790_v54 = vadd.f32 %v7749_v20, %v7598_v60  ;;  %v7918_v50 = vadd.f32 %v7886_v0, %v7749_v20  ;;  %v7791_v4 = vadd.f32 %v7754_v51, %v7599_v47  ;;  %v7919_v23 = vadd.f32 %v7887_v10, %v7754_v51 }
 0x8c7   : > { %7822 = vst [vmem:[%s8703_s14 + $0xe8] sm:$0xff] %v7790_v54  ;;  %8241 = vst [vmem:[%s8703_s14 + $0x1e8] sm:$0xff] %v7918_v50 }
 0x8c8   : > { %7823 = vst [vmem:[%s8703_s14 + $0xf0] sm:$0xff] %v7791_v4  ;;  %8242 = vst [vmem:[%s8703_s14 + $0x1f0] sm:$0xff] %v7919_v23  ;;  %v7567_v13 = vpop.permute.xlu1 %7566 }
 0x8c9   : > { %v7600_v45 = vmul.f32 %v7567_v13, %v7408_v5  ;;  %v7888_v3 = vmul.f32 %v8211_v17, %v7567_v13 }
 0x8cc   : > { %v7759_v63 = vpop.permute.xlu1 %7758 }
 0x8cd   : > { %v7792_v56 = vadd.f32 %v7759_v63, %v7600_v45  ;;  %v7920_v34 = vadd.f32 %v7888_v3, %v7759_v63 }
 0x8cf   : > { %7824 = vst [vmem:[%s8703_s14 + $0xf8] sm:$0xff] %v7792_v56  ;;  %8243 = vst [vmem:[%s8703_s14 + $0x1f8] sm:$0xff] %v7920_v34 }
 0x8d0 PF: > { %s15_s26 = sadd.s32 1, %s8560_s26   ;;  %s15276_s22 = sld [smem:[#allocation5_spill]] }
 0x8d1   : > { %p12_p1 = scmp.ge.s32.totalorder %s15_s26, 18   ;;  %s15277_s9 = sld [smem:[#allocation7_spill]] }
 0x8d2   : > { %s15278_s28 = sld [smem:[#allocation6_spill]]  ;;  %s15280_s18 = smov %s8532_s19 }
 0x8d3   : > { %s15279_s25 = sld [smem:[#allocation8_spill]]  ;;  %s15281_s19 = smov %s8666_s12 }
 0x8d4   : > { %s15282_s20 = smov %s8548_s23  ;;  %s15283_s21 = smov %s8552_s24 }
 0x8d5   :  { %14 = sbr.rel (!%p12_p1) target bundleno = 7 (0x7), region = 135 }
 0x8d7   : > { %s15284_s23 = smov %s15277_s9 }
 0x8d8   : > { %s15285_s24 = smov %s15278_s28 }

</bundles_post_ra>
